<compile_context>
chip_gen: v6e
topology: v6e:2x2x1
jax: 0.10.0
libtpu: 0.0.40
codegen_flags: <defaults>
</compile_context>

<pallas_src>
import jax
import jax.numpy as jnp
from jax import lax
from jax.experimental import pallas as pl

H = 51      # true hidden size of the LSTM cells
HP = 128    # lane-padded hidden size (zero padding, exact for real slots)
IN = 2      # LSTMCell(2, 51) input feature size


def _lstm_seq_kernel(x_ref,
                     wih1_ref, whh1_ref, b1_ref,
                     w2_ref, b2_ref,
                     wl_ref, bl_ref,
                     out_ref):
    T, B, _ = x_ref.shape

    # ---- loop-invariant hoists (JAX does not CSE broadcasts inside loops) ----
    whh1 = whh1_ref[...]                                # (HP, 4*HP)
    w2 = w2_ref[...]                                    # (2*HP, 4*HP) fused [Wih2; Whh2]
    wih1_r0 = wih1_ref[0:1, :]                          # (1, 4*HP)
    wih1_r1 = wih1_ref[1:2, :]                          # (1, 4*HP)
    b1 = jnp.broadcast_to(b1_ref[...], (B, 4 * HP))     # (B, 4*HP)
    b2 = jnp.broadcast_to(b2_ref[...], (B, 4 * HP))     # (B, 4*HP)
    wl = jnp.broadcast_to(wl_ref[...], (B, HP))         # (B, HP)
    lane_t = lax.broadcasted_iota(jnp.int32, (1, T), 1)  # (1, T)

    def gate_math(gates, c):
        i = jax.nn.sigmoid(gates[:, 0 * HP:1 * HP])
        f = jax.nn.sigmoid(gates[:, 1 * HP:2 * HP])
        g = jnp.tanh(gates[:, 2 * HP:3 * HP])
        o = jax.nn.sigmoid(gates[:, 3 * HP:4 * HP])
        c_new = f * c + i * g
        h_new = o * jnp.tanh(c_new)
        return h_new, c_new

    def step(t, carry):
        h1, c1, h2, c2, yacc = carry
        x_t = x_ref[t]                                  # (B, IN)

        # lstm1: input projection on the VPU (a K=2 MXU matmul would waste a pass).
        gates1 = (jnp.dot(h1, whh1, preferred_element_type=jnp.float32)
                  + x_t[:, 0:1] * wih1_r0
                  + x_t[:, 1:2] * wih1_r1
                  + b1)
        h1n, c1n = gate_math(gates1, c1)

        # lstm2: single fused K=2*HP matmul over [h1_new, h2_prev].
        hcat = jnp.concatenate([h1n, h2], axis=-1)      # (B, 2*HP)
        gates2 = jnp.dot(hcat, w2, preferred_element_type=jnp.float32) + b2
        h2n, c2n = gate_math(gates2, c2)

        # linear: VPU multiply + lane reduce (avoid N=1 MXU matmul); write into
        # lane t of the (B, T) accumulator via a one-hot mask.
        y_t = jnp.sum(h2n * wl, axis=-1, keepdims=True)           # (B, 1)
        yacc = yacc + y_t * (lane_t == t).astype(jnp.float32)     # (B, T)
        return (h1n, c1n, h2n, c2n, yacc)

    zeros_h = jnp.zeros((B, HP), jnp.float32)
    init = (zeros_h, zeros_h, zeros_h, zeros_h, jnp.zeros((B, T), jnp.float32))
    _, _, _, _, yacc = lax.fori_loop(0, T, step, init, unroll=True)

    # Single lane-dense store of the whole result; linear bias added once here.
    out_ref[...] = yacc + bl_ref[...]


# ---------- parameter padding glue (plain JAX) ----------

def _pad_ih(w):
    """(4H, in_dim) torch layout -> (in_dim, 4*HP), transposed, gate-block padded."""
    in_dim = w.shape[1]
    out = jnp.zeros((in_dim, 4 * HP), w.dtype)
    for k in range(4):
        out = out.at[:, k * HP:k * HP + H].set(w[k * H:(k + 1) * H, :].T)
    return out


def _pad_hh(w):
    """(4H, H) torch layout -> (HP, 4*HP), transposed, gate-block padded."""
    out = jnp.zeros((HP, 4 * HP), w.dtype)
    for k in range(4):
        out = out.at[:H, k * HP:k * HP + H].set(w[k * H:(k + 1) * H, :].T)
    return out


def _pad_b(b):
    """(4H,) -> (1, 4*HP)."""
    out = jnp.zeros((1, 4 * HP), b.dtype)
    for k in range(4):
        out = out.at[0, k * HP:k * HP + H].set(b[k * H:(k + 1) * H])
    return out


def sequence_forward(x, params):
    """x: (T, B, IN) float32 -> (B, T) float32 (matches torch.stack(outputs,1).squeeze(2))."""
    (wih1, whh1, bih1, bhh1, wih2, whh2, bih2, bhh2, wl, bl) = params
    T, B, _ = x.shape

    wih1_p = _pad_ih(wih1)                                            # (IN, 4*HP)
    whh1_p = _pad_hh(whh1)                                            # (HP, 4*HP)
    b1_p = _pad_b(bih1 + bhh1)                                        # (1, 4*HP)
    w2_p = jnp.concatenate([_pad_hh(wih2), _pad_hh(whh2)], axis=0)    # (2*HP, 4*HP)
    b2_p = _pad_b(bih2 + bhh2)                                        # (1, 4*HP)
    wl_p = jnp.zeros((1, HP), jnp.float32).at[0, :H].set(wl[0])       # (1, HP)
    bl_p = bl.reshape(1, 1)                                           # (1, 1)

    # Single invocation, no grid: every operand is a whole-array VMEM block
    # (total footprint < 1 MiB — fine on v5e/v6e/v7x).
    return pl.pallas_call(
        _lstm_seq_kernel,
        out_shape=jax.ShapeDtypeStruct((B, T), jnp.float32),
    )(x, wih1_p, whh1_p, b1_p, w2_p, b2_p, wl_p, bl_p)


# ---------- pure-JAX reference (unpadded), for correctness check ----------

def _ref_cell(x, h, c, wih, whh, bih, bhh):
    gates = x @ wih.T + bih + h @ whh.T + bhh
    i = jax.nn.sigmoid(gates[:, 0 * H:1 * H])
    f = jax.nn.sigmoid(gates[:, 1 * H:2 * H])
    g = jnp.tanh(gates[:, 2 * H:3 * H])
    o = jax.nn.sigmoid(gates[:, 3 * H:4 * H])
    c_new = f * c + i * g
    h_new = o * jnp.tanh(c_new)
    return h_new, c_new


def ref_forward(x, params):
    (wih1, whh1, bih1, bhh1, wih2, whh2, bih2, bhh2, wl, bl) = params
    T, B, _ = x.shape
    h1 = jnp.zeros((B, H), jnp.float32)
    c1 = jnp.zeros((B, H), jnp.float32)
    h2 = jnp.zeros((B, H), jnp.float32)
    c2 = jnp.zeros((B, H), jnp.float32)
    outs = []
    for t in range(T):
        h1, c1 = _ref_cell(x[t], h1, c1, wih1, whh1, bih1, bhh1)
        h2, c2 = _ref_cell(h1, h2, c2, wih2, whh2, bih2, bhh2)
        outs.append(h2 @ wl.T + bl)               # (B, 1)
    return jnp.stack(outs, axis=1)[:, :, 0]       # (B, T)


if __name__ == "__main__":
    key = jax.random.PRNGKey(0)
    T, B = 8, 8
    keys = jax.random.split(key, 11)
    s = float(1.0 / (H ** 0.5))

    def u(k, shape):
        return jax.random.uniform(k, shape, jnp.float32, -s, s)

    wih1 = u(keys[0], (4 * H, IN))
    whh1 = u(keys[1], (4 * H, H))
    bih1 = u(keys[2], (4 * H,))
    bhh1 = u(keys[3], (4 * H,))
    wih2 = u(keys[4], (4 * H, H))
    whh2 = u(keys[5], (4 * H, H))
    bih2 = u(keys[6], (4 * H,))
    bhh2 = u(keys[7], (4 * H,))
    wl = u(keys[8], (1, H))
    bl = u(keys[9], (1,))
    x = jax.random.normal(keys[10], (T, B, IN), jnp.float32)

    params = (wih1, whh1, bih1, bhh1, wih2, whh2, bih2, bhh2, wl, bl)

    out = sequence_forward(x, params)
    out = jax.block_until_ready(out)

    ref = ref_forward(x, params)
    assert out.shape == (B, T), out.shape
    assert jnp.allclose(out, ref, rtol=1e-4, atol=1e-4), float(jnp.max(jnp.abs(out - ref)))

    print("KERNEL_OK")
</pallas_src>

<mosaic_0001>
module attributes {stable_mosaic.version = 11 : i64} {
  func.func @_lstm_seq_kernel(%arg0: memref<8x8x2xf32, #tpu.memory_space<vmem>>, %arg1: memref<2x512xf32, #tpu.memory_space<vmem>>, %arg2: memref<128x512xf32, #tpu.memory_space<vmem>>, %arg3: memref<1x512xf32, #tpu.memory_space<vmem>>, %arg4: memref<256x512xf32, #tpu.memory_space<vmem>>, %arg5: memref<1x512xf32, #tpu.memory_space<vmem>>, %arg6: memref<1x128xf32, #tpu.memory_space<vmem>>, %arg7: memref<1x1xf32, #tpu.memory_space<vmem>>, %arg8: memref<8x8xf32, #tpu.memory_space<vmem>>) attributes {dimension_semantics = [], scalar_prefetch = 0 : i64, scratch_operands = 0 : i64, tpu.core_type = #tpu.core_type<tc>} {
    %c0 = arith.constant 0 : index
    %c0_0 = arith.constant 0 : index
    %0 = vector.load %arg2[%c0, %c0_0] : memref<128x512xf32, #tpu.memory_space<vmem>>, vector<128x512xf32>
    %c0_1 = arith.constant 0 : index
    %c0_2 = arith.constant 0 : index
    %1 = vector.load %arg4[%c0_1, %c0_2] : memref<256x512xf32, #tpu.memory_space<vmem>>, vector<256x512xf32>
    %c0_3 = arith.constant 0 : index
    %c0_4 = arith.constant 0 : index
    %2 = vector.load %arg1[%c0_3, %c0_4] : memref<2x512xf32, #tpu.memory_space<vmem>>, vector<1x512xf32>
    %c1 = arith.constant 1 : index
    %c0_5 = arith.constant 0 : index
    %3 = vector.load %arg1[%c1, %c0_5] : memref<2x512xf32, #tpu.memory_space<vmem>>, vector<1x512xf32>
    %c0_6 = arith.constant 0 : index
    %c0_7 = arith.constant 0 : index
    %4 = vector.load %arg3[%c0_6, %c0_7] : memref<1x512xf32, #tpu.memory_space<vmem>>, vector<1x512xf32>
    %5 = vector.shape_cast %4 : vector<1x512xf32> to vector<1x512xf32>
    %6 = vector.broadcast %5 : vector<1x512xf32> to vector<8x512xf32>
    %c0_8 = arith.constant 0 : index
    %c0_9 = arith.constant 0 : index
    %7 = vector.load %arg5[%c0_8, %c0_9] : memref<1x512xf32, #tpu.memory_space<vmem>>, vector<1x512xf32>
    %8 = vector.shape_cast %7 : vector<1x512xf32> to vector<1x512xf32>
    %9 = vector.broadcast %8 : vector<1x512xf32> to vector<8x512xf32>
    %c0_10 = arith.constant 0 : index
    %c0_11 = arith.constant 0 : index
    %10 = vector.load %arg6[%c0_10, %c0_11] : memref<1x128xf32, #tpu.memory_space<vmem>>, vector<1x128xf32>
    %11 = vector.shape_cast %10 : vector<1x128xf32> to vector<1x128xf32>
    %12 = vector.broadcast %11 : vector<1x128xf32> to vector<8x128xf32>
    %13 = tpu.iota {dimensions = array<i32: 1>} : vector<1x8xi32>
    %cst = arith.constant 0.000000e+00 : f32
    %14 = vector.broadcast %cst : f32 to vector<8x128xf32>
    %cst_12 = arith.constant 0.000000e+00 : f32
    %15 = vector.broadcast %cst_12 : f32 to vector<8x8xf32>
    %c0_i32 = arith.constant 0 : i32
    %16 = arith.index_cast %c0_i32 : i32 to index
    %c0_13 = arith.constant 0 : index
    %c0_14 = arith.constant 0 : index
    %17 = vector.load %arg0[%16, %c0_13, %c0_14] : memref<8x8x2xf32, #tpu.memory_space<vmem>>, vector<1x8x2xf32>
    %18 = vector.shape_cast %17 : vector<1x8x2xf32> to vector<8x2xf32>
    %cst_15 = arith.constant dense<0.000000e+00> : vector<8x512xf32>
    %19 = tpu.matmul %14, %0, %cst_15 {dimension_numbers = #tpu.dot_dimension_numbers<[1], [0], [0], [1], [0, 0, 1, 1], [], []>} : vector<8x128xf32>, vector<128x512xf32>, vector<8x512xf32> -> vector<8x512xf32>
    %20 = vector.extract_strided_slice %18 {offsets = [0, 0], sizes = [8, 1], strides = [1, 1]} : vector<8x2xf32> to vector<8x1xf32>
    %21 = vector.broadcast %20 : vector<8x1xf32> to vector<8x512xf32>
    %22 = vector.broadcast %2 : vector<1x512xf32> to vector<8x512xf32>
    %23 = arith.mulf %21, %22 : vector<8x512xf32>
    %24 = arith.addf %19, %23 : vector<8x512xf32>
    %25 = vector.extract_strided_slice %18 {offsets = [0, 1], sizes = [8, 1], strides = [1, 1]} : vector<8x2xf32> to vector<8x1xf32>
    %26 = vector.broadcast %25 : vector<8x1xf32> to vector<8x512xf32>
    %27 = vector.broadcast %3 : vector<1x512xf32> to vector<8x512xf32>
    %28 = arith.mulf %26, %27 : vector<8x512xf32>
    %29 = arith.addf %24, %28 : vector<8x512xf32>
    %30 = arith.addf %29, %6 : vector<8x512xf32>
    %31 = vector.extract_strided_slice %30 {offsets = [0, 0], sizes = [8, 128], strides = [1, 1]} : vector<8x512xf32> to vector<8x128xf32>
    %32 = arith.negf %31 : vector<8x128xf32>
    %33 = math.exp %32 : vector<8x128xf32>
    %cst_16 = arith.constant 1.000000e+00 : f32
    %34 = vector.broadcast %cst_16 : f32 to vector<8x128xf32>
    %35 = arith.addf %34, %33 : vector<8x128xf32>
    %36 = arith.divf %34, %35 : vector<8x128xf32>
    %37 = vector.extract_strided_slice %30 {offsets = [0, 128], sizes = [8, 128], strides = [1, 1]} : vector<8x512xf32> to vector<8x128xf32>
    %38 = arith.negf %37 : vector<8x128xf32>
    %39 = math.exp %38 : vector<8x128xf32>
    %cst_17 = arith.constant 1.000000e+00 : f32
    %40 = vector.broadcast %cst_17 : f32 to vector<8x128xf32>
    %41 = arith.addf %40, %39 : vector<8x128xf32>
    %42 = arith.divf %40, %41 : vector<8x128xf32>
    %43 = vector.extract_strided_slice %30 {offsets = [0, 256], sizes = [8, 128], strides = [1, 1]} : vector<8x512xf32> to vector<8x128xf32>
    %44 = math.tanh %43 : vector<8x128xf32>
    %45 = vector.extract_strided_slice %30 {offsets = [0, 384], sizes = [8, 128], strides = [1, 1]} : vector<8x512xf32> to vector<8x128xf32>
    %46 = arith.negf %45 : vector<8x128xf32>
    %47 = math.exp %46 : vector<8x128xf32>
    %cst_18 = arith.constant 1.000000e+00 : f32
    %48 = vector.broadcast %cst_18 : f32 to vector<8x128xf32>
    %49 = arith.addf %48, %47 : vector<8x128xf32>
    %50 = arith.divf %48, %49 : vector<8x128xf32>
    %51 = arith.mulf %42, %14 : vector<8x128xf32>
    %52 = arith.mulf %36, %44 : vector<8x128xf32>
    %53 = arith.addf %51, %52 : vector<8x128xf32>
    %54 = math.tanh %53 : vector<8x128xf32>
    %55 = arith.mulf %50, %54 : vector<8x128xf32>
    %56 = tpu.concatenate %55, %14 in 1 : vector<8x128xf32>, vector<8x128xf32> -> vector<8x256xf32>
    %cst_19 = arith.constant dense<0.000000e+00> : vector<8x512xf32>
    %57 = tpu.matmul %56, %1, %cst_19 {dimension_numbers = #tpu.dot_dimension_numbers<[1], [0], [0], [1], [0, 0, 1, 1], [], []>} : vector<8x256xf32>, vector<256x512xf32>, vector<8x512xf32> -> vector<8x512xf32>
    %58 = arith.addf %57, %9 : vector<8x512xf32>
    %59 = vector.extract_strided_slice %58 {offsets = [0, 0], sizes = [8, 128], strides = [1, 1]} : vector<8x512xf32> to vector<8x128xf32>
    %60 = arith.negf %59 : vector<8x128xf32>
    %61 = math.exp %60 : vector<8x128xf32>
    %cst_20 = arith.constant 1.000000e+00 : f32
    %62 = vector.broadcast %cst_20 : f32 to vector<8x128xf32>
    %63 = arith.addf %62, %61 : vector<8x128xf32>
    %64 = arith.divf %62, %63 : vector<8x128xf32>
    %65 = vector.extract_strided_slice %58 {offsets = [0, 128], sizes = [8, 128], strides = [1, 1]} : vector<8x512xf32> to vector<8x128xf32>
    %66 = arith.negf %65 : vector<8x128xf32>
    %67 = math.exp %66 : vector<8x128xf32>
    %cst_21 = arith.constant 1.000000e+00 : f32
    %68 = vector.broadcast %cst_21 : f32 to vector<8x128xf32>
    %69 = arith.addf %68, %67 : vector<8x128xf32>
    %70 = arith.divf %68, %69 : vector<8x128xf32>
    %71 = vector.extract_strided_slice %58 {offsets = [0, 256], sizes = [8, 128], strides = [1, 1]} : vector<8x512xf32> to vector<8x128xf32>
    %72 = math.tanh %71 : vector<8x128xf32>
    %73 = vector.extract_strided_slice %58 {offsets = [0, 384], sizes = [8, 128], strides = [1, 1]} : vector<8x512xf32> to vector<8x128xf32>
    %74 = arith.negf %73 : vector<8x128xf32>
    %75 = math.exp %74 : vector<8x128xf32>
    %cst_22 = arith.constant 1.000000e+00 : f32
    %76 = vector.broadcast %cst_22 : f32 to vector<8x128xf32>
    %77 = arith.addf %76, %75 : vector<8x128xf32>
    %78 = arith.divf %76, %77 : vector<8x128xf32>
    %79 = arith.mulf %70, %14 : vector<8x128xf32>
    %80 = arith.mulf %64, %72 : vector<8x128xf32>
    %81 = arith.addf %79, %80 : vector<8x128xf32>
    %82 = math.tanh %81 : vector<8x128xf32>
    %83 = arith.mulf %78, %82 : vector<8x128xf32>
    %84 = arith.mulf %83, %12 : vector<8x128xf32>
    %cst_23 = arith.constant dense<0.000000e+00> : vector<8xf32>
    %85 = vector.multi_reduction <add>, %84, %cst_23 [1] : vector<8x128xf32> to vector<8xf32>
    %86 = vector.shape_cast %85 : vector<8xf32> to vector<8x1xf32>
    %87 = vector.broadcast %c0_i32 : i32 to vector<1x8xi32>
    %88 = arith.cmpi eq, %13, %87 : vector<1x8xi32>
    %89 = arith.extui %88 : vector<1x8xi1> to vector<1x8xi32>
    %90 = arith.sitofp %89 : vector<1x8xi32> to vector<1x8xf32>
    %91 = vector.broadcast %86 : vector<8x1xf32> to vector<8x8xf32>
    %92 = vector.broadcast %90 : vector<1x8xf32> to vector<8x8xf32>
    %93 = arith.mulf %91, %92 : vector<8x8xf32>
    %94 = arith.addf %15, %93 : vector<8x8xf32>
    %c1_i32 = arith.constant 1 : i32
    %95 = arith.index_cast %c1_i32 : i32 to index
    %c0_24 = arith.constant 0 : index
    %c0_25 = arith.constant 0 : index
    %96 = vector.load %arg0[%95, %c0_24, %c0_25] : memref<8x8x2xf32, #tpu.memory_space<vmem>>, vector<1x8x2xf32>
    %97 = vector.shape_cast %96 : vector<1x8x2xf32> to vector<8x2xf32>
    %cst_26 = arith.constant dense<0.000000e+00> : vector<8x512xf32>
    %98 = tpu.matmul %55, %0, %cst_26 {dimension_numbers = #tpu.dot_dimension_numbers<[1], [0], [0], [1], [0, 0, 1, 1], [], []>} : vector<8x128xf32>, vector<128x512xf32>, vector<8x512xf32> -> vector<8x512xf32>
    %99 = vector.extract_strided_slice %97 {offsets = [0, 0], sizes = [8, 1], strides = [1, 1]} : vector<8x2xf32> to vector<8x1xf32>
    %100 = vector.broadcast %99 : vector<8x1xf32> to vector<8x512xf32>
    %101 = vector.broadcast %2 : vector<1x512xf32> to vector<8x512xf32>
    %102 = arith.mulf %100, %101 : vector<8x512xf32>
    %103 = arith.addf %98, %102 : vector<8x512xf32>
    %104 = vector.extract_strided_slice %97 {offsets = [0, 1], sizes = [8, 1], strides = [1, 1]} : vector<8x2xf32> to vector<8x1xf32>
    %105 = vector.broadcast %104 : vector<8x1xf32> to vector<8x512xf32>
    %106 = vector.broadcast %3 : vector<1x512xf32> to vector<8x512xf32>
    %107 = arith.mulf %105, %106 : vector<8x512xf32>
    %108 = arith.addf %103, %107 : vector<8x512xf32>
    %109 = arith.addf %108, %6 : vector<8x512xf32>
    %110 = vector.extract_strided_slice %109 {offsets = [0, 0], sizes = [8, 128], strides = [1, 1]} : vector<8x512xf32> to vector<8x128xf32>
    %111 = arith.negf %110 : vector<8x128xf32>
    %112 = math.exp %111 : vector<8x128xf32>
    %cst_27 = arith.constant 1.000000e+00 : f32
    %113 = vector.broadcast %cst_27 : f32 to vector<8x128xf32>
    %114 = arith.addf %113, %112 : vector<8x128xf32>
    %115 = arith.divf %113, %114 : vector<8x128xf32>
    %116 = vector.extract_strided_slice %109 {offsets = [0, 128], sizes = [8, 128], strides = [1, 1]} : vector<8x512xf32> to vector<8x128xf32>
    %117 = arith.negf %116 : vector<8x128xf32>
    %118 = math.exp %117 : vector<8x128xf32>
    %cst_28 = arith.constant 1.000000e+00 : f32
    %119 = vector.broadcast %cst_28 : f32 to vector<8x128xf32>
    %120 = arith.addf %119, %118 : vector<8x128xf32>
    %121 = arith.divf %119, %120 : vector<8x128xf32>
    %122 = vector.extract_strided_slice %109 {offsets = [0, 256], sizes = [8, 128], strides = [1, 1]} : vector<8x512xf32> to vector<8x128xf32>
    %123 = math.tanh %122 : vector<8x128xf32>
    %124 = vector.extract_strided_slice %109 {offsets = [0, 384], sizes = [8, 128], strides = [1, 1]} : vector<8x512xf32> to vector<8x128xf32>
    %125 = arith.negf %124 : vector<8x128xf32>
    %126 = math.exp %125 : vector<8x128xf32>
    %cst_29 = arith.constant 1.000000e+00 : f32
    %127 = vector.broadcast %cst_29 : f32 to vector<8x128xf32>
    %128 = arith.addf %127, %126 : vector<8x128xf32>
    %129 = arith.divf %127, %128 : vector<8x128xf32>
    %130 = arith.mulf %121, %53 : vector<8x128xf32>
    %131 = arith.mulf %115, %123 : vector<8x128xf32>
    %132 = arith.addf %130, %131 : vector<8x128xf32>
    %133 = math.tanh %132 : vector<8x128xf32>
    %134 = arith.mulf %129, %133 : vector<8x128xf32>
    %135 = tpu.concatenate %134, %83 in 1 : vector<8x128xf32>, vector<8x128xf32> -> vector<8x256xf32>
    %cst_30 = arith.constant dense<0.000000e+00> : vector<8x512xf32>
    %136 = tpu.matmul %135, %1, %cst_30 {dimension_numbers = #tpu.dot_dimension_numbers<[1], [0], [0], [1], [0, 0, 1, 1], [], []>} : vector<8x256xf32>, vector<256x512xf32>, vector<8x512xf32> -> vector<8x512xf32>
    %137 = arith.addf %136, %9 : vector<8x512xf32>
    %138 = vector.extract_strided_slice %137 {offsets = [0, 0], sizes = [8, 128], strides = [1, 1]} : vector<8x512xf32> to vector<8x128xf32>
    %139 = arith.negf %138 : vector<8x128xf32>
    %140 = math.exp %139 : vector<8x128xf32>
    %cst_31 = arith.constant 1.000000e+00 : f32
    %141 = vector.broadcast %cst_31 : f32 to vector<8x128xf32>
    %142 = arith.addf %141, %140 : vector<8x128xf32>
    %143 = arith.divf %141, %142 : vector<8x128xf32>
    %144 = vector.extract_strided_slice %137 {offsets = [0, 128], sizes = [8, 128], strides = [1, 1]} : vector<8x512xf32> to vector<8x128xf32>
    %145 = arith.negf %144 : vector<8x128xf32>
    %146 = math.exp %145 : vector<8x128xf32>
    %cst_32 = arith.constant 1.000000e+00 : f32
    %147 = vector.broadcast %cst_32 : f32 to vector<8x128xf32>
    %148 = arith.addf %147, %146 : vector<8x128xf32>
    %149 = arith.divf %147, %148 : vector<8x128xf32>
    %150 = vector.extract_strided_slice %137 {offsets = [0, 256], sizes = [8, 128], strides = [1, 1]} : vector<8x512xf32> to vector<8x128xf32>
    %151 = math.tanh %150 : vector<8x128xf32>
    %152 = vector.extract_strided_slice %137 {offsets = [0, 384], sizes = [8, 128], strides = [1, 1]} : vector<8x512xf32> to vector<8x128xf32>
    %153 = arith.negf %152 : vector<8x128xf32>
    %154 = math.exp %153 : vector<8x128xf32>
    %cst_33 = arith.constant 1.000000e+00 : f32
    %155 = vector.broadcast %cst_33 : f32 to vector<8x128xf32>
    %156 = arith.addf %155, %154 : vector<8x128xf32>
    %157 = arith.divf %155, %156 : vector<8x128xf32>
    %158 = arith.mulf %149, %81 : vector<8x128xf32>
    %159 = arith.mulf %143, %151 : vector<8x128xf32>
    %160 = arith.addf %158, %159 : vector<8x128xf32>
    %161 = math.tanh %160 : vector<8x128xf32>
    %162 = arith.mulf %157, %161 : vector<8x128xf32>
    %163 = arith.mulf %162, %12 : vector<8x128xf32>
    %cst_34 = arith.constant dense<0.000000e+00> : vector<8xf32>
    %164 = vector.multi_reduction <add>, %163, %cst_34 [1] : vector<8x128xf32> to vector<8xf32>
    %165 = vector.shape_cast %164 : vector<8xf32> to vector<8x1xf32>
    %166 = vector.broadcast %c1_i32 : i32 to vector<1x8xi32>
    %167 = arith.cmpi eq, %13, %166 : vector<1x8xi32>
    %168 = arith.extui %167 : vector<1x8xi1> to vector<1x8xi32>
    %169 = arith.sitofp %168 : vector<1x8xi32> to vector<1x8xf32>
    %170 = vector.broadcast %165 : vector<8x1xf32> to vector<8x8xf32>
    %171 = vector.broadcast %169 : vector<1x8xf32> to vector<8x8xf32>
    %172 = arith.mulf %170, %171 : vector<8x8xf32>
    %173 = arith.addf %94, %172 : vector<8x8xf32>
    %c2_i32 = arith.constant 2 : i32
    %174 = arith.index_cast %c2_i32 : i32 to index
    %c0_35 = arith.constant 0 : index
    %c0_36 = arith.constant 0 : index
    %175 = vector.load %arg0[%174, %c0_35, %c0_36] : memref<8x8x2xf32, #tpu.memory_space<vmem>>, vector<1x8x2xf32>
    %176 = vector.shape_cast %175 : vector<1x8x2xf32> to vector<8x2xf32>
    %cst_37 = arith.constant dense<0.000000e+00> : vector<8x512xf32>
    %177 = tpu.matmul %134, %0, %cst_37 {dimension_numbers = #tpu.dot_dimension_numbers<[1], [0], [0], [1], [0, 0, 1, 1], [], []>} : vector<8x128xf32>, vector<128x512xf32>, vector<8x512xf32> -> vector<8x512xf32>
    %178 = vector.extract_strided_slice %176 {offsets = [0, 0], sizes = [8, 1], strides = [1, 1]} : vector<8x2xf32> to vector<8x1xf32>
    %179 = vector.broadcast %178 : vector<8x1xf32> to vector<8x512xf32>
    %180 = vector.broadcast %2 : vector<1x512xf32> to vector<8x512xf32>
    %181 = arith.mulf %179, %180 : vector<8x512xf32>
    %182 = arith.addf %177, %181 : vector<8x512xf32>
    %183 = vector.extract_strided_slice %176 {offsets = [0, 1], sizes = [8, 1], strides = [1, 1]} : vector<8x2xf32> to vector<8x1xf32>
    %184 = vector.broadcast %183 : vector<8x1xf32> to vector<8x512xf32>
    %185 = vector.broadcast %3 : vector<1x512xf32> to vector<8x512xf32>
    %186 = arith.mulf %184, %185 : vector<8x512xf32>
    %187 = arith.addf %182, %186 : vector<8x512xf32>
    %188 = arith.addf %187, %6 : vector<8x512xf32>
    %189 = vector.extract_strided_slice %188 {offsets = [0, 0], sizes = [8, 128], strides = [1, 1]} : vector<8x512xf32> to vector<8x128xf32>
    %190 = arith.negf %189 : vector<8x128xf32>
    %191 = math.exp %190 : vector<8x128xf32>
    %cst_38 = arith.constant 1.000000e+00 : f32
    %192 = vector.broadcast %cst_38 : f32 to vector<8x128xf32>
    %193 = arith.addf %192, %191 : vector<8x128xf32>
    %194 = arith.divf %192, %193 : vector<8x128xf32>
    %195 = vector.extract_strided_slice %188 {offsets = [0, 128], sizes = [8, 128], strides = [1, 1]} : vector<8x512xf32> to vector<8x128xf32>
    %196 = arith.negf %195 : vector<8x128xf32>
    %197 = math.exp %196 : vector<8x128xf32>
    %cst_39 = arith.constant 1.000000e+00 : f32
    %198 = vector.broadcast %cst_39 : f32 to vector<8x128xf32>
    %199 = arith.addf %198, %197 : vector<8x128xf32>
    %200 = arith.divf %198, %199 : vector<8x128xf32>
    %201 = vector.extract_strided_slice %188 {offsets = [0, 256], sizes = [8, 128], strides = [1, 1]} : vector<8x512xf32> to vector<8x128xf32>
    %202 = math.tanh %201 : vector<8x128xf32>
    %203 = vector.extract_strided_slice %188 {offsets = [0, 384], sizes = [8, 128], strides = [1, 1]} : vector<8x512xf32> to vector<8x128xf32>
    %204 = arith.negf %203 : vector<8x128xf32>
    %205 = math.exp %204 : vector<8x128xf32>
    %cst_40 = arith.constant 1.000000e+00 : f32
    %206 = vector.broadcast %cst_40 : f32 to vector<8x128xf32>
    %207 = arith.addf %206, %205 : vector<8x128xf32>
    %208 = arith.divf %206, %207 : vector<8x128xf32>
    %209 = arith.mulf %200, %132 : vector<8x128xf32>
    %210 = arith.mulf %194, %202 : vector<8x128xf32>
    %211 = arith.addf %209, %210 : vector<8x128xf32>
    %212 = math.tanh %211 : vector<8x128xf32>
    %213 = arith.mulf %208, %212 : vector<8x128xf32>
    %214 = tpu.concatenate %213, %162 in 1 : vector<8x128xf32>, vector<8x128xf32> -> vector<8x256xf32>
    %cst_41 = arith.constant dense<0.000000e+00> : vector<8x512xf32>
    %215 = tpu.matmul %214, %1, %cst_41 {dimension_numbers = #tpu.dot_dimension_numbers<[1], [0], [0], [1], [0, 0, 1, 1], [], []>} : vector<8x256xf32>, vector<256x512xf32>, vector<8x512xf32> -> vector<8x512xf32>
    %216 = arith.addf %215, %9 : vector<8x512xf32>
    %217 = vector.extract_strided_slice %216 {offsets = [0, 0], sizes = [8, 128], strides = [1, 1]} : vector<8x512xf32> to vector<8x128xf32>
    %218 = arith.negf %217 : vector<8x128xf32>
    %219 = math.exp %218 : vector<8x128xf32>
    %cst_42 = arith.constant 1.000000e+00 : f32
    %220 = vector.broadcast %cst_42 : f32 to vector<8x128xf32>
    %221 = arith.addf %220, %219 : vector<8x128xf32>
    %222 = arith.divf %220, %221 : vector<8x128xf32>
    %223 = vector.extract_strided_slice %216 {offsets = [0, 128], sizes = [8, 128], strides = [1, 1]} : vector<8x512xf32> to vector<8x128xf32>
    %224 = arith.negf %223 : vector<8x128xf32>
    %225 = math.exp %224 : vector<8x128xf32>
    %cst_43 = arith.constant 1.000000e+00 : f32
    %226 = vector.broadcast %cst_43 : f32 to vector<8x128xf32>
    %227 = arith.addf %226, %225 : vector<8x128xf32>
    %228 = arith.divf %226, %227 : vector<8x128xf32>
    %229 = vector.extract_strided_slice %216 {offsets = [0, 256], sizes = [8, 128], strides = [1, 1]} : vector<8x512xf32> to vector<8x128xf32>
    %230 = math.tanh %229 : vector<8x128xf32>
    %231 = vector.extract_strided_slice %216 {offsets = [0, 384], sizes = [8, 128], strides = [1, 1]} : vector<8x512xf32> to vector<8x128xf32>
    %232 = arith.negf %231 : vector<8x128xf32>
    %233 = math.exp %232 : vector<8x128xf32>
    %cst_44 = arith.constant 1.000000e+00 : f32
    %234 = vector.broadcast %cst_44 : f32 to vector<8x128xf32>
    %235 = arith.addf %234, %233 : vector<8x128xf32>
    %236 = arith.divf %234, %235 : vector<8x128xf32>
    %237 = arith.mulf %228, %160 : vector<8x128xf32>
    %238 = arith.mulf %222, %230 : vector<8x128xf32>
    %239 = arith.addf %237, %238 : vector<8x128xf32>
    %240 = math.tanh %239 : vector<8x128xf32>
    %241 = arith.mulf %236, %240 : vector<8x128xf32>
    %242 = arith.mulf %241, %12 : vector<8x128xf32>
    %cst_45 = arith.constant dense<0.000000e+00> : vector<8xf32>
    %243 = vector.multi_reduction <add>, %242, %cst_45 [1] : vector<8x128xf32> to vector<8xf32>
    %244 = vector.shape_cast %243 : vector<8xf32> to vector<8x1xf32>
    %245 = vector.broadcast %c2_i32 : i32 to vector<1x8xi32>
    %246 = arith.cmpi eq, %13, %245 : vector<1x8xi32>
    %247 = arith.extui %246 : vector<1x8xi1> to vector<1x8xi32>
    %248 = arith.sitofp %247 : vector<1x8xi32> to vector<1x8xf32>
    %249 = vector.broadcast %244 : vector<8x1xf32> to vector<8x8xf32>
    %250 = vector.broadcast %248 : vector<1x8xf32> to vector<8x8xf32>
    %251 = arith.mulf %249, %250 : vector<8x8xf32>
    %252 = arith.addf %173, %251 : vector<8x8xf32>
    %c3_i32 = arith.constant 3 : i32
    %253 = arith.index_cast %c3_i32 : i32 to index
    %c0_46 = arith.constant 0 : index
    %c0_47 = arith.constant 0 : index
    %254 = vector.load %arg0[%253, %c0_46, %c0_47] : memref<8x8x2xf32, #tpu.memory_space<vmem>>, vector<1x8x2xf32>
    %255 = vector.shape_cast %254 : vector<1x8x2xf32> to vector<8x2xf32>
    %cst_48 = arith.constant dense<0.000000e+00> : vector<8x512xf32>
    %256 = tpu.matmul %213, %0, %cst_48 {dimension_numbers = #tpu.dot_dimension_numbers<[1], [0], [0], [1], [0, 0, 1, 1], [], []>} : vector<8x128xf32>, vector<128x512xf32>, vector<8x512xf32> -> vector<8x512xf32>
    %257 = vector.extract_strided_slice %255 {offsets = [0, 0], sizes = [8, 1], strides = [1, 1]} : vector<8x2xf32> to vector<8x1xf32>
    %258 = vector.broadcast %257 : vector<8x1xf32> to vector<8x512xf32>
    %259 = vector.broadcast %2 : vector<1x512xf32> to vector<8x512xf32>
    %260 = arith.mulf %258, %259 : vector<8x512xf32>
    %261 = arith.addf %256, %260 : vector<8x512xf32>
    %262 = vector.extract_strided_slice %255 {offsets = [0, 1], sizes = [8, 1], strides = [1, 1]} : vector<8x2xf32> to vector<8x1xf32>
    %263 = vector.broadcast %262 : vector<8x1xf32> to vector<8x512xf32>
    %264 = vector.broadcast %3 : vector<1x512xf32> to vector<8x512xf32>
    %265 = arith.mulf %263, %264 : vector<8x512xf32>
    %266 = arith.addf %261, %265 : vector<8x512xf32>
    %267 = arith.addf %266, %6 : vector<8x512xf32>
    %268 = vector.extract_strided_slice %267 {offsets = [0, 0], sizes = [8, 128], strides = [1, 1]} : vector<8x512xf32> to vector<8x128xf32>
    %269 = arith.negf %268 : vector<8x128xf32>
    %270 = math.exp %269 : vector<8x128xf32>
    %cst_49 = arith.constant 1.000000e+00 : f32
    %271 = vector.broadcast %cst_49 : f32 to vector<8x128xf32>
    %272 = arith.addf %271, %270 : vector<8x128xf32>
    %273 = arith.divf %271, %272 : vector<8x128xf32>
    %274 = vector.extract_strided_slice %267 {offsets = [0, 128], sizes = [8, 128], strides = [1, 1]} : vector<8x512xf32> to vector<8x128xf32>
    %275 = arith.negf %274 : vector<8x128xf32>
    %276 = math.exp %275 : vector<8x128xf32>
    %cst_50 = arith.constant 1.000000e+00 : f32
    %277 = vector.broadcast %cst_50 : f32 to vector<8x128xf32>
    %278 = arith.addf %277, %276 : vector<8x128xf32>
    %279 = arith.divf %277, %278 : vector<8x128xf32>
    %280 = vector.extract_strided_slice %267 {offsets = [0, 256], sizes = [8, 128], strides = [1, 1]} : vector<8x512xf32> to vector<8x128xf32>
    %281 = math.tanh %280 : vector<8x128xf32>
    %282 = vector.extract_strided_slice %267 {offsets = [0, 384], sizes = [8, 128], strides = [1, 1]} : vector<8x512xf32> to vector<8x128xf32>
    %283 = arith.negf %282 : vector<8x128xf32>
    %284 = math.exp %283 : vector<8x128xf32>
    %cst_51 = arith.constant 1.000000e+00 : f32
    %285 = vector.broadcast %cst_51 : f32 to vector<8x128xf32>
    %286 = arith.addf %285, %284 : vector<8x128xf32>
    %287 = arith.divf %285, %286 : vector<8x128xf32>
    %288 = arith.mulf %279, %211 : vector<8x128xf32>
    %289 = arith.mulf %273, %281 : vector<8x128xf32>
    %290 = arith.addf %288, %289 : vector<8x128xf32>
    %291 = math.tanh %290 : vector<8x128xf32>
    %292 = arith.mulf %287, %291 : vector<8x128xf32>
    %293 = tpu.concatenate %292, %241 in 1 : vector<8x128xf32>, vector<8x128xf32> -> vector<8x256xf32>
    %cst_52 = arith.constant dense<0.000000e+00> : vector<8x512xf32>
    %294 = tpu.matmul %293, %1, %cst_52 {dimension_numbers = #tpu.dot_dimension_numbers<[1], [0], [0], [1], [0, 0, 1, 1], [], []>} : vector<8x256xf32>, vector<256x512xf32>, vector<8x512xf32> -> vector<8x512xf32>
    %295 = arith.addf %294, %9 : vector<8x512xf32>
    %296 = vector.extract_strided_slice %295 {offsets = [0, 0], sizes = [8, 128], strides = [1, 1]} : vector<8x512xf32> to vector<8x128xf32>
    %297 = arith.negf %296 : vector<8x128xf32>
    %298 = math.exp %297 : vector<8x128xf32>
    %cst_53 = arith.constant 1.000000e+00 : f32
    %299 = vector.broadcast %cst_53 : f32 to vector<8x128xf32>
    %300 = arith.addf %299, %298 : vector<8x128xf32>
    %301 = arith.divf %299, %300 : vector<8x128xf32>
    %302 = vector.extract_strided_slice %295 {offsets = [0, 128], sizes = [8, 128], strides = [1, 1]} : vector<8x512xf32> to vector<8x128xf32>
    %303 = arith.negf %302 : vector<8x128xf32>
    %304 = math.exp %303 : vector<8x128xf32>
    %cst_54 = arith.constant 1.000000e+00 : f32
    %305 = vector.broadcast %cst_54 : f32 to vector<8x128xf32>
    %306 = arith.addf %305, %304 : vector<8x128xf32>
    %307 = arith.divf %305, %306 : vector<8x128xf32>
    %308 = vector.extract_strided_slice %295 {offsets = [0, 256], sizes = [8, 128], strides = [1, 1]} : vector<8x512xf32> to vector<8x128xf32>
    %309 = math.tanh %308 : vector<8x128xf32>
    %310 = vector.extract_strided_slice %295 {offsets = [0, 384], sizes = [8, 128], strides = [1, 1]} : vector<8x512xf32> to vector<8x128xf32>
    %311 = arith.negf %310 : vector<8x128xf32>
    %312 = math.exp %311 : vector<8x128xf32>
    %cst_55 = arith.constant 1.000000e+00 : f32
    %313 = vector.broadcast %cst_55 : f32 to vector<8x128xf32>
    %314 = arith.addf %313, %312 : vector<8x128xf32>
    %315 = arith.divf %313, %314 : vector<8x128xf32>
    %316 = arith.mulf %307, %239 : vector<8x128xf32>
    %317 = arith.mulf %301, %309 : vector<8x128xf32>
    %318 = arith.addf %316, %317 : vector<8x128xf32>
    %319 = math.tanh %318 : vector<8x128xf32>
    %320 = arith.mulf %315, %319 : vector<8x128xf32>
    %321 = arith.mulf %320, %12 : vector<8x128xf32>
    %cst_56 = arith.constant dense<0.000000e+00> : vector<8xf32>
    %322 = vector.multi_reduction <add>, %321, %cst_56 [1] : vector<8x128xf32> to vector<8xf32>
    %323 = vector.shape_cast %322 : vector<8xf32> to vector<8x1xf32>
    %324 = vector.broadcast %c3_i32 : i32 to vector<1x8xi32>
    %325 = arith.cmpi eq, %13, %324 : vector<1x8xi32>
    %326 = arith.extui %325 : vector<1x8xi1> to vector<1x8xi32>
    %327 = arith.sitofp %326 : vector<1x8xi32> to vector<1x8xf32>
    %328 = vector.broadcast %323 : vector<8x1xf32> to vector<8x8xf32>
    %329 = vector.broadcast %327 : vector<1x8xf32> to vector<8x8xf32>
    %330 = arith.mulf %328, %329 : vector<8x8xf32>
    %331 = arith.addf %252, %330 : vector<8x8xf32>
    %c4_i32 = arith.constant 4 : i32
    %332 = arith.index_cast %c4_i32 : i32 to index
    %c0_57 = arith.constant 0 : index
    %c0_58 = arith.constant 0 : index
    %333 = vector.load %arg0[%332, %c0_57, %c0_58] : memref<8x8x2xf32, #tpu.memory_space<vmem>>, vector<1x8x2xf32>
    %334 = vector.shape_cast %333 : vector<1x8x2xf32> to vector<8x2xf32>
    %cst_59 = arith.constant dense<0.000000e+00> : vector<8x512xf32>
    %335 = tpu.matmul %292, %0, %cst_59 {dimension_numbers = #tpu.dot_dimension_numbers<[1], [0], [0], [1], [0, 0, 1, 1], [], []>} : vector<8x128xf32>, vector<128x512xf32>, vector<8x512xf32> -> vector<8x512xf32>
    %336 = vector.extract_strided_slice %334 {offsets = [0, 0], sizes = [8, 1], strides = [1, 1]} : vector<8x2xf32> to vector<8x1xf32>
    %337 = vector.broadcast %336 : vector<8x1xf32> to vector<8x512xf32>
    %338 = vector.broadcast %2 : vector<1x512xf32> to vector<8x512xf32>
    %339 = arith.mulf %337, %338 : vector<8x512xf32>
    %340 = arith.addf %335, %339 : vector<8x512xf32>
    %341 = vector.extract_strided_slice %334 {offsets = [0, 1], sizes = [8, 1], strides = [1, 1]} : vector<8x2xf32> to vector<8x1xf32>
    %342 = vector.broadcast %341 : vector<8x1xf32> to vector<8x512xf32>
    %343 = vector.broadcast %3 : vector<1x512xf32> to vector<8x512xf32>
    %344 = arith.mulf %342, %343 : vector<8x512xf32>
    %345 = arith.addf %340, %344 : vector<8x512xf32>
    %346 = arith.addf %345, %6 : vector<8x512xf32>
    %347 = vector.extract_strided_slice %346 {offsets = [0, 0], sizes = [8, 128], strides = [1, 1]} : vector<8x512xf32> to vector<8x128xf32>
    %348 = arith.negf %347 : vector<8x128xf32>
    %349 = math.exp %348 : vector<8x128xf32>
    %cst_60 = arith.constant 1.000000e+00 : f32
    %350 = vector.broadcast %cst_60 : f32 to vector<8x128xf32>
    %351 = arith.addf %350, %349 : vector<8x128xf32>
    %352 = arith.divf %350, %351 : vector<8x128xf32>
    %353 = vector.extract_strided_slice %346 {offsets = [0, 128], sizes = [8, 128], strides = [1, 1]} : vector<8x512xf32> to vector<8x128xf32>
    %354 = arith.negf %353 : vector<8x128xf32>
    %355 = math.exp %354 : vector<8x128xf32>
    %cst_61 = arith.constant 1.000000e+00 : f32
    %356 = vector.broadcast %cst_61 : f32 to vector<8x128xf32>
    %357 = arith.addf %356, %355 : vector<8x128xf32>
    %358 = arith.divf %356, %357 : vector<8x128xf32>
    %359 = vector.extract_strided_slice %346 {offsets = [0, 256], sizes = [8, 128], strides = [1, 1]} : vector<8x512xf32> to vector<8x128xf32>
    %360 = math.tanh %359 : vector<8x128xf32>
    %361 = vector.extract_strided_slice %346 {offsets = [0, 384], sizes = [8, 128], strides = [1, 1]} : vector<8x512xf32> to vector<8x128xf32>
    %362 = arith.negf %361 : vector<8x128xf32>
    %363 = math.exp %362 : vector<8x128xf32>
    %cst_62 = arith.constant 1.000000e+00 : f32
    %364 = vector.broadcast %cst_62 : f32 to vector<8x128xf32>
    %365 = arith.addf %364, %363 : vector<8x128xf32>
    %366 = arith.divf %364, %365 : vector<8x128xf32>
    %367 = arith.mulf %358, %290 : vector<8x128xf32>
    %368 = arith.mulf %352, %360 : vector<8x128xf32>
    %369 = arith.addf %367, %368 : vector<8x128xf32>
    %370 = math.tanh %369 : vector<8x128xf32>
    %371 = arith.mulf %366, %370 : vector<8x128xf32>
    %372 = tpu.concatenate %371, %320 in 1 : vector<8x128xf32>, vector<8x128xf32> -> vector<8x256xf32>
    %cst_63 = arith.constant dense<0.000000e+00> : vector<8x512xf32>
    %373 = tpu.matmul %372, %1, %cst_63 {dimension_numbers = #tpu.dot_dimension_numbers<[1], [0], [0], [1], [0, 0, 1, 1], [], []>} : vector<8x256xf32>, vector<256x512xf32>, vector<8x512xf32> -> vector<8x512xf32>
    %374 = arith.addf %373, %9 : vector<8x512xf32>
    %375 = vector.extract_strided_slice %374 {offsets = [0, 0], sizes = [8, 128], strides = [1, 1]} : vector<8x512xf32> to vector<8x128xf32>
    %376 = arith.negf %375 : vector<8x128xf32>
    %377 = math.exp %376 : vector<8x128xf32>
    %cst_64 = arith.constant 1.000000e+00 : f32
    %378 = vector.broadcast %cst_64 : f32 to vector<8x128xf32>
    %379 = arith.addf %378, %377 : vector<8x128xf32>
    %380 = arith.divf %378, %379 : vector<8x128xf32>
    %381 = vector.extract_strided_slice %374 {offsets = [0, 128], sizes = [8, 128], strides = [1, 1]} : vector<8x512xf32> to vector<8x128xf32>
    %382 = arith.negf %381 : vector<8x128xf32>
    %383 = math.exp %382 : vector<8x128xf32>
    %cst_65 = arith.constant 1.000000e+00 : f32
    %384 = vector.broadcast %cst_65 : f32 to vector<8x128xf32>
    %385 = arith.addf %384, %383 : vector<8x128xf32>
    %386 = arith.divf %384, %385 : vector<8x128xf32>
    %387 = vector.extract_strided_slice %374 {offsets = [0, 256], sizes = [8, 128], strides = [1, 1]} : vector<8x512xf32> to vector<8x128xf32>
    %388 = math.tanh %387 : vector<8x128xf32>
    %389 = vector.extract_strided_slice %374 {offsets = [0, 384], sizes = [8, 128], strides = [1, 1]} : vector<8x512xf32> to vector<8x128xf32>
    %390 = arith.negf %389 : vector<8x128xf32>
    %391 = math.exp %390 : vector<8x128xf32>
    %cst_66 = arith.constant 1.000000e+00 : f32
    %392 = vector.broadcast %cst_66 : f32 to vector<8x128xf32>
    %393 = arith.addf %392, %391 : vector<8x128xf32>
    %394 = arith.divf %392, %393 : vector<8x128xf32>
    %395 = arith.mulf %386, %318 : vector<8x128xf32>
    %396 = arith.mulf %380, %388 : vector<8x128xf32>
    %397 = arith.addf %395, %396 : vector<8x128xf32>
    %398 = math.tanh %397 : vector<8x128xf32>
    %399 = arith.mulf %394, %398 : vector<8x128xf32>
    %400 = arith.mulf %399, %12 : vector<8x128xf32>
    %cst_67 = arith.constant dense<0.000000e+00> : vector<8xf32>
    %401 = vector.multi_reduction <add>, %400, %cst_67 [1] : vector<8x128xf32> to vector<8xf32>
    %402 = vector.shape_cast %401 : vector<8xf32> to vector<8x1xf32>
    %403 = vector.broadcast %c4_i32 : i32 to vector<1x8xi32>
    %404 = arith.cmpi eq, %13, %403 : vector<1x8xi32>
    %405 = arith.extui %404 : vector<1x8xi1> to vector<1x8xi32>
    %406 = arith.sitofp %405 : vector<1x8xi32> to vector<1x8xf32>
    %407 = vector.broadcast %402 : vector<8x1xf32> to vector<8x8xf32>
    %408 = vector.broadcast %406 : vector<1x8xf32> to vector<8x8xf32>
    %409 = arith.mulf %407, %408 : vector<8x8xf32>
    %410 = arith.addf %331, %409 : vector<8x8xf32>
    %c5_i32 = arith.constant 5 : i32
    %411 = arith.index_cast %c5_i32 : i32 to index
    %c0_68 = arith.constant 0 : index
    %c0_69 = arith.constant 0 : index
    %412 = vector.load %arg0[%411, %c0_68, %c0_69] : memref<8x8x2xf32, #tpu.memory_space<vmem>>, vector<1x8x2xf32>
    %413 = vector.shape_cast %412 : vector<1x8x2xf32> to vector<8x2xf32>
    %cst_70 = arith.constant dense<0.000000e+00> : vector<8x512xf32>
    %414 = tpu.matmul %371, %0, %cst_70 {dimension_numbers = #tpu.dot_dimension_numbers<[1], [0], [0], [1], [0, 0, 1, 1], [], []>} : vector<8x128xf32>, vector<128x512xf32>, vector<8x512xf32> -> vector<8x512xf32>
    %415 = vector.extract_strided_slice %413 {offsets = [0, 0], sizes = [8, 1], strides = [1, 1]} : vector<8x2xf32> to vector<8x1xf32>
    %416 = vector.broadcast %415 : vector<8x1xf32> to vector<8x512xf32>
    %417 = vector.broadcast %2 : vector<1x512xf32> to vector<8x512xf32>
    %418 = arith.mulf %416, %417 : vector<8x512xf32>
    %419 = arith.addf %414, %418 : vector<8x512xf32>
    %420 = vector.extract_strided_slice %413 {offsets = [0, 1], sizes = [8, 1], strides = [1, 1]} : vector<8x2xf32> to vector<8x1xf32>
    %421 = vector.broadcast %420 : vector<8x1xf32> to vector<8x512xf32>
    %422 = vector.broadcast %3 : vector<1x512xf32> to vector<8x512xf32>
    %423 = arith.mulf %421, %422 : vector<8x512xf32>
    %424 = arith.addf %419, %423 : vector<8x512xf32>
    %425 = arith.addf %424, %6 : vector<8x512xf32>
    %426 = vector.extract_strided_slice %425 {offsets = [0, 0], sizes = [8, 128], strides = [1, 1]} : vector<8x512xf32> to vector<8x128xf32>
    %427 = arith.negf %426 : vector<8x128xf32>
    %428 = math.exp %427 : vector<8x128xf32>
    %cst_71 = arith.constant 1.000000e+00 : f32
    %429 = vector.broadcast %cst_71 : f32 to vector<8x128xf32>
    %430 = arith.addf %429, %428 : vector<8x128xf32>
    %431 = arith.divf %429, %430 : vector<8x128xf32>
    %432 = vector.extract_strided_slice %425 {offsets = [0, 128], sizes = [8, 128], strides = [1, 1]} : vector<8x512xf32> to vector<8x128xf32>
    %433 = arith.negf %432 : vector<8x128xf32>
    %434 = math.exp %433 : vector<8x128xf32>
    %cst_72 = arith.constant 1.000000e+00 : f32
    %435 = vector.broadcast %cst_72 : f32 to vector<8x128xf32>
    %436 = arith.addf %435, %434 : vector<8x128xf32>
    %437 = arith.divf %435, %436 : vector<8x128xf32>
    %438 = vector.extract_strided_slice %425 {offsets = [0, 256], sizes = [8, 128], strides = [1, 1]} : vector<8x512xf32> to vector<8x128xf32>
    %439 = math.tanh %438 : vector<8x128xf32>
    %440 = vector.extract_strided_slice %425 {offsets = [0, 384], sizes = [8, 128], strides = [1, 1]} : vector<8x512xf32> to vector<8x128xf32>
    %441 = arith.negf %440 : vector<8x128xf32>
    %442 = math.exp %441 : vector<8x128xf32>
    %cst_73 = arith.constant 1.000000e+00 : f32
    %443 = vector.broadcast %cst_73 : f32 to vector<8x128xf32>
    %444 = arith.addf %443, %442 : vector<8x128xf32>
    %445 = arith.divf %443, %444 : vector<8x128xf32>
    %446 = arith.mulf %437, %369 : vector<8x128xf32>
    %447 = arith.mulf %431, %439 : vector<8x128xf32>
    %448 = arith.addf %446, %447 : vector<8x128xf32>
    %449 = math.tanh %448 : vector<8x128xf32>
    %450 = arith.mulf %445, %449 : vector<8x128xf32>
    %451 = tpu.concatenate %450, %399 in 1 : vector<8x128xf32>, vector<8x128xf32> -> vector<8x256xf32>
    %cst_74 = arith.constant dense<0.000000e+00> : vector<8x512xf32>
    %452 = tpu.matmul %451, %1, %cst_74 {dimension_numbers = #tpu.dot_dimension_numbers<[1], [0], [0], [1], [0, 0, 1, 1], [], []>} : vector<8x256xf32>, vector<256x512xf32>, vector<8x512xf32> -> vector<8x512xf32>
    %453 = arith.addf %452, %9 : vector<8x512xf32>
    %454 = vector.extract_strided_slice %453 {offsets = [0, 0], sizes = [8, 128], strides = [1, 1]} : vector<8x512xf32> to vector<8x128xf32>
    %455 = arith.negf %454 : vector<8x128xf32>
    %456 = math.exp %455 : vector<8x128xf32>
    %cst_75 = arith.constant 1.000000e+00 : f32
    %457 = vector.broadcast %cst_75 : f32 to vector<8x128xf32>
    %458 = arith.addf %457, %456 : vector<8x128xf32>
    %459 = arith.divf %457, %458 : vector<8x128xf32>
    %460 = vector.extract_strided_slice %453 {offsets = [0, 128], sizes = [8, 128], strides = [1, 1]} : vector<8x512xf32> to vector<8x128xf32>
    %461 = arith.negf %460 : vector<8x128xf32>
    %462 = math.exp %461 : vector<8x128xf32>
    %cst_76 = arith.constant 1.000000e+00 : f32
    %463 = vector.broadcast %cst_76 : f32 to vector<8x128xf32>
    %464 = arith.addf %463, %462 : vector<8x128xf32>
    %465 = arith.divf %463, %464 : vector<8x128xf32>
    %466 = vector.extract_strided_slice %453 {offsets = [0, 256], sizes = [8, 128], strides = [1, 1]} : vector<8x512xf32> to vector<8x128xf32>
    %467 = math.tanh %466 : vector<8x128xf32>
    %468 = vector.extract_strided_slice %453 {offsets = [0, 384], sizes = [8, 128], strides = [1, 1]} : vector<8x512xf32> to vector<8x128xf32>
    %469 = arith.negf %468 : vector<8x128xf32>
    %470 = math.exp %469 : vector<8x128xf32>
    %cst_77 = arith.constant 1.000000e+00 : f32
    %471 = vector.broadcast %cst_77 : f32 to vector<8x128xf32>
    %472 = arith.addf %471, %470 : vector<8x128xf32>
    %473 = arith.divf %471, %472 : vector<8x128xf32>
    %474 = arith.mulf %465, %397 : vector<8x128xf32>
    %475 = arith.mulf %459, %467 : vector<8x128xf32>
    %476 = arith.addf %474, %475 : vector<8x128xf32>
    %477 = math.tanh %476 : vector<8x128xf32>
    %478 = arith.mulf %473, %477 : vector<8x128xf32>
    %479 = arith.mulf %478, %12 : vector<8x128xf32>
    %cst_78 = arith.constant dense<0.000000e+00> : vector<8xf32>
    %480 = vector.multi_reduction <add>, %479, %cst_78 [1] : vector<8x128xf32> to vector<8xf32>
    %481 = vector.shape_cast %480 : vector<8xf32> to vector<8x1xf32>
    %482 = vector.broadcast %c5_i32 : i32 to vector<1x8xi32>
    %483 = arith.cmpi eq, %13, %482 : vector<1x8xi32>
    %484 = arith.extui %483 : vector<1x8xi1> to vector<1x8xi32>
    %485 = arith.sitofp %484 : vector<1x8xi32> to vector<1x8xf32>
    %486 = vector.broadcast %481 : vector<8x1xf32> to vector<8x8xf32>
    %487 = vector.broadcast %485 : vector<1x8xf32> to vector<8x8xf32>
    %488 = arith.mulf %486, %487 : vector<8x8xf32>
    %489 = arith.addf %410, %488 : vector<8x8xf32>
    %c6_i32 = arith.constant 6 : i32
    %490 = arith.index_cast %c6_i32 : i32 to index
    %c0_79 = arith.constant 0 : index
    %c0_80 = arith.constant 0 : index
    %491 = vector.load %arg0[%490, %c0_79, %c0_80] : memref<8x8x2xf32, #tpu.memory_space<vmem>>, vector<1x8x2xf32>
    %492 = vector.shape_cast %491 : vector<1x8x2xf32> to vector<8x2xf32>
    %cst_81 = arith.constant dense<0.000000e+00> : vector<8x512xf32>
    %493 = tpu.matmul %450, %0, %cst_81 {dimension_numbers = #tpu.dot_dimension_numbers<[1], [0], [0], [1], [0, 0, 1, 1], [], []>} : vector<8x128xf32>, vector<128x512xf32>, vector<8x512xf32> -> vector<8x512xf32>
    %494 = vector.extract_strided_slice %492 {offsets = [0, 0], sizes = [8, 1], strides = [1, 1]} : vector<8x2xf32> to vector<8x1xf32>
    %495 = vector.broadcast %494 : vector<8x1xf32> to vector<8x512xf32>
    %496 = vector.broadcast %2 : vector<1x512xf32> to vector<8x512xf32>
    %497 = arith.mulf %495, %496 : vector<8x512xf32>
    %498 = arith.addf %493, %497 : vector<8x512xf32>
    %499 = vector.extract_strided_slice %492 {offsets = [0, 1], sizes = [8, 1], strides = [1, 1]} : vector<8x2xf32> to vector<8x1xf32>
    %500 = vector.broadcast %499 : vector<8x1xf32> to vector<8x512xf32>
    %501 = vector.broadcast %3 : vector<1x512xf32> to vector<8x512xf32>
    %502 = arith.mulf %500, %501 : vector<8x512xf32>
    %503 = arith.addf %498, %502 : vector<8x512xf32>
    %504 = arith.addf %503, %6 : vector<8x512xf32>
    %505 = vector.extract_strided_slice %504 {offsets = [0, 0], sizes = [8, 128], strides = [1, 1]} : vector<8x512xf32> to vector<8x128xf32>
    %506 = arith.negf %505 : vector<8x128xf32>
    %507 = math.exp %506 : vector<8x128xf32>
    %cst_82 = arith.constant 1.000000e+00 : f32
    %508 = vector.broadcast %cst_82 : f32 to vector<8x128xf32>
    %509 = arith.addf %508, %507 : vector<8x128xf32>
    %510 = arith.divf %508, %509 : vector<8x128xf32>
    %511 = vector.extract_strided_slice %504 {offsets = [0, 128], sizes = [8, 128], strides = [1, 1]} : vector<8x512xf32> to vector<8x128xf32>
    %512 = arith.negf %511 : vector<8x128xf32>
    %513 = math.exp %512 : vector<8x128xf32>
    %cst_83 = arith.constant 1.000000e+00 : f32
    %514 = vector.broadcast %cst_83 : f32 to vector<8x128xf32>
    %515 = arith.addf %514, %513 : vector<8x128xf32>
    %516 = arith.divf %514, %515 : vector<8x128xf32>
    %517 = vector.extract_strided_slice %504 {offsets = [0, 256], sizes = [8, 128], strides = [1, 1]} : vector<8x512xf32> to vector<8x128xf32>
    %518 = math.tanh %517 : vector<8x128xf32>
    %519 = vector.extract_strided_slice %504 {offsets = [0, 384], sizes = [8, 128], strides = [1, 1]} : vector<8x512xf32> to vector<8x128xf32>
    %520 = arith.negf %519 : vector<8x128xf32>
    %521 = math.exp %520 : vector<8x128xf32>
    %cst_84 = arith.constant 1.000000e+00 : f32
    %522 = vector.broadcast %cst_84 : f32 to vector<8x128xf32>
    %523 = arith.addf %522, %521 : vector<8x128xf32>
    %524 = arith.divf %522, %523 : vector<8x128xf32>
    %525 = arith.mulf %516, %448 : vector<8x128xf32>
    %526 = arith.mulf %510, %518 : vector<8x128xf32>
    %527 = arith.addf %525, %526 : vector<8x128xf32>
    %528 = math.tanh %527 : vector<8x128xf32>
    %529 = arith.mulf %524, %528 : vector<8x128xf32>
    %530 = tpu.concatenate %529, %478 in 1 : vector<8x128xf32>, vector<8x128xf32> -> vector<8x256xf32>
    %cst_85 = arith.constant dense<0.000000e+00> : vector<8x512xf32>
    %531 = tpu.matmul %530, %1, %cst_85 {dimension_numbers = #tpu.dot_dimension_numbers<[1], [0], [0], [1], [0, 0, 1, 1], [], []>} : vector<8x256xf32>, vector<256x512xf32>, vector<8x512xf32> -> vector<8x512xf32>
    %532 = arith.addf %531, %9 : vector<8x512xf32>
    %533 = vector.extract_strided_slice %532 {offsets = [0, 0], sizes = [8, 128], strides = [1, 1]} : vector<8x512xf32> to vector<8x128xf32>
    %534 = arith.negf %533 : vector<8x128xf32>
    %535 = math.exp %534 : vector<8x128xf32>
    %cst_86 = arith.constant 1.000000e+00 : f32
    %536 = vector.broadcast %cst_86 : f32 to vector<8x128xf32>
    %537 = arith.addf %536, %535 : vector<8x128xf32>
    %538 = arith.divf %536, %537 : vector<8x128xf32>
    %539 = vector.extract_strided_slice %532 {offsets = [0, 128], sizes = [8, 128], strides = [1, 1]} : vector<8x512xf32> to vector<8x128xf32>
    %540 = arith.negf %539 : vector<8x128xf32>
    %541 = math.exp %540 : vector<8x128xf32>
    %cst_87 = arith.constant 1.000000e+00 : f32
    %542 = vector.broadcast %cst_87 : f32 to vector<8x128xf32>
    %543 = arith.addf %542, %541 : vector<8x128xf32>
    %544 = arith.divf %542, %543 : vector<8x128xf32>
    %545 = vector.extract_strided_slice %532 {offsets = [0, 256], sizes = [8, 128], strides = [1, 1]} : vector<8x512xf32> to vector<8x128xf32>
    %546 = math.tanh %545 : vector<8x128xf32>
    %547 = vector.extract_strided_slice %532 {offsets = [0, 384], sizes = [8, 128], strides = [1, 1]} : vector<8x512xf32> to vector<8x128xf32>
    %548 = arith.negf %547 : vector<8x128xf32>
    %549 = math.exp %548 : vector<8x128xf32>
    %cst_88 = arith.constant 1.000000e+00 : f32
    %550 = vector.broadcast %cst_88 : f32 to vector<8x128xf32>
    %551 = arith.addf %550, %549 : vector<8x128xf32>
    %552 = arith.divf %550, %551 : vector<8x128xf32>
    %553 = arith.mulf %544, %476 : vector<8x128xf32>
    %554 = arith.mulf %538, %546 : vector<8x128xf32>
    %555 = arith.addf %553, %554 : vector<8x128xf32>
    %556 = math.tanh %555 : vector<8x128xf32>
    %557 = arith.mulf %552, %556 : vector<8x128xf32>
    %558 = arith.mulf %557, %12 : vector<8x128xf32>
    %cst_89 = arith.constant dense<0.000000e+00> : vector<8xf32>
    %559 = vector.multi_reduction <add>, %558, %cst_89 [1] : vector<8x128xf32> to vector<8xf32>
    %560 = vector.shape_cast %559 : vector<8xf32> to vector<8x1xf32>
    %561 = vector.broadcast %c6_i32 : i32 to vector<1x8xi32>
    %562 = arith.cmpi eq, %13, %561 : vector<1x8xi32>
    %563 = arith.extui %562 : vector<1x8xi1> to vector<1x8xi32>
    %564 = arith.sitofp %563 : vector<1x8xi32> to vector<1x8xf32>
    %565 = vector.broadcast %560 : vector<8x1xf32> to vector<8x8xf32>
    %566 = vector.broadcast %564 : vector<1x8xf32> to vector<8x8xf32>
    %567 = arith.mulf %565, %566 : vector<8x8xf32>
    %568 = arith.addf %489, %567 : vector<8x8xf32>
    %c7_i32 = arith.constant 7 : i32
    %569 = arith.index_cast %c7_i32 : i32 to index
    %c0_90 = arith.constant 0 : index
    %c0_91 = arith.constant 0 : index
    %570 = vector.load %arg0[%569, %c0_90, %c0_91] : memref<8x8x2xf32, #tpu.memory_space<vmem>>, vector<1x8x2xf32>
    %571 = vector.shape_cast %570 : vector<1x8x2xf32> to vector<8x2xf32>
    %cst_92 = arith.constant dense<0.000000e+00> : vector<8x512xf32>
    %572 = tpu.matmul %529, %0, %cst_92 {dimension_numbers = #tpu.dot_dimension_numbers<[1], [0], [0], [1], [0, 0, 1, 1], [], []>} : vector<8x128xf32>, vector<128x512xf32>, vector<8x512xf32> -> vector<8x512xf32>
    %573 = vector.extract_strided_slice %571 {offsets = [0, 0], sizes = [8, 1], strides = [1, 1]} : vector<8x2xf32> to vector<8x1xf32>
    %574 = vector.broadcast %573 : vector<8x1xf32> to vector<8x512xf32>
    %575 = vector.broadcast %2 : vector<1x512xf32> to vector<8x512xf32>
    %576 = arith.mulf %574, %575 : vector<8x512xf32>
    %577 = arith.addf %572, %576 : vector<8x512xf32>
    %578 = vector.extract_strided_slice %571 {offsets = [0, 1], sizes = [8, 1], strides = [1, 1]} : vector<8x2xf32> to vector<8x1xf32>
    %579 = vector.broadcast %578 : vector<8x1xf32> to vector<8x512xf32>
    %580 = vector.broadcast %3 : vector<1x512xf32> to vector<8x512xf32>
    %581 = arith.mulf %579, %580 : vector<8x512xf32>
    %582 = arith.addf %577, %581 : vector<8x512xf32>
    %583 = arith.addf %582, %6 : vector<8x512xf32>
    %584 = vector.extract_strided_slice %583 {offsets = [0, 0], sizes = [8, 128], strides = [1, 1]} : vector<8x512xf32> to vector<8x128xf32>
    %585 = arith.negf %584 : vector<8x128xf32>
    %586 = math.exp %585 : vector<8x128xf32>
    %cst_93 = arith.constant 1.000000e+00 : f32
    %587 = vector.broadcast %cst_93 : f32 to vector<8x128xf32>
    %588 = arith.addf %587, %586 : vector<8x128xf32>
    %589 = arith.divf %587, %588 : vector<8x128xf32>
    %590 = vector.extract_strided_slice %583 {offsets = [0, 128], sizes = [8, 128], strides = [1, 1]} : vector<8x512xf32> to vector<8x128xf32>
    %591 = arith.negf %590 : vector<8x128xf32>
    %592 = math.exp %591 : vector<8x128xf32>
    %cst_94 = arith.constant 1.000000e+00 : f32
    %593 = vector.broadcast %cst_94 : f32 to vector<8x128xf32>
    %594 = arith.addf %593, %592 : vector<8x128xf32>
    %595 = arith.divf %593, %594 : vector<8x128xf32>
    %596 = vector.extract_strided_slice %583 {offsets = [0, 256], sizes = [8, 128], strides = [1, 1]} : vector<8x512xf32> to vector<8x128xf32>
    %597 = math.tanh %596 : vector<8x128xf32>
    %598 = vector.extract_strided_slice %583 {offsets = [0, 384], sizes = [8, 128], strides = [1, 1]} : vector<8x512xf32> to vector<8x128xf32>
    %599 = arith.negf %598 : vector<8x128xf32>
    %600 = math.exp %599 : vector<8x128xf32>
    %cst_95 = arith.constant 1.000000e+00 : f32
    %601 = vector.broadcast %cst_95 : f32 to vector<8x128xf32>
    %602 = arith.addf %601, %600 : vector<8x128xf32>
    %603 = arith.divf %601, %602 : vector<8x128xf32>
    %604 = arith.mulf %595, %527 : vector<8x128xf32>
    %605 = arith.mulf %589, %597 : vector<8x128xf32>
    %606 = arith.addf %604, %605 : vector<8x128xf32>
    %607 = math.tanh %606 : vector<8x128xf32>
    %608 = arith.mulf %603, %607 : vector<8x128xf32>
    %609 = tpu.concatenate %608, %557 in 1 : vector<8x128xf32>, vector<8x128xf32> -> vector<8x256xf32>
    %cst_96 = arith.constant dense<0.000000e+00> : vector<8x512xf32>
    %610 = tpu.matmul %609, %1, %cst_96 {dimension_numbers = #tpu.dot_dimension_numbers<[1], [0], [0], [1], [0, 0, 1, 1], [], []>} : vector<8x256xf32>, vector<256x512xf32>, vector<8x512xf32> -> vector<8x512xf32>
    %611 = arith.addf %610, %9 : vector<8x512xf32>
    %612 = vector.extract_strided_slice %611 {offsets = [0, 0], sizes = [8, 128], strides = [1, 1]} : vector<8x512xf32> to vector<8x128xf32>
    %613 = arith.negf %612 : vector<8x128xf32>
    %614 = math.exp %613 : vector<8x128xf32>
    %cst_97 = arith.constant 1.000000e+00 : f32
    %615 = vector.broadcast %cst_97 : f32 to vector<8x128xf32>
    %616 = arith.addf %615, %614 : vector<8x128xf32>
    %617 = arith.divf %615, %616 : vector<8x128xf32>
    %618 = vector.extract_strided_slice %611 {offsets = [0, 128], sizes = [8, 128], strides = [1, 1]} : vector<8x512xf32> to vector<8x128xf32>
    %619 = arith.negf %618 : vector<8x128xf32>
    %620 = math.exp %619 : vector<8x128xf32>
    %cst_98 = arith.constant 1.000000e+00 : f32
    %621 = vector.broadcast %cst_98 : f32 to vector<8x128xf32>
    %622 = arith.addf %621, %620 : vector<8x128xf32>
    %623 = arith.divf %621, %622 : vector<8x128xf32>
    %624 = vector.extract_strided_slice %611 {offsets = [0, 256], sizes = [8, 128], strides = [1, 1]} : vector<8x512xf32> to vector<8x128xf32>
    %625 = math.tanh %624 : vector<8x128xf32>
    %626 = vector.extract_strided_slice %611 {offsets = [0, 384], sizes = [8, 128], strides = [1, 1]} : vector<8x512xf32> to vector<8x128xf32>
    %627 = arith.negf %626 : vector<8x128xf32>
    %628 = math.exp %627 : vector<8x128xf32>
    %cst_99 = arith.constant 1.000000e+00 : f32
    %629 = vector.broadcast %cst_99 : f32 to vector<8x128xf32>
    %630 = arith.addf %629, %628 : vector<8x128xf32>
    %631 = arith.divf %629, %630 : vector<8x128xf32>
    %632 = arith.mulf %623, %555 : vector<8x128xf32>
    %633 = arith.mulf %617, %625 : vector<8x128xf32>
    %634 = arith.addf %632, %633 : vector<8x128xf32>
    %635 = math.tanh %634 : vector<8x128xf32>
    %636 = arith.mulf %631, %635 : vector<8x128xf32>
    %637 = arith.mulf %636, %12 : vector<8x128xf32>
    %cst_100 = arith.constant dense<0.000000e+00> : vector<8xf32>
    %638 = vector.multi_reduction <add>, %637, %cst_100 [1] : vector<8x128xf32> to vector<8xf32>
    %639 = vector.shape_cast %638 : vector<8xf32> to vector<8x1xf32>
    %640 = vector.broadcast %c7_i32 : i32 to vector<1x8xi32>
    %641 = arith.cmpi eq, %13, %640 : vector<1x8xi32>
    %642 = arith.extui %641 : vector<1x8xi1> to vector<1x8xi32>
    %643 = arith.sitofp %642 : vector<1x8xi32> to vector<1x8xf32>
    %644 = vector.broadcast %639 : vector<8x1xf32> to vector<8x8xf32>
    %645 = vector.broadcast %643 : vector<1x8xf32> to vector<8x8xf32>
    %646 = arith.mulf %644, %645 : vector<8x8xf32>
    %647 = arith.addf %568, %646 : vector<8x8xf32>
    %c8_i32 = arith.constant 8 : i32
    %c0_101 = arith.constant 0 : index
    %c0_102 = arith.constant 0 : index
    %648 = vector.load %arg7[%c0_101, %c0_102] : memref<1x1xf32, #tpu.memory_space<vmem>>, vector<1x1xf32>
    %649 = vector.broadcast %648 : vector<1x1xf32> to vector<8x8xf32>
    %650 = arith.addf %647, %649 : vector<8x8xf32>
    %c0_103 = arith.constant 0 : index
    %c0_104 = arith.constant 0 : index
    %651 = vector.load %arg8[%c0_103, %c0_104] : memref<8x8xf32, #tpu.memory_space<vmem>>, vector<8x8xf32>
    tpu.vector_store %arg8[%c0_103, %c0_104], %650 {strides = array<i32>} : memref<8x8xf32, #tpu.memory_space<vmem>>, vector<8x8xf32>,
    return
  }
}

</mosaic_0001>

<bundles_post_ra>
// kernel: tpu_custom_call.1
= control target key start
LH: loop header
LB: loop body
LE: loop exit
PB: predicated region body
PF: predicated region fallthrough
CT: control target
= control target key end

     0   :  { %s7834_s0 = inlined_call_operand.vmem [shape: f32[8,8,2], index: 0, kind: input, shape index: {}]   ;;  %s7835_s1 = inlined_call_operand.vmem [shape: f32[2,512], index: 1, kind: input, shape index: {}]   ;;  %s7836_s2 = inlined_call_operand.hbm [shape: f32[128,512], index: 2, kind: input, shape index: {}]   ;;  %s7837_s3 = inlined_call_operand.vmem [shape: f32[1,512], index: 3, kind: input, shape index: {}]   ;;  %s7838_s4 = inlined_call_operand.hbm [shape: f32[256,512], index: 4, kind: input, shape index: {}]   ;;  %s7839_s5 = inlined_call_operand.vmem [shape: f32[1,512], index: 5, kind: input, shape index: {}]   ;;  %s7840_s6 = inlined_call_operand.vmem [shape: f32[1,128], index: 6, kind: input, shape index: {}]   ;;  %s7841_s7 = inlined_call_operand.<no memory space> [shape: f32[1,1], index: 7, kind: input, shape index: {}]   ;;  %s7842_s8 = inlined_call_operand.hbm [shape: f32[8,8], index: 8, kind: output, shape index: {}]  }
   0x1   :  { %v13_v0 = vstv %s7841_s7 }
   0x2   :  { %14 = vst [vmem:[#allocation2] sm:$0x1] %v13_v0 }
   0x3   :  { %15 = vsyncpa [#allocation4], 0 }
   0x4   :  { %16 = vsyncpa [#allocation7], 0 }
   0x5   :  { %17 = vsyncpa [#allocation5], 0  ;;  %s4295_s29 = smov [#allocation3]  }
   0x6   :  { %s27_s30 = sshll.u32 %s4295_s29, 4  ;;  %s28_s30 = int_to_ptr.vmem [resolvable:$true] %s27_s30 }
   0x7   :  { %s4237_s9 = scalar_lea.vmem %s28_s30, 8192  ;;  %p4242_p1 = scmp.lt.s32.totalorder %s28_s30, %s28_s30 }
   0x8   :  { %p4238_p0 = scmp.ne.s32.totalorder %s28_s30, %s4237_s9  ;;  %p4243_p2 = scmp.lt.s32.totalorder %s4237_s9, %s4237_s9 }
   0xa   :  { %p4244_p3 = por %p4243_p2, %p4242_p1 }
   0xc   :  { %p4245_p4 = pnand %p4244_p3, %p4238_p0 }
   0xe   :  { %4248 = shalt.err (!%p4245_p4)
}
   0xf   :  { %s4296_s10 = smov 512   ;;  %s4297_s11 = smov 32  }
  0x10   :  { %33 = dma.hbm_to_vmem [thread:$0]  %s7836_s2, 8192, %s28_s30, [#allocation4], %s4296_s10, %s4296_s10, %s4297_s11  }
  0x11   :  { %s4298_s7 = smov [#allocation6]  }
  0x12   :  { %s41_s14 = sshll.u32 %s4298_s7, 4  ;;  %s42_s14 = int_to_ptr.vmem [resolvable:$true] %s41_s14 }
  0x13   :  { %s4257_s15 = scalar_lea.vmem %s42_s14, 16384  ;;  %p4262_p6 = scmp.lt.s32.totalorder %s42_s14, %s42_s14 }
  0x14   :  { %p4258_p5 = scmp.ne.s32.totalorder %s42_s14, %s4257_s15  ;;  %p4263_p7 = scmp.lt.s32.totalorder %s4257_s15, %s4257_s15 }
  0x16   :  { %p4264_p8 = por %p4263_p7, %p4262_p6 }
  0x18   :  { %p4265_p9 = pnand %p4264_p8, %p4258_p5 }
  0x1a   :  { %4268 = shalt.err (!%p4265_p9)
}
  0x1b   :  { %47 = dma.hbm_to_vmem [thread:$0]  %s7838_s4, 16384, %s42_s14, [#allocation7], %s4296_s10, %s4296_s10, %s4297_s11  }
  0x1c   :  { %4289 = dma.done.wait [#allocation4], 8192  }
  0x1d   :  { %4290 = vsyncadd [#allocation4], 4294959104 }
  0x1e   :  { %4291 = dma.done.wait [#allocation7], 16384  }
  0x1f   :  { %4292 = vsyncadd [#allocation7], 4294950912  ;;  %v7845_v1 = vmov 0.0   ;;  %v7843_v2 = vmov 0   ;;  %v4361_v3 = vld [vmem:[#allocation3 + $0x1e8] sm:$0xff]  ;;  %v4363_v4 = vld [vmem:[#allocation3 + $0x1f8] sm:$0xff] }
  0x20   :  { %403 = vmatprep.mubr.f32.mxu0 %v7845_v1  ;;  %474 = vmatprep.mubr.f32.mxu1 %v7845_v1  ;;  %v4365_v5 = vld [vmem:[#allocation3 + $0x1e0] sm:$0xff]  ;;  %v4369_v6 = vld [vmem:[#allocation3 + $0x1f0] sm:$0xff]  ;;  %v4371_v7 = vld [vmem:[#allocation3 + $0x1c8] sm:$0xff]  ;;  %vm3296_vm8 = vcmask 64512  }
  0x21   :  { %3388 = vset.pattern.permute.xlu0 %v7843_v2  ;;  %3390 = vset.pattern.permute.xlu1 %v7843_v2  ;;  %v4373_v8 = vld [vmem:[#allocation3 + $0x1d8] sm:$0xff]  ;;  %v4377_v9 = vld [vmem:[#allocation3 + $0x1c0] sm:$0xff]  ;;  %v4379_v10 = vld [vmem:[#allocation3 + $0x1d0] sm:$0xff] }
  0x22   :  { %339 = vmatprep.subr.mxu0 %v4361_v3  ;;  %410 = vmatprep.subr.mxu1 %v4363_v4  ;;  %v4381_v11 = vld [vmem:[#allocation3 + $0x1a8] sm:$0xff]  ;;  %v4385_v12 = vld [vmem:[#allocation3 + $0x1b8] sm:$0xff]  ;;  %v4387_v13 = vld [vmem:[#allocation3 + $0x1a0] sm:$0xff] }
  0x23   :  { %340 = vmatpush1.msra.mxu0 %v4365_v5  ;;  %411 = vmatpush1.msra.mxu1 %v4369_v6  ;;  %v4389_v14 = vld [vmem:[#allocation3 + $0x1b0] sm:$0xff]  ;;  %v4393_v15 = vld [vmem:[#allocation3 + $0x188] sm:$0xff]  ;;  %v4395_v16 = vld [vmem:[#allocation3 + $0x198] sm:$0xff] }
  0x24   :  { %341 = vmatprep.subr.mxu0 %v4371_v7  ;;  %412 = vmatprep.subr.mxu1 %v4373_v8  ;;  %v4399_v17 = vld [vmem:[#allocation3 + $0x180] sm:$0xff]  ;;  %v4401_v18 = vld [vmem:[#allocation3 + $0x190] sm:$0xff]  ;;  %v4405_v19 = vld [vmem:[#allocation3 + $0x168] sm:$0xff] }
  0x25   :  { %342 = vmatpush1.msra.mxu0 %v4377_v9  ;;  %413 = vmatpush1.msra.mxu1 %v4379_v10  ;;  %v4407_v20 = vld [vmem:[#allocation3 + $0x178] sm:$0xff]  ;;  %v4411_v21 = vld [vmem:[#allocation3 + $0x160] sm:$0xff]  ;;  %v4413_v22 = vld [vmem:[#allocation3 + $0x170] sm:$0xff] }
  0x26   :  { %343 = vmatprep.subr.mxu0 %v4381_v11  ;;  %414 = vmatprep.subr.mxu1 %v4385_v12  ;;  %v4417_v23 = vld [vmem:[#allocation3 + $0x148] sm:$0xff]  ;;  %v4419_v24 = vld [vmem:[#allocation3 + $0x158] sm:$0xff]  ;;  %v4423_v25 = vld [vmem:[#allocation3 + $0x140] sm:$0xff] }
  0x27   :  { %344 = vmatpush1.msra.mxu0 %v4387_v13  ;;  %415 = vmatpush1.msra.mxu1 %v4389_v14  ;;  %v4425_v26 = vld [vmem:[#allocation3 + $0x150] sm:$0xff]  ;;  %v4429_v27 = vld [vmem:[#allocation3 + $0x128] sm:$0xff]  ;;  %v4431_v28 = vld [vmem:[#allocation3 + $0x138] sm:$0xff] }
  0x28   :  { %345 = vmatprep.subr.mxu0 %v4393_v15  ;;  %416 = vmatprep.subr.mxu1 %v4395_v16  ;;  %v4435_v29 = vld [vmem:[#allocation3 + $0x120] sm:$0xff]  ;;  %v4437_v30 = vld [vmem:[#allocation3 + $0x130] sm:$0xff]  ;;  %v4441_v31 = vld [vmem:[#allocation3 + $0x108] sm:$0xff] }
  0x29   :  { %346 = vmatpush1.msra.mxu0 %v4399_v17  ;;  %417 = vmatpush1.msra.mxu1 %v4401_v18  ;;  %v4443_v32 = vld [vmem:[#allocation3 + $0x118] sm:$0xff]  ;;  %v4447_v33 = vld [vmem:[#allocation3 + $0x100] sm:$0xff]  ;;  %v4449_v34 = vld [vmem:[#allocation3 + $0x110] sm:$0xff] }
  0x2a   :  { %347 = vmatprep.subr.mxu0 %v4405_v19  ;;  %418 = vmatprep.subr.mxu1 %v4407_v20  ;;  %v4453_v35 = vld [vmem:[#allocation3 + $0xe8] sm:$0xff]  ;;  %v4455_v36 = vld [vmem:[#allocation3 + $0xf8] sm:$0xff]  ;;  %v4459_v37 = vld [vmem:[#allocation3 + $0xe0] sm:$0xff] }
  0x2b   :  { %348 = vmatpush1.msra.mxu0 %v4411_v21  ;;  %419 = vmatpush1.msra.mxu1 %v4413_v22  ;;  %v4461_v38 = vld [vmem:[#allocation3 + $0xf0] sm:$0xff]  ;;  %v4465_v39 = vld [vmem:[#allocation3 + $0xc8] sm:$0xff]  ;;  %v4467_v40 = vld [vmem:[#allocation3 + $0xd8] sm:$0xff] }
  0x2c   :  { %349 = vmatprep.subr.mxu0 %v4417_v23  ;;  %420 = vmatprep.subr.mxu1 %v4419_v24  ;;  %v4471_v41 = vld [vmem:[#allocation3 + $0xc0] sm:$0xff]  ;;  %v4473_v42 = vld [vmem:[#allocation3 + $0xd0] sm:$0xff]  ;;  %v4477_v43 = vld [vmem:[#allocation3 + $0xa8] sm:$0xff] }
  0x2d   :  { %350 = vmatpush1.msra.mxu0 %v4423_v25  ;;  %421 = vmatpush1.msra.mxu1 %v4425_v26  ;;  %8529 = vst [vmem:[#allocation12_spill] sm:$0xff] %v4473_v42  ;;  %8530 = vst [vmem:[#allocation13_spill] sm:$0xff] %v4477_v43  ;;  %v4479_v44 = vld [vmem:[#allocation3 + $0xb8] sm:$0xff]  ;;  %v4483_v45 = vld [vmem:[#allocation3 + $0xa0] sm:$0xff] }
  0x2e   :  { %351 = vmatprep.subr.mxu0 %v4429_v27  ;;  %422 = vmatprep.subr.mxu1 %v4431_v28  ;;  %8531 = vst [vmem:[#allocation14_spill] sm:$0xff] %v4479_v44  ;;  %8532 = vst [vmem:[#allocation15_spill] sm:$0xff] %v4483_v45  ;;  %v4485_v46 = vld [vmem:[#allocation3 + $0xb0] sm:$0xff]  ;;  %v4489_v47 = vld [vmem:[#allocation3 + $0x88] sm:$0xff] }
  0x2f   :  { %352 = vmatpush1.msra.mxu0 %v4435_v29  ;;  %423 = vmatpush1.msra.mxu1 %v4437_v30  ;;  %8533 = vst [vmem:[#allocation16_spill] sm:$0xff] %v4485_v46  ;;  %8534 = vst [vmem:[#allocation17_spill] sm:$0xff] %v4489_v47  ;;  %v4491_v48 = vld [vmem:[#allocation3 + $0x98] sm:$0xff]  ;;  %v4495_v49 = vld [vmem:[#allocation3 + $0x80] sm:$0xff] }
  0x30   :  { %353 = vmatprep.subr.mxu0 %v4441_v31  ;;  %424 = vmatprep.subr.mxu1 %v4443_v32  ;;  %8535 = vst [vmem:[#allocation18_spill] sm:$0xff] %v4491_v48  ;;  %8536 = vst [vmem:[#allocation19_spill] sm:$0xff] %v4495_v49  ;;  %v4497_v50 = vld [vmem:[#allocation3 + $0x90] sm:$0xff]  ;;  %v4501_v51 = vld [vmem:[#allocation3 + $0x68] sm:$0xff] }
  0x31   :  { %354 = vmatpush1.msra.mxu0 %v4447_v33  ;;  %425 = vmatpush1.msra.mxu1 %v4449_v34  ;;  %8537 = vst [vmem:[#allocation20_spill] sm:$0xff] %v4497_v50  ;;  %8538 = vst [vmem:[#allocation21_spill] sm:$0xff] %v4501_v51  ;;  %v4503_v52 = vld [vmem:[#allocation3 + $0x78] sm:$0xff]  ;;  %v4507_v53 = vld [vmem:[#allocation3 + $0x60] sm:$0xff] }
  0x32   :  { %355 = vmatprep.subr.mxu0 %v4453_v35  ;;  %426 = vmatprep.subr.mxu1 %v4455_v36  ;;  %8539 = vst [vmem:[#allocation22_spill] sm:$0xff] %v4503_v52  ;;  %8540 = vst [vmem:[#allocation23_spill] sm:$0xff] %v4507_v53  ;;  %v4509_v54 = vld [vmem:[#allocation3 + $0x70] sm:$0xff]  ;;  %v4513_v55 = vld [vmem:[#allocation3 + $0x48] sm:$0xff] }
  0x33   :  { %356 = vmatpush1.msra.mxu0 %v4459_v37  ;;  %427 = vmatpush1.msra.mxu1 %v4461_v38  ;;  %8541 = vst [vmem:[#allocation24_spill] sm:$0xff] %v4509_v54  ;;  %8542 = vst [vmem:[#allocation25_spill] sm:$0xff] %v4513_v55  ;;  %v4515_v56 = vld [vmem:[#allocation3 + $0x58] sm:$0xff]  ;;  %v4519_v57 = vld [vmem:[#allocation3 + $0x40] sm:$0xff] }
  0x34   :  { %357 = vmatprep.subr.mxu0 %v4465_v39  ;;  %428 = vmatprep.subr.mxu1 %v4467_v40  ;;  %8543 = vst [vmem:[#allocation26_spill] sm:$0xff] %v4515_v56  ;;  %8544 = vst [vmem:[#allocation27_spill] sm:$0xff] %v4519_v57  ;;  %v4521_v58 = vld [vmem:[#allocation3 + $0x50] sm:$0xff]  ;;  %v4525_v59 = vld [vmem:[#allocation3 + $0x28] sm:$0xff] }
  0x35   :  { %358 = vmatpush1.msra.mxu0 %v4471_v41  ;;  %429 = vmatpush1.msra.mxu1 %v4473_v42  ;;  %8545 = vst [vmem:[#allocation28_spill] sm:$0xff] %v4521_v58  ;;  %8546 = vst [vmem:[#allocation29_spill] sm:$0xff] %v4525_v59  ;;  %v4527_v60 = vld [vmem:[#allocation3 + $0x38] sm:$0xff]  ;;  %v4531_v61 = vld [vmem:[#allocation3 + $0x20] sm:$0xff] }
  0x36   :  { %359 = vmatprep.subr.mxu0 %v4477_v43  ;;  %430 = vmatprep.subr.mxu1 %v4479_v44  ;;  %8547 = vst [vmem:[#allocation30_spill] sm:$0xff] %v4527_v60  ;;  %8548 = vst [vmem:[#allocation31_spill] sm:$0xff] %v4531_v61  ;;  %v4533_v62 = vld [vmem:[#allocation3 + $0x30] sm:$0xff]  ;;  %v4537_v63 = vld [vmem:[#allocation3 + $0x8] sm:$0xff] }
  0x37   :  { %360 = vmatpush1.msra.mxu0 %v4483_v45  ;;  %431 = vmatpush1.msra.mxu1 %v4485_v46  ;;  %8549 = vst [vmem:[#allocation32_spill] sm:$0xff] %v4533_v62  ;;  %8550 = vst [vmem:[#allocation33_spill] sm:$0xff] %v4537_v63  ;;  %v4539_v0 = vld [vmem:[#allocation3 + $0x18] sm:$0xff]  ;;  %v4543_v2 = vld [vmem:[#allocation3] sm:$0xff] }
  0x38   :  { %361 = vmatprep.subr.mxu0 %v4489_v47  ;;  %432 = vmatprep.subr.mxu1 %v4491_v48  ;;  %8551 = vst [vmem:[#allocation34_spill] sm:$0xff] %v4539_v0  ;;  %8552 = vst [vmem:[#allocation35_spill] sm:$0xff] %v4543_v2  ;;  %v4545_v1 = vld [vmem:[#allocation3 + $0x10] sm:$0xff] }
  0x39   :  { %362 = vmatpush1.msra.mxu0 %v4495_v49  ;;  %433 = vmatpush1.msra.mxu1 %v4497_v50  ;;  %8553 = vst [vmem:[#allocation36_spill] sm:$0xff] %v4545_v1  ;;  %v4920_v50 = vld [vmem:[#allocation6 + $0x298] sm:$0xff]  ;;  %v4936_v49 = vld [vmem:[#allocation6 + $0x260] sm:$0xff] }
  0x3a   :  { %363 = vmatprep.subr.mxu0 %v4501_v51  ;;  %434 = vmatprep.subr.mxu1 %v4503_v52  ;;  %v4904_v52 = vld [vmem:[#allocation6 + $0x2d0] sm:$0xff]  ;;  %v4912_v51 = vld [vmem:[#allocation6 + $0x2a0] sm:$0xff]  ;;  %8665 = vst [vmem:[#allocation146_spill] sm:$0xff] %v4920_v50  ;;  %8670 = vst [vmem:[#allocation151_spill] sm:$0xff] %v4936_v49 }
  0x3b   :  { %364 = vmatpush1.msra.mxu0 %v4507_v53  ;;  %435 = vmatpush1.msra.mxu1 %v4509_v54  ;;  %v4636_v54 = vld [vmem:[#allocation6 + $0x198] sm:$0xff]  ;;  %v4640_v53 = vld [vmem:[#allocation6 + $0x180] sm:$0xff]  ;;  %8659 = vst [vmem:[#allocation140_spill] sm:$0xff] %v4904_v52  ;;  %8662 = vst [vmem:[#allocation143_spill] sm:$0xff] %v4912_v51 }
  0x3c   :  { %365 = vmatprep.subr.mxu0 %v4513_v55  ;;  %436 = vmatprep.subr.mxu1 %v4515_v56  ;;  %v4600_v56 = vld [vmem:[#allocation6 + $0x1c0] sm:$0xff]  ;;  %v4624_v55 = vld [vmem:[#allocation6 + $0x1b8] sm:$0xff]  ;;  %8569 = vst [vmem:[#allocation50_spill] sm:$0xff] %v4636_v54  ;;  %8570 = vst [vmem:[#allocation51_spill] sm:$0xff] %v4640_v53 }
  0x3d   :  { %366 = vmatpush1.msra.mxu0 %v4519_v57  ;;  %437 = vmatpush1.msra.mxu1 %v4521_v58  ;;  %v308_v58 = vld [vmem:[%s7834_s0] sm:$0xff]  ;;  %8561 = vst [vmem:[#allocation43_spill] sm:$0xff] %v4600_v56  ;;  %8565 = vst [vmem:[#allocation46_spill] sm:$0xff] %v4624_v55 }
  0x3e   :  { %367 = vmatprep.subr.mxu0 %v4525_v59  ;;  %438 = vmatprep.subr.mxu1 %v4527_v60  ;;  %v8554_v60 = vmov 0.0   ;;  %v4596_v59 = vld [vmem:[#allocation6 + $0x1c8] sm:$0xff]  ;;  %v4598_v57 = vld [vmem:[#allocation6 + $0x1d8] sm:$0xff] }
  0x3f   :  { %368 = vmatpush1.msra.mxu0 %v4531_v61  ;;  %439 = vmatpush1.msra.mxu1 %v4533_v62  ;;  %v4586_v62 = vld [vmem:[#allocation6 + $0x1f0] sm:$0xff]  ;;  %v4591_v61 = vld [vmem:[%s7834_s0 + $0x28] sm:$0xff]  ;;  %8559 = vst [vmem:[#allocation41_spill] sm:$0xff] %v4596_v59  ;;  %8560 = vst [vmem:[#allocation42_spill] sm:$0xff] %v4598_v57 }
  0x40   :  { %369 = vmatprep.subr.mxu0 %v4537_v63  ;;  %440 = vmatprep.subr.mxu1 %v4539_v0  ;;  %v7853_v63 = vmov 1   ;;  %v4564_v0 = vld [vmem:[%s7834_s0 + $0x10] sm:$0xff]  ;;  %8558 = vst [vmem:[#allocation40_spill] sm:$0xff] %v4586_v62 }
  0x41   :  { %370 = vmatpush1.msra.mxu0 %v4543_v2  ;;  %441 = vmatpush1.msra.mxu1 %v4545_v1  ;;  %v4570_v1 = vld [vmem:[%s7834_s0 + $0x18] sm:$0xff]  ;;  %v4582_v2 = vld [vmem:[#allocation6 + $0x1e0] sm:$0xff] }
  0x42   :  { %404 = vmatmul.mubr.f32.vlgmr.msra.gmra.mxu0 %v8554_v60  ;;  %475 = vmatmul.mubr.f32.vlgmr.msra.gmra.mxu1 %v8554_v60  ;;  %8557 = vst [vmem:[#allocation39_spill] sm:$0xff] %v4582_v2 }
  0x43   :  { %311 = vperm.xlu0 %3388, %v308_v58   ;;  %606 = vmatprep.mubr.f32.mxu0 %v8554_v60 }
  0x44   :  { %677 = vmatprep.mubr.f32.mxu1 %v8554_v60  ;;  %v4576_v60 = vld [vmem:[%s7834_s0 + $0x20] sm:$0xff] }
  0x47   :  { %3389 = vset.pattern.permute.xlu0 %v7853_v63  ;;  %v4580_v63 = vld [vmem:[#allocation6 + $0x1f8] sm:$0xff] }
  0x48   :  { %482 = vperm.xlu0 %3389, %v308_v58   ;;  %v4578_v58 = vld [vmem:[#allocation6 + $0x1e8] sm:$0xff]  ;;  %8556 = vst [vmem:[#allocation38_spill] sm:$0xff] %v4580_v63  ;;  %613 = vmatprep.subr.mxu1 %v4580_v63 }
  0x49   :  { %8555 = vst [vmem:[#allocation37_spill] sm:$0xff] %v4578_v58  ;;  %542 = vmatprep.subr.mxu0 %v4578_v58  ;;  %614 = vmatpush1.msra.mxu1 %v4586_v62  ;;  %v4604_v58 = vld [vmem:[#allocation6 + $0x1d0] sm:$0xff] }
  0x4a   :  { %543 = vmatpush1.msra.mxu0 %v4582_v2  ;;  %8562 = vst [vmem:[#allocation44_spill] sm:$0xff] %v4604_v58  ;;  %v4609_v63 = vld [vmem:[%s7834_s0 + $0x30] sm:$0xff]  ;;  %615 = vmatprep.subr.mxu1 %v4598_v57  ;;  %v4618_v62 = vld [vmem:[%s7834_s0 + $0x38] sm:$0xff] }
  0x4b   :  { %544 = vmatprep.subr.mxu0 %v4596_v59  ;;  %616 = vmatpush1.msra.mxu1 %v4604_v58  ;;  %v8563_v59 = vmov 0   ;;  %v4622_v2 = vld [vmem:[#allocation6 + $0x1a8] sm:$0xff]  ;;  %v4628_v58 = vld [vmem:[#allocation6 + $0x1a0] sm:$0xff] }
  0x4c   :  { %1237 = vperm.xlu0 %3389, %v4564_v0   ;;  %545 = vmatpush1.msra.mxu0 %v4600_v56  ;;  %8564 = vst [vmem:[#allocation45_spill] sm:$0xff] %v4622_v2  ;;  %8566 = vst [vmem:[#allocation47_spill] sm:$0xff] %v4628_v58  ;;  %v4630_v56 = vld [vmem:[#allocation6 + $0x1b0] sm:$0xff]  ;;  %v4634_v57 = vld [vmem:[#allocation6 + $0x188] sm:$0xff] }
  0x4d   :  { %546 = vmatprep.subr.mxu0 %v4622_v2  ;;  %617 = vmatprep.subr.mxu1 %v4624_v55  ;;  %8567 = vst [vmem:[#allocation48_spill] sm:$0xff] %v4630_v56  ;;  %8568 = vst [vmem:[#allocation49_spill] sm:$0xff] %v4634_v57  ;;  %v4642_v2 = vld [vmem:[#allocation6 + $0x190] sm:$0xff]  ;;  %v4646_v55 = vld [vmem:[#allocation6 + $0x168] sm:$0xff] }
  0x4e   :  { %547 = vmatpush1.msra.mxu0 %v4628_v58  ;;  %618 = vmatpush1.msra.mxu1 %v4630_v56  ;;  %8571 = vst [vmem:[#allocation52_spill] sm:$0xff] %v4642_v2  ;;  %8572 = vst [vmem:[#allocation53_spill] sm:$0xff] %v4646_v55  ;;  %v4648_v58 = vld [vmem:[#allocation6 + $0x178] sm:$0xff]  ;;  %v4652_v56 = vld [vmem:[#allocation6 + $0x160] sm:$0xff] }
  0x4f   :  { %548 = vmatprep.subr.mxu0 %v4634_v57  ;;  %619 = vmatprep.subr.mxu1 %v4636_v54  ;;  %8573 = vst [vmem:[#allocation54_spill] sm:$0xff] %v4648_v58  ;;  %8574 = vst [vmem:[#allocation55_spill] sm:$0xff] %v4652_v56  ;;  %v4654_v57 = vld [vmem:[#allocation6 + $0x170] sm:$0xff]  ;;  %v4658_v54 = vld [vmem:[#allocation6 + $0x148] sm:$0xff] }
  0x50   :  { %1604 = vperm.xlu0 %3389, %v4570_v1   ;;  %549 = vmatpush1.msra.mxu0 %v4640_v53  ;;  %8575 = vst [vmem:[#allocation56_spill] sm:$0xff] %v4654_v57  ;;  %8576 = vst [vmem:[#allocation57_spill] sm:$0xff] %v4658_v54  ;;  %v4660_v53 = vld [vmem:[#allocation6 + $0x158] sm:$0xff] }
  0x51   :  { %620 = vmatpush1.msra.mxu1 %v4642_v2  ;;  %550 = vmatprep.subr.mxu0 %v4646_v55  ;;  %8577 = vst [vmem:[#allocation58_spill] sm:$0xff] %v4660_v53  ;;  %v4664_v2 = vld [vmem:[#allocation6 + $0x140] sm:$0xff]  ;;  %v4666_v55 = vld [vmem:[#allocation6 + $0x150] sm:$0xff] }
  0x52   :  { %621 = vmatprep.subr.mxu1 %v4648_v58  ;;  %551 = vmatpush1.msra.mxu0 %v4652_v56  ;;  %8578 = vst [vmem:[#allocation59_spill] sm:$0xff] %v4664_v2  ;;  %8579 = vst [vmem:[#allocation60_spill] sm:$0xff] %v4666_v55  ;;  %v4670_v58 = vld [vmem:[#allocation6 + $0x128] sm:$0xff]  ;;  %v4672_v56 = vld [vmem:[#allocation6 + $0x138] sm:$0xff] }
  0x53   :  { %622 = vmatpush1.msra.mxu1 %v4654_v57  ;;  %552 = vmatprep.subr.mxu0 %v4658_v54  ;;  %8580 = vst [vmem:[#allocation61_spill] sm:$0xff] %v4670_v58  ;;  %8581 = vst [vmem:[#allocation62_spill] sm:$0xff] %v4672_v56  ;;  %v4676_v57 = vld [vmem:[#allocation6 + $0x120] sm:$0xff]  ;;  %v4678_v54 = vld [vmem:[#allocation6 + $0x130] sm:$0xff] }
  0x54   :  { %1971 = vperm.xlu0 %3389, %v4576_v60   ;;  %623 = vmatprep.subr.mxu1 %v4660_v53  ;;  %8582 = vst [vmem:[#allocation63_spill] sm:$0xff] %v4676_v57  ;;  %8583 = vst [vmem:[#allocation64_spill] sm:$0xff] %v4678_v54  ;;  %v4682_v53 = vld [vmem:[#allocation6 + $0x108] sm:$0xff] }
  0x55   :  { %553 = vmatpush1.msra.mxu0 %v4664_v2  ;;  %624 = vmatpush1.msra.mxu1 %v4666_v55  ;;  %8584 = vst [vmem:[#allocation65_spill] sm:$0xff] %v4682_v53  ;;  %v4684_v2 = vld [vmem:[#allocation6 + $0x118] sm:$0xff]  ;;  %v4688_v55 = vld [vmem:[#allocation6 + $0x100] sm:$0xff] }
  0x56   :  { %554 = vmatprep.subr.mxu0 %v4670_v58  ;;  %625 = vmatprep.subr.mxu1 %v4672_v56  ;;  %8585 = vst [vmem:[#allocation66_spill] sm:$0xff] %v4684_v2  ;;  %8586 = vst [vmem:[#allocation67_spill] sm:$0xff] %v4688_v55  ;;  %v4690_v58 = vld [vmem:[#allocation6 + $0x110] sm:$0xff]  ;;  %v4694_v56 = vld [vmem:[#allocation6 + $0xe8] sm:$0xff] }
  0x57   :  { %555 = vmatpush1.msra.mxu0 %v4676_v57  ;;  %626 = vmatpush1.msra.mxu1 %v4678_v54  ;;  %8587 = vst [vmem:[#allocation68_spill] sm:$0xff] %v4690_v58  ;;  %8588 = vst [vmem:[#allocation69_spill] sm:$0xff] %v4694_v56  ;;  %v4696_v57 = vld [vmem:[#allocation6 + $0xf8] sm:$0xff]  ;;  %v4700_v54 = vld [vmem:[#allocation6 + $0xe0] sm:$0xff] }
  0x58   :  { %2338 = vperm.xlu0 %3389, %v4591_v61   ;;  %556 = vmatprep.subr.mxu0 %v4682_v53  ;;  %8589 = vst [vmem:[#allocation70_spill] sm:$0xff] %v4696_v57  ;;  %8590 = vst [vmem:[#allocation71_spill] sm:$0xff] %v4700_v54  ;;  %v4702_v53 = vld [vmem:[#allocation6 + $0xf0] sm:$0xff] }
  0x59   :  { %627 = vmatprep.subr.mxu1 %v4684_v2  ;;  %557 = vmatpush1.msra.mxu0 %v4688_v55  ;;  %8591 = vst [vmem:[#allocation72_spill] sm:$0xff] %v4702_v53  ;;  %v4706_v2 = vld [vmem:[#allocation6 + $0xc8] sm:$0xff]  ;;  %v4708_v55 = vld [vmem:[#allocation6 + $0xd8] sm:$0xff] }
  0x5a   :  { %628 = vmatpush1.msra.mxu1 %v4690_v58  ;;  %558 = vmatprep.subr.mxu0 %v4694_v56  ;;  %8592 = vst [vmem:[#allocation73_spill] sm:$0xff] %v4706_v2  ;;  %8593 = vst [vmem:[#allocation74_spill] sm:$0xff] %v4708_v55  ;;  %v4712_v58 = vld [vmem:[#allocation6 + $0xc0] sm:$0xff]  ;;  %v4714_v56 = vld [vmem:[#allocation6 + $0xd0] sm:$0xff] }
  0x5b   :  { %629 = vmatprep.subr.mxu1 %v4696_v57  ;;  %559 = vmatpush1.msra.mxu0 %v4700_v54  ;;  %8594 = vst [vmem:[#allocation75_spill] sm:$0xff] %v4712_v58  ;;  %8595 = vst [vmem:[#allocation76_spill] sm:$0xff] %v4714_v56  ;;  %v4718_v57 = vld [vmem:[#allocation6 + $0xa8] sm:$0xff]  ;;  %v4720_v54 = vld [vmem:[#allocation6 + $0xb8] sm:$0xff] }
  0x5c   :  { %2705 = vperm.xlu0 %3389, %v4609_v63   ;;  %630 = vmatpush1.msra.mxu1 %v4702_v53  ;;  %8596 = vst [vmem:[#allocation77_spill] sm:$0xff] %v4718_v57  ;;  %8597 = vst [vmem:[#allocation78_spill] sm:$0xff] %v4720_v54  ;;  %v4724_v53 = vld [vmem:[#allocation6 + $0xa0] sm:$0xff] }
  0x5d   :  { %560 = vmatprep.subr.mxu0 %v4706_v2  ;;  %631 = vmatprep.subr.mxu1 %v4708_v55  ;;  %8598 = vst [vmem:[#allocation79_spill] sm:$0xff] %v4724_v53  ;;  %v4726_v2 = vld [vmem:[#allocation6 + $0xb0] sm:$0xff]  ;;  %v4730_v55 = vld [vmem:[#allocation6 + $0x88] sm:$0xff] }
  0x5e   :  { %561 = vmatpush1.msra.mxu0 %v4712_v58  ;;  %632 = vmatpush1.msra.mxu1 %v4714_v56  ;;  %8599 = vst [vmem:[#allocation80_spill] sm:$0xff] %v4726_v2  ;;  %8600 = vst [vmem:[#allocation81_spill] sm:$0xff] %v4730_v55  ;;  %v4732_v58 = vld [vmem:[#allocation6 + $0x98] sm:$0xff]  ;;  %v4736_v56 = vld [vmem:[#allocation6 + $0x80] sm:$0xff] }
  0x5f   :  { %562 = vmatprep.subr.mxu0 %v4718_v57  ;;  %633 = vmatprep.subr.mxu1 %v4720_v54  ;;  %8601 = vst [vmem:[#allocation82_spill] sm:$0xff] %v4732_v58  ;;  %8602 = vst [vmem:[#allocation83_spill] sm:$0xff] %v4736_v56  ;;  %v4738_v57 = vld [vmem:[#allocation6 + $0x90] sm:$0xff]  ;;  %v4742_v54 = vld [vmem:[#allocation6 + $0x68] sm:$0xff] }
  0x60   :  { %3072 = vperm.xlu0 %3389, %v4618_v62   ;;  %563 = vmatpush1.msra.mxu0 %v4724_v53  ;;  %8603 = vst [vmem:[#allocation84_spill] sm:$0xff] %v4738_v57  ;;  %8604 = vst [vmem:[#allocation85_spill] sm:$0xff] %v4742_v54  ;;  %v4744_v53 = vld [vmem:[#allocation6 + $0x78] sm:$0xff] }
  0x61   :  { %634 = vmatpush1.msra.mxu1 %v4726_v2  ;;  %564 = vmatprep.subr.mxu0 %v4730_v55  ;;  %8605 = vst [vmem:[#allocation86_spill] sm:$0xff] %v4744_v53  ;;  %v4748_v2 = vld [vmem:[#allocation6 + $0x60] sm:$0xff]  ;;  %v4750_v55 = vld [vmem:[#allocation6 + $0x70] sm:$0xff] }
  0x62   :  { %635 = vmatprep.subr.mxu1 %v4732_v58  ;;  %565 = vmatpush1.msra.mxu0 %v4736_v56  ;;  %8606 = vst [vmem:[#allocation87_spill] sm:$0xff] %v4748_v2  ;;  %8607 = vst [vmem:[#allocation88_spill] sm:$0xff] %v4750_v55  ;;  %v4754_v58 = vld [vmem:[#allocation6 + $0x48] sm:$0xff]  ;;  %v4756_v56 = vld [vmem:[#allocation6 + $0x58] sm:$0xff] }
  0x63   :  { %636 = vmatpush1.msra.mxu1 %v4738_v57  ;;  %566 = vmatprep.subr.mxu0 %v4742_v54  ;;  %8608 = vst [vmem:[#allocation89_spill] sm:$0xff] %v4754_v58  ;;  %8609 = vst [vmem:[#allocation90_spill] sm:$0xff] %v4756_v56  ;;  %v4760_v57 = vld [vmem:[#allocation6 + $0x40] sm:$0xff]  ;;  %v4762_v54 = vld [vmem:[#allocation6 + $0x50] sm:$0xff] }
  0x64   :  { %3393 = vset.pattern.permute.xlu0 %v8563_v59  ;;  %637 = vmatprep.subr.mxu1 %v4744_v53  ;;  %8610 = vst [vmem:[#allocation91_spill] sm:$0xff] %v4760_v57  ;;  %8611 = vst [vmem:[#allocation92_spill] sm:$0xff] %v4762_v54  ;;  %v4766_v53 = vld [vmem:[#allocation6 + $0x28] sm:$0xff] }
  0x65   :  { %567 = vmatpush1.msra.mxu0 %v4748_v2  ;;  %638 = vmatpush1.msra.mxu1 %v4750_v55  ;;  %8612 = vst [vmem:[#allocation93_spill] sm:$0xff] %v4766_v53  ;;  %v4768_v2 = vld [vmem:[#allocation6 + $0x38] sm:$0xff]  ;;  %v4772_v55 = vld [vmem:[#allocation6 + $0x20] sm:$0xff] }
  0x66   :  { %568 = vmatprep.subr.mxu0 %v4754_v58  ;;  %639 = vmatprep.subr.mxu1 %v4756_v56  ;;  %8613 = vst [vmem:[#allocation94_spill] sm:$0xff] %v4768_v2  ;;  %8614 = vst [vmem:[#allocation95_spill] sm:$0xff] %v4772_v55  ;;  %v4774_v58 = vld [vmem:[#allocation6 + $0x30] sm:$0xff]  ;;  %v4778_v56 = vld [vmem:[#allocation6 + $0x8] sm:$0xff] }
  0x67   :  { %569 = vmatpush1.msra.mxu0 %v4760_v57  ;;  %640 = vmatpush1.msra.mxu1 %v4762_v54  ;;  %8615 = vst [vmem:[#allocation96_spill] sm:$0xff] %v4774_v58  ;;  %8616 = vst [vmem:[#allocation97_spill] sm:$0xff] %v4778_v56  ;;  %v4780_v57 = vld [vmem:[#allocation6 + $0x18] sm:$0xff]  ;;  %v4784_v54 = vld [vmem:[#allocation6] sm:$0xff] }
  0x68   :  { %570 = vmatprep.subr.mxu0 %v4766_v53  ;;  %641 = vmatprep.subr.mxu1 %v4768_v2  ;;  %8617 = vst [vmem:[#allocation98_spill] sm:$0xff] %v4780_v57  ;;  %8618 = vst [vmem:[#allocation99_spill] sm:$0xff] %v4784_v54  ;;  %v4786_v53 = vld [vmem:[#allocation6 + $0x10] sm:$0xff]  ;;  %v4790_v2 = vld [vmem:[#allocation6 + $0x3e8] sm:$0xff] }
  0x69   :  { %571 = vmatpush1.msra.mxu0 %v4772_v55  ;;  %642 = vmatpush1.msra.mxu1 %v4774_v58  ;;  %8619 = vst [vmem:[#allocation100_spill] sm:$0xff] %v4786_v53  ;;  %8620 = vst [vmem:[#allocation101_spill] sm:$0xff] %v4790_v2  ;;  %v4792_v55 = vld [vmem:[#allocation6 + $0x3f8] sm:$0xff]  ;;  %v4796_v58 = vld [vmem:[#allocation6 + $0x3e0] sm:$0xff] }
  0x6a   :  { %572 = vmatprep.subr.mxu0 %v4778_v56  ;;  %643 = vmatprep.subr.mxu1 %v4780_v57  ;;  %8621 = vst [vmem:[#allocation102_spill] sm:$0xff] %v4792_v55  ;;  %8622 = vst [vmem:[#allocation103_spill] sm:$0xff] %v4796_v58  ;;  %v4798_v56 = vld [vmem:[#allocation6 + $0x3f0] sm:$0xff]  ;;  %v4802_v57 = vld [vmem:[#allocation6 + $0x3c8] sm:$0xff] }
  0x6b   :  { %573 = vmatpush1.msra.mxu0 %v4784_v54  ;;  %644 = vmatpush1.msra.mxu1 %v4786_v53  ;;  %8623 = vst [vmem:[#allocation104_spill] sm:$0xff] %v4798_v56  ;;  %8624 = vst [vmem:[#allocation105_spill] sm:$0xff] %v4802_v57  ;;  %v4804_v54 = vld [vmem:[#allocation6 + $0x3d8] sm:$0xff]  ;;  %v4808_v53 = vld [vmem:[#allocation6 + $0x3c0] sm:$0xff] }
  0x6c   :  { %574 = vmatprep.subr.mxu0 %v4790_v2  ;;  %645 = vmatprep.subr.mxu1 %v4792_v55  ;;  %8625 = vst [vmem:[#allocation106_spill] sm:$0xff] %v4804_v54  ;;  %8626 = vst [vmem:[#allocation107_spill] sm:$0xff] %v4808_v53  ;;  %v4810_v2 = vld [vmem:[#allocation6 + $0x3d0] sm:$0xff]  ;;  %v4814_v55 = vld [vmem:[#allocation6 + $0x3a8] sm:$0xff] }
  0x6d   :  { %575 = vmatpush2.msra.mxu0 %v4796_v58  ;;  %646 = vmatpush2.msra.mxu1 %v4798_v56  ;;  %8627 = vst [vmem:[#allocation108_spill] sm:$0xff] %v4810_v2  ;;  %8628 = vst [vmem:[#allocation109_spill] sm:$0xff] %v4814_v55  ;;  %v4816_v58 = vld [vmem:[#allocation6 + $0x3b8] sm:$0xff]  ;;  %v4820_v56 = vld [vmem:[#allocation6 + $0x3a0] sm:$0xff] }
  0x6e   :  { %576 = vmatprep.subr.mxu0 %v4802_v57  ;;  %647 = vmatprep.subr.mxu1 %v4804_v54  ;;  %8629 = vst [vmem:[#allocation110_spill] sm:$0xff] %v4816_v58  ;;  %8630 = vst [vmem:[#allocation111_spill] sm:$0xff] %v4820_v56  ;;  %v4822_v57 = vld [vmem:[#allocation6 + $0x3b0] sm:$0xff]  ;;  %v4826_v54 = vld [vmem:[#allocation6 + $0x388] sm:$0xff] }
  0x6f   :  { %577 = vmatpush2.msra.mxu0 %v4808_v53  ;;  %648 = vmatpush2.msra.mxu1 %v4810_v2  ;;  %8631 = vst [vmem:[#allocation112_spill] sm:$0xff] %v4822_v57  ;;  %8632 = vst [vmem:[#allocation113_spill] sm:$0xff] %v4826_v54  ;;  %v4828_v53 = vld [vmem:[#allocation6 + $0x398] sm:$0xff]  ;;  %v4832_v2 = vld [vmem:[#allocation6 + $0x380] sm:$0xff] }
  0x70   :  { %578 = vmatprep.subr.mxu0 %v4814_v55  ;;  %649 = vmatprep.subr.mxu1 %v4816_v58  ;;  %8633 = vst [vmem:[#allocation114_spill] sm:$0xff] %v4828_v53  ;;  %8634 = vst [vmem:[#allocation115_spill] sm:$0xff] %v4832_v2  ;;  %v4834_v55 = vld [vmem:[#allocation6 + $0x390] sm:$0xff]  ;;  %v4838_v58 = vld [vmem:[#allocation6 + $0x368] sm:$0xff] }
  0x71   :  { %579 = vmatpush2.msra.mxu0 %v4820_v56  ;;  %650 = vmatpush2.msra.mxu1 %v4822_v57  ;;  %8635 = vst [vmem:[#allocation116_spill] sm:$0xff] %v4834_v55  ;;  %8636 = vst [vmem:[#allocation117_spill] sm:$0xff] %v4838_v58  ;;  %v4840_v56 = vld [vmem:[#allocation6 + $0x378] sm:$0xff]  ;;  %v4844_v57 = vld [vmem:[#allocation6 + $0x360] sm:$0xff] }
  0x72   :  { %580 = vmatprep.subr.mxu0 %v4826_v54  ;;  %651 = vmatprep.subr.mxu1 %v4828_v53  ;;  %8637 = vst [vmem:[#allocation118_spill] sm:$0xff] %v4840_v56  ;;  %8638 = vst [vmem:[#allocation119_spill] sm:$0xff] %v4844_v57  ;;  %v4846_v54 = vld [vmem:[#allocation6 + $0x370] sm:$0xff]  ;;  %v4850_v53 = vld [vmem:[#allocation6 + $0x348] sm:$0xff] }
  0x73   :  { %581 = vmatpush2.msra.mxu0 %v4832_v2  ;;  %652 = vmatpush2.msra.mxu1 %v4834_v55  ;;  %8639 = vst [vmem:[#allocation120_spill] sm:$0xff] %v4846_v54  ;;  %8640 = vst [vmem:[#allocation121_spill] sm:$0xff] %v4850_v53  ;;  %v4852_v2 = vld [vmem:[#allocation6 + $0x358] sm:$0xff]  ;;  %v4856_v55 = vld [vmem:[#allocation6 + $0x340] sm:$0xff] }
  0x74   :  { %582 = vmatprep.subr.mxu0 %v4838_v58  ;;  %653 = vmatprep.subr.mxu1 %v4840_v56  ;;  %8641 = vst [vmem:[#allocation122_spill] sm:$0xff] %v4852_v2  ;;  %8642 = vst [vmem:[#allocation123_spill] sm:$0xff] %v4856_v55  ;;  %v4858_v58 = vld [vmem:[#allocation6 + $0x350] sm:$0xff]  ;;  %v4862_v56 = vld [vmem:[#allocation6 + $0x328] sm:$0xff] }
  0x75   :  { %583 = vmatpush2.msra.mxu0 %v4844_v57  ;;  %654 = vmatpush2.msra.mxu1 %v4846_v54  ;;  %8643 = vst [vmem:[#allocation124_spill] sm:$0xff] %v4858_v58  ;;  %8644 = vst [vmem:[#allocation125_spill] sm:$0xff] %v4862_v56  ;;  %v4864_v57 = vld [vmem:[#allocation6 + $0x338] sm:$0xff]  ;;  %v4868_v54 = vld [vmem:[#allocation6 + $0x320] sm:$0xff] }
  0x76   :  { %584 = vmatprep.subr.mxu0 %v4850_v53  ;;  %655 = vmatprep.subr.mxu1 %v4852_v2  ;;  %8645 = vst [vmem:[#allocation126_spill] sm:$0xff] %v4864_v57  ;;  %8646 = vst [vmem:[#allocation127_spill] sm:$0xff] %v4868_v54  ;;  %v4870_v53 = vld [vmem:[#allocation6 + $0x330] sm:$0xff]  ;;  %v4874_v2 = vld [vmem:[#allocation6 + $0x308] sm:$0xff] }
  0x77   :  { %585 = vmatpush2.msra.mxu0 %v4856_v55  ;;  %656 = vmatpush2.msra.mxu1 %v4858_v58  ;;  %8647 = vst [vmem:[#allocation128_spill] sm:$0xff] %v4870_v53  ;;  %8648 = vst [vmem:[#allocation129_spill] sm:$0xff] %v4874_v2  ;;  %v4876_v55 = vld [vmem:[#allocation6 + $0x318] sm:$0xff]  ;;  %v4880_v58 = vld [vmem:[#allocation6 + $0x300] sm:$0xff] }
  0x78   :  { %586 = vmatprep.subr.mxu0 %v4862_v56  ;;  %657 = vmatprep.subr.mxu1 %v4864_v57  ;;  %8649 = vst [vmem:[#allocation130_spill] sm:$0xff] %v4876_v55  ;;  %8650 = vst [vmem:[#allocation131_spill] sm:$0xff] %v4880_v58  ;;  %v4882_v56 = vld [vmem:[#allocation6 + $0x310] sm:$0xff]  ;;  %v4886_v57 = vld [vmem:[#allocation6 + $0x2e8] sm:$0xff] }
  0x79   :  { %587 = vmatpush2.msra.mxu0 %v4868_v54  ;;  %658 = vmatpush2.msra.mxu1 %v4870_v53  ;;  %8651 = vst [vmem:[#allocation132_spill] sm:$0xff] %v4882_v56  ;;  %8652 = vst [vmem:[#allocation133_spill] sm:$0xff] %v4886_v57  ;;  %v4888_v54 = vld [vmem:[#allocation6 + $0x2f8] sm:$0xff]  ;;  %v4892_v53 = vld [vmem:[#allocation6 + $0x2e0] sm:$0xff] }
  0x7a   :  { %588 = vmatprep.subr.mxu0 %v4874_v2  ;;  %659 = vmatprep.subr.mxu1 %v4876_v55  ;;  %8653 = vst [vmem:[#allocation134_spill] sm:$0xff] %v4888_v54  ;;  %8654 = vst [vmem:[#allocation135_spill] sm:$0xff] %v4892_v53  ;;  %v4894_v2 = vld [vmem:[#allocation6 + $0x2f0] sm:$0xff]  ;;  %v4896_v55 = vld [vmem:[#allocation6 + $0x2c8] sm:$0xff] }
  0x7b   :  { %589 = vmatpush2.msra.mxu0 %v4880_v58  ;;  %660 = vmatpush2.msra.mxu1 %v4882_v56  ;;  %8655 = vst [vmem:[#allocation136_spill] sm:$0xff] %v4894_v2  ;;  %8656 = vst [vmem:[#allocation137_spill] sm:$0xff] %v4896_v55  ;;  %v4900_v58 = vld [vmem:[#allocation6 + $0x2d8] sm:$0xff]  ;;  %v4902_v56 = vld [vmem:[#allocation6 + $0x2c0] sm:$0xff] }
  0x7c   :  { %590 = vmatprep.subr.mxu0 %v4886_v57  ;;  %661 = vmatprep.subr.mxu1 %v4888_v54  ;;  %8657 = vst [vmem:[#allocation138_spill] sm:$0xff] %v4900_v58  ;;  %8658 = vst [vmem:[#allocation139_spill] sm:$0xff] %v4902_v56  ;;  %v4908_v54 = vld [vmem:[#allocation6 + $0x2a8] sm:$0xff]  ;;  %v4910_v57 = vld [vmem:[#allocation6 + $0x2b8] sm:$0xff] }
  0x7d   :  { %591 = vmatpush2.msra.mxu0 %v4892_v53  ;;  %662 = vmatpush2.msra.mxu1 %v4894_v2  ;;  %8660 = vst [vmem:[#allocation141_spill] sm:$0xff] %v4908_v54  ;;  %8661 = vst [vmem:[#allocation142_spill] sm:$0xff] %v4910_v57  ;;  %v4916_v2 = vld [vmem:[#allocation6 + $0x2b0] sm:$0xff]  ;;  %v4918_v53 = vld [vmem:[#allocation6 + $0x288] sm:$0xff] }
  0x7e   :  { %592 = vmatprep.subr.mxu0 %v4896_v55  ;;  %663 = vmatprep.subr.mxu1 %v4900_v58  ;;  %8663 = vst [vmem:[#allocation144_spill] sm:$0xff] %v4916_v2  ;;  %8664 = vst [vmem:[#allocation145_spill] sm:$0xff] %v4918_v53  ;;  %v4924_v58 = vld [vmem:[#allocation6 + $0x280] sm:$0xff]  ;;  %v4926_v55 = vld [vmem:[#allocation6 + $0x290] sm:$0xff] }
  0x7f   :  { %593 = vmatpush2.msra.mxu0 %v4902_v56  ;;  %664 = vmatpush2.msra.mxu1 %v4904_v52  ;;  %8666 = vst [vmem:[#allocation147_spill] sm:$0xff] %v4924_v58  ;;  %8667 = vst [vmem:[#allocation148_spill] sm:$0xff] %v4926_v55  ;;  %v4930_v56 = vld [vmem:[#allocation6 + $0x268] sm:$0xff]  ;;  %v4932_v52 = vld [vmem:[#allocation6 + $0x278] sm:$0xff] }
  0x80   :  { %594 = vmatprep.subr.mxu0 %v4908_v54  ;;  %665 = vmatprep.subr.mxu1 %v4910_v57  ;;  %8668 = vst [vmem:[#allocation149_spill] sm:$0xff] %v4930_v56  ;;  %8669 = vst [vmem:[#allocation150_spill] sm:$0xff] %v4932_v52  ;;  %v4938_v54 = vld [vmem:[#allocation6 + $0x270] sm:$0xff]  ;;  %v4942_v57 = vld [vmem:[#allocation6 + $0x248] sm:$0xff] }
  0x81   :  { %595 = vmatpush2.msra.mxu0 %v4912_v51  ;;  %666 = vmatpush2.msra.mxu1 %v4916_v2  ;;  %8671 = vst [vmem:[#allocation152_spill] sm:$0xff] %v4938_v54  ;;  %8672 = vst [vmem:[#allocation153_spill] sm:$0xff] %v4942_v57  ;;  %v4944_v51 = vld [vmem:[#allocation6 + $0x258] sm:$0xff]  ;;  %v4948_v2 = vld [vmem:[#allocation6 + $0x240] sm:$0xff] }
  0x82   :  { %596 = vmatprep.subr.mxu0 %v4918_v53  ;;  %667 = vmatprep.subr.mxu1 %v4920_v50  ;;  %8673 = vst [vmem:[#allocation154_spill] sm:$0xff] %v4944_v51  ;;  %8674 = vst [vmem:[#allocation155_spill] sm:$0xff] %v4948_v2  ;;  %v4950_v53 = vld [vmem:[#allocation6 + $0x250] sm:$0xff]  ;;  %v4954_v50 = vld [vmem:[#allocation6 + $0x228] sm:$0xff] }
  0x83   :  { %597 = vmatpush2.msra.mxu0 %v4924_v58  ;;  %668 = vmatpush2.msra.mxu1 %v4926_v55  ;;  %8675 = vst [vmem:[#allocation156_spill] sm:$0xff] %v4950_v53  ;;  %8676 = vst [vmem:[#allocation157_spill] sm:$0xff] %v4954_v50  ;;  %v4956_v58 = vld [vmem:[#allocation6 + $0x238] sm:$0xff]  ;;  %v4960_v55 = vld [vmem:[#allocation6 + $0x220] sm:$0xff] }
  0x84   :  { %598 = vmatprep.subr.mxu0 %v4930_v56  ;;  %669 = vmatprep.subr.mxu1 %v4932_v52  ;;  %8677 = vst [vmem:[#allocation158_spill] sm:$0xff] %v4956_v58  ;;  %8678 = vst [vmem:[#allocation159_spill] sm:$0xff] %v4960_v55  ;;  %v4962_v56 = vld [vmem:[#allocation6 + $0x230] sm:$0xff]  ;;  %v4966_v52 = vld [vmem:[#allocation6 + $0x208] sm:$0xff] }
  0x85   :  { %599 = vmatpush2.msra.mxu0 %v4936_v49  ;;  %670 = vmatpush2.msra.mxu1 %v4938_v54  ;;  %8679 = vst [vmem:[#allocation160_spill] sm:$0xff] %v4962_v56  ;;  %8680 = vst [vmem:[#allocation161_spill] sm:$0xff] %v4966_v52  ;;  %v4968_v49 = vld [vmem:[#allocation6 + $0x218] sm:$0xff]  ;;  %v4972_v54 = vld [vmem:[#allocation6 + $0x200] sm:$0xff] }
  0x86   :  { %600 = vmatprep.subr.mxu0 %v4942_v57  ;;  %671 = vmatprep.subr.mxu1 %v4944_v51  ;;  %8681 = vst [vmem:[#allocation162_spill] sm:$0xff] %v4968_v49  ;;  %8682 = vst [vmem:[#allocation163_spill] sm:$0xff] %v4972_v54  ;;  %v4974_v57 = vld [vmem:[#allocation6 + $0x210] sm:$0xff] }
  0x87   :  { %601 = vmatpush2.msra.mxu0 %v4948_v2  ;;  %672 = vmatpush2.msra.mxu1 %v4950_v53  ;;  %8683 = vst [vmem:[#allocation164_spill] sm:$0xff] %v4974_v57 }
  0x88   :  { %602 = vmatprep.subr.mxu0 %v4954_v50  ;;  %673 = vmatprep.subr.mxu1 %v4956_v58  ;;  %v3323_v58 = vld [vmem:[%s7834_s0 + $0x8] sm:$0xff] }
  0x89   :  { %603 = vmatpush2.msra.mxu0 %v4960_v55  ;;  %674 = vmatpush2.msra.mxu1 %v4962_v56  ;;  %v8684_v55 = vmov 1  }
  0x8a   :  { %604 = vmatprep.subr.mxu0 %v4966_v52  ;;  %675 = vmatprep.subr.mxu1 %v4968_v49  ;;  %v7988_v49 = vlaneseq  ;;  %v255_v52 = vld [vmem:[%s7837_s3] sm:$0xf] }
  0x8b   :  { %605 = vmatpush2.msra.mxu0 %v4972_v54  ;;  %676 = vmatpush2.msra.mxu1 %v4974_v57 }
  0x8c   :  { %727 = vmatprep.subr.mxu0 %v4361_v3  ;;  %798 = vmatprep.subr.mxu1 %v4363_v4  ;;  %v258_v57 = vshrl.u32 %v7988_v49, 7  ;;  %v252_v4 = vld [vmem:[%s7835_s1] ss:$2 sm:$0xf] }
  0x8d   :  { %720 = vperm.xlu1 %3390, %v3323_v58  }
  0x8e   :  { %v4993_v3 = vsub.s32 0, %v258_v57  ;;  %v5022_v56 = vsub.s32 3, %v258_v57 }
  0x90   :  { %8685 = vst [vmem:[#allocation165_spill] sm:$0xff] %v4993_v3  ;;  %v5033_v46 = vrot.slane %v252_v4, %v5022_v56 }
  0x91   :  { %3391 = vset.pattern.permute.xlu1 %v8684_v55 }
  0x92   :  { %870 = vperm.xlu1 %3391, %v3323_v58  }
  0x96   :  { %3392 = vset.pattern.permute.xlu1 %v8563_v59  ;;  %v3314_v59 = vld [vmem:[%s7835_s1 + $0x1] ss:$2 sm:$0xf] }
  0x97   :  { %1087 = vperm.xlu1 %3392, %v4564_v0   ;;  %v5003_v0 = vrot.slane %v252_v4, %v4993_v3 }
  0x99   :  { %8686 = vst [vmem:[#allocation166_spill] sm:$0xff] %v5003_v0 }
  0x9b   :  { %1454 = vperm.xlu1 %3392, %v4570_v1   ;;  %v5005_v1 = vsub.s32 1, %v258_v57 }
  0x9d   :  { %8687 = vst [vmem:[#allocation167_spill] sm:$0xff] %v5005_v1  ;;  %v5013_v58 = vrot.slane %v252_v4, %v5005_v1  ;;  %v5016_v49 = vrot.slane %v3314_v59, %v5005_v1  ;;  %v5036_v44 = vrot.slane %v255_v52, %v5005_v1 }
  0x9f   :  { %1821 = vperm.xlu1 %3392, %v4576_v60   ;;  %v5009_v60 = vrot.slane %v3314_v59, %v4993_v3  ;;  %8689 = vst [vmem:[#allocation169_spill] sm:$0xff] %v5013_v58  ;;  %8690 = vst [vmem:[#allocation170_spill] sm:$0xff] %v5016_v49 }
  0xa1   :  { %8688 = vst [vmem:[#allocation168_spill] sm:$0xff] %v5009_v60 }
  0xa3   :  { %2188 = vperm.xlu1 %3392, %v4591_v61  }
  0xa7   :  { %2555 = vperm.xlu1 %3392, %v4609_v63  }
  0xab   :  { %2922 = vperm.xlu1 %3392, %v4618_v62   ;;  %v5030_v62 = vsub.s32 2, %v258_v57 }
  0xad   :  { %v5050_v1 = vrot.slane %v3314_v59, %v5030_v62 }
  0xbe   :  { %v312_v55 = vpop.permute.xlu0 %311 }
  0xbf   :  { %v335_v61 = vmul.f32 %v5003_v0, %v312_v55  ;;  %v5026_v0 = vrot.slane %v255_v52, %v4993_v3  ;;  %v336_v51 = vmul.f32 %v5013_v58, %v312_v55  ;;  %v5039_v3 = vrot.slane %v3314_v59, %v5022_v56 }
  0xc0   :  { %v338_v57 = vmul.f32 %v5033_v46, %v312_v55 }
  0xc3   :  { %v483_v54 = vpop.permute.xlu0 %482 }
  0xc4   :  { %v506_v63 = vmul.f32 %v5009_v60, %v483_v54  ;;  %v507_v48 = vmul.f32 %v5016_v49, %v483_v54  ;;  %v5043_v49 = vrot.slane %v252_v4, %v5030_v62 }
 0x102   :  { %v405_v50 = vpop.f32.mrf.mxu0  ;;  %v476_v2 = vpop.f32.mrf.mxu1 }
 0x103   :  { %v406_v53 = vadd.f32 %v405_v50, %v335_v61 }
 0x104   :  { %v407_v47 = vpop.f32.mrf.mxu0  ;;  %v478_v58 = vpop.f32.mrf.mxu1 }
 0x105   :  { %v510_v45 = vadd.f32 %v506_v63, %v406_v53  ;;  %v408_v60 = vadd.f32 %v407_v47, %v336_v51  ;;  %v479_v53 = vadd.f32 %v478_v58, %v338_v57  ;;  %v509_v63 = vmul.f32 %v5039_v3, %v483_v54 }
 0x106   :  { %v337_v51 = vmul.f32 %v5043_v49, %v312_v55  ;;  %v5058_v58 = vrot.slane %v255_v52, %v5030_v62 }
 0x107   :  { %v514_v50 = vadd.f32 %v510_v45, %v5026_v0  ;;  %v511_v61 = vadd.f32 %v507_v48, %v408_v60  ;;  %v5053_v45 = vrot.slane %v255_v52, %v5022_v56  ;;  %v513_v48 = vadd.f32 %v509_v63, %v479_v53 }
 0x108   :  { %v477_v4 = vadd.f32 %v476_v2, %v337_v51  ;;  %v508_v60 = vmul.f32 %v5050_v1, %v483_v54 }
 0x109   :  { %v3316_v43 = vmul.f32 -1.442695, %v514_v50  ;;  %v515_v42 = vadd.f32 %v511_v61, %v5036_v44  ;;  %8691 = vst [vmem:[#allocation171_spill] sm:$0xff] %v5053_v45  ;;  %v517_v50 = vadd.f32 %v513_v48, %v5053_v45 }
 0x10b   :  { %3394 = vpow2.f32 %v3316_v43  ;;  %v3317_v47 = vmul.f32 -1.442695, %v515_v42  ;;  %v512_v43 = vadd.f32 %v508_v60, %v477_v4  ;;  %v3318_v42 = vmul.f32 -1.442695, %v517_v50 }
 0x10d   :  { %3396 = vpow2.f32 %v3317_v47  ;;  %v516_v55 = vadd.f32 %v512_v43, %v5058_v58  ;;  %v8729_v43 = vld [vmem:[#allocation48_spill] sm:$0xff] }
 0x10e   :  { %3398 = vpow2.f32 %v3318_v42  ;;  %v8730_v42 = vld [vmem:[#allocation49_spill] sm:$0xff] }
 0x118   :  { %v3395_v61 = vpop.eup %3394 }
 0x119   :  { %v521_v59 = vadd.f32 1.0, %v3395_v61  ;;  %v8731_v61 = vld [vmem:[#allocation50_spill] sm:$0xff] }
 0x11a   :  { %v3397_v57 = vpop.eup %3396 }
 0x11b   :  { %3400 = vrcp.f32 %v521_v59  ;;  %v527_v47 = vadd.f32 1.0, %v3397_v57  ;;  %v3399_v2 = vpop.eup %3398  ;;  %v8733_v59 = vld [vmem:[#allocation52_spill] sm:$0xff]  ;;  %v8734_v57 = vld [vmem:[#allocation53_spill] sm:$0xff] }
 0x11c   :  { %3402 = vtanh.f32 %v516_v55  ;;  %v534_v51 = vadd.f32 1.0, %v3399_v2  ;;  %v8732_v55 = vld [vmem:[#allocation51_spill] sm:$0xff] }
 0x11d   :  { %3404 = vrcp.f32 %v527_v47  ;;  %v8735_v47 = vld [vmem:[#allocation54_spill] sm:$0xff]  ;;  %v8736_v2 = vld [vmem:[#allocation55_spill] sm:$0xff] }
 0x11e   :  { %3406 = vrcp.f32 %v534_v51  ;;  %v8740_v51 = vld [vmem:[#allocation59_spill] sm:$0xff] }
 0x128   :  { %v3401_v53 = vpop.eup %3400 }
 0x129   :  { %v3403_v54 = vpop.eup %3402 }
 0x12a   :  { %v3405_v63 = vpop.eup %3404  ;;  %v538_v52 = vmul.f32 %v3403_v54, %v3401_v53  ;;  %v8737_v53 = vld [vmem:[#allocation56_spill] sm:$0xff]  ;;  %v8738_v54 = vld [vmem:[#allocation57_spill] sm:$0xff] }
 0x12b   :  { %v537_v48 = vmul.f32 0.0, %v3405_v63  ;;  %v3407_v4 = vpop.eup %3406  ;;  %v8739_v63 = vld [vmem:[#allocation58_spill] sm:$0xff] }
 0x12d   :  { %v5061_v45 = vadd.f32 %v538_v52, %v537_v48  ;;  %v8741_v48 = vld [vmem:[#allocation60_spill] sm:$0xff]  ;;  %v8742_v52 = vld [vmem:[#allocation61_spill] sm:$0xff] }
 0x12f   :  { %3408 = vtanh.f32 %v5061_v45 }
 0x13c   :  { %v3409_v60 = vpop.eup %3408 }
 0x13d   :  { %v5064_v50 = vmul.f32 %v3409_v60, %v3407_v4  ;;  %v8743_v4 = vld [vmem:[#allocation62_spill] sm:$0xff]  ;;  %v8744_v60 = vld [vmem:[#allocation63_spill] sm:$0xff] }
 0x13f   :  { %607 = vmatmul.mubr.f32.vlgmr.msra.gmra.mxu0 %v5064_v50  ;;  %678 = vmatmul.mubr.f32.vlgmr.msra.gmra.mxu1 %v5064_v50 }
 0x140   :  { %728 = vmatpush1.msra.mxu0 %v4365_v5  ;;  %799 = vmatpush1.msra.mxu1 %v4369_v6  ;;  %v8692_v5 = vld [vmem:[#allocation12_spill] sm:$0xff]  ;;  %v8693_v6 = vld [vmem:[#allocation13_spill] sm:$0xff] }
 0x141   :  { %729 = vmatprep.subr.mxu0 %v4371_v7  ;;  %800 = vmatprep.subr.mxu1 %v4373_v8  ;;  %v8694_v7 = vld [vmem:[#allocation14_spill] sm:$0xff]  ;;  %v8695_v8 = vld [vmem:[#allocation15_spill] sm:$0xff] }
 0x142   :  { %730 = vmatpush1.msra.mxu0 %v4377_v9  ;;  %801 = vmatpush1.msra.mxu1 %v4379_v10  ;;  %v8696_v9 = vld [vmem:[#allocation16_spill] sm:$0xff]  ;;  %v8697_v10 = vld [vmem:[#allocation17_spill] sm:$0xff] }
 0x143   :  { %731 = vmatprep.subr.mxu0 %v4381_v11  ;;  %802 = vmatprep.subr.mxu1 %v4385_v12  ;;  %v8698_v11 = vld [vmem:[#allocation18_spill] sm:$0xff]  ;;  %v8699_v12 = vld [vmem:[#allocation19_spill] sm:$0xff] }
 0x144   :  { %732 = vmatpush1.msra.mxu0 %v4387_v13  ;;  %803 = vmatpush1.msra.mxu1 %v4389_v14  ;;  %v8700_v13 = vld [vmem:[#allocation20_spill] sm:$0xff]  ;;  %v8701_v14 = vld [vmem:[#allocation21_spill] sm:$0xff] }
 0x145   :  { %733 = vmatprep.subr.mxu0 %v4393_v15  ;;  %804 = vmatprep.subr.mxu1 %v4395_v16  ;;  %v8702_v15 = vld [vmem:[#allocation22_spill] sm:$0xff]  ;;  %v8703_v16 = vld [vmem:[#allocation23_spill] sm:$0xff] }
 0x146   :  { %734 = vmatpush1.msra.mxu0 %v4399_v17  ;;  %805 = vmatpush1.msra.mxu1 %v4401_v18  ;;  %v8704_v17 = vld [vmem:[#allocation24_spill] sm:$0xff]  ;;  %v8705_v18 = vld [vmem:[#allocation25_spill] sm:$0xff] }
 0x147   :  { %735 = vmatprep.subr.mxu0 %v4405_v19  ;;  %806 = vmatprep.subr.mxu1 %v4407_v20  ;;  %v8706_v19 = vld [vmem:[#allocation26_spill] sm:$0xff]  ;;  %v8707_v20 = vld [vmem:[#allocation27_spill] sm:$0xff] }
 0x148   :  { %736 = vmatpush1.msra.mxu0 %v4411_v21  ;;  %807 = vmatpush1.msra.mxu1 %v4413_v22  ;;  %v8708_v21 = vld [vmem:[#allocation28_spill] sm:$0xff]  ;;  %v8709_v22 = vld [vmem:[#allocation29_spill] sm:$0xff] }
 0x149   :  { %737 = vmatprep.subr.mxu0 %v4417_v23  ;;  %808 = vmatprep.subr.mxu1 %v4419_v24  ;;  %v8710_v23 = vld [vmem:[#allocation30_spill] sm:$0xff]  ;;  %v8711_v24 = vld [vmem:[#allocation31_spill] sm:$0xff] }
 0x14a   :  { %738 = vmatpush1.msra.mxu0 %v4423_v25  ;;  %809 = vmatpush1.msra.mxu1 %v4425_v26  ;;  %v8712_v25 = vld [vmem:[#allocation32_spill] sm:$0xff]  ;;  %v8713_v26 = vld [vmem:[#allocation33_spill] sm:$0xff] }
 0x14b   :  { %739 = vmatprep.subr.mxu0 %v4429_v27  ;;  %810 = vmatprep.subr.mxu1 %v4431_v28  ;;  %v8714_v27 = vld [vmem:[#allocation34_spill] sm:$0xff]  ;;  %v8715_v28 = vld [vmem:[#allocation35_spill] sm:$0xff] }
 0x14c   :  { %740 = vmatpush1.msra.mxu0 %v4435_v29  ;;  %811 = vmatpush1.msra.mxu1 %v4437_v30  ;;  %v8716_v29 = vmov 0.0   ;;  %v8717_v30 = vld [vmem:[#allocation36_spill] sm:$0xff] }
 0x14d   :  { %741 = vmatprep.subr.mxu0 %v4441_v31  ;;  %812 = vmatprep.subr.mxu1 %v4443_v32  ;;  %v8718_v31 = vld [vmem:[#allocation37_spill] sm:$0xff]  ;;  %v8719_v32 = vld [vmem:[#allocation38_spill] sm:$0xff] }
 0x14e   :  { %742 = vmatpush1.msra.mxu0 %v4447_v33  ;;  %813 = vmatpush1.msra.mxu1 %v4449_v34  ;;  %v8720_v33 = vld [vmem:[#allocation39_spill] sm:$0xff]  ;;  %v8721_v34 = vld [vmem:[#allocation40_spill] sm:$0xff] }
 0x14f   :  { %743 = vmatprep.subr.mxu0 %v4453_v35  ;;  %814 = vmatprep.subr.mxu1 %v4455_v36  ;;  %v8722_v35 = vld [vmem:[#allocation41_spill] sm:$0xff]  ;;  %v8723_v36 = vld [vmem:[#allocation42_spill] sm:$0xff] }
 0x150   :  { %744 = vmatpush1.msra.mxu0 %v4459_v37  ;;  %815 = vmatpush1.msra.mxu1 %v4461_v38  ;;  %v8724_v37 = vld [vmem:[#allocation43_spill] sm:$0xff]  ;;  %v8725_v38 = vld [vmem:[#allocation44_spill] sm:$0xff] }
 0x151   :  { %745 = vmatprep.subr.mxu0 %v4465_v39  ;;  %816 = vmatprep.subr.mxu1 %v4467_v40  ;;  %v8726_v39 = vld [vmem:[#allocation45_spill] sm:$0xff]  ;;  %v8727_v40 = vld [vmem:[#allocation46_spill] sm:$0xff] }
 0x152   :  { %746 = vmatpush1.msra.mxu0 %v4471_v41  ;;  %817 = vmatpush1.msra.mxu1 %v8692_v5  ;;  %v8728_v41 = vld [vmem:[#allocation47_spill] sm:$0xff]  ;;  %v8746_v5 = vld [vmem:[#allocation65_spill] sm:$0xff] }
 0x153   :  { %747 = vmatprep.subr.mxu0 %v8693_v6  ;;  %818 = vmatprep.subr.mxu1 %v8694_v7  ;;  %v8747_v6 = vld [vmem:[#allocation66_spill] sm:$0xff]  ;;  %v8748_v7 = vld [vmem:[#allocation67_spill] sm:$0xff] }
 0x154   :  { %748 = vmatpush1.msra.mxu0 %v8695_v8  ;;  %819 = vmatpush1.msra.mxu1 %v8696_v9  ;;  %v8749_v8 = vld [vmem:[#allocation68_spill] sm:$0xff]  ;;  %v8750_v9 = vld [vmem:[#allocation69_spill] sm:$0xff] }
 0x155   :  { %749 = vmatprep.subr.mxu0 %v8697_v10  ;;  %820 = vmatprep.subr.mxu1 %v8698_v11  ;;  %v8751_v10 = vld [vmem:[#allocation70_spill] sm:$0xff]  ;;  %v8752_v11 = vld [vmem:[#allocation71_spill] sm:$0xff] }
 0x156   :  { %750 = vmatpush1.msra.mxu0 %v8699_v12  ;;  %821 = vmatpush1.msra.mxu1 %v8700_v13  ;;  %v8753_v12 = vld [vmem:[#allocation72_spill] sm:$0xff]  ;;  %v8754_v13 = vld [vmem:[#allocation73_spill] sm:$0xff] }
 0x157   :  { %751 = vmatprep.subr.mxu0 %v8701_v14  ;;  %822 = vmatprep.subr.mxu1 %v8702_v15  ;;  %v8755_v14 = vld [vmem:[#allocation74_spill] sm:$0xff]  ;;  %v8756_v15 = vld [vmem:[#allocation75_spill] sm:$0xff] }
 0x158   :  { %752 = vmatpush1.msra.mxu0 %v8703_v16  ;;  %823 = vmatpush1.msra.mxu1 %v8704_v17  ;;  %v8757_v16 = vld [vmem:[#allocation76_spill] sm:$0xff]  ;;  %v8758_v17 = vld [vmem:[#allocation77_spill] sm:$0xff] }
 0x159   :  { %753 = vmatprep.subr.mxu0 %v8705_v18  ;;  %824 = vmatprep.subr.mxu1 %v8706_v19  ;;  %v8759_v18 = vld [vmem:[#allocation78_spill] sm:$0xff]  ;;  %v8760_v19 = vld [vmem:[#allocation79_spill] sm:$0xff] }
 0x15a   :  { %754 = vmatpush1.msra.mxu0 %v8707_v20  ;;  %825 = vmatpush1.msra.mxu1 %v8708_v21  ;;  %v8761_v20 = vld [vmem:[#allocation80_spill] sm:$0xff]  ;;  %v8762_v21 = vld [vmem:[#allocation81_spill] sm:$0xff] }
 0x15b   :  { %755 = vmatprep.subr.mxu0 %v8709_v22  ;;  %826 = vmatprep.subr.mxu1 %v8710_v23  ;;  %v8763_v22 = vld [vmem:[#allocation82_spill] sm:$0xff]  ;;  %v8764_v23 = vld [vmem:[#allocation83_spill] sm:$0xff] }
 0x15c   :  { %756 = vmatpush1.msra.mxu0 %v8711_v24  ;;  %827 = vmatpush1.msra.mxu1 %v8712_v25  ;;  %v8765_v24 = vld [vmem:[#allocation84_spill] sm:$0xff]  ;;  %v8766_v25 = vld [vmem:[#allocation85_spill] sm:$0xff] }
 0x15d   :  { %757 = vmatprep.subr.mxu0 %v8713_v26  ;;  %828 = vmatprep.subr.mxu1 %v8714_v27  ;;  %v8767_v26 = vld [vmem:[#allocation86_spill] sm:$0xff]  ;;  %v8768_v27 = vld [vmem:[#allocation87_spill] sm:$0xff] }
 0x15e   :  { %758 = vmatpush1.msra.mxu0 %v8715_v28  ;;  %791 = vmatprep.mubr.f32.mxu0 %v8716_v29  ;;  %v8769_v28 = vld [vmem:[#allocation88_spill] sm:$0xff] }
 0x15f   :  { %829 = vmatpush1.msra.mxu1 %v8717_v30  ;;  %862 = vmatprep.mubr.f32.mxu1 %v8716_v29  ;;  %v8770_v30 = vld [vmem:[#allocation89_spill] sm:$0xff] }
 0x160   :  { %792 = vmatmul.mubr.f32.vlgmr.msra.gmra.mxu0 %v5064_v50  ;;  %863 = vmatmul.mubr.f32.vlgmr.msra.gmra.mxu1 %v5064_v50  ;;  %v8745_v50 = vld [vmem:[#allocation64_spill] sm:$0xff] }
 0x161   :  { %909 = vmatprep.subr.mxu0 %v8718_v31  ;;  %980 = vmatprep.subr.mxu1 %v8719_v32  ;;  %v8771_v31 = vld [vmem:[#allocation90_spill] sm:$0xff]  ;;  %v8772_v32 = vld [vmem:[#allocation91_spill] sm:$0xff] }
 0x162   :  { %910 = vmatpush1.msra.mxu0 %v8720_v33  ;;  %981 = vmatpush1.msra.mxu1 %v8721_v34  ;;  %v8773_v33 = vld [vmem:[#allocation92_spill] sm:$0xff]  ;;  %v8774_v34 = vld [vmem:[#allocation93_spill] sm:$0xff] }
 0x163   :  { %911 = vmatprep.subr.mxu0 %v8722_v35  ;;  %982 = vmatprep.subr.mxu1 %v8723_v36  ;;  %v8775_v35 = vld [vmem:[#allocation94_spill] sm:$0xff]  ;;  %v8776_v36 = vld [vmem:[#allocation95_spill] sm:$0xff] }
 0x164   :  { %912 = vmatpush1.msra.mxu0 %v8724_v37  ;;  %983 = vmatpush1.msra.mxu1 %v8725_v38  ;;  %v8777_v37 = vld [vmem:[#allocation96_spill] sm:$0xff]  ;;  %v8778_v38 = vld [vmem:[#allocation97_spill] sm:$0xff] }
 0x165   :  { %913 = vmatprep.subr.mxu0 %v8726_v39  ;;  %984 = vmatprep.subr.mxu1 %v8727_v40  ;;  %v8779_v39 = vld [vmem:[#allocation98_spill] sm:$0xff]  ;;  %v8780_v40 = vld [vmem:[#allocation99_spill] sm:$0xff] }
 0x166   :  { %914 = vmatpush1.msra.mxu0 %v8728_v41  ;;  %985 = vmatpush1.msra.mxu1 %v8729_v43  ;;  %v8781_v41 = vld [vmem:[#allocation100_spill] sm:$0xff]  ;;  %v8782_v43 = vld [vmem:[#allocation101_spill] sm:$0xff] }
 0x167   :  { %915 = vmatprep.subr.mxu0 %v8730_v42  ;;  %986 = vmatprep.subr.mxu1 %v8731_v61  ;;  %v8783_v42 = vld [vmem:[#allocation102_spill] sm:$0xff]  ;;  %v8784_v61 = vld [vmem:[#allocation103_spill] sm:$0xff] }
 0x168   :  { %916 = vmatpush1.msra.mxu0 %v8732_v55  ;;  %987 = vmatpush1.msra.mxu1 %v8733_v59  ;;  %v8785_v55 = vld [vmem:[#allocation104_spill] sm:$0xff]  ;;  %v8786_v59 = vld [vmem:[#allocation105_spill] sm:$0xff] }
 0x169   :  { %917 = vmatprep.subr.mxu0 %v8734_v57  ;;  %988 = vmatprep.subr.mxu1 %v8735_v47  ;;  %v8787_v57 = vld [vmem:[#allocation106_spill] sm:$0xff]  ;;  %v8788_v47 = vld [vmem:[#allocation107_spill] sm:$0xff] }
 0x16a   :  { %918 = vmatpush1.msra.mxu0 %v8736_v2  ;;  %989 = vmatpush1.msra.mxu1 %v8737_v53  ;;  %v8789_v2 = vld [vmem:[#allocation108_spill] sm:$0xff]  ;;  %v8790_v53 = vld [vmem:[#allocation109_spill] sm:$0xff] }
 0x16b   :  { %919 = vmatprep.subr.mxu0 %v8738_v54  ;;  %990 = vmatprep.subr.mxu1 %v8739_v63  ;;  %v8791_v54 = vld [vmem:[#allocation110_spill] sm:$0xff]  ;;  %v8792_v63 = vld [vmem:[#allocation111_spill] sm:$0xff] }
 0x16c   :  { %920 = vmatpush1.msra.mxu0 %v8740_v51  ;;  %991 = vmatpush1.msra.mxu1 %v8741_v48  ;;  %v8793_v51 = vld [vmem:[#allocation112_spill] sm:$0xff]  ;;  %v8794_v48 = vld [vmem:[#allocation113_spill] sm:$0xff] }
 0x16d   :  { %921 = vmatprep.subr.mxu0 %v8742_v52  ;;  %992 = vmatprep.subr.mxu1 %v8743_v4  ;;  %v8795_v52 = vld [vmem:[#allocation114_spill] sm:$0xff]  ;;  %v8796_v4 = vld [vmem:[#allocation115_spill] sm:$0xff] }
 0x16e   :  { %922 = vmatpush1.msra.mxu0 %v8744_v60  ;;  %993 = vmatpush1.msra.mxu1 %v8745_v50  ;;  %v8797_v60 = vld [vmem:[#allocation116_spill] sm:$0xff]  ;;  %v8798_v50 = vld [vmem:[#allocation117_spill] sm:$0xff] }
 0x16f   :  { %923 = vmatprep.subr.mxu0 %v8746_v5  ;;  %994 = vmatprep.subr.mxu1 %v8747_v6  ;;  %v8799_v5 = vld [vmem:[#allocation118_spill] sm:$0xff]  ;;  %v8800_v6 = vld [vmem:[#allocation119_spill] sm:$0xff] }
 0x170   :  { %924 = vmatpush1.msra.mxu0 %v8748_v7  ;;  %995 = vmatpush1.msra.mxu1 %v8749_v8  ;;  %v8801_v7 = vld [vmem:[#allocation120_spill] sm:$0xff]  ;;  %v8802_v8 = vld [vmem:[#allocation121_spill] sm:$0xff] }
 0x171   :  { %925 = vmatprep.subr.mxu0 %v8750_v9  ;;  %996 = vmatprep.subr.mxu1 %v8751_v10  ;;  %v8803_v9 = vld [vmem:[#allocation122_spill] sm:$0xff]  ;;  %v8804_v10 = vld [vmem:[#allocation123_spill] sm:$0xff] }
 0x172   :  { %926 = vmatpush1.msra.mxu0 %v8752_v11  ;;  %997 = vmatpush1.msra.mxu1 %v8753_v12  ;;  %v8805_v11 = vld [vmem:[#allocation124_spill] sm:$0xff]  ;;  %v8806_v12 = vld [vmem:[#allocation125_spill] sm:$0xff] }
 0x173   :  { %927 = vmatprep.subr.mxu0 %v8754_v13  ;;  %998 = vmatprep.subr.mxu1 %v8755_v14  ;;  %v8807_v13 = vld [vmem:[#allocation126_spill] sm:$0xff]  ;;  %v8808_v14 = vld [vmem:[#allocation127_spill] sm:$0xff] }
 0x174   :  { %928 = vmatpush1.msra.mxu0 %v8756_v15  ;;  %999 = vmatpush1.msra.mxu1 %v8757_v16  ;;  %v8809_v15 = vld [vmem:[#allocation128_spill] sm:$0xff]  ;;  %v8810_v16 = vld [vmem:[#allocation129_spill] sm:$0xff] }
 0x175   :  { %929 = vmatprep.subr.mxu0 %v8758_v17  ;;  %1000 = vmatprep.subr.mxu1 %v8759_v18  ;;  %v8811_v17 = vld [vmem:[#allocation130_spill] sm:$0xff]  ;;  %v8812_v18 = vld [vmem:[#allocation131_spill] sm:$0xff] }
 0x176   :  { %930 = vmatpush1.msra.mxu0 %v8760_v19  ;;  %1001 = vmatpush1.msra.mxu1 %v8761_v20  ;;  %v8813_v19 = vld [vmem:[#allocation132_spill] sm:$0xff]  ;;  %v8814_v20 = vld [vmem:[#allocation133_spill] sm:$0xff] }
 0x177   :  { %931 = vmatprep.subr.mxu0 %v8762_v21  ;;  %1002 = vmatprep.subr.mxu1 %v8763_v22  ;;  %v8815_v21 = vld [vmem:[#allocation134_spill] sm:$0xff]  ;;  %v8816_v22 = vld [vmem:[#allocation135_spill] sm:$0xff] }
 0x178   :  { %932 = vmatpush1.msra.mxu0 %v8764_v23  ;;  %1003 = vmatpush1.msra.mxu1 %v8765_v24  ;;  %v8817_v23 = vld [vmem:[#allocation136_spill] sm:$0xff]  ;;  %v8818_v24 = vld [vmem:[#allocation137_spill] sm:$0xff] }
 0x179   :  { %933 = vmatprep.subr.mxu0 %v8766_v25  ;;  %1004 = vmatprep.subr.mxu1 %v8767_v26  ;;  %v8819_v25 = vld [vmem:[#allocation138_spill] sm:$0xff]  ;;  %v8820_v26 = vld [vmem:[#allocation139_spill] sm:$0xff] }
 0x17a   :  { %934 = vmatpush1.msra.mxu0 %v8768_v27  ;;  %1005 = vmatpush1.msra.mxu1 %v8769_v28  ;;  %v8821_v27 = vld [vmem:[#allocation140_spill] sm:$0xff]  ;;  %v8822_v28 = vld [vmem:[#allocation141_spill] sm:$0xff] }
 0x17b   :  { %935 = vmatprep.subr.mxu0 %v8770_v30  ;;  %1006 = vmatprep.subr.mxu1 %v8771_v31  ;;  %v8823_v30 = vld [vmem:[#allocation142_spill] sm:$0xff]  ;;  %v8824_v31 = vld [vmem:[#allocation143_spill] sm:$0xff] }
 0x17c   :  { %936 = vmatpush1.msra.mxu0 %v8772_v32  ;;  %1007 = vmatpush1.msra.mxu1 %v8773_v33  ;;  %v8825_v32 = vld [vmem:[#allocation144_spill] sm:$0xff]  ;;  %v8826_v33 = vld [vmem:[#allocation145_spill] sm:$0xff] }
 0x17d   :  { %937 = vmatprep.subr.mxu0 %v8774_v34  ;;  %1008 = vmatprep.subr.mxu1 %v8775_v35  ;;  %v8827_v34 = vld [vmem:[#allocation146_spill] sm:$0xff]  ;;  %v8828_v35 = vld [vmem:[#allocation147_spill] sm:$0xff] }
 0x17e   :  { %938 = vmatpush1.msra.mxu0 %v8776_v36  ;;  %1009 = vmatpush1.msra.mxu1 %v8777_v37  ;;  %v8829_v36 = vld [vmem:[#allocation148_spill] sm:$0xff]  ;;  %v8830_v37 = vld [vmem:[#allocation149_spill] sm:$0xff] }
 0x17f   :  { %939 = vmatprep.subr.mxu0 %v8778_v38  ;;  %1010 = vmatprep.subr.mxu1 %v8779_v39  ;;  %v8831_v38 = vld [vmem:[#allocation150_spill] sm:$0xff]  ;;  %v8832_v39 = vld [vmem:[#allocation151_spill] sm:$0xff] }
 0x180   :  { %940 = vmatpush1.msra.mxu0 %v8780_v40  ;;  %1011 = vmatpush1.msra.mxu1 %v8781_v41  ;;  %v8833_v40 = vld [vmem:[#allocation152_spill] sm:$0xff]  ;;  %v8834_v41 = vld [vmem:[#allocation153_spill] sm:$0xff] }
 0x181   :  { %941 = vmatprep.subr.mxu0 %v8782_v43  ;;  %1012 = vmatprep.subr.mxu1 %v8783_v42  ;;  %v8835_v43 = vld [vmem:[#allocation154_spill] sm:$0xff]  ;;  %v8836_v42 = vld [vmem:[#allocation155_spill] sm:$0xff] }
 0x182   :  { %942 = vmatpush2.msra.mxu0 %v8784_v61  ;;  %1013 = vmatpush2.msra.mxu1 %v8785_v55  ;;  %v8837_v61 = vld [vmem:[#allocation156_spill] sm:$0xff]  ;;  %v8838_v55 = vld [vmem:[#allocation157_spill] sm:$0xff] }
 0x183   :  { %943 = vmatprep.subr.mxu0 %v8786_v59  ;;  %1014 = vmatprep.subr.mxu1 %v8787_v57  ;;  %v8839_v59 = vld [vmem:[#allocation158_spill] sm:$0xff]  ;;  %v8840_v57 = vld [vmem:[#allocation159_spill] sm:$0xff] }
 0x184   :  { %944 = vmatpush2.msra.mxu0 %v8788_v47  ;;  %1015 = vmatpush2.msra.mxu1 %v8789_v2  ;;  %v8841_v47 = vld [vmem:[#allocation160_spill] sm:$0xff]  ;;  %v8842_v2 = vld [vmem:[#allocation161_spill] sm:$0xff] }
 0x185   :  { %945 = vmatprep.subr.mxu0 %v8790_v53  ;;  %1016 = vmatprep.subr.mxu1 %v8791_v54  ;;  %v8843_v53 = vld [vmem:[#allocation162_spill] sm:$0xff]  ;;  %v8844_v54 = vld [vmem:[#allocation163_spill] sm:$0xff] }
 0x186   :  { %946 = vmatpush2.msra.mxu0 %v8792_v63  ;;  %1017 = vmatpush2.msra.mxu1 %v8793_v51  ;;  %v8845_v63 = vld [vmem:[#allocation164_spill] sm:$0xff] }
 0x187   :  { %947 = vmatprep.subr.mxu0 %v8794_v48  ;;  %1018 = vmatprep.subr.mxu1 %v8795_v52  ;;  %v5262_v51 = vld [vmem:[#allocation3 + $0x1e8] sm:$0xff]  ;;  %v5265_v48 = vld [vmem:[#allocation3 + $0x1f8] sm:$0xff] }
 0x188   :  { %948 = vmatpush2.msra.mxu0 %v8796_v4  ;;  %1019 = vmatpush2.msra.mxu1 %v8797_v60  ;;  %v277_v52 = vld [vmem:[%s7839_s5] sm:$0xf]  ;;  %v8846_v4 = vld [vmem:[#allocation165_spill] sm:$0xff] }
 0x189   :  { %949 = vmatprep.subr.mxu0 %v8798_v50  ;;  %1020 = vmatprep.subr.mxu1 %v8799_v5  ;;  %v5272_v60 = vrot.slane %v277_v52, %v8846_v4  ;;  %v8848_v50 = vld [vmem:[#allocation167_spill] sm:$0xff] }
 0x18a   :  { %950 = vmatpush2.msra.mxu0 %v8800_v6  ;;  %1021 = vmatpush2.msra.mxu1 %v8801_v7  ;;  %v5275_v5 = vrot.slane %v277_v52, %v8848_v50 }
 0x18b   :  { %951 = vmatprep.subr.mxu0 %v8802_v8  ;;  %1022 = vmatprep.subr.mxu1 %v8803_v9  ;;  %8847 = vst [vmem:[#allocation12_spill] sm:$0xff] %v5272_v60 }
 0x18c   :  { %952 = vmatpush2.msra.mxu0 %v8804_v10  ;;  %1023 = vmatpush2.msra.mxu1 %v8805_v11  ;;  %8849 = vst [vmem:[#allocation13_spill] sm:$0xff] %v5275_v5 }
 0x18d   :  { %953 = vmatprep.subr.mxu0 %v8806_v12  ;;  %1024 = vmatprep.subr.mxu1 %v8807_v13  ;;  %v5280_v13 = vrot.slane %v277_v52, %v5022_v56 }
 0x18e   :  { %954 = vmatpush2.msra.mxu0 %v8808_v14  ;;  %1025 = vmatpush2.msra.mxu1 %v8809_v15 }
 0x18f   :  { %955 = vmatprep.subr.mxu0 %v8810_v16  ;;  %1026 = vmatprep.subr.mxu1 %v8811_v17  ;;  %8850 = vst [vmem:[#allocation14_spill] sm:$0xff] %v5280_v13  ;;  %v5284_v16 = vrot.slane %v277_v52, %v5030_v62 }
 0x190   :  { %956 = vmatpush2.msra.mxu0 %v8812_v18  ;;  %1027 = vmatpush2.msra.mxu1 %v8813_v19 }
 0x191   :  { %957 = vmatprep.subr.mxu0 %v8814_v20  ;;  %1028 = vmatprep.subr.mxu1 %v8815_v21  ;;  %8851 = vst [vmem:[#allocation15_spill] sm:$0xff] %v5284_v16 }
 0x192   :  { %958 = vmatpush2.msra.mxu0 %v8816_v22  ;;  %1029 = vmatpush2.msra.mxu1 %v8817_v23  ;;  %v721_v23 = vpop.permute.xlu1 %720 }
 0x193   :  { %959 = vmatprep.subr.mxu0 %v8818_v24  ;;  %1030 = vmatprep.subr.mxu1 %v8819_v25  ;;  %v8852_v24 = vld [vmem:[#allocation166_spill] sm:$0xff]  ;;  %v725_v50 = vmul.f32 %v721_v23, %v5043_v49 }
 0x194   :  { %960 = vmatpush2.msra.mxu0 %v8820_v26  ;;  %1031 = vmatpush2.msra.mxu1 %v8821_v27  ;;  %v723_v25 = vmul.f32 %v721_v23, %v8852_v24  ;;  %v8853_v26 = vld [vmem:[#allocation168_spill] sm:$0xff] }
 0x195   :  { %961 = vmatprep.subr.mxu0 %v8822_v28  ;;  %1032 = vmatprep.subr.mxu1 %v8823_v30 }
 0x196   :  { %962 = vmatpush2.msra.mxu0 %v8824_v31  ;;  %1033 = vmatpush2.msra.mxu1 %v8825_v32  ;;  %v871_v56 = vpop.permute.xlu1 %870 }
 0x197   :  { %963 = vmatprep.subr.mxu0 %v8826_v33  ;;  %1034 = vmatprep.subr.mxu1 %v8827_v34  ;;  %v873_v27 = vmul.f32 %v871_v56, %v8853_v26  ;;  %v8854_v33 = vld [vmem:[#allocation169_spill] sm:$0xff]  ;;  %v876_v52 = vmul.f32 %v871_v56, %v5039_v3 }
 0x198   :  { %964 = vmatpush2.msra.mxu0 %v8828_v35  ;;  %1035 = vmatpush2.msra.mxu1 %v8829_v36  ;;  %v724_v34 = vmul.f32 %v721_v23, %v8854_v33  ;;  %v8855_v35 = vld [vmem:[#allocation170_spill] sm:$0xff] }
 0x199   :  { %965 = vmatprep.subr.mxu0 %v8830_v37  ;;  %1036 = vmatprep.subr.mxu1 %v8831_v38  ;;  %v874_v36 = vmul.f32 %v871_v56, %v8855_v35 }
 0x19a   :  { %966 = vmatpush2.msra.mxu0 %v8832_v39  ;;  %1037 = vmatpush2.msra.mxu1 %v8833_v40 }
 0x19b   :  { %967 = vmatprep.subr.mxu0 %v8834_v41  ;;  %1038 = vmatprep.subr.mxu1 %v8835_v43 }
 0x19c   :  { %968 = vmatpush2.msra.mxu0 %v8836_v42  ;;  %1039 = vmatpush2.msra.mxu1 %v8837_v61 }
 0x19d   :  { %969 = vmatprep.subr.mxu0 %v8838_v55  ;;  %1040 = vmatprep.subr.mxu1 %v8839_v59 }
 0x19e   :  { %970 = vmatpush2.msra.mxu0 %v8840_v57  ;;  %1041 = vmatpush2.msra.mxu1 %v8841_v47 }
 0x19f   :  { %971 = vmatprep.subr.mxu0 %v8842_v2  ;;  %1042 = vmatprep.subr.mxu1 %v8843_v53  ;;  %v726_v2 = vmul.f32 %v721_v23, %v5033_v46 }
 0x1a0   :  { %972 = vmatpush2.msra.mxu0 %v8844_v54  ;;  %1043 = vmatpush2.msra.mxu1 %v8845_v63 }
 0x1a1   :  { %1094 = vmatprep.subr.mxu0 %v5262_v51  ;;  %1165 = vmatprep.subr.mxu1 %v5265_v48 }
 0x1ff   :  { %v608_v6 = vpop.f32.mrf.mxu0  ;;  %v679_v11 = vpop.f32.mrf.mxu1 }
 0x200   :  { %v609_v7 = vadd.f32 %v608_v6, %v5272_v60  ;;  %v680_v19 = vadd.f32 %v679_v11, %v5284_v16 }
 0x201   :  { %v610_v8 = vpop.f32.mrf.mxu0  ;;  %v681_v14 = vpop.f32.mrf.mxu1 }
 0x202   :  { %v3319_v9 = vmul.f32 -1.442695, %v609_v7  ;;  %v611_v10 = vadd.f32 %v610_v8, %v5275_v5  ;;  %v682_v15 = vadd.f32 %v681_v14, %v5280_v13  ;;  %v875_v8 = vmul.f32 %v871_v56, %v5050_v1 }
 0x204   :  { %3410 = vpow2.f32 %v3319_v9  ;;  %v3320_v12 = vmul.f32 -1.442695, %v611_v10  ;;  %v3321_v17 = vmul.f32 -1.442695, %v682_v15  ;;  %v8856_v9 = vld [vmem:[#allocation171_spill] sm:$0xff] }
 0x206   :  { %3412 = vpow2.f32 %v3320_v12 }
 0x207   :  { %3414 = vpow2.f32 %v3321_v17  ;;  %v5304_v17 = vld [vmem:[%s7840_s6] ss:$0 sm:$0xff] }
 0x211   :  { %v3411_v18 = vpop.eup %3410 }
 0x212   :  { %v687_v20 = vadd.f32 1.0, %v3411_v18 }
 0x213   :  { %v3413_v21 = vpop.eup %3412 }
 0x214   :  { %3416 = vrcp.f32 %v687_v20  ;;  %v693_v22 = vadd.f32 1.0, %v3413_v21  ;;  %v3415_v28 = vpop.eup %3414 }
 0x215   :  { %3418 = vtanh.f32 %v680_v19  ;;  %v700_v40 = vadd.f32 1.0, %v3415_v28 }
 0x216   :  { %3420 = vrcp.f32 %v693_v22 }
 0x217   :  { %3422 = vrcp.f32 %v700_v40  ;;  %v5319_v40 = vld [vmem:[#allocation3 + $0x1f0] sm:$0xff] }
 0x220   :  { %v793_v62 = vpop.f32.mrf.mxu0  ;;  %v864_v32 = vpop.f32.mrf.mxu1 }
 0x221   :  { %v3417_v30 = vpop.eup %3416  ;;  %v794_v31 = vadd.f32 %v793_v62, %v723_v25  ;;  %v865_v7 = vadd.f32 %v864_v32, %v725_v50  ;;  %v5364_v50 = vld [vmem:[#allocation3 + $0x160] sm:$0xff] }
 0x222   :  { %v3419_v37 = vpop.eup %3418  ;;  %v795_v38 = vpop.f32.mrf.mxu0 }
 0x223   :  { %v3421_v39 = vpop.eup %3420  ;;  %v877_v41 = vadd.f32 %v873_v27, %v794_v31  ;;  %v796_v43 = vadd.f32 %v795_v38, %v724_v34  ;;  %v704_v61 = vmul.f32 %v3419_v37, %v3417_v30  ;;  %v866_v57 = vpop.f32.mrf.mxu1  ;;  %v879_v11 = vadd.f32 %v875_v8, %v865_v7  ;;  %v5370_v7 = vld [vmem:[#allocation3 + $0x148] sm:$0xff]  ;;  %v5373_v8 = vld [vmem:[#allocation3 + $0x158] sm:$0xff] }
 0x224   :  { %v703_v42 = vmul.f32 0.0, %v3421_v39  ;;  %v867_v63 = vadd.f32 %v866_v57, %v726_v2  ;;  %v3423_v12 = vpop.eup %3422  ;;  %v5316_v39 = vld [vmem:[#allocation3 + $0x1e0] sm:$0xff]  ;;  %v5343_v57 = vld [vmem:[#allocation3 + $0x1b0] sm:$0xff]  ;;  %v5346_v2 = vld [vmem:[#allocation3 + $0x188] sm:$0xff] }
 0x225   :  { %v881_v55 = vadd.f32 %v877_v41, %v5026_v0  ;;  %v878_v59 = vadd.f32 %v874_v36, %v796_v43  ;;  %v883_v19 = vadd.f32 %v879_v11, %v5058_v58  ;;  %v5325_v41 = vld [vmem:[#allocation3 + $0x1d8] sm:$0xff]  ;;  %v5328_v43 = vld [vmem:[#allocation3 + $0x1c0] sm:$0xff]  ;;  %v5379_v11 = vld [vmem:[#allocation3 + $0x150] sm:$0xff] }
 0x226   :  { %v5292_v47 = vadd.f32 %v704_v61, %v703_v42  ;;  %v880_v6 = vadd.f32 %v876_v52, %v867_v63  ;;  %v5331_v42 = vld [vmem:[#allocation3 + $0x1d0] sm:$0xff]  ;;  %v5334_v61 = vld [vmem:[#allocation3 + $0x1a8] sm:$0xff] }
 0x227   :  { %v3324_v53 = vmul.f32 -1.442695, %v881_v55  ;;  %v882_v54 = vadd.f32 %v878_v59, %v5036_v44  ;;  %v5337_v55 = vld [vmem:[#allocation3 + $0x1b8] sm:$0xff]  ;;  %v5340_v59 = vld [vmem:[#allocation3 + $0x1a0] sm:$0xff]  ;;  %v5355_v63 = vld [vmem:[#allocation3 + $0x190] sm:$0xff] }
 0x228   :  { %3424 = vtanh.f32 %v5292_v47  ;;  %v884_v10 = vadd.f32 %v880_v6, %v8856_v9  ;;  %v5358_v52 = vld [vmem:[#allocation3 + $0x168] sm:$0xff]  ;;  %v5367_v6 = vld [vmem:[#allocation3 + $0x170] sm:$0xff] }
 0x229   :  { %3426 = vpow2.f32 %v3324_v53  ;;  %v3325_v4 = vmul.f32 -1.442695, %v882_v54  ;;  %v5349_v53 = vld [vmem:[#allocation3 + $0x198] sm:$0xff]  ;;  %v5352_v54 = vld [vmem:[#allocation3 + $0x180] sm:$0xff] }
 0x22a   :  { %v3326_v14 = vmul.f32 -1.442695, %v884_v10  ;;  %v5376_v10 = vld [vmem:[#allocation3 + $0x140] sm:$0xff] }
 0x22b   :  { %3428 = vpow2.f32 %v3325_v4  ;;  %v5361_v4 = vld [vmem:[#allocation3 + $0x178] sm:$0xff] }
 0x22c   :  { %3430 = vpow2.f32 %v3326_v14  ;;  %v5385_v14 = vld [vmem:[#allocation3 + $0x138] sm:$0xff] }
 0x235   :  { %v3425_v15 = vpop.eup %3424 }
 0x236   :  { %v3427_v18 = vpop.eup %3426  ;;  %v707_v20 = vmul.f32 %v3425_v15, %v3423_v12  ;;  %v5382_v12 = vld [vmem:[#allocation3 + $0x128] sm:$0xff]  ;;  %v5388_v15 = vld [vmem:[#allocation3 + $0x120] sm:$0xff] }
 0x237   :  { %v888_v21 = vadd.f32 1.0, %v3427_v18  ;;  %v5391_v18 = vld [vmem:[#allocation3 + $0x130] sm:$0xff] }
 0x238   :  { %v3429_v22 = vpop.eup %3428  ;;  %973 = vmatprep.mubr.f32.mxu0 %v707_v20  ;;  %1044 = vmatprep.mubr.f32.mxu1 %v707_v20  ;;  %v708_v23 = vmul.f32 %v5304_v17, %v707_v20  ;;  %v5397_v20 = vld [vmem:[#allocation3 + $0x118] sm:$0xff] }
 0x239   :  { %3432 = vrcp.f32 %v888_v21  ;;  %v894_v56 = vadd.f32 1.0, %v3429_v22  ;;  %v3431_v25 = vpop.eup %3430  ;;  %v5400_v21 = vld [vmem:[#allocation3 + $0x100] sm:$0xff]  ;;  %v5403_v22 = vld [vmem:[#allocation3 + $0x110] sm:$0xff] }
 0x23a   :  { %3434 = vtanh.f32 %v883_v19  ;;  %709 = vadd.xlane.f32.xlu1 %v708_v23  ;;  %v901_v30 = vadd.f32 1.0, %v3431_v25  ;;  %v5394_v19 = vld [vmem:[#allocation3 + $0x108] sm:$0xff]  ;;  %8857 = vst [vmem:[#allocation16_spill] sm:$0xff] %v5400_v21  ;;  %8858 = vst [vmem:[#allocation17_spill] sm:$0xff] %v5403_v22  ;;  %v5412_v25 = vld [vmem:[#allocation3 + $0xe0] sm:$0xff] }
 0x23b   :  { %3436 = vrcp.f32 %v894_v56  ;;  %v5406_v23 = vld [vmem:[#allocation3 + $0xe8] sm:$0xff]  ;;  %v5409_v56 = vld [vmem:[#allocation3 + $0xf8] sm:$0xff]  ;;  %8861 = vst [vmem:[#allocation20_spill] sm:$0xff] %v5412_v25 }
 0x23c   :  { %3438 = vrcp.f32 %v901_v30  ;;  %8859 = vst [vmem:[#allocation18_spill] sm:$0xff] %v5406_v23  ;;  %8860 = vst [vmem:[#allocation19_spill] sm:$0xff] %v5409_v56  ;;  %v5424_v30 = vld [vmem:[#allocation3 + $0xc0] sm:$0xff] }
 0x23d   :  { %8865 = vst [vmem:[#allocation24_spill] sm:$0xff] %v5424_v30 }
 0x246   :  { %v3433_v27 = vpop.eup %3432 }
 0x247   :  { %v3435_v28 = vpop.eup %3434 }
 0x248   :  { %v3437_v62 = vpop.eup %3436  ;;  %v905_v31 = vmul.f32 %v3435_v28, %v3433_v27  ;;  %v5415_v27 = vld [vmem:[#allocation3 + $0xf0] sm:$0xff]  ;;  %v5418_v28 = vld [vmem:[#allocation3 + $0xc8] sm:$0xff] }
 0x249   :  { %v904_v32 = vmul.f32 %v3437_v62, %v5061_v45  ;;  %v3439_v36 = vpop.eup %3438  ;;  %v5322_v45 = vld [vmem:[#allocation3 + $0x1c8] sm:$0xff]  ;;  %8862 = vst [vmem:[#allocation21_spill] sm:$0xff] %v5415_v27  ;;  %8863 = vst [vmem:[#allocation22_spill] sm:$0xff] %v5418_v28  ;;  %v5421_v62 = vld [vmem:[#allocation3 + $0xd8] sm:$0xff] }
 0x24a   :  { %8864 = vst [vmem:[#allocation23_spill] sm:$0xff] %v5421_v62 }
 0x24b   :  { %v5309_v34 = vadd.f32 %v905_v31, %v904_v32  ;;  %v5427_v31 = vld [vmem:[#allocation3 + $0xd0] sm:$0xff]  ;;  %v5430_v32 = vld [vmem:[#allocation3 + $0xa8] sm:$0xff] }
 0x24c   :  { %8866 = vst [vmem:[#allocation25_spill] sm:$0xff] %v5427_v31  ;;  %8867 = vst [vmem:[#allocation26_spill] sm:$0xff] %v5430_v32 }
 0x24d   :  { %3440 = vtanh.f32 %v5309_v34 }
 0x25a   :  { %v3441_v37 = vpop.eup %3440 }
 0x25b   :  { %v5312_v38 = vmul.f32 %v3441_v37, %v3439_v36  ;;  %v5433_v36 = vld [vmem:[#allocation3 + $0xb8] sm:$0xff]  ;;  %v5436_v37 = vld [vmem:[#allocation3 + $0xa0] sm:$0xff] }
 0x25c   :  { %8868 = vst [vmem:[#allocation27_spill] sm:$0xff] %v5433_v36  ;;  %8869 = vst [vmem:[#allocation28_spill] sm:$0xff] %v5436_v37 }
 0x25d   :  { %974 = vmatmul.mubr.f32.vlgmr.msra.gmra.mxu0 %v5312_v38  ;;  %1045 = vmatmul.mubr.f32.vlgmr.msra.gmra.mxu1 %v5312_v38 }
 0x25e   :  { %1095 = vmatpush1.msra.mxu0 %v5316_v39  ;;  %1166 = vmatpush1.msra.mxu1 %v5319_v40 }
 0x25f   :  { %1096 = vmatprep.subr.mxu0 %v5322_v45  ;;  %1167 = vmatprep.subr.mxu1 %v5325_v41 }
 0x260   :  { %1097 = vmatpush1.msra.mxu0 %v5328_v43  ;;  %1168 = vmatpush1.msra.mxu1 %v5331_v42 }
 0x261   :  { %1098 = vmatprep.subr.mxu0 %v5334_v61  ;;  %1169 = vmatprep.subr.mxu1 %v5337_v55 }
 0x262   :  { %1099 = vmatpush1.msra.mxu0 %v5340_v59  ;;  %1170 = vmatpush1.msra.mxu1 %v5343_v57 }
 0x263   :  { %1100 = vmatprep.subr.mxu0 %v5346_v2  ;;  %1171 = vmatprep.subr.mxu1 %v5349_v53 }
 0x264   :  { %1101 = vmatpush1.msra.mxu0 %v5352_v54  ;;  %1172 = vmatpush1.msra.mxu1 %v5355_v63 }
 0x265   :  { %1102 = vmatprep.subr.mxu0 %v5358_v52  ;;  %1173 = vmatprep.subr.mxu1 %v5361_v4 }
 0x266   :  { %1103 = vmatpush1.msra.mxu0 %v5364_v50  ;;  %1174 = vmatpush1.msra.mxu1 %v5367_v6 }
 0x267   :  { %1104 = vmatprep.subr.mxu0 %v5370_v7  ;;  %1175 = vmatprep.subr.mxu1 %v5373_v8 }
 0x268   :  { %1105 = vmatpush1.msra.mxu0 %v5376_v10  ;;  %1176 = vmatpush1.msra.mxu1 %v5379_v11 }
 0x269   :  { %1106 = vmatprep.subr.mxu0 %v5382_v12  ;;  %1177 = vmatprep.subr.mxu1 %v5385_v14 }
 0x26a   :  { %1107 = vmatpush1.msra.mxu0 %v5388_v15  ;;  %1178 = vmatpush1.msra.mxu1 %v5391_v18 }
 0x26b   :  { %1108 = vmatprep.subr.mxu0 %v5394_v19  ;;  %1179 = vmatprep.subr.mxu1 %v5397_v20 }
 0x26c   :  { %1109 = vmatpush1.msra.mxu0 %v5400_v21  ;;  %1180 = vmatpush1.msra.mxu1 %v5403_v22 }
 0x26d   :  { %1110 = vmatprep.subr.mxu0 %v5406_v23  ;;  %1181 = vmatprep.subr.mxu1 %v5409_v56 }
 0x26e   :  { %1111 = vmatpush1.msra.mxu0 %v5412_v25  ;;  %1182 = vmatpush1.msra.mxu1 %v5415_v27 }
 0x26f   :  { %1112 = vmatprep.subr.mxu0 %v5418_v28  ;;  %1183 = vmatprep.subr.mxu1 %v5421_v62  ;;  %v5439_v62 = vld [vmem:[#allocation3 + $0xb0] sm:$0xff] }
 0x270   :  { %1113 = vmatpush1.msra.mxu0 %v5424_v30  ;;  %1184 = vmatpush1.msra.mxu1 %v5427_v31  ;;  %8870 = vst [vmem:[#allocation29_spill] sm:$0xff] %v5439_v62  ;;  %v5442_v30 = vld [vmem:[#allocation3 + $0x88] sm:$0xff]  ;;  %v5445_v31 = vld [vmem:[#allocation3 + $0x98] sm:$0xff] }
 0x271   :  { %1114 = vmatprep.subr.mxu0 %v5430_v32  ;;  %1185 = vmatprep.subr.mxu1 %v5433_v36  ;;  %8871 = vst [vmem:[#allocation30_spill] sm:$0xff] %v5442_v30  ;;  %8872 = vst [vmem:[#allocation31_spill] sm:$0xff] %v5445_v31  ;;  %v5448_v32 = vld [vmem:[#allocation3 + $0x80] sm:$0xff]  ;;  %v5451_v36 = vld [vmem:[#allocation3 + $0x90] sm:$0xff] }
 0x272   :  { %1115 = vmatpush1.msra.mxu0 %v5436_v37  ;;  %1186 = vmatpush1.msra.mxu1 %v5439_v62  ;;  %8873 = vst [vmem:[#allocation32_spill] sm:$0xff] %v5448_v32  ;;  %8874 = vst [vmem:[#allocation33_spill] sm:$0xff] %v5451_v36  ;;  %v5454_v37 = vld [vmem:[#allocation3 + $0x68] sm:$0xff]  ;;  %v5457_v62 = vld [vmem:[#allocation3 + $0x78] sm:$0xff] }
 0x273   :  { %1116 = vmatprep.subr.mxu0 %v5442_v30  ;;  %1187 = vmatprep.subr.mxu1 %v5445_v31  ;;  %8875 = vst [vmem:[#allocation34_spill] sm:$0xff] %v5454_v37  ;;  %8876 = vst [vmem:[#allocation35_spill] sm:$0xff] %v5457_v62  ;;  %v5460_v30 = vld [vmem:[#allocation3 + $0x60] sm:$0xff]  ;;  %v5463_v31 = vld [vmem:[#allocation3 + $0x70] sm:$0xff] }
 0x274   :  { %1117 = vmatpush1.msra.mxu0 %v5448_v32  ;;  %1188 = vmatpush1.msra.mxu1 %v5451_v36  ;;  %8877 = vst [vmem:[#allocation36_spill] sm:$0xff] %v5460_v30  ;;  %8878 = vst [vmem:[#allocation37_spill] sm:$0xff] %v5463_v31  ;;  %v5466_v32 = vld [vmem:[#allocation3 + $0x48] sm:$0xff]  ;;  %v5469_v36 = vld [vmem:[#allocation3 + $0x58] sm:$0xff] }
 0x275   :  { %1118 = vmatprep.subr.mxu0 %v5454_v37  ;;  %1189 = vmatprep.subr.mxu1 %v5457_v62  ;;  %8879 = vst [vmem:[#allocation38_spill] sm:$0xff] %v5466_v32  ;;  %8880 = vst [vmem:[#allocation39_spill] sm:$0xff] %v5469_v36  ;;  %v5472_v37 = vld [vmem:[#allocation3 + $0x40] sm:$0xff]  ;;  %v5475_v62 = vld [vmem:[#allocation3 + $0x50] sm:$0xff] }
 0x276   :  { %1119 = vmatpush1.msra.mxu0 %v5460_v30  ;;  %1190 = vmatpush1.msra.mxu1 %v5463_v31  ;;  %8881 = vst [vmem:[#allocation40_spill] sm:$0xff] %v5472_v37  ;;  %8882 = vst [vmem:[#allocation41_spill] sm:$0xff] %v5475_v62  ;;  %v5478_v30 = vld [vmem:[#allocation3 + $0x28] sm:$0xff]  ;;  %v5481_v31 = vld [vmem:[#allocation3 + $0x38] sm:$0xff] }
 0x277   :  { %1120 = vmatprep.subr.mxu0 %v5466_v32  ;;  %1191 = vmatprep.subr.mxu1 %v5469_v36  ;;  %8883 = vst [vmem:[#allocation42_spill] sm:$0xff] %v5478_v30  ;;  %8884 = vst [vmem:[#allocation43_spill] sm:$0xff] %v5481_v31  ;;  %v5484_v32 = vld [vmem:[#allocation3 + $0x20] sm:$0xff]  ;;  %v5487_v36 = vld [vmem:[#allocation3 + $0x30] sm:$0xff] }
 0x278   :  { %1121 = vmatpush1.msra.mxu0 %v5472_v37  ;;  %1192 = vmatpush1.msra.mxu1 %v5475_v62  ;;  %8885 = vst [vmem:[#allocation44_spill] sm:$0xff] %v5484_v32  ;;  %8886 = vst [vmem:[#allocation45_spill] sm:$0xff] %v5487_v36  ;;  %v5490_v37 = vld [vmem:[#allocation3 + $0x8] sm:$0xff]  ;;  %v5493_v62 = vld [vmem:[#allocation3 + $0x18] sm:$0xff] }
 0x279   :  { %1122 = vmatprep.subr.mxu0 %v5478_v30  ;;  %1193 = vmatprep.subr.mxu1 %v5481_v31  ;;  %8887 = vst [vmem:[#allocation46_spill] sm:$0xff] %v5490_v37  ;;  %8888 = vst [vmem:[#allocation47_spill] sm:$0xff] %v5493_v62  ;;  %v5496_v30 = vld [vmem:[#allocation3] sm:$0xff]  ;;  %v5500_v31 = vld [vmem:[#allocation3 + $0x10] sm:$0xff] }
 0x27a   :  { %1123 = vmatpush1.msra.mxu0 %v5484_v32  ;;  %1194 = vmatpush1.msra.mxu1 %v5487_v36  ;;  %8889 = vst [vmem:[#allocation48_spill] sm:$0xff] %v5496_v30  ;;  %8890 = vst [vmem:[#allocation49_spill] sm:$0xff] %v5500_v31  ;;  %v5515_v36 = vld [vmem:[#allocation6 + $0x1f0] sm:$0xff] }
 0x27b   :  { %1124 = vmatprep.subr.mxu0 %v5490_v37  ;;  %1195 = vmatprep.subr.mxu1 %v5493_v62  ;;  %v5506_v37 = vld [vmem:[#allocation6 + $0x1e8] sm:$0xff]  ;;  %v5509_v62 = vld [vmem:[#allocation6 + $0x1f8] sm:$0xff]  ;;  %8894 = vst [vmem:[#allocation53_spill] sm:$0xff] %v5515_v36 }
 0x27c   :  { %1125 = vmatpush1.msra.mxu0 %v5496_v30  ;;  %1158 = vmatprep.mubr.f32.mxu0 %v8716_v29  ;;  %8891 = vst [vmem:[#allocation50_spill] sm:$0xff] %v5506_v37  ;;  %8892 = vst [vmem:[#allocation51_spill] sm:$0xff] %v5509_v62  ;;  %v5512_v30 = vld [vmem:[#allocation6 + $0x1e0] sm:$0xff] }
 0x27d   :  { %1196 = vmatpush1.msra.mxu1 %v5500_v31  ;;  %1229 = vmatprep.mubr.f32.mxu1 %v8716_v29  ;;  %8893 = vst [vmem:[#allocation52_spill] sm:$0xff] %v5512_v30  ;;  %v5518_v31 = vld [vmem:[#allocation6 + $0x1c8] sm:$0xff] }
 0x27e   :  { %1159 = vmatmul.mubr.f32.vlgmr.msra.gmra.mxu0 %v5312_v38  ;;  %1230 = vmatmul.mubr.f32.vlgmr.msra.gmra.mxu1 %v5312_v38  ;;  %8895 = vst [vmem:[#allocation54_spill] sm:$0xff] %v5518_v31  ;;  %v5521_v38 = vld [vmem:[#allocation6 + $0x1d8] sm:$0xff] }
 0x27f   :  { %1276 = vmatprep.subr.mxu0 %v5506_v37  ;;  %1347 = vmatprep.subr.mxu1 %v5509_v62  ;;  %8896 = vst [vmem:[#allocation55_spill] sm:$0xff] %v5521_v38  ;;  %v5524_v37 = vld [vmem:[#allocation6 + $0x1c0] sm:$0xff]  ;;  %v5527_v62 = vld [vmem:[#allocation6 + $0x1d0] sm:$0xff] }
 0x280   :  { %1277 = vmatpush1.msra.mxu0 %v5512_v30  ;;  %1348 = vmatpush1.msra.mxu1 %v5515_v36  ;;  %8897 = vst [vmem:[#allocation56_spill] sm:$0xff] %v5524_v37  ;;  %8898 = vst [vmem:[#allocation57_spill] sm:$0xff] %v5527_v62  ;;  %v5530_v30 = vld [vmem:[#allocation6 + $0x1a8] sm:$0xff]  ;;  %v5533_v36 = vld [vmem:[#allocation6 + $0x1b8] sm:$0xff] }
 0x281   :  { %1278 = vmatprep.subr.mxu0 %v5518_v31  ;;  %1349 = vmatprep.subr.mxu1 %v5521_v38  ;;  %8899 = vst [vmem:[#allocation58_spill] sm:$0xff] %v5530_v30  ;;  %8900 = vst [vmem:[#allocation59_spill] sm:$0xff] %v5533_v36  ;;  %v5536_v31 = vld [vmem:[#allocation6 + $0x1a0] sm:$0xff]  ;;  %v5539_v38 = vld [vmem:[#allocation6 + $0x1b0] sm:$0xff] }
 0x282   :  { %1279 = vmatpush1.msra.mxu0 %v5524_v37  ;;  %1350 = vmatpush1.msra.mxu1 %v5527_v62  ;;  %8901 = vst [vmem:[#allocation60_spill] sm:$0xff] %v5536_v31  ;;  %8902 = vst [vmem:[#allocation61_spill] sm:$0xff] %v5539_v38  ;;  %v5542_v37 = vld [vmem:[#allocation6 + $0x188] sm:$0xff]  ;;  %v5545_v62 = vld [vmem:[#allocation6 + $0x198] sm:$0xff] }
 0x283   :  { %1280 = vmatprep.subr.mxu0 %v5530_v30  ;;  %1351 = vmatprep.subr.mxu1 %v5533_v36  ;;  %8903 = vst [vmem:[#allocation62_spill] sm:$0xff] %v5542_v37  ;;  %8904 = vst [vmem:[#allocation63_spill] sm:$0xff] %v5545_v62  ;;  %v5548_v30 = vld [vmem:[#allocation6 + $0x180] sm:$0xff]  ;;  %v5551_v36 = vld [vmem:[#allocation6 + $0x190] sm:$0xff] }
 0x284   :  { %1281 = vmatpush1.msra.mxu0 %v5536_v31  ;;  %1352 = vmatpush1.msra.mxu1 %v5539_v38  ;;  %8905 = vst [vmem:[#allocation64_spill] sm:$0xff] %v5548_v30  ;;  %8906 = vst [vmem:[#allocation65_spill] sm:$0xff] %v5551_v36  ;;  %v5554_v31 = vld [vmem:[#allocation6 + $0x168] sm:$0xff]  ;;  %v5557_v38 = vld [vmem:[#allocation6 + $0x178] sm:$0xff] }
 0x285   :  { %1282 = vmatprep.subr.mxu0 %v5542_v37  ;;  %1353 = vmatprep.subr.mxu1 %v5545_v62  ;;  %8907 = vst [vmem:[#allocation66_spill] sm:$0xff] %v5554_v31  ;;  %8908 = vst [vmem:[#allocation67_spill] sm:$0xff] %v5557_v38  ;;  %v5560_v37 = vld [vmem:[#allocation6 + $0x160] sm:$0xff]  ;;  %v5563_v62 = vld [vmem:[#allocation6 + $0x170] sm:$0xff] }
 0x286   :  { %1283 = vmatpush1.msra.mxu0 %v5548_v30  ;;  %1354 = vmatpush1.msra.mxu1 %v5551_v36  ;;  %8909 = vst [vmem:[#allocation68_spill] sm:$0xff] %v5560_v37  ;;  %8910 = vst [vmem:[#allocation69_spill] sm:$0xff] %v5563_v62  ;;  %v5566_v30 = vld [vmem:[#allocation6 + $0x148] sm:$0xff]  ;;  %v5569_v36 = vld [vmem:[#allocation6 + $0x158] sm:$0xff] }
 0x287   :  { %1284 = vmatprep.subr.mxu0 %v5554_v31  ;;  %1355 = vmatprep.subr.mxu1 %v5557_v38  ;;  %8911 = vst [vmem:[#allocation70_spill] sm:$0xff] %v5566_v30  ;;  %8912 = vst [vmem:[#allocation71_spill] sm:$0xff] %v5569_v36  ;;  %v5572_v31 = vld [vmem:[#allocation6 + $0x140] sm:$0xff]  ;;  %v5575_v38 = vld [vmem:[#allocation6 + $0x150] sm:$0xff] }
 0x288   :  { %1285 = vmatpush1.msra.mxu0 %v5560_v37  ;;  %1356 = vmatpush1.msra.mxu1 %v5563_v62  ;;  %8913 = vst [vmem:[#allocation72_spill] sm:$0xff] %v5572_v31  ;;  %8914 = vst [vmem:[#allocation73_spill] sm:$0xff] %v5575_v38  ;;  %v5578_v37 = vld [vmem:[#allocation6 + $0x128] sm:$0xff]  ;;  %v5581_v62 = vld [vmem:[#allocation6 + $0x138] sm:$0xff] }
 0x289   :  { %1286 = vmatprep.subr.mxu0 %v5566_v30  ;;  %1357 = vmatprep.subr.mxu1 %v5569_v36  ;;  %8915 = vst [vmem:[#allocation74_spill] sm:$0xff] %v5578_v37  ;;  %8916 = vst [vmem:[#allocation75_spill] sm:$0xff] %v5581_v62  ;;  %v5584_v30 = vld [vmem:[#allocation6 + $0x120] sm:$0xff]  ;;  %v5587_v36 = vld [vmem:[#allocation6 + $0x130] sm:$0xff] }
 0x28a   :  { %1287 = vmatpush1.msra.mxu0 %v5572_v31  ;;  %1358 = vmatpush1.msra.mxu1 %v5575_v38  ;;  %8917 = vst [vmem:[#allocation76_spill] sm:$0xff] %v5584_v30  ;;  %8918 = vst [vmem:[#allocation77_spill] sm:$0xff] %v5587_v36  ;;  %v5590_v31 = vld [vmem:[#allocation6 + $0x108] sm:$0xff]  ;;  %v5593_v38 = vld [vmem:[#allocation6 + $0x118] sm:$0xff] }
 0x28b   :  { %1288 = vmatprep.subr.mxu0 %v5578_v37  ;;  %1359 = vmatprep.subr.mxu1 %v5581_v62  ;;  %8919 = vst [vmem:[#allocation78_spill] sm:$0xff] %v5590_v31  ;;  %8920 = vst [vmem:[#allocation79_spill] sm:$0xff] %v5593_v38  ;;  %v5596_v37 = vld [vmem:[#allocation6 + $0x100] sm:$0xff]  ;;  %v5599_v62 = vld [vmem:[#allocation6 + $0x110] sm:$0xff] }
 0x28c   :  { %1289 = vmatpush1.msra.mxu0 %v5584_v30  ;;  %1360 = vmatpush1.msra.mxu1 %v5587_v36  ;;  %8921 = vst [vmem:[#allocation80_spill] sm:$0xff] %v5596_v37  ;;  %8922 = vst [vmem:[#allocation81_spill] sm:$0xff] %v5599_v62  ;;  %v5602_v30 = vld [vmem:[#allocation6 + $0xe8] sm:$0xff]  ;;  %v5605_v36 = vld [vmem:[#allocation6 + $0xf8] sm:$0xff] }
 0x28d   :  { %1290 = vmatprep.subr.mxu0 %v5590_v31  ;;  %1361 = vmatprep.subr.mxu1 %v5593_v38  ;;  %8923 = vst [vmem:[#allocation82_spill] sm:$0xff] %v5602_v30  ;;  %8924 = vst [vmem:[#allocation83_spill] sm:$0xff] %v5605_v36  ;;  %v5608_v31 = vld [vmem:[#allocation6 + $0xe0] sm:$0xff]  ;;  %v5611_v38 = vld [vmem:[#allocation6 + $0xf0] sm:$0xff] }
 0x28e   :  { %1291 = vmatpush1.msra.mxu0 %v5596_v37  ;;  %1362 = vmatpush1.msra.mxu1 %v5599_v62  ;;  %8925 = vst [vmem:[#allocation84_spill] sm:$0xff] %v5608_v31  ;;  %8926 = vst [vmem:[#allocation85_spill] sm:$0xff] %v5611_v38  ;;  %v5614_v37 = vld [vmem:[#allocation6 + $0xc8] sm:$0xff]  ;;  %v5617_v62 = vld [vmem:[#allocation6 + $0xd8] sm:$0xff] }
 0x28f   :  { %1292 = vmatprep.subr.mxu0 %v5602_v30  ;;  %1363 = vmatprep.subr.mxu1 %v5605_v36  ;;  %8927 = vst [vmem:[#allocation86_spill] sm:$0xff] %v5614_v37  ;;  %8928 = vst [vmem:[#allocation87_spill] sm:$0xff] %v5617_v62  ;;  %v5620_v30 = vld [vmem:[#allocation6 + $0xc0] sm:$0xff]  ;;  %v5623_v36 = vld [vmem:[#allocation6 + $0xd0] sm:$0xff] }
 0x290   :  { %1293 = vmatpush1.msra.mxu0 %v5608_v31  ;;  %1364 = vmatpush1.msra.mxu1 %v5611_v38  ;;  %8929 = vst [vmem:[#allocation88_spill] sm:$0xff] %v5620_v30  ;;  %8930 = vst [vmem:[#allocation89_spill] sm:$0xff] %v5623_v36  ;;  %v5626_v31 = vld [vmem:[#allocation6 + $0xa8] sm:$0xff]  ;;  %v5629_v38 = vld [vmem:[#allocation6 + $0xb8] sm:$0xff] }
 0x291   :  { %1294 = vmatprep.subr.mxu0 %v5614_v37  ;;  %1365 = vmatprep.subr.mxu1 %v5617_v62  ;;  %8931 = vst [vmem:[#allocation90_spill] sm:$0xff] %v5626_v31  ;;  %8932 = vst [vmem:[#allocation91_spill] sm:$0xff] %v5629_v38  ;;  %v5632_v37 = vld [vmem:[#allocation6 + $0xa0] sm:$0xff]  ;;  %v5635_v62 = vld [vmem:[#allocation6 + $0xb0] sm:$0xff] }
 0x292   :  { %1295 = vmatpush1.msra.mxu0 %v5620_v30  ;;  %1366 = vmatpush1.msra.mxu1 %v5623_v36  ;;  %8933 = vst [vmem:[#allocation92_spill] sm:$0xff] %v5632_v37  ;;  %8934 = vst [vmem:[#allocation93_spill] sm:$0xff] %v5635_v62  ;;  %v5638_v30 = vld [vmem:[#allocation6 + $0x88] sm:$0xff]  ;;  %v5641_v36 = vld [vmem:[#allocation6 + $0x98] sm:$0xff] }
 0x293   :  { %1296 = vmatprep.subr.mxu0 %v5626_v31  ;;  %1367 = vmatprep.subr.mxu1 %v5629_v38  ;;  %8935 = vst [vmem:[#allocation94_spill] sm:$0xff] %v5638_v30  ;;  %8936 = vst [vmem:[#allocation95_spill] sm:$0xff] %v5641_v36  ;;  %v5644_v31 = vld [vmem:[#allocation6 + $0x80] sm:$0xff]  ;;  %v5647_v38 = vld [vmem:[#allocation6 + $0x90] sm:$0xff] }
 0x294   :  { %1297 = vmatpush1.msra.mxu0 %v5632_v37  ;;  %1368 = vmatpush1.msra.mxu1 %v5635_v62  ;;  %8937 = vst [vmem:[#allocation96_spill] sm:$0xff] %v5644_v31  ;;  %8938 = vst [vmem:[#allocation97_spill] sm:$0xff] %v5647_v38  ;;  %v5650_v37 = vld [vmem:[#allocation6 + $0x68] sm:$0xff]  ;;  %v5653_v62 = vld [vmem:[#allocation6 + $0x78] sm:$0xff] }
 0x295   :  { %1298 = vmatprep.subr.mxu0 %v5638_v30  ;;  %1369 = vmatprep.subr.mxu1 %v5641_v36  ;;  %8939 = vst [vmem:[#allocation98_spill] sm:$0xff] %v5650_v37  ;;  %8940 = vst [vmem:[#allocation99_spill] sm:$0xff] %v5653_v62  ;;  %v5656_v30 = vld [vmem:[#allocation6 + $0x60] sm:$0xff]  ;;  %v5659_v36 = vld [vmem:[#allocation6 + $0x70] sm:$0xff] }
 0x296   :  { %1299 = vmatpush1.msra.mxu0 %v5644_v31  ;;  %1370 = vmatpush1.msra.mxu1 %v5647_v38  ;;  %8941 = vst [vmem:[#allocation100_spill] sm:$0xff] %v5656_v30  ;;  %8942 = vst [vmem:[#allocation101_spill] sm:$0xff] %v5659_v36  ;;  %v5662_v31 = vld [vmem:[#allocation6 + $0x48] sm:$0xff]  ;;  %v5665_v38 = vld [vmem:[#allocation6 + $0x58] sm:$0xff] }
 0x297   :  { %1300 = vmatprep.subr.mxu0 %v5650_v37  ;;  %1371 = vmatprep.subr.mxu1 %v5653_v62  ;;  %8943 = vst [vmem:[#allocation102_spill] sm:$0xff] %v5662_v31  ;;  %8944 = vst [vmem:[#allocation103_spill] sm:$0xff] %v5665_v38  ;;  %v5668_v37 = vld [vmem:[#allocation6 + $0x40] sm:$0xff]  ;;  %v5671_v62 = vld [vmem:[#allocation6 + $0x50] sm:$0xff] }
 0x298   :  { %1301 = vmatpush1.msra.mxu0 %v5656_v30  ;;  %1372 = vmatpush1.msra.mxu1 %v5659_v36  ;;  %8945 = vst [vmem:[#allocation104_spill] sm:$0xff] %v5668_v37  ;;  %8946 = vst [vmem:[#allocation105_spill] sm:$0xff] %v5671_v62  ;;  %v5674_v30 = vld [vmem:[#allocation6 + $0x28] sm:$0xff]  ;;  %v5677_v36 = vld [vmem:[#allocation6 + $0x38] sm:$0xff] }
 0x299   :  { %1302 = vmatprep.subr.mxu0 %v5662_v31  ;;  %1373 = vmatprep.subr.mxu1 %v5665_v38  ;;  %8947 = vst [vmem:[#allocation106_spill] sm:$0xff] %v5674_v30  ;;  %8948 = vst [vmem:[#allocation107_spill] sm:$0xff] %v5677_v36  ;;  %v5680_v31 = vld [vmem:[#allocation6 + $0x20] sm:$0xff]  ;;  %v5683_v38 = vld [vmem:[#allocation6 + $0x30] sm:$0xff] }
 0x29a   :  { %1303 = vmatpush1.msra.mxu0 %v5668_v37  ;;  %1374 = vmatpush1.msra.mxu1 %v5671_v62  ;;  %8949 = vst [vmem:[#allocation108_spill] sm:$0xff] %v5680_v31  ;;  %8950 = vst [vmem:[#allocation109_spill] sm:$0xff] %v5683_v38  ;;  %v5686_v37 = vld [vmem:[#allocation6 + $0x8] sm:$0xff]  ;;  %v5689_v62 = vld [vmem:[#allocation6 + $0x18] sm:$0xff] }
 0x29b   :  { %1304 = vmatprep.subr.mxu0 %v5674_v30  ;;  %1375 = vmatprep.subr.mxu1 %v5677_v36  ;;  %8951 = vst [vmem:[#allocation110_spill] sm:$0xff] %v5686_v37  ;;  %8952 = vst [vmem:[#allocation111_spill] sm:$0xff] %v5689_v62  ;;  %v5692_v30 = vld [vmem:[#allocation6] sm:$0xff]  ;;  %v5695_v36 = vld [vmem:[#allocation6 + $0x10] sm:$0xff] }
 0x29c   :  { %1305 = vmatpush1.msra.mxu0 %v5680_v31  ;;  %1376 = vmatpush1.msra.mxu1 %v5683_v38  ;;  %8953 = vst [vmem:[#allocation112_spill] sm:$0xff] %v5692_v30  ;;  %8954 = vst [vmem:[#allocation113_spill] sm:$0xff] %v5695_v36  ;;  %v5698_v31 = vld [vmem:[#allocation6 + $0x3e8] sm:$0xff]  ;;  %v5701_v38 = vld [vmem:[#allocation6 + $0x3f8] sm:$0xff] }
 0x29d   :  { %1306 = vmatprep.subr.mxu0 %v5686_v37  ;;  %1377 = vmatprep.subr.mxu1 %v5689_v62  ;;  %8955 = vst [vmem:[#allocation114_spill] sm:$0xff] %v5698_v31  ;;  %8956 = vst [vmem:[#allocation115_spill] sm:$0xff] %v5701_v38  ;;  %v5704_v37 = vld [vmem:[#allocation6 + $0x3e0] sm:$0xff]  ;;  %v5707_v62 = vld [vmem:[#allocation6 + $0x3f0] sm:$0xff] }
 0x29e   :  { %1307 = vmatpush1.msra.mxu0 %v5692_v30  ;;  %1378 = vmatpush1.msra.mxu1 %v5695_v36  ;;  %8957 = vst [vmem:[#allocation116_spill] sm:$0xff] %v5704_v37  ;;  %8958 = vst [vmem:[#allocation117_spill] sm:$0xff] %v5707_v62  ;;  %v5710_v30 = vld [vmem:[#allocation6 + $0x3c8] sm:$0xff]  ;;  %v5713_v36 = vld [vmem:[#allocation6 + $0x3d8] sm:$0xff] }
 0x29f   :  { %1308 = vmatprep.subr.mxu0 %v5698_v31  ;;  %1379 = vmatprep.subr.mxu1 %v5701_v38  ;;  %8959 = vst [vmem:[#allocation118_spill] sm:$0xff] %v5710_v30  ;;  %8960 = vst [vmem:[#allocation119_spill] sm:$0xff] %v5713_v36  ;;  %v5716_v31 = vld [vmem:[#allocation6 + $0x3c0] sm:$0xff]  ;;  %v5719_v38 = vld [vmem:[#allocation6 + $0x3d0] sm:$0xff] }
 0x2a0   :  { %1309 = vmatpush2.msra.mxu0 %v5704_v37  ;;  %1380 = vmatpush2.msra.mxu1 %v5707_v62  ;;  %8961 = vst [vmem:[#allocation120_spill] sm:$0xff] %v5716_v31  ;;  %8962 = vst [vmem:[#allocation121_spill] sm:$0xff] %v5719_v38  ;;  %v5722_v37 = vld [vmem:[#allocation6 + $0x3a8] sm:$0xff]  ;;  %v5725_v62 = vld [vmem:[#allocation6 + $0x3b8] sm:$0xff] }
 0x2a1   :  { %1310 = vmatprep.subr.mxu0 %v5710_v30  ;;  %1381 = vmatprep.subr.mxu1 %v5713_v36  ;;  %8963 = vst [vmem:[#allocation122_spill] sm:$0xff] %v5722_v37  ;;  %8964 = vst [vmem:[#allocation123_spill] sm:$0xff] %v5725_v62  ;;  %v5728_v30 = vld [vmem:[#allocation6 + $0x3a0] sm:$0xff]  ;;  %v5731_v36 = vld [vmem:[#allocation6 + $0x3b0] sm:$0xff] }
 0x2a2   :  { %1311 = vmatpush2.msra.mxu0 %v5716_v31  ;;  %1382 = vmatpush2.msra.mxu1 %v5719_v38  ;;  %8965 = vst [vmem:[#allocation124_spill] sm:$0xff] %v5728_v30  ;;  %8966 = vst [vmem:[#allocation125_spill] sm:$0xff] %v5731_v36  ;;  %v5734_v31 = vld [vmem:[#allocation6 + $0x388] sm:$0xff]  ;;  %v5737_v38 = vld [vmem:[#allocation6 + $0x398] sm:$0xff] }
 0x2a3   :  { %1312 = vmatprep.subr.mxu0 %v5722_v37  ;;  %1383 = vmatprep.subr.mxu1 %v5725_v62  ;;  %8967 = vst [vmem:[#allocation126_spill] sm:$0xff] %v5734_v31  ;;  %8968 = vst [vmem:[#allocation127_spill] sm:$0xff] %v5737_v38  ;;  %v5740_v37 = vld [vmem:[#allocation6 + $0x380] sm:$0xff]  ;;  %v5743_v62 = vld [vmem:[#allocation6 + $0x390] sm:$0xff] }
 0x2a4   :  { %1313 = vmatpush2.msra.mxu0 %v5728_v30  ;;  %1384 = vmatpush2.msra.mxu1 %v5731_v36  ;;  %8969 = vst [vmem:[#allocation128_spill] sm:$0xff] %v5740_v37  ;;  %8970 = vst [vmem:[#allocation129_spill] sm:$0xff] %v5743_v62  ;;  %v5746_v30 = vld [vmem:[#allocation6 + $0x368] sm:$0xff]  ;;  %v5749_v36 = vld [vmem:[#allocation6 + $0x378] sm:$0xff] }
 0x2a5   :  { %1314 = vmatprep.subr.mxu0 %v5734_v31  ;;  %1385 = vmatprep.subr.mxu1 %v5737_v38  ;;  %8971 = vst [vmem:[#allocation130_spill] sm:$0xff] %v5746_v30  ;;  %8972 = vst [vmem:[#allocation131_spill] sm:$0xff] %v5749_v36  ;;  %v5752_v31 = vld [vmem:[#allocation6 + $0x360] sm:$0xff]  ;;  %v5755_v38 = vld [vmem:[#allocation6 + $0x370] sm:$0xff] }
 0x2a6   :  { %1315 = vmatpush2.msra.mxu0 %v5740_v37  ;;  %1386 = vmatpush2.msra.mxu1 %v5743_v62  ;;  %8973 = vst [vmem:[#allocation132_spill] sm:$0xff] %v5752_v31  ;;  %8974 = vst [vmem:[#allocation133_spill] sm:$0xff] %v5755_v38  ;;  %v5758_v37 = vld [vmem:[#allocation6 + $0x348] sm:$0xff]  ;;  %v5761_v62 = vld [vmem:[#allocation6 + $0x358] sm:$0xff] }
 0x2a7   :  { %1316 = vmatprep.subr.mxu0 %v5746_v30  ;;  %1387 = vmatprep.subr.mxu1 %v5749_v36  ;;  %8975 = vst [vmem:[#allocation134_spill] sm:$0xff] %v5758_v37  ;;  %8976 = vst [vmem:[#allocation135_spill] sm:$0xff] %v5761_v62  ;;  %v5764_v30 = vld [vmem:[#allocation6 + $0x340] sm:$0xff]  ;;  %v5767_v36 = vld [vmem:[#allocation6 + $0x350] sm:$0xff] }
 0x2a8   :  { %1317 = vmatpush2.msra.mxu0 %v5752_v31  ;;  %1388 = vmatpush2.msra.mxu1 %v5755_v38  ;;  %8977 = vst [vmem:[#allocation136_spill] sm:$0xff] %v5764_v30  ;;  %8978 = vst [vmem:[#allocation137_spill] sm:$0xff] %v5767_v36  ;;  %v5770_v31 = vld [vmem:[#allocation6 + $0x328] sm:$0xff]  ;;  %v5773_v38 = vld [vmem:[#allocation6 + $0x338] sm:$0xff] }
 0x2a9   :  { %1318 = vmatprep.subr.mxu0 %v5758_v37  ;;  %1389 = vmatprep.subr.mxu1 %v5761_v62  ;;  %8979 = vst [vmem:[#allocation138_spill] sm:$0xff] %v5770_v31  ;;  %8980 = vst [vmem:[#allocation139_spill] sm:$0xff] %v5773_v38  ;;  %v5776_v37 = vld [vmem:[#allocation6 + $0x320] sm:$0xff]  ;;  %v5779_v62 = vld [vmem:[#allocation6 + $0x330] sm:$0xff] }
 0x2aa   :  { %1319 = vmatpush2.msra.mxu0 %v5764_v30  ;;  %1390 = vmatpush2.msra.mxu1 %v5767_v36  ;;  %8981 = vst [vmem:[#allocation140_spill] sm:$0xff] %v5776_v37  ;;  %8982 = vst [vmem:[#allocation141_spill] sm:$0xff] %v5779_v62  ;;  %v5782_v30 = vld [vmem:[#allocation6 + $0x308] sm:$0xff]  ;;  %v5785_v36 = vld [vmem:[#allocation6 + $0x318] sm:$0xff] }
 0x2ab   :  { %1320 = vmatprep.subr.mxu0 %v5770_v31  ;;  %1391 = vmatprep.subr.mxu1 %v5773_v38  ;;  %8983 = vst [vmem:[#allocation142_spill] sm:$0xff] %v5782_v30  ;;  %8984 = vst [vmem:[#allocation143_spill] sm:$0xff] %v5785_v36  ;;  %v5788_v31 = vld [vmem:[#allocation6 + $0x300] sm:$0xff]  ;;  %v5791_v38 = vld [vmem:[#allocation6 + $0x310] sm:$0xff] }
 0x2ac   :  { %1321 = vmatpush2.msra.mxu0 %v5776_v37  ;;  %1392 = vmatpush2.msra.mxu1 %v5779_v62  ;;  %8985 = vst [vmem:[#allocation144_spill] sm:$0xff] %v5788_v31  ;;  %8986 = vst [vmem:[#allocation145_spill] sm:$0xff] %v5791_v38  ;;  %v5794_v37 = vld [vmem:[#allocation6 + $0x2e8] sm:$0xff]  ;;  %v5797_v62 = vld [vmem:[#allocation6 + $0x2f8] sm:$0xff] }
 0x2ad   :  { %1322 = vmatprep.subr.mxu0 %v5782_v30  ;;  %1393 = vmatprep.subr.mxu1 %v5785_v36  ;;  %8987 = vst [vmem:[#allocation146_spill] sm:$0xff] %v5794_v37  ;;  %8988 = vst [vmem:[#allocation147_spill] sm:$0xff] %v5797_v62  ;;  %v5800_v30 = vld [vmem:[#allocation6 + $0x2e0] sm:$0xff]  ;;  %v5803_v36 = vld [vmem:[#allocation6 + $0x2f0] sm:$0xff] }
 0x2ae   :  { %1323 = vmatpush2.msra.mxu0 %v5788_v31  ;;  %1394 = vmatpush2.msra.mxu1 %v5791_v38  ;;  %8989 = vst [vmem:[#allocation148_spill] sm:$0xff] %v5800_v30  ;;  %8990 = vst [vmem:[#allocation149_spill] sm:$0xff] %v5803_v36  ;;  %v5806_v31 = vld [vmem:[#allocation6 + $0x2c8] sm:$0xff]  ;;  %v5809_v38 = vld [vmem:[#allocation6 + $0x2d8] sm:$0xff] }
 0x2af   :  { %1324 = vmatprep.subr.mxu0 %v5794_v37  ;;  %1395 = vmatprep.subr.mxu1 %v5797_v62  ;;  %8991 = vst [vmem:[#allocation150_spill] sm:$0xff] %v5806_v31  ;;  %8992 = vst [vmem:[#allocation151_spill] sm:$0xff] %v5809_v38  ;;  %v5812_v37 = vld [vmem:[#allocation6 + $0x2c0] sm:$0xff]  ;;  %v5815_v62 = vld [vmem:[#allocation6 + $0x2d0] sm:$0xff] }
 0x2b0   :  { %1325 = vmatpush2.msra.mxu0 %v5800_v30  ;;  %1396 = vmatpush2.msra.mxu1 %v5803_v36  ;;  %8993 = vst [vmem:[#allocation152_spill] sm:$0xff] %v5812_v37  ;;  %8994 = vst [vmem:[#allocation153_spill] sm:$0xff] %v5815_v62  ;;  %v5818_v30 = vld [vmem:[#allocation6 + $0x2a8] sm:$0xff]  ;;  %v5821_v36 = vld [vmem:[#allocation6 + $0x2b8] sm:$0xff] }
 0x2b1   :  { %1326 = vmatprep.subr.mxu0 %v5806_v31  ;;  %1397 = vmatprep.subr.mxu1 %v5809_v38  ;;  %8995 = vst [vmem:[#allocation154_spill] sm:$0xff] %v5818_v30  ;;  %8996 = vst [vmem:[#allocation155_spill] sm:$0xff] %v5821_v36  ;;  %v5824_v31 = vld [vmem:[#allocation6 + $0x2a0] sm:$0xff]  ;;  %v5827_v38 = vld [vmem:[#allocation6 + $0x2b0] sm:$0xff] }
 0x2b2   :  { %1327 = vmatpush2.msra.mxu0 %v5812_v37  ;;  %1398 = vmatpush2.msra.mxu1 %v5815_v62  ;;  %8997 = vst [vmem:[#allocation156_spill] sm:$0xff] %v5824_v31  ;;  %8998 = vst [vmem:[#allocation157_spill] sm:$0xff] %v5827_v38  ;;  %v5830_v37 = vld [vmem:[#allocation6 + $0x288] sm:$0xff]  ;;  %v5833_v62 = vld [vmem:[#allocation6 + $0x298] sm:$0xff] }
 0x2b3   :  { %1328 = vmatprep.subr.mxu0 %v5818_v30  ;;  %1399 = vmatprep.subr.mxu1 %v5821_v36  ;;  %8999 = vst [vmem:[#allocation158_spill] sm:$0xff] %v5830_v37  ;;  %9000 = vst [vmem:[#allocation159_spill] sm:$0xff] %v5833_v62  ;;  %v5836_v30 = vld [vmem:[#allocation6 + $0x280] sm:$0xff]  ;;  %v5839_v36 = vld [vmem:[#allocation6 + $0x290] sm:$0xff] }
 0x2b4   :  { %1329 = vmatpush2.msra.mxu0 %v5824_v31  ;;  %1400 = vmatpush2.msra.mxu1 %v5827_v38  ;;  %9001 = vst [vmem:[#allocation160_spill] sm:$0xff] %v5836_v30  ;;  %9002 = vst [vmem:[#allocation161_spill] sm:$0xff] %v5839_v36  ;;  %v5842_v31 = vld [vmem:[#allocation6 + $0x268] sm:$0xff]  ;;  %v5845_v38 = vld [vmem:[#allocation6 + $0x278] sm:$0xff] }
 0x2b5   :  { %1330 = vmatprep.subr.mxu0 %v5830_v37  ;;  %1401 = vmatprep.subr.mxu1 %v5833_v62  ;;  %9003 = vst [vmem:[#allocation162_spill] sm:$0xff] %v5842_v31  ;;  %9004 = vst [vmem:[#allocation163_spill] sm:$0xff] %v5845_v38  ;;  %v5848_v37 = vld [vmem:[#allocation6 + $0x260] sm:$0xff]  ;;  %v5851_v62 = vld [vmem:[#allocation6 + $0x270] sm:$0xff] }
 0x2b6   :  { %1331 = vmatpush2.msra.mxu0 %v5836_v30  ;;  %1402 = vmatpush2.msra.mxu1 %v5839_v36  ;;  %9005 = vst [vmem:[#allocation164_spill] sm:$0xff] %v5848_v37  ;;  %9006 = vst [vmem:[#allocation165_spill] sm:$0xff] %v5851_v62  ;;  %v5854_v30 = vld [vmem:[#allocation6 + $0x248] sm:$0xff]  ;;  %v5857_v36 = vld [vmem:[#allocation6 + $0x258] sm:$0xff] }
 0x2b7   :  { %1332 = vmatprep.subr.mxu0 %v5842_v31  ;;  %1403 = vmatprep.subr.mxu1 %v5845_v38  ;;  %9007 = vst [vmem:[#allocation167_spill] sm:$0xff] %v5854_v30  ;;  %9008 = vst [vmem:[#allocation170_spill] sm:$0xff] %v5857_v36  ;;  %v5860_v31 = vld [vmem:[#allocation6 + $0x240] sm:$0xff]  ;;  %v5863_v38 = vld [vmem:[#allocation6 + $0x250] sm:$0xff] }
 0x2b8   :  { %1333 = vmatpush2.msra.mxu0 %v5848_v37  ;;  %1404 = vmatpush2.msra.mxu1 %v5851_v62  ;;  %9009 = vst [vmem:[#allocation171_spill] sm:$0xff] %v5860_v31  ;;  %9010 = vst [vmem:[#allocation172_spill] sm:$0xff] %v5863_v38  ;;  %v5866_v37 = vld [vmem:[#allocation6 + $0x228] sm:$0xff]  ;;  %v5869_v62 = vld [vmem:[#allocation6 + $0x238] sm:$0xff] }
 0x2b9   :  { %1334 = vmatprep.subr.mxu0 %v5854_v30  ;;  %1405 = vmatprep.subr.mxu1 %v5857_v36  ;;  %9011 = vst [vmem:[#allocation173_spill] sm:$0xff] %v5866_v37  ;;  %9012 = vst [vmem:[#allocation174_spill] sm:$0xff] %v5869_v62  ;;  %v5872_v30 = vld [vmem:[#allocation6 + $0x220] sm:$0xff]  ;;  %v5875_v36 = vld [vmem:[#allocation6 + $0x230] sm:$0xff] }
 0x2ba   :  { %1335 = vmatpush2.msra.mxu0 %v5860_v31  ;;  %1406 = vmatpush2.msra.mxu1 %v5863_v38  ;;  %9013 = vst [vmem:[#allocation175_spill] sm:$0xff] %v5872_v30  ;;  %9014 = vst [vmem:[#allocation176_spill] sm:$0xff] %v5875_v36  ;;  %v5878_v31 = vld [vmem:[#allocation6 + $0x208] sm:$0xff]  ;;  %v5881_v38 = vld [vmem:[#allocation6 + $0x218] sm:$0xff] }
 0x2bb   :  { %1336 = vmatprep.subr.mxu0 %v5866_v37  ;;  %1407 = vmatprep.subr.mxu1 %v5869_v62  ;;  %9015 = vst [vmem:[#allocation177_spill] sm:$0xff] %v5878_v31  ;;  %9016 = vst [vmem:[#allocation178_spill] sm:$0xff] %v5881_v38  ;;  %v5884_v37 = vld [vmem:[#allocation6 + $0x200] sm:$0xff]  ;;  %v5887_v62 = vld [vmem:[#allocation6 + $0x210] sm:$0xff] }
 0x2bc   :  { %1337 = vmatpush2.msra.mxu0 %v5872_v30  ;;  %1408 = vmatpush2.msra.mxu1 %v5875_v36  ;;  %9017 = vst [vmem:[#allocation179_spill] sm:$0xff] %v5884_v37  ;;  %9018 = vst [vmem:[#allocation180_spill] sm:$0xff] %v5887_v62 }
 0x2bd   :  { %1338 = vmatprep.subr.mxu0 %v5878_v31  ;;  %1409 = vmatprep.subr.mxu1 %v5881_v38 }
 0x2be   :  { %1339 = vmatpush2.msra.mxu0 %v5884_v37  ;;  %1410 = vmatpush2.msra.mxu1 %v5887_v62 }
 0x2bf   :  { %1461 = vmatprep.subr.mxu0 %v5262_v51  ;;  %1532 = vmatprep.subr.mxu1 %v5265_v48 }
 0x31d   :  { %v975_v36 = vpop.f32.mrf.mxu0  ;;  %v1046_v38 = vpop.f32.mrf.mxu1 }
 0x31e   :  { %v976_v30 = vadd.f32 %v975_v36, %v5272_v60  ;;  %v1047_v51 = vadd.f32 %v1046_v38, %v5284_v16 }
 0x31f   :  { %v977_v31 = vpop.f32.mrf.mxu0  ;;  %v1048_v37 = vpop.f32.mrf.mxu1 }
 0x320   :  { %v3327_v29 = vmul.f32 -1.442695, %v976_v30  ;;  %v978_v32 = vadd.f32 %v977_v31, %v5275_v5  ;;  %v1049_v27 = vadd.f32 %v1048_v37, %v5280_v13  ;;  %v1088_v30 = vpop.permute.xlu1 %1087 }
 0x321   :  { %v1091_v31 = vmul.f32 %v1088_v30, %v8854_v33  ;;  %v1093_v33 = vmul.f32 %v1088_v30, %v5033_v46 }
 0x322   :  { %3442 = vpow2.f32 %v3327_v29  ;;  %v3328_v28 = vmul.f32 -1.442695, %v978_v32  ;;  %v3329_v25 = vmul.f32 -1.442695, %v1049_v27  ;;  %v1090_v29 = vmul.f32 %v1088_v30, %v8852_v24  ;;  %v1238_v32 = vpop.permute.xlu0 %1237 }
 0x323   :  { %v1240_v13 = vmul.f32 %v1238_v32, %v8853_v26 }
 0x324   :  { %3444 = vpow2.f32 %v3328_v28 }
 0x325   :  { %3446 = vpow2.f32 %v3329_v25 }
 0x32f   :  { %v3443_v62 = vpop.eup %3442 }
 0x330   :  { %v1054_v56 = vadd.f32 1.0, %v3443_v62 }
 0x331   :  { %v3445_v48 = vpop.eup %3444 }
 0x332   :  { %3448 = vrcp.f32 %v1054_v56  ;;  %v1060_v36 = vadd.f32 1.0, %v3445_v48  ;;  %v3447_v28 = vpop.eup %3446 }
 0x333   :  { %3450 = vtanh.f32 %v1047_v51  ;;  %v1067_v56 = vadd.f32 1.0, %v3447_v28 }
 0x334   :  { %3452 = vrcp.f32 %v1060_v36  ;;  %v1241_v36 = vmul.f32 %v1238_v32, %v8855_v35 }
 0x335   :  { %3454 = vrcp.f32 %v1067_v56 }
 0x33e   :  { %v1160_v5 = vpop.f32.mrf.mxu0  ;;  %v1231_v38 = vpop.f32.mrf.mxu1 }
 0x33f   :  { %v3449_v37 = vpop.eup %3448  ;;  %v1161_v27 = vadd.f32 %v1160_v5, %v1090_v29 }
 0x340   :  { %v3451_v62 = vpop.eup %3450  ;;  %v1162_v16 = vpop.f32.mrf.mxu0 }
 0x341   :  { %v3453_v25 = vpop.eup %3452  ;;  %v1244_v48 = vadd.f32 %v1240_v13, %v1161_v27  ;;  %v1163_v51 = vadd.f32 %v1162_v16, %v1091_v31  ;;  %v1071_v60 = vmul.f32 %v3451_v62, %v3449_v37  ;;  %v1233_v5 = vpop.f32.mrf.mxu1  ;;  %v1092_v16 = vmul.f32 %v1088_v30, %v5043_v49 }
 0x342   :  { %v1070_v24 = vmul.f32 %v3453_v25, %v5292_v47  ;;  %v1234_v28 = vadd.f32 %v1233_v5, %v1093_v33  ;;  %v1243_v47 = vmul.f32 %v1238_v32, %v5039_v3  ;;  %v1242_v27 = vmul.f32 %v1238_v32, %v5050_v1 }
 0x343   :  { %v1248_v23 = vadd.f32 %v1244_v48, %v5026_v0  ;;  %v1245_v22 = vadd.f32 %v1241_v36, %v1163_v51  ;;  %v1232_v37 = vadd.f32 %v1231_v38, %v1092_v16 }
 0x344   :  { %v5903_v29 = vadd.f32 %v1071_v60, %v1070_v24  ;;  %v1247_v31 = vadd.f32 %v1243_v47, %v1234_v28 }
 0x345   :  { %v3332_v26 = vmul.f32 -1.442695, %v1248_v23  ;;  %v1249_v21 = vadd.f32 %v1245_v22, %v5036_v44  ;;  %v1246_v24 = vadd.f32 %v1242_v27, %v1232_v37  ;;  %v3455_v23 = vpop.eup %3454  ;;  %v9048_v37 = vld [vmem:[#allocation45_spill] sm:$0xff]  ;;  %v9049_v27 = vld [vmem:[#allocation46_spill] sm:$0xff] }
 0x346   :  { %3456 = vtanh.f32 %v5903_v29  ;;  %v1251_v60 = vadd.f32 %v1247_v31, %v8856_v9 }
 0x347   :  { %3458 = vpow2.f32 %v3332_v26  ;;  %v3333_v13 = vmul.f32 -1.442695, %v1249_v21  ;;  %v1250_v25 = vadd.f32 %v1246_v24, %v5058_v58  ;;  %v9051_v24 = vld [vmem:[#allocation48_spill] sm:$0xff] }
 0x348   :  { %v3334_v62 = vmul.f32 -1.442695, %v1251_v60  ;;  %v9050_v60 = vld [vmem:[#allocation47_spill] sm:$0xff] }
 0x349   :  { %3460 = vpow2.f32 %v3333_v13 }
 0x34a   :  { %3462 = vpow2.f32 %v3334_v62  ;;  %v9053_v62 = vld [vmem:[#allocation49_spill] sm:$0xff] }
 0x353   :  { %v3457_v22 = vpop.eup %3456 }
 0x354   :  { %v3459_v33 = vpop.eup %3458  ;;  %v1074_v26 = vmul.f32 %v3457_v22, %v3455_v23  ;;  %v9052_v23 = vmov 0.0   ;;  %v9054_v22 = vld [vmem:[#allocation50_spill] sm:$0xff] }
 0x355   :  { %v1255_v21 = vadd.f32 1.0, %v3459_v33  ;;  %v9055_v33 = vld [vmem:[#allocation51_spill] sm:$0xff] }
 0x356   :  { %v3461_v56 = vpop.eup %3460  ;;  %1340 = vmatprep.mubr.f32.mxu0 %v1074_v26  ;;  %1411 = vmatprep.mubr.f32.mxu1 %v1074_v26  ;;  %v1075_v30 = vmul.f32 %v5304_v17, %v1074_v26  ;;  %v9057_v26 = vld [vmem:[#allocation53_spill] sm:$0xff] }
 0x357   :  { %3464 = vrcp.f32 %v1255_v21  ;;  %v1261_v38 = vadd.f32 1.0, %v3461_v56  ;;  %v3463_v32 = vpop.eup %3462  ;;  %v9058_v21 = vld [vmem:[#allocation54_spill] sm:$0xff]  ;;  %v9059_v56 = vld [vmem:[#allocation55_spill] sm:$0xff] }
 0x358   :  { %3466 = vtanh.f32 %v1250_v25  ;;  %1076 = vadd.xlane.f32.xlu0 %v1075_v30  ;;  %v1268_v5 = vadd.f32 1.0, %v3463_v32  ;;  %v9056_v25 = vld [vmem:[#allocation52_spill] sm:$0xff]  ;;  %v9062_v32 = vld [vmem:[#allocation58_spill] sm:$0xff] }
 0x359   :  { %3468 = vrcp.f32 %v1261_v38  ;;  %v9060_v30 = vld [vmem:[#allocation56_spill] sm:$0xff]  ;;  %v9061_v38 = vld [vmem:[#allocation57_spill] sm:$0xff] }
 0x35a   :  { %3470 = vrcp.f32 %v1268_v5  ;;  %v9066_v5 = vld [vmem:[#allocation62_spill] sm:$0xff] }
 0x364   :  { %v3465_v48 = vpop.eup %3464 }
 0x365   :  { %v3467_v51 = vpop.eup %3466 }
 0x366   :  { %v3469_v36 = vpop.eup %3468  ;;  %v1272_v28 = vmul.f32 %v3467_v51, %v3465_v48  ;;  %v9063_v48 = vld [vmem:[#allocation59_spill] sm:$0xff]  ;;  %v9064_v51 = vld [vmem:[#allocation60_spill] sm:$0xff] }
 0x367   :  { %v1271_v13 = vmul.f32 %v3469_v36, %v5309_v34  ;;  %v3471_v47 = vpop.eup %3470  ;;  %v9019_v34 = vld [vmem:[#allocation16_spill] sm:$0xff]  ;;  %v9065_v36 = vld [vmem:[#allocation61_spill] sm:$0xff] }
 0x369   :  { %v5914_v16 = vadd.f32 %v1272_v28, %v1271_v13  ;;  %v9067_v28 = vld [vmem:[#allocation63_spill] sm:$0xff]  ;;  %v9068_v13 = vld [vmem:[#allocation64_spill] sm:$0xff] }
 0x36b   :  { %3472 = vtanh.f32 %v5914_v16 }
 0x378   :  { %v3473_v17 = vpop.eup %3472 }
 0x379   :  { %v5917_v31 = vmul.f32 %v3473_v17, %v3471_v47  ;;  %v9069_v47 = vld [vmem:[#allocation65_spill] sm:$0xff]  ;;  %v9070_v17 = vld [vmem:[#allocation66_spill] sm:$0xff] }
 0x37b   :  { %1341 = vmatmul.mubr.f32.vlgmr.msra.gmra.mxu0 %v5917_v31  ;;  %1412 = vmatmul.mubr.f32.vlgmr.msra.gmra.mxu1 %v5917_v31 }
 0x37c   :  { %1462 = vmatpush1.msra.mxu0 %v5316_v39  ;;  %1533 = vmatpush1.msra.mxu1 %v5319_v40  ;;  %v9020_v39 = vld [vmem:[#allocation17_spill] sm:$0xff]  ;;  %v9021_v40 = vld [vmem:[#allocation18_spill] sm:$0xff] }
 0x37d   :  { %1463 = vmatprep.subr.mxu0 %v5322_v45  ;;  %1534 = vmatprep.subr.mxu1 %v5325_v41  ;;  %v9022_v45 = vld [vmem:[#allocation19_spill] sm:$0xff]  ;;  %v9023_v41 = vld [vmem:[#allocation20_spill] sm:$0xff] }
 0x37e   :  { %1464 = vmatpush1.msra.mxu0 %v5328_v43  ;;  %1535 = vmatpush1.msra.mxu1 %v5331_v42  ;;  %v9024_v43 = vld [vmem:[#allocation21_spill] sm:$0xff]  ;;  %v9025_v42 = vld [vmem:[#allocation22_spill] sm:$0xff] }
 0x37f   :  { %1465 = vmatprep.subr.mxu0 %v5334_v61  ;;  %1536 = vmatprep.subr.mxu1 %v5337_v55  ;;  %v9026_v61 = vld [vmem:[#allocation23_spill] sm:$0xff]  ;;  %v9027_v55 = vld [vmem:[#allocation24_spill] sm:$0xff] }
 0x380   :  { %1466 = vmatpush1.msra.mxu0 %v5340_v59  ;;  %1537 = vmatpush1.msra.mxu1 %v5343_v57  ;;  %v9028_v59 = vld [vmem:[#allocation25_spill] sm:$0xff]  ;;  %v9029_v57 = vld [vmem:[#allocation26_spill] sm:$0xff] }
 0x381   :  { %1467 = vmatprep.subr.mxu0 %v5346_v2  ;;  %1538 = vmatprep.subr.mxu1 %v5349_v53  ;;  %v9030_v2 = vld [vmem:[#allocation27_spill] sm:$0xff]  ;;  %v9031_v53 = vld [vmem:[#allocation28_spill] sm:$0xff] }
 0x382   :  { %1468 = vmatpush1.msra.mxu0 %v5352_v54  ;;  %1539 = vmatpush1.msra.mxu1 %v5355_v63  ;;  %v9032_v54 = vld [vmem:[#allocation29_spill] sm:$0xff]  ;;  %v9033_v63 = vld [vmem:[#allocation30_spill] sm:$0xff] }
 0x383   :  { %1469 = vmatprep.subr.mxu0 %v5358_v52  ;;  %1540 = vmatprep.subr.mxu1 %v5361_v4  ;;  %v9034_v52 = vld [vmem:[#allocation31_spill] sm:$0xff]  ;;  %v9035_v4 = vld [vmem:[#allocation32_spill] sm:$0xff] }
 0x384   :  { %1470 = vmatpush1.msra.mxu0 %v5364_v50  ;;  %1541 = vmatpush1.msra.mxu1 %v5367_v6  ;;  %v9036_v50 = vld [vmem:[#allocation33_spill] sm:$0xff]  ;;  %v9037_v6 = vld [vmem:[#allocation34_spill] sm:$0xff] }
 0x385   :  { %1471 = vmatprep.subr.mxu0 %v5370_v7  ;;  %1542 = vmatprep.subr.mxu1 %v5373_v8  ;;  %v9038_v7 = vld [vmem:[#allocation35_spill] sm:$0xff]  ;;  %v9039_v8 = vld [vmem:[#allocation36_spill] sm:$0xff] }
 0x386   :  { %1472 = vmatpush1.msra.mxu0 %v5376_v10  ;;  %1543 = vmatpush1.msra.mxu1 %v5379_v11  ;;  %v9040_v10 = vld [vmem:[#allocation37_spill] sm:$0xff]  ;;  %v9041_v11 = vld [vmem:[#allocation38_spill] sm:$0xff] }
 0x387   :  { %1473 = vmatprep.subr.mxu0 %v5382_v12  ;;  %1544 = vmatprep.subr.mxu1 %v5385_v14  ;;  %v9042_v12 = vld [vmem:[#allocation39_spill] sm:$0xff]  ;;  %v9043_v14 = vld [vmem:[#allocation40_spill] sm:$0xff] }
 0x388   :  { %1474 = vmatpush1.msra.mxu0 %v5388_v15  ;;  %1545 = vmatpush1.msra.mxu1 %v5391_v18  ;;  %v9044_v15 = vld [vmem:[#allocation41_spill] sm:$0xff]  ;;  %v9045_v18 = vld [vmem:[#allocation42_spill] sm:$0xff] }
 0x389   :  { %1475 = vmatprep.subr.mxu0 %v5394_v19  ;;  %1546 = vmatprep.subr.mxu1 %v5397_v20  ;;  %v9046_v19 = vld [vmem:[#allocation43_spill] sm:$0xff]  ;;  %v9047_v20 = vld [vmem:[#allocation44_spill] sm:$0xff] }
 0x38a   :  { %1476 = vmatpush1.msra.mxu0 %v9019_v34  ;;  %1547 = vmatpush1.msra.mxu1 %v9020_v39  ;;  %v9072_v34 = vld [vmem:[#allocation68_spill] sm:$0xff]  ;;  %v9073_v39 = vld [vmem:[#allocation69_spill] sm:$0xff] }
 0x38b   :  { %1477 = vmatprep.subr.mxu0 %v9021_v40  ;;  %1548 = vmatprep.subr.mxu1 %v9022_v45  ;;  %v9074_v40 = vld [vmem:[#allocation70_spill] sm:$0xff]  ;;  %v9075_v45 = vld [vmem:[#allocation71_spill] sm:$0xff] }
 0x38c   :  { %1478 = vmatpush1.msra.mxu0 %v9023_v41  ;;  %1549 = vmatpush1.msra.mxu1 %v9024_v43  ;;  %v9076_v41 = vld [vmem:[#allocation72_spill] sm:$0xff]  ;;  %v9077_v43 = vld [vmem:[#allocation73_spill] sm:$0xff] }
 0x38d   :  { %1479 = vmatprep.subr.mxu0 %v9025_v42  ;;  %1550 = vmatprep.subr.mxu1 %v9026_v61  ;;  %v9078_v42 = vld [vmem:[#allocation74_spill] sm:$0xff]  ;;  %v9079_v61 = vld [vmem:[#allocation75_spill] sm:$0xff] }
 0x38e   :  { %1480 = vmatpush1.msra.mxu0 %v9027_v55  ;;  %1551 = vmatpush1.msra.mxu1 %v9028_v59  ;;  %v9080_v55 = vld [vmem:[#allocation76_spill] sm:$0xff]  ;;  %v9081_v59 = vld [vmem:[#allocation77_spill] sm:$0xff] }
 0x38f   :  { %1481 = vmatprep.subr.mxu0 %v9029_v57  ;;  %1552 = vmatprep.subr.mxu1 %v9030_v2  ;;  %v9082_v57 = vld [vmem:[#allocation78_spill] sm:$0xff]  ;;  %v9083_v2 = vld [vmem:[#allocation79_spill] sm:$0xff] }
 0x390   :  { %1482 = vmatpush1.msra.mxu0 %v9031_v53  ;;  %1553 = vmatpush1.msra.mxu1 %v9032_v54  ;;  %v9084_v53 = vld [vmem:[#allocation80_spill] sm:$0xff]  ;;  %v9085_v54 = vld [vmem:[#allocation81_spill] sm:$0xff] }
 0x391   :  { %1483 = vmatprep.subr.mxu0 %v9033_v63  ;;  %1554 = vmatprep.subr.mxu1 %v9034_v52  ;;  %v9086_v63 = vld [vmem:[#allocation82_spill] sm:$0xff]  ;;  %v9087_v52 = vld [vmem:[#allocation83_spill] sm:$0xff] }
 0x392   :  { %1484 = vmatpush1.msra.mxu0 %v9035_v4  ;;  %1555 = vmatpush1.msra.mxu1 %v9036_v50  ;;  %v9088_v4 = vld [vmem:[#allocation84_spill] sm:$0xff]  ;;  %v9089_v50 = vld [vmem:[#allocation85_spill] sm:$0xff] }
 0x393   :  { %1485 = vmatprep.subr.mxu0 %v9037_v6  ;;  %1556 = vmatprep.subr.mxu1 %v9038_v7  ;;  %v9090_v6 = vld [vmem:[#allocation86_spill] sm:$0xff]  ;;  %v9091_v7 = vld [vmem:[#allocation87_spill] sm:$0xff] }
 0x394   :  { %1486 = vmatpush1.msra.mxu0 %v9039_v8  ;;  %1557 = vmatpush1.msra.mxu1 %v9040_v10  ;;  %v9092_v8 = vld [vmem:[#allocation88_spill] sm:$0xff]  ;;  %v9093_v10 = vld [vmem:[#allocation89_spill] sm:$0xff] }
 0x395   :  { %1487 = vmatprep.subr.mxu0 %v9041_v11  ;;  %1558 = vmatprep.subr.mxu1 %v9042_v12  ;;  %v9094_v11 = vld [vmem:[#allocation90_spill] sm:$0xff]  ;;  %v9095_v12 = vld [vmem:[#allocation91_spill] sm:$0xff] }
 0x396   :  { %1488 = vmatpush1.msra.mxu0 %v9043_v14  ;;  %1559 = vmatpush1.msra.mxu1 %v9044_v15  ;;  %v9096_v14 = vld [vmem:[#allocation92_spill] sm:$0xff]  ;;  %v9097_v15 = vld [vmem:[#allocation93_spill] sm:$0xff] }
 0x397   :  { %1489 = vmatprep.subr.mxu0 %v9045_v18  ;;  %1560 = vmatprep.subr.mxu1 %v9046_v19  ;;  %v9098_v18 = vld [vmem:[#allocation94_spill] sm:$0xff]  ;;  %v9099_v19 = vld [vmem:[#allocation95_spill] sm:$0xff] }
 0x398   :  { %1490 = vmatpush1.msra.mxu0 %v9047_v20  ;;  %1561 = vmatpush1.msra.mxu1 %v9048_v37  ;;  %v9100_v20 = vld [vmem:[#allocation96_spill] sm:$0xff]  ;;  %v9101_v37 = vld [vmem:[#allocation97_spill] sm:$0xff] }
 0x399   :  { %1491 = vmatprep.subr.mxu0 %v9049_v27  ;;  %1562 = vmatprep.subr.mxu1 %v9050_v60  ;;  %v9102_v27 = vld [vmem:[#allocation98_spill] sm:$0xff]  ;;  %v9103_v60 = vld [vmem:[#allocation99_spill] sm:$0xff] }
 0x39a   :  { %1492 = vmatpush1.msra.mxu0 %v9051_v24  ;;  %1525 = vmatprep.mubr.f32.mxu0 %v9052_v23  ;;  %v9104_v24 = vld [vmem:[#allocation100_spill] sm:$0xff] }
 0x39b   :  { %1563 = vmatpush1.msra.mxu1 %v9053_v62  ;;  %1596 = vmatprep.mubr.f32.mxu1 %v9052_v23  ;;  %v9105_v62 = vld [vmem:[#allocation101_spill] sm:$0xff] }
 0x39c   :  { %1526 = vmatmul.mubr.f32.vlgmr.msra.gmra.mxu0 %v5917_v31  ;;  %1597 = vmatmul.mubr.f32.vlgmr.msra.gmra.mxu1 %v5917_v31  ;;  %v9071_v31 = vld [vmem:[#allocation67_spill] sm:$0xff] }
 0x39d   :  { %1643 = vmatprep.subr.mxu0 %v9054_v22  ;;  %1714 = vmatprep.subr.mxu1 %v9055_v33  ;;  %v9106_v22 = vld [vmem:[#allocation102_spill] sm:$0xff]  ;;  %v9107_v33 = vld [vmem:[#allocation103_spill] sm:$0xff] }
 0x39e   :  { %1644 = vmatpush1.msra.mxu0 %v9056_v25  ;;  %1715 = vmatpush1.msra.mxu1 %v9057_v26  ;;  %v9108_v25 = vld [vmem:[#allocation104_spill] sm:$0xff]  ;;  %v9109_v26 = vld [vmem:[#allocation105_spill] sm:$0xff] }
 0x39f   :  { %1645 = vmatprep.subr.mxu0 %v9058_v21  ;;  %1716 = vmatprep.subr.mxu1 %v9059_v56  ;;  %v9110_v21 = vld [vmem:[#allocation106_spill] sm:$0xff]  ;;  %v9111_v56 = vld [vmem:[#allocation107_spill] sm:$0xff] }
 0x3a0   :  { %1646 = vmatpush1.msra.mxu0 %v9060_v30  ;;  %1717 = vmatpush1.msra.mxu1 %v9061_v38  ;;  %v9112_v30 = vld [vmem:[#allocation108_spill] sm:$0xff]  ;;  %v9113_v38 = vld [vmem:[#allocation109_spill] sm:$0xff] }
 0x3a1   :  { %1647 = vmatprep.subr.mxu0 %v9062_v32  ;;  %1718 = vmatprep.subr.mxu1 %v9063_v48  ;;  %v9114_v32 = vld [vmem:[#allocation110_spill] sm:$0xff]  ;;  %v9115_v48 = vld [vmem:[#allocation111_spill] sm:$0xff] }
 0x3a2   :  { %1648 = vmatpush1.msra.mxu0 %v9064_v51  ;;  %1719 = vmatpush1.msra.mxu1 %v9065_v36  ;;  %v9116_v51 = vld [vmem:[#allocation112_spill] sm:$0xff]  ;;  %v9117_v36 = vld [vmem:[#allocation113_spill] sm:$0xff] }
 0x3a3   :  { %1649 = vmatprep.subr.mxu0 %v9066_v5  ;;  %1720 = vmatprep.subr.mxu1 %v9067_v28  ;;  %v9118_v5 = vld [vmem:[#allocation114_spill] sm:$0xff]  ;;  %v9119_v28 = vld [vmem:[#allocation115_spill] sm:$0xff] }
 0x3a4   :  { %1650 = vmatpush1.msra.mxu0 %v9068_v13  ;;  %1721 = vmatpush1.msra.mxu1 %v9069_v47  ;;  %v9120_v13 = vld [vmem:[#allocation116_spill] sm:$0xff]  ;;  %v9121_v47 = vld [vmem:[#allocation117_spill] sm:$0xff] }
 0x3a5   :  { %1651 = vmatprep.subr.mxu0 %v9070_v17  ;;  %1722 = vmatprep.subr.mxu1 %v9071_v31  ;;  %v9122_v17 = vld [vmem:[#allocation118_spill] sm:$0xff]  ;;  %v9123_v31 = vld [vmem:[#allocation119_spill] sm:$0xff] }
 0x3a6   :  { %1652 = vmatpush1.msra.mxu0 %v9072_v34  ;;  %1723 = vmatpush1.msra.mxu1 %v9073_v39  ;;  %v9124_v34 = vld [vmem:[#allocation120_spill] sm:$0xff]  ;;  %v9125_v39 = vld [vmem:[#allocation121_spill] sm:$0xff] }
 0x3a7   :  { %1653 = vmatprep.subr.mxu0 %v9074_v40  ;;  %1724 = vmatprep.subr.mxu1 %v9075_v45  ;;  %v9126_v40 = vld [vmem:[#allocation122_spill] sm:$0xff]  ;;  %v9127_v45 = vld [vmem:[#allocation123_spill] sm:$0xff] }
 0x3a8   :  { %1654 = vmatpush1.msra.mxu0 %v9076_v41  ;;  %1725 = vmatpush1.msra.mxu1 %v9077_v43  ;;  %v9128_v41 = vld [vmem:[#allocation124_spill] sm:$0xff]  ;;  %v9129_v43 = vld [vmem:[#allocation125_spill] sm:$0xff] }
 0x3a9   :  { %1655 = vmatprep.subr.mxu0 %v9078_v42  ;;  %1726 = vmatprep.subr.mxu1 %v9079_v61  ;;  %v9130_v42 = vld [vmem:[#allocation126_spill] sm:$0xff]  ;;  %v9131_v61 = vld [vmem:[#allocation127_spill] sm:$0xff] }
 0x3aa   :  { %1656 = vmatpush1.msra.mxu0 %v9080_v55  ;;  %1727 = vmatpush1.msra.mxu1 %v9081_v59  ;;  %v9132_v55 = vld [vmem:[#allocation128_spill] sm:$0xff]  ;;  %v9133_v59 = vld [vmem:[#allocation129_spill] sm:$0xff] }
 0x3ab   :  { %1657 = vmatprep.subr.mxu0 %v9082_v57  ;;  %1728 = vmatprep.subr.mxu1 %v9083_v2  ;;  %v9134_v57 = vld [vmem:[#allocation130_spill] sm:$0xff]  ;;  %v9135_v2 = vld [vmem:[#allocation131_spill] sm:$0xff] }
 0x3ac   :  { %1658 = vmatpush1.msra.mxu0 %v9084_v53  ;;  %1729 = vmatpush1.msra.mxu1 %v9085_v54  ;;  %v9136_v53 = vld [vmem:[#allocation132_spill] sm:$0xff]  ;;  %v9137_v54 = vld [vmem:[#allocation133_spill] sm:$0xff] }
 0x3ad   :  { %1659 = vmatprep.subr.mxu0 %v9086_v63  ;;  %1730 = vmatprep.subr.mxu1 %v9087_v52  ;;  %v9138_v63 = vld [vmem:[#allocation134_spill] sm:$0xff]  ;;  %v9139_v52 = vld [vmem:[#allocation135_spill] sm:$0xff] }
 0x3ae   :  { %1660 = vmatpush1.msra.mxu0 %v9088_v4  ;;  %1731 = vmatpush1.msra.mxu1 %v9089_v50  ;;  %v9140_v4 = vld [vmem:[#allocation136_spill] sm:$0xff]  ;;  %v9141_v50 = vld [vmem:[#allocation137_spill] sm:$0xff] }
 0x3af   :  { %1661 = vmatprep.subr.mxu0 %v9090_v6  ;;  %1732 = vmatprep.subr.mxu1 %v9091_v7  ;;  %v9142_v6 = vld [vmem:[#allocation138_spill] sm:$0xff]  ;;  %v9143_v7 = vld [vmem:[#allocation139_spill] sm:$0xff] }
 0x3b0   :  { %1662 = vmatpush1.msra.mxu0 %v9092_v8  ;;  %1733 = vmatpush1.msra.mxu1 %v9093_v10  ;;  %v9144_v8 = vld [vmem:[#allocation140_spill] sm:$0xff]  ;;  %v9145_v10 = vld [vmem:[#allocation141_spill] sm:$0xff] }
 0x3b1   :  { %1663 = vmatprep.subr.mxu0 %v9094_v11  ;;  %1734 = vmatprep.subr.mxu1 %v9095_v12  ;;  %v9146_v11 = vld [vmem:[#allocation142_spill] sm:$0xff]  ;;  %v9147_v12 = vld [vmem:[#allocation143_spill] sm:$0xff] }
 0x3b2   :  { %1664 = vmatpush1.msra.mxu0 %v9096_v14  ;;  %1735 = vmatpush1.msra.mxu1 %v9097_v15  ;;  %v9148_v14 = vld [vmem:[#allocation144_spill] sm:$0xff]  ;;  %v9149_v15 = vld [vmem:[#allocation145_spill] sm:$0xff] }
 0x3b3   :  { %1665 = vmatprep.subr.mxu0 %v9098_v18  ;;  %1736 = vmatprep.subr.mxu1 %v9099_v19  ;;  %v9150_v18 = vld [vmem:[#allocation146_spill] sm:$0xff]  ;;  %v9151_v19 = vld [vmem:[#allocation147_spill] sm:$0xff] }
 0x3b4   :  { %1666 = vmatpush1.msra.mxu0 %v9100_v20  ;;  %1737 = vmatpush1.msra.mxu1 %v9101_v37  ;;  %v9152_v20 = vld [vmem:[#allocation148_spill] sm:$0xff]  ;;  %v9153_v37 = vld [vmem:[#allocation149_spill] sm:$0xff] }
 0x3b5   :  { %1667 = vmatprep.subr.mxu0 %v9102_v27  ;;  %1738 = vmatprep.subr.mxu1 %v9103_v60  ;;  %v9154_v27 = vld [vmem:[#allocation150_spill] sm:$0xff]  ;;  %v9155_v60 = vld [vmem:[#allocation151_spill] sm:$0xff] }
 0x3b6   :  { %1668 = vmatpush1.msra.mxu0 %v9104_v24  ;;  %1739 = vmatpush1.msra.mxu1 %v9105_v62  ;;  %v9156_v24 = vld [vmem:[#allocation152_spill] sm:$0xff]  ;;  %v9157_v62 = vld [vmem:[#allocation153_spill] sm:$0xff] }
 0x3b7   :  { %1669 = vmatprep.subr.mxu0 %v9106_v22  ;;  %1740 = vmatprep.subr.mxu1 %v9107_v33  ;;  %v9158_v22 = vld [vmem:[#allocation154_spill] sm:$0xff]  ;;  %v9159_v33 = vld [vmem:[#allocation155_spill] sm:$0xff] }
 0x3b8   :  { %1670 = vmatpush1.msra.mxu0 %v9108_v25  ;;  %1741 = vmatpush1.msra.mxu1 %v9109_v26  ;;  %v9160_v25 = vld [vmem:[#allocation156_spill] sm:$0xff]  ;;  %v9161_v26 = vld [vmem:[#allocation157_spill] sm:$0xff] }
 0x3b9   :  { %1671 = vmatprep.subr.mxu0 %v9110_v21  ;;  %1742 = vmatprep.subr.mxu1 %v9111_v56  ;;  %v9162_v21 = vld [vmem:[#allocation158_spill] sm:$0xff]  ;;  %v9163_v56 = vld [vmem:[#allocation159_spill] sm:$0xff] }
 0x3ba   :  { %1672 = vmatpush1.msra.mxu0 %v9112_v30  ;;  %1743 = vmatpush1.msra.mxu1 %v9113_v38  ;;  %v9164_v30 = vld [vmem:[#allocation160_spill] sm:$0xff]  ;;  %v9165_v38 = vld [vmem:[#allocation161_spill] sm:$0xff] }
 0x3bb   :  { %1673 = vmatprep.subr.mxu0 %v9114_v32  ;;  %1744 = vmatprep.subr.mxu1 %v9115_v48  ;;  %v9166_v32 = vld [vmem:[#allocation162_spill] sm:$0xff]  ;;  %v9167_v48 = vld [vmem:[#allocation163_spill] sm:$0xff] }
 0x3bc   :  { %1674 = vmatpush1.msra.mxu0 %v9116_v51  ;;  %1745 = vmatpush1.msra.mxu1 %v9117_v36  ;;  %v9168_v51 = vld [vmem:[#allocation164_spill] sm:$0xff]  ;;  %v9169_v36 = vld [vmem:[#allocation165_spill] sm:$0xff] }
 0x3bd   :  { %1675 = vmatprep.subr.mxu0 %v9118_v5  ;;  %1746 = vmatprep.subr.mxu1 %v9119_v28  ;;  %v9170_v5 = vld [vmem:[#allocation167_spill] sm:$0xff]  ;;  %v9171_v28 = vld [vmem:[#allocation170_spill] sm:$0xff] }
 0x3be   :  { %1676 = vmatpush2.msra.mxu0 %v9120_v13  ;;  %1747 = vmatpush2.msra.mxu1 %v9121_v47  ;;  %v9172_v13 = vld [vmem:[#allocation171_spill] sm:$0xff]  ;;  %v9173_v47 = vld [vmem:[#allocation172_spill] sm:$0xff] }
 0x3bf   :  { %1677 = vmatprep.subr.mxu0 %v9122_v17  ;;  %1748 = vmatprep.subr.mxu1 %v9123_v31  ;;  %v9174_v17 = vld [vmem:[#allocation173_spill] sm:$0xff]  ;;  %v9175_v31 = vld [vmem:[#allocation174_spill] sm:$0xff] }
 0x3c0   :  { %1678 = vmatpush2.msra.mxu0 %v9124_v34  ;;  %1749 = vmatpush2.msra.mxu1 %v9125_v39  ;;  %v9176_v34 = vld [vmem:[#allocation175_spill] sm:$0xff]  ;;  %v9177_v39 = vld [vmem:[#allocation176_spill] sm:$0xff] }
 0x3c1   :  { %1679 = vmatprep.subr.mxu0 %v9126_v40  ;;  %1750 = vmatprep.subr.mxu1 %v9127_v45  ;;  %v9178_v40 = vld [vmem:[#allocation177_spill] sm:$0xff]  ;;  %v9179_v45 = vld [vmem:[#allocation178_spill] sm:$0xff] }
 0x3c2   :  { %1680 = vmatpush2.msra.mxu0 %v9128_v41  ;;  %1751 = vmatpush2.msra.mxu1 %v9129_v43  ;;  %v9180_v41 = vld [vmem:[#allocation179_spill] sm:$0xff]  ;;  %v9181_v43 = vld [vmem:[#allocation180_spill] sm:$0xff] }
 0x3c3   :  { %1681 = vmatprep.subr.mxu0 %v9130_v42  ;;  %1752 = vmatprep.subr.mxu1 %v9131_v61  ;;  %v6115_v42 = vld [vmem:[#allocation3 + $0x1e8] sm:$0xff]  ;;  %v6118_v61 = vld [vmem:[#allocation3 + $0x1f8] sm:$0xff] }
 0x3c4   :  { %1682 = vmatpush2.msra.mxu0 %v9132_v55  ;;  %1753 = vmatpush2.msra.mxu1 %v9133_v59  ;;  %v9182_v59 = vld [vmem:[#allocation12_spill] sm:$0xff] }
 0x3c5   :  { %1683 = vmatprep.subr.mxu0 %v9134_v57  ;;  %1754 = vmatprep.subr.mxu1 %v9135_v2 }
 0x3c6   :  { %1684 = vmatpush2.msra.mxu0 %v9136_v53  ;;  %1755 = vmatpush2.msra.mxu1 %v9137_v54  ;;  %v9183_v54 = vld [vmem:[#allocation13_spill] sm:$0xff] }
 0x3c7   :  { %1685 = vmatprep.subr.mxu0 %v9138_v63  ;;  %1756 = vmatprep.subr.mxu1 %v9139_v52 }
 0x3c8   :  { %1686 = vmatpush2.msra.mxu0 %v9140_v4  ;;  %1757 = vmatpush2.msra.mxu1 %v9141_v50 }
 0x3c9   :  { %1687 = vmatprep.subr.mxu0 %v9142_v6  ;;  %1758 = vmatprep.subr.mxu1 %v9143_v7  ;;  %v9184_v6 = vld [vmem:[#allocation14_spill] sm:$0xff] }
 0x3ca   :  { %1688 = vmatpush2.msra.mxu0 %v9144_v8  ;;  %1759 = vmatpush2.msra.mxu1 %v9145_v10 }
 0x3cb   :  { %1689 = vmatprep.subr.mxu0 %v9146_v11  ;;  %1760 = vmatprep.subr.mxu1 %v9147_v12  ;;  %v9185_v11 = vld [vmem:[#allocation15_spill] sm:$0xff] }
 0x3cc   :  { %1690 = vmatpush2.msra.mxu0 %v9148_v14  ;;  %1761 = vmatpush2.msra.mxu1 %v9149_v15 }
 0x3cd   :  { %1691 = vmatprep.subr.mxu0 %v9150_v18  ;;  %1762 = vmatprep.subr.mxu1 %v9151_v19  ;;  %v1455_v19 = vpop.permute.xlu1 %1454 }
 0x3ce   :  { %1692 = vmatpush2.msra.mxu0 %v9152_v20  ;;  %1763 = vmatpush2.msra.mxu1 %v9153_v37  ;;  %v9186_v20 = vld [vmem:[#allocation166_spill] sm:$0xff] }
 0x3cf   :  { %1693 = vmatprep.subr.mxu0 %v9154_v27  ;;  %1764 = vmatprep.subr.mxu1 %v9155_v60  ;;  %v1457_v37 = vmul.f32 %v1455_v19, %v9186_v20  ;;  %v1605_v60 = vpop.permute.xlu0 %1604 }
 0x3d0   :  { %1694 = vmatpush2.msra.mxu0 %v9156_v24  ;;  %1765 = vmatpush2.msra.mxu1 %v9157_v62 }
 0x3d1   :  { %1695 = vmatprep.subr.mxu0 %v9158_v22  ;;  %1766 = vmatprep.subr.mxu1 %v9159_v33  ;;  %v9187_v33 = vld [vmem:[#allocation168_spill] sm:$0xff] }
 0x3d2   :  { %1696 = vmatpush2.msra.mxu0 %v9160_v25  ;;  %1767 = vmatpush2.msra.mxu1 %v9161_v26  ;;  %v1607_v25 = vmul.f32 %v1605_v60, %v9187_v33 }
 0x3d3   :  { %1697 = vmatprep.subr.mxu0 %v9162_v21  ;;  %1768 = vmatprep.subr.mxu1 %v9163_v56  ;;  %v9188_v21 = vld [vmem:[#allocation169_spill] sm:$0xff] }
 0x3d4   :  { %1698 = vmatpush2.msra.mxu0 %v9164_v30  ;;  %1769 = vmatpush2.msra.mxu1 %v9165_v38  ;;  %v1458_v56 = vmul.f32 %v1455_v19, %v9188_v21 }
 0x3d5   :  { %1699 = vmatprep.subr.mxu0 %v9166_v32  ;;  %1770 = vmatprep.subr.mxu1 %v9167_v48 }
 0x3d6   :  { %1700 = vmatpush2.msra.mxu0 %v9168_v51  ;;  %1771 = vmatpush2.msra.mxu1 %v9169_v36 }
 0x3d7   :  { %1701 = vmatprep.subr.mxu0 %v9170_v5  ;;  %1772 = vmatprep.subr.mxu1 %v9171_v28  ;;  %v1608_v5 = vmul.f32 %v1605_v60, %v8855_v35 }
 0x3d8   :  { %1702 = vmatpush2.msra.mxu0 %v9172_v13  ;;  %1773 = vmatpush2.msra.mxu1 %v9173_v47 }
 0x3d9   :  { %1703 = vmatprep.subr.mxu0 %v9174_v17  ;;  %1774 = vmatprep.subr.mxu1 %v9175_v31 }
 0x3da   :  { %1704 = vmatpush2.msra.mxu0 %v9176_v34  ;;  %1775 = vmatpush2.msra.mxu1 %v9177_v39  ;;  %v1460_v34 = vmul.f32 %v1455_v19, %v5033_v46 }
 0x3db   :  { %1705 = vmatprep.subr.mxu0 %v9178_v40  ;;  %1776 = vmatprep.subr.mxu1 %v9179_v45 }
 0x3dc   :  { %1706 = vmatpush2.msra.mxu0 %v9180_v41  ;;  %1777 = vmatpush2.msra.mxu1 %v9181_v43 }
 0x3dd   :  { %1828 = vmatprep.subr.mxu0 %v6115_v42  ;;  %1899 = vmatprep.subr.mxu1 %v6118_v61 }
 0x43b   :  { %v1342_v55 = vpop.f32.mrf.mxu0  ;;  %v1413_v52 = vpop.f32.mrf.mxu1 }
 0x43c   :  { %v1343_v57 = vadd.f32 %v1342_v55, %v9182_v59  ;;  %v1414_v12 = vadd.f32 %v1413_v52, %v9185_v11  ;;  %v1610_v55 = vmul.f32 %v1605_v60, %v5039_v3 }
 0x43d   :  { %v1344_v2 = vpop.f32.mrf.mxu0  ;;  %v1415_v50 = vpop.f32.mrf.mxu1 }
 0x43e   :  { %v3335_v53 = vmul.f32 -1.442695, %v1343_v57  ;;  %v1345_v63 = vadd.f32 %v1344_v2, %v9183_v54  ;;  %v1416_v7 = vadd.f32 %v1415_v50, %v9184_v6 }
 0x440   :  { %3474 = vpow2.f32 %v3335_v53  ;;  %v3336_v4 = vmul.f32 -1.442695, %v1345_v63  ;;  %v3337_v8 = vmul.f32 -1.442695, %v1416_v7  ;;  %v1609_v53 = vmul.f32 %v1605_v60, %v5050_v1 }
 0x442   :  { %3476 = vpow2.f32 %v3336_v4 }
 0x443   :  { %3478 = vpow2.f32 %v3337_v8 }
 0x44d   :  { %v3475_v10 = vpop.eup %3474 }
 0x44e   :  { %v1421_v14 = vadd.f32 1.0, %v3475_v10 }
 0x44f   :  { %v3477_v15 = vpop.eup %3476 }
 0x450   :  { %3480 = vrcp.f32 %v1421_v14  ;;  %v1427_v18 = vadd.f32 1.0, %v3477_v15  ;;  %v3479_v27 = vpop.eup %3478 }
 0x451   :  { %3482 = vtanh.f32 %v1414_v12  ;;  %v1434_v48 = vadd.f32 1.0, %v3479_v27 }
 0x452   :  { %3484 = vrcp.f32 %v1427_v18  ;;  %v6144_v18 = vld [vmem:[%s7840_s6] ss:$0 sm:$0xff] }
 0x453   :  { %3486 = vrcp.f32 %v1434_v48  ;;  %v6155_v48 = vld [vmem:[#allocation3 + $0x1e0] sm:$0xff] }
 0x45c   :  { %v1527_v24 = vpop.f32.mrf.mxu0  ;;  %v1598_v26 = vpop.f32.mrf.mxu1 }
 0x45d   :  { %v3481_v62 = vpop.eup %3480  ;;  %v1528_v22 = vadd.f32 %v1527_v24, %v1457_v37 }
 0x45e   :  { %v3483_v30 = vpop.eup %3482  ;;  %v1529_v38 = vpop.f32.mrf.mxu0 }
 0x45f   :  { %v3485_v32 = vpop.eup %3484  ;;  %v1611_v51 = vadd.f32 %v1607_v25, %v1528_v22  ;;  %v1530_v36 = vadd.f32 %v1529_v38, %v1458_v56  ;;  %v1438_v28 = vmul.f32 %v3483_v30, %v3481_v62  ;;  %v1600_v31 = vpop.f32.mrf.mxu1 }
 0x460   :  { %v1437_v13 = vmul.f32 %v3485_v32, %v5903_v29  ;;  %v1601_v41 = vadd.f32 %v1600_v31, %v1460_v34  ;;  %v1459_v29 = vmul.f32 %v1455_v19, %v5043_v49  ;;  %v3487_v4 = vpop.eup %3486  ;;  %v6182_v31 = vld [vmem:[#allocation3 + $0x1b0] sm:$0xff]  ;;  %v6185_v34 = vld [vmem:[#allocation3 + $0x188] sm:$0xff] }
 0x461   :  { %v1615_v47 = vadd.f32 %v1611_v51, %v5026_v0  ;;  %v1612_v17 = vadd.f32 %v1608_v5, %v1530_v36  ;;  %v6158_v51 = vld [vmem:[#allocation3 + $0x1f0] sm:$0xff]  ;;  %v6164_v36 = vld [vmem:[#allocation3 + $0x1d8] sm:$0xff]  ;;  %v6167_v5 = vld [vmem:[#allocation3 + $0x1c0] sm:$0xff] }
 0x462   :  { %v6132_v39 = vadd.f32 %v1438_v28, %v1437_v13  ;;  %v1614_v57 = vadd.f32 %v1610_v55, %v1601_v41  ;;  %v1599_v2 = vadd.f32 %v1598_v26, %v1459_v29  ;;  %v6170_v28 = vld [vmem:[#allocation3 + $0x1d0] sm:$0xff]  ;;  %v6173_v13 = vld [vmem:[#allocation3 + $0x1a8] sm:$0xff]  ;;  %v6200_v55 = vld [vmem:[#allocation3 + $0x178] sm:$0xff] }
 0x463   :  { %v3340_v40 = vmul.f32 -1.442695, %v1615_v47  ;;  %v1616_v45 = vadd.f32 %v1612_v17, %v5036_v44  ;;  %v6176_v47 = vld [vmem:[#allocation3 + $0x1b8] sm:$0xff]  ;;  %v6179_v17 = vld [vmem:[#allocation3 + $0x1a0] sm:$0xff]  ;;  %v6194_v41 = vld [vmem:[#allocation3 + $0x190] sm:$0xff] }
 0x464   :  { %3488 = vtanh.f32 %v6132_v39  ;;  %v1618_v63 = vadd.f32 %v1614_v57, %v8856_v9  ;;  %v1613_v52 = vadd.f32 %v1609_v53, %v1599_v2  ;;  %v6203_v29 = vld [vmem:[#allocation3 + $0x160] sm:$0xff]  ;;  %v6206_v57 = vld [vmem:[#allocation3 + $0x170] sm:$0xff]  ;;  %v6209_v2 = vld [vmem:[#allocation3 + $0x148] sm:$0xff] }
 0x465   :  { %3490 = vpow2.f32 %v3340_v40  ;;  %v3341_v43 = vmul.f32 -1.442695, %v1616_v45  ;;  %v6188_v40 = vld [vmem:[#allocation3 + $0x198] sm:$0xff]  ;;  %v6191_v45 = vld [vmem:[#allocation3 + $0x180] sm:$0xff] }
 0x466   :  { %v3342_v50 = vmul.f32 -1.442695, %v1618_v63  ;;  %v1617_v10 = vadd.f32 %v1613_v52, %v5058_v58  ;;  %v6212_v53 = vld [vmem:[#allocation3 + $0x158] sm:$0xff]  ;;  %v6215_v63 = vld [vmem:[#allocation3 + $0x140] sm:$0xff]  ;;  %v6218_v52 = vld [vmem:[#allocation3 + $0x150] sm:$0xff] }
 0x467   :  { %3492 = vpow2.f32 %v3341_v43  ;;  %v6197_v43 = vld [vmem:[#allocation3 + $0x168] sm:$0xff] }
 0x468   :  { %3494 = vpow2.f32 %v3342_v50  ;;  %v6224_v50 = vld [vmem:[#allocation3 + $0x138] sm:$0xff] }
 0x471   :  { %v3489_v7 = vpop.eup %3488 }
 0x472   :  { %v3491_v8 = vpop.eup %3490  ;;  %v1441_v12 = vmul.f32 %v3489_v7, %v3487_v4  ;;  %v6221_v4 = vld [vmem:[#allocation3 + $0x128] sm:$0xff]  ;;  %v6227_v7 = vld [vmem:[#allocation3 + $0x120] sm:$0xff] }
 0x473   :  { %v1622_v14 = vadd.f32 1.0, %v3491_v8  ;;  %v6230_v8 = vld [vmem:[#allocation3 + $0x130] sm:$0xff] }
 0x474   :  { %v3493_v15 = vpop.eup %3492  ;;  %1707 = vmatprep.mubr.f32.mxu0 %v1441_v12  ;;  %1778 = vmatprep.mubr.f32.mxu1 %v1441_v12  ;;  %v1442_v19 = vmul.f32 %v6144_v18, %v1441_v12  ;;  %v6236_v12 = vld [vmem:[#allocation3 + $0x118] sm:$0xff] }
 0x475   :  { %3496 = vrcp.f32 %v1622_v14  ;;  %v1628_v37 = vadd.f32 1.0, %v3493_v15  ;;  %v3495_v27 = vpop.eup %3494  ;;  %v6239_v14 = vld [vmem:[#allocation3 + $0x100] sm:$0xff]  ;;  %v6242_v15 = vld [vmem:[#allocation3 + $0x110] sm:$0xff] }
 0x476   :  { %3498 = vtanh.f32 %v1617_v10  ;;  %1443 = vadd.xlane.f32.xlu0 %v1442_v19  ;;  %v1635_v22 = vadd.f32 1.0, %v3495_v27  ;;  %v6233_v10 = vld [vmem:[#allocation3 + $0x108] sm:$0xff]  ;;  %9189 = vst [vmem:[#allocation16_spill] sm:$0xff] %v6239_v14  ;;  %9190 = vst [vmem:[#allocation17_spill] sm:$0xff] %v6242_v15  ;;  %v6251_v27 = vld [vmem:[#allocation3 + $0xe0] sm:$0xff] }
 0x477   :  { %3500 = vrcp.f32 %v1628_v37  ;;  %v6245_v19 = vld [vmem:[#allocation3 + $0xe8] sm:$0xff]  ;;  %v6248_v37 = vld [vmem:[#allocation3 + $0xf8] sm:$0xff]  ;;  %9193 = vst [vmem:[#allocation20_spill] sm:$0xff] %v6251_v27 }
 0x478   :  { %3502 = vrcp.f32 %v1635_v22  ;;  %9191 = vst [vmem:[#allocation18_spill] sm:$0xff] %v6245_v19  ;;  %9192 = vst [vmem:[#allocation19_spill] sm:$0xff] %v6248_v37  ;;  %v6263_v22 = vld [vmem:[#allocation3 + $0xc0] sm:$0xff] }
 0x479   :  { %9197 = vst [vmem:[#allocation24_spill] sm:$0xff] %v6263_v22 }
 0x482   :  { %v3497_v60 = vpop.eup %3496 }
 0x483   :  { %v3499_v24 = vpop.eup %3498 }
 0x484   :  { %v3501_v62 = vpop.eup %3500  ;;  %v1639_v25 = vmul.f32 %v3499_v24, %v3497_v60  ;;  %v6254_v60 = vld [vmem:[#allocation3 + $0xf0] sm:$0xff]  ;;  %v6257_v24 = vld [vmem:[#allocation3 + $0xc8] sm:$0xff] }
 0x485   :  { %v1638_v26 = vmul.f32 %v3501_v62, %v5914_v16  ;;  %v3503_v30 = vpop.eup %3502  ;;  %v6161_v16 = vld [vmem:[#allocation3 + $0x1c8] sm:$0xff]  ;;  %9194 = vst [vmem:[#allocation21_spill] sm:$0xff] %v6254_v60  ;;  %9195 = vst [vmem:[#allocation22_spill] sm:$0xff] %v6257_v24  ;;  %v6260_v62 = vld [vmem:[#allocation3 + $0xd8] sm:$0xff] }
 0x486   :  { %9196 = vst [vmem:[#allocation23_spill] sm:$0xff] %v6260_v62 }
 0x487   :  { %v6148_v56 = vadd.f32 %v1639_v25, %v1638_v26  ;;  %v6266_v25 = vld [vmem:[#allocation3 + $0xd0] sm:$0xff]  ;;  %v6269_v26 = vld [vmem:[#allocation3 + $0xa8] sm:$0xff] }
 0x488   :  { %9198 = vst [vmem:[#allocation25_spill] sm:$0xff] %v6266_v25  ;;  %9199 = vst [vmem:[#allocation26_spill] sm:$0xff] %v6269_v26 }
 0x489   :  { %3504 = vtanh.f32 %v6148_v56 }
 0x496   :  { %v3505_v38 = vpop.eup %3504 }
 0x497   :  { %v6151_v32 = vmul.f32 %v3505_v38, %v3503_v30  ;;  %v6272_v30 = vld [vmem:[#allocation3 + $0xb8] sm:$0xff]  ;;  %v6275_v38 = vld [vmem:[#allocation3 + $0xa0] sm:$0xff] }
 0x498   :  { %9200 = vst [vmem:[#allocation27_spill] sm:$0xff] %v6272_v30  ;;  %9201 = vst [vmem:[#allocation28_spill] sm:$0xff] %v6275_v38 }
 0x499   :  { %1708 = vmatmul.mubr.f32.vlgmr.msra.gmra.mxu0 %v6151_v32  ;;  %1779 = vmatmul.mubr.f32.vlgmr.msra.gmra.mxu1 %v6151_v32 }
 0x49a   :  { %1829 = vmatpush1.msra.mxu0 %v6155_v48  ;;  %1900 = vmatpush1.msra.mxu1 %v6158_v51 }
 0x49b   :  { %1830 = vmatprep.subr.mxu0 %v6161_v16  ;;  %1901 = vmatprep.subr.mxu1 %v6164_v36 }
 0x49c   :  { %1831 = vmatpush1.msra.mxu0 %v6167_v5  ;;  %1902 = vmatpush1.msra.mxu1 %v6170_v28 }
 0x49d   :  { %1832 = vmatprep.subr.mxu0 %v6173_v13  ;;  %1903 = vmatprep.subr.mxu1 %v6176_v47 }
 0x49e   :  { %1833 = vmatpush1.msra.mxu0 %v6179_v17  ;;  %1904 = vmatpush1.msra.mxu1 %v6182_v31 }
 0x49f   :  { %1834 = vmatprep.subr.mxu0 %v6185_v34  ;;  %1905 = vmatprep.subr.mxu1 %v6188_v40 }
 0x4a0   :  { %1835 = vmatpush1.msra.mxu0 %v6191_v45  ;;  %1906 = vmatpush1.msra.mxu1 %v6194_v41 }
 0x4a1   :  { %1836 = vmatprep.subr.mxu0 %v6197_v43  ;;  %1907 = vmatprep.subr.mxu1 %v6200_v55 }
 0x4a2   :  { %1837 = vmatpush1.msra.mxu0 %v6203_v29  ;;  %1908 = vmatpush1.msra.mxu1 %v6206_v57 }
 0x4a3   :  { %1838 = vmatprep.subr.mxu0 %v6209_v2  ;;  %1909 = vmatprep.subr.mxu1 %v6212_v53 }
 0x4a4   :  { %1839 = vmatpush1.msra.mxu0 %v6215_v63  ;;  %1910 = vmatpush1.msra.mxu1 %v6218_v52 }
 0x4a5   :  { %1840 = vmatprep.subr.mxu0 %v6221_v4  ;;  %1911 = vmatprep.subr.mxu1 %v6224_v50 }
 0x4a6   :  { %1841 = vmatpush1.msra.mxu0 %v6227_v7  ;;  %1912 = vmatpush1.msra.mxu1 %v6230_v8 }
 0x4a7   :  { %1842 = vmatprep.subr.mxu0 %v6233_v10  ;;  %1913 = vmatprep.subr.mxu1 %v6236_v12 }
 0x4a8   :  { %1843 = vmatpush1.msra.mxu0 %v6239_v14  ;;  %1914 = vmatpush1.msra.mxu1 %v6242_v15 }
 0x4a9   :  { %1844 = vmatprep.subr.mxu0 %v6245_v19  ;;  %1915 = vmatprep.subr.mxu1 %v6248_v37 }
 0x4aa   :  { %1845 = vmatpush1.msra.mxu0 %v6251_v27  ;;  %1916 = vmatpush1.msra.mxu1 %v6254_v60 }
 0x4ab   :  { %1846 = vmatprep.subr.mxu0 %v6257_v24  ;;  %1917 = vmatprep.subr.mxu1 %v6260_v62  ;;  %v6278_v62 = vld [vmem:[#allocation3 + $0xb0] sm:$0xff] }
 0x4ac   :  { %1847 = vmatpush1.msra.mxu0 %v6263_v22  ;;  %1918 = vmatpush1.msra.mxu1 %v6266_v25  ;;  %9202 = vst [vmem:[#allocation29_spill] sm:$0xff] %v6278_v62  ;;  %v6281_v22 = vld [vmem:[#allocation3 + $0x88] sm:$0xff]  ;;  %v6284_v25 = vld [vmem:[#allocation3 + $0x98] sm:$0xff] }
 0x4ad   :  { %1848 = vmatprep.subr.mxu0 %v6269_v26  ;;  %1919 = vmatprep.subr.mxu1 %v6272_v30  ;;  %9203 = vst [vmem:[#allocation30_spill] sm:$0xff] %v6281_v22  ;;  %9204 = vst [vmem:[#allocation31_spill] sm:$0xff] %v6284_v25  ;;  %v6287_v26 = vld [vmem:[#allocation3 + $0x80] sm:$0xff]  ;;  %v6290_v30 = vld [vmem:[#allocation3 + $0x90] sm:$0xff] }
 0x4ae   :  { %1849 = vmatpush1.msra.mxu0 %v6275_v38  ;;  %1920 = vmatpush1.msra.mxu1 %v6278_v62  ;;  %9205 = vst [vmem:[#allocation32_spill] sm:$0xff] %v6287_v26  ;;  %9206 = vst [vmem:[#allocation33_spill] sm:$0xff] %v6290_v30  ;;  %v6293_v38 = vld [vmem:[#allocation3 + $0x68] sm:$0xff]  ;;  %v6296_v62 = vld [vmem:[#allocation3 + $0x78] sm:$0xff] }
 0x4af   :  { %1850 = vmatprep.subr.mxu0 %v6281_v22  ;;  %1921 = vmatprep.subr.mxu1 %v6284_v25  ;;  %9207 = vst [vmem:[#allocation34_spill] sm:$0xff] %v6293_v38  ;;  %9208 = vst [vmem:[#allocation35_spill] sm:$0xff] %v6296_v62  ;;  %v6299_v22 = vld [vmem:[#allocation3 + $0x60] sm:$0xff]  ;;  %v6302_v25 = vld [vmem:[#allocation3 + $0x70] sm:$0xff] }
 0x4b0   :  { %1851 = vmatpush1.msra.mxu0 %v6287_v26  ;;  %1922 = vmatpush1.msra.mxu1 %v6290_v30  ;;  %9209 = vst [vmem:[#allocation36_spill] sm:$0xff] %v6299_v22  ;;  %9210 = vst [vmem:[#allocation37_spill] sm:$0xff] %v6302_v25  ;;  %v6305_v26 = vld [vmem:[#allocation3 + $0x48] sm:$0xff]  ;;  %v6308_v30 = vld [vmem:[#allocation3 + $0x58] sm:$0xff] }
 0x4b1   :  { %1852 = vmatprep.subr.mxu0 %v6293_v38  ;;  %1923 = vmatprep.subr.mxu1 %v6296_v62  ;;  %9211 = vst [vmem:[#allocation38_spill] sm:$0xff] %v6305_v26  ;;  %9212 = vst [vmem:[#allocation39_spill] sm:$0xff] %v6308_v30  ;;  %v6311_v38 = vld [vmem:[#allocation3 + $0x40] sm:$0xff]  ;;  %v6314_v62 = vld [vmem:[#allocation3 + $0x50] sm:$0xff] }
 0x4b2   :  { %1853 = vmatpush1.msra.mxu0 %v6299_v22  ;;  %1924 = vmatpush1.msra.mxu1 %v6302_v25  ;;  %9213 = vst [vmem:[#allocation40_spill] sm:$0xff] %v6311_v38  ;;  %9214 = vst [vmem:[#allocation41_spill] sm:$0xff] %v6314_v62  ;;  %v6317_v22 = vld [vmem:[#allocation3 + $0x28] sm:$0xff]  ;;  %v6320_v25 = vld [vmem:[#allocation3 + $0x38] sm:$0xff] }
 0x4b3   :  { %1854 = vmatprep.subr.mxu0 %v6305_v26  ;;  %1925 = vmatprep.subr.mxu1 %v6308_v30  ;;  %9215 = vst [vmem:[#allocation42_spill] sm:$0xff] %v6317_v22  ;;  %9216 = vst [vmem:[#allocation43_spill] sm:$0xff] %v6320_v25  ;;  %v6323_v26 = vld [vmem:[#allocation3 + $0x20] sm:$0xff]  ;;  %v6326_v30 = vld [vmem:[#allocation3 + $0x30] sm:$0xff] }
 0x4b4   :  { %1855 = vmatpush1.msra.mxu0 %v6311_v38  ;;  %1926 = vmatpush1.msra.mxu1 %v6314_v62  ;;  %9217 = vst [vmem:[#allocation44_spill] sm:$0xff] %v6323_v26  ;;  %9218 = vst [vmem:[#allocation45_spill] sm:$0xff] %v6326_v30  ;;  %v6329_v38 = vld [vmem:[#allocation3 + $0x8] sm:$0xff]  ;;  %v6332_v62 = vld [vmem:[#allocation3 + $0x18] sm:$0xff] }
 0x4b5   :  { %1856 = vmatprep.subr.mxu0 %v6317_v22  ;;  %1927 = vmatprep.subr.mxu1 %v6320_v25  ;;  %9219 = vst [vmem:[#allocation46_spill] sm:$0xff] %v6329_v38  ;;  %9220 = vst [vmem:[#allocation47_spill] sm:$0xff] %v6332_v62  ;;  %v6335_v22 = vld [vmem:[#allocation3] sm:$0xff]  ;;  %v6339_v25 = vld [vmem:[#allocation3 + $0x10] sm:$0xff] }
 0x4b6   :  { %1857 = vmatpush1.msra.mxu0 %v6323_v26  ;;  %1928 = vmatpush1.msra.mxu1 %v6326_v30  ;;  %9221 = vst [vmem:[#allocation48_spill] sm:$0xff] %v6335_v22  ;;  %9222 = vst [vmem:[#allocation49_spill] sm:$0xff] %v6339_v25  ;;  %v6354_v30 = vld [vmem:[#allocation6 + $0x1f0] sm:$0xff] }
 0x4b7   :  { %1858 = vmatprep.subr.mxu0 %v6329_v38  ;;  %1929 = vmatprep.subr.mxu1 %v6332_v62  ;;  %v6345_v38 = vld [vmem:[#allocation6 + $0x1e8] sm:$0xff]  ;;  %v6348_v62 = vld [vmem:[#allocation6 + $0x1f8] sm:$0xff]  ;;  %9226 = vst [vmem:[#allocation53_spill] sm:$0xff] %v6354_v30 }
 0x4b8   :  { %1859 = vmatpush1.msra.mxu0 %v6335_v22  ;;  %1892 = vmatprep.mubr.f32.mxu0 %v9052_v23  ;;  %9223 = vst [vmem:[#allocation50_spill] sm:$0xff] %v6345_v38  ;;  %9224 = vst [vmem:[#allocation51_spill] sm:$0xff] %v6348_v62  ;;  %v6351_v22 = vld [vmem:[#allocation6 + $0x1e0] sm:$0xff] }
 0x4b9   :  { %1930 = vmatpush1.msra.mxu1 %v6339_v25  ;;  %1963 = vmatprep.mubr.f32.mxu1 %v9052_v23  ;;  %9225 = vst [vmem:[#allocation52_spill] sm:$0xff] %v6351_v22  ;;  %v6357_v25 = vld [vmem:[#allocation6 + $0x1c8] sm:$0xff] }
 0x4ba   :  { %1893 = vmatmul.mubr.f32.vlgmr.msra.gmra.mxu0 %v6151_v32  ;;  %1964 = vmatmul.mubr.f32.vlgmr.msra.gmra.mxu1 %v6151_v32  ;;  %9227 = vst [vmem:[#allocation54_spill] sm:$0xff] %v6357_v25  ;;  %v6360_v32 = vld [vmem:[#allocation6 + $0x1d8] sm:$0xff] }
 0x4bb   :  { %2010 = vmatprep.subr.mxu0 %v6345_v38  ;;  %2081 = vmatprep.subr.mxu1 %v6348_v62  ;;  %9228 = vst [vmem:[#allocation55_spill] sm:$0xff] %v6360_v32  ;;  %v6363_v38 = vld [vmem:[#allocation6 + $0x1c0] sm:$0xff]  ;;  %v6366_v62 = vld [vmem:[#allocation6 + $0x1d0] sm:$0xff] }
 0x4bc   :  { %2011 = vmatpush1.msra.mxu0 %v6351_v22  ;;  %2082 = vmatpush1.msra.mxu1 %v6354_v30  ;;  %9229 = vst [vmem:[#allocation56_spill] sm:$0xff] %v6363_v38  ;;  %9230 = vst [vmem:[#allocation57_spill] sm:$0xff] %v6366_v62  ;;  %v6369_v22 = vld [vmem:[#allocation6 + $0x1a8] sm:$0xff]  ;;  %v6372_v30 = vld [vmem:[#allocation6 + $0x1b8] sm:$0xff] }
 0x4bd   :  { %2012 = vmatprep.subr.mxu0 %v6357_v25  ;;  %2083 = vmatprep.subr.mxu1 %v6360_v32  ;;  %9231 = vst [vmem:[#allocation58_spill] sm:$0xff] %v6369_v22  ;;  %9232 = vst [vmem:[#allocation59_spill] sm:$0xff] %v6372_v30  ;;  %v6375_v25 = vld [vmem:[#allocation6 + $0x1a0] sm:$0xff]  ;;  %v6378_v32 = vld [vmem:[#allocation6 + $0x1b0] sm:$0xff] }
 0x4be   :  { %2013 = vmatpush1.msra.mxu0 %v6363_v38  ;;  %2084 = vmatpush1.msra.mxu1 %v6366_v62  ;;  %9233 = vst [vmem:[#allocation60_spill] sm:$0xff] %v6375_v25  ;;  %9234 = vst [vmem:[#allocation61_spill] sm:$0xff] %v6378_v32  ;;  %v6381_v38 = vld [vmem:[#allocation6 + $0x188] sm:$0xff]  ;;  %v6384_v62 = vld [vmem:[#allocation6 + $0x198] sm:$0xff] }
 0x4bf   :  { %2014 = vmatprep.subr.mxu0 %v6369_v22  ;;  %2085 = vmatprep.subr.mxu1 %v6372_v30  ;;  %9235 = vst [vmem:[#allocation62_spill] sm:$0xff] %v6381_v38  ;;  %9236 = vst [vmem:[#allocation63_spill] sm:$0xff] %v6384_v62  ;;  %v6387_v22 = vld [vmem:[#allocation6 + $0x180] sm:$0xff]  ;;  %v6390_v30 = vld [vmem:[#allocation6 + $0x190] sm:$0xff] }
 0x4c0   :  { %2015 = vmatpush1.msra.mxu0 %v6375_v25  ;;  %2086 = vmatpush1.msra.mxu1 %v6378_v32  ;;  %9237 = vst [vmem:[#allocation64_spill] sm:$0xff] %v6387_v22  ;;  %9238 = vst [vmem:[#allocation65_spill] sm:$0xff] %v6390_v30  ;;  %v6393_v25 = vld [vmem:[#allocation6 + $0x168] sm:$0xff]  ;;  %v6396_v32 = vld [vmem:[#allocation6 + $0x178] sm:$0xff] }
 0x4c1   :  { %2016 = vmatprep.subr.mxu0 %v6381_v38  ;;  %2087 = vmatprep.subr.mxu1 %v6384_v62  ;;  %9239 = vst [vmem:[#allocation66_spill] sm:$0xff] %v6393_v25  ;;  %9240 = vst [vmem:[#allocation67_spill] sm:$0xff] %v6396_v32  ;;  %v6399_v38 = vld [vmem:[#allocation6 + $0x160] sm:$0xff]  ;;  %v6402_v62 = vld [vmem:[#allocation6 + $0x170] sm:$0xff] }
 0x4c2   :  { %2017 = vmatpush1.msra.mxu0 %v6387_v22  ;;  %2088 = vmatpush1.msra.mxu1 %v6390_v30  ;;  %9241 = vst [vmem:[#allocation68_spill] sm:$0xff] %v6399_v38  ;;  %9242 = vst [vmem:[#allocation69_spill] sm:$0xff] %v6402_v62  ;;  %v6405_v22 = vld [vmem:[#allocation6 + $0x148] sm:$0xff]  ;;  %v6408_v30 = vld [vmem:[#allocation6 + $0x158] sm:$0xff] }
 0x4c3   :  { %2018 = vmatprep.subr.mxu0 %v6393_v25  ;;  %2089 = vmatprep.subr.mxu1 %v6396_v32  ;;  %9243 = vst [vmem:[#allocation70_spill] sm:$0xff] %v6405_v22  ;;  %9244 = vst [vmem:[#allocation71_spill] sm:$0xff] %v6408_v30  ;;  %v6411_v25 = vld [vmem:[#allocation6 + $0x140] sm:$0xff]  ;;  %v6414_v32 = vld [vmem:[#allocation6 + $0x150] sm:$0xff] }
 0x4c4   :  { %2019 = vmatpush1.msra.mxu0 %v6399_v38  ;;  %2090 = vmatpush1.msra.mxu1 %v6402_v62  ;;  %9245 = vst [vmem:[#allocation72_spill] sm:$0xff] %v6411_v25  ;;  %9246 = vst [vmem:[#allocation73_spill] sm:$0xff] %v6414_v32  ;;  %v6417_v38 = vld [vmem:[#allocation6 + $0x128] sm:$0xff]  ;;  %v6420_v62 = vld [vmem:[#allocation6 + $0x138] sm:$0xff] }
 0x4c5   :  { %2020 = vmatprep.subr.mxu0 %v6405_v22  ;;  %2091 = vmatprep.subr.mxu1 %v6408_v30  ;;  %9247 = vst [vmem:[#allocation74_spill] sm:$0xff] %v6417_v38  ;;  %9248 = vst [vmem:[#allocation75_spill] sm:$0xff] %v6420_v62  ;;  %v6423_v22 = vld [vmem:[#allocation6 + $0x120] sm:$0xff]  ;;  %v6426_v30 = vld [vmem:[#allocation6 + $0x130] sm:$0xff] }
 0x4c6   :  { %2021 = vmatpush1.msra.mxu0 %v6411_v25  ;;  %2092 = vmatpush1.msra.mxu1 %v6414_v32  ;;  %9249 = vst [vmem:[#allocation76_spill] sm:$0xff] %v6423_v22  ;;  %9250 = vst [vmem:[#allocation77_spill] sm:$0xff] %v6426_v30  ;;  %v6429_v25 = vld [vmem:[#allocation6 + $0x108] sm:$0xff]  ;;  %v6432_v32 = vld [vmem:[#allocation6 + $0x118] sm:$0xff] }
 0x4c7   :  { %2022 = vmatprep.subr.mxu0 %v6417_v38  ;;  %2093 = vmatprep.subr.mxu1 %v6420_v62  ;;  %9251 = vst [vmem:[#allocation78_spill] sm:$0xff] %v6429_v25  ;;  %9252 = vst [vmem:[#allocation79_spill] sm:$0xff] %v6432_v32  ;;  %v6435_v38 = vld [vmem:[#allocation6 + $0x100] sm:$0xff]  ;;  %v6438_v62 = vld [vmem:[#allocation6 + $0x110] sm:$0xff] }
 0x4c8   :  { %2023 = vmatpush1.msra.mxu0 %v6423_v22  ;;  %2094 = vmatpush1.msra.mxu1 %v6426_v30  ;;  %9253 = vst [vmem:[#allocation80_spill] sm:$0xff] %v6435_v38  ;;  %9254 = vst [vmem:[#allocation81_spill] sm:$0xff] %v6438_v62  ;;  %v6441_v22 = vld [vmem:[#allocation6 + $0xe8] sm:$0xff]  ;;  %v6444_v30 = vld [vmem:[#allocation6 + $0xf8] sm:$0xff] }
 0x4c9   :  { %2024 = vmatprep.subr.mxu0 %v6429_v25  ;;  %2095 = vmatprep.subr.mxu1 %v6432_v32  ;;  %9255 = vst [vmem:[#allocation82_spill] sm:$0xff] %v6441_v22  ;;  %9256 = vst [vmem:[#allocation83_spill] sm:$0xff] %v6444_v30  ;;  %v6447_v25 = vld [vmem:[#allocation6 + $0xe0] sm:$0xff]  ;;  %v6450_v32 = vld [vmem:[#allocation6 + $0xf0] sm:$0xff] }
 0x4ca   :  { %2025 = vmatpush1.msra.mxu0 %v6435_v38  ;;  %2096 = vmatpush1.msra.mxu1 %v6438_v62  ;;  %9257 = vst [vmem:[#allocation84_spill] sm:$0xff] %v6447_v25  ;;  %9258 = vst [vmem:[#allocation85_spill] sm:$0xff] %v6450_v32  ;;  %v6453_v38 = vld [vmem:[#allocation6 + $0xc8] sm:$0xff]  ;;  %v6456_v62 = vld [vmem:[#allocation6 + $0xd8] sm:$0xff] }
 0x4cb   :  { %2026 = vmatprep.subr.mxu0 %v6441_v22  ;;  %2097 = vmatprep.subr.mxu1 %v6444_v30  ;;  %9259 = vst [vmem:[#allocation86_spill] sm:$0xff] %v6453_v38  ;;  %9260 = vst [vmem:[#allocation87_spill] sm:$0xff] %v6456_v62  ;;  %v6459_v22 = vld [vmem:[#allocation6 + $0xc0] sm:$0xff]  ;;  %v6462_v30 = vld [vmem:[#allocation6 + $0xd0] sm:$0xff] }
 0x4cc   :  { %2027 = vmatpush1.msra.mxu0 %v6447_v25  ;;  %2098 = vmatpush1.msra.mxu1 %v6450_v32  ;;  %9261 = vst [vmem:[#allocation88_spill] sm:$0xff] %v6459_v22  ;;  %9262 = vst [vmem:[#allocation89_spill] sm:$0xff] %v6462_v30  ;;  %v6465_v25 = vld [vmem:[#allocation6 + $0xa8] sm:$0xff]  ;;  %v6468_v32 = vld [vmem:[#allocation6 + $0xb8] sm:$0xff] }
 0x4cd   :  { %2028 = vmatprep.subr.mxu0 %v6453_v38  ;;  %2099 = vmatprep.subr.mxu1 %v6456_v62  ;;  %9263 = vst [vmem:[#allocation90_spill] sm:$0xff] %v6465_v25  ;;  %9264 = vst [vmem:[#allocation91_spill] sm:$0xff] %v6468_v32  ;;  %v6471_v38 = vld [vmem:[#allocation6 + $0xa0] sm:$0xff]  ;;  %v6474_v62 = vld [vmem:[#allocation6 + $0xb0] sm:$0xff] }
 0x4ce   :  { %2029 = vmatpush1.msra.mxu0 %v6459_v22  ;;  %2100 = vmatpush1.msra.mxu1 %v6462_v30  ;;  %9265 = vst [vmem:[#allocation92_spill] sm:$0xff] %v6471_v38  ;;  %9266 = vst [vmem:[#allocation93_spill] sm:$0xff] %v6474_v62  ;;  %v6477_v22 = vld [vmem:[#allocation6 + $0x88] sm:$0xff]  ;;  %v6480_v30 = vld [vmem:[#allocation6 + $0x98] sm:$0xff] }
 0x4cf   :  { %2030 = vmatprep.subr.mxu0 %v6465_v25  ;;  %2101 = vmatprep.subr.mxu1 %v6468_v32  ;;  %9267 = vst [vmem:[#allocation94_spill] sm:$0xff] %v6477_v22  ;;  %9268 = vst [vmem:[#allocation95_spill] sm:$0xff] %v6480_v30  ;;  %v6483_v25 = vld [vmem:[#allocation6 + $0x80] sm:$0xff]  ;;  %v6486_v32 = vld [vmem:[#allocation6 + $0x90] sm:$0xff] }
 0x4d0   :  { %2031 = vmatpush1.msra.mxu0 %v6471_v38  ;;  %2102 = vmatpush1.msra.mxu1 %v6474_v62  ;;  %9269 = vst [vmem:[#allocation96_spill] sm:$0xff] %v6483_v25  ;;  %9270 = vst [vmem:[#allocation97_spill] sm:$0xff] %v6486_v32  ;;  %v6489_v38 = vld [vmem:[#allocation6 + $0x68] sm:$0xff]  ;;  %v6492_v62 = vld [vmem:[#allocation6 + $0x78] sm:$0xff] }
 0x4d1   :  { %2032 = vmatprep.subr.mxu0 %v6477_v22  ;;  %2103 = vmatprep.subr.mxu1 %v6480_v30  ;;  %9271 = vst [vmem:[#allocation98_spill] sm:$0xff] %v6489_v38  ;;  %9272 = vst [vmem:[#allocation99_spill] sm:$0xff] %v6492_v62  ;;  %v6495_v22 = vld [vmem:[#allocation6 + $0x60] sm:$0xff]  ;;  %v6498_v30 = vld [vmem:[#allocation6 + $0x70] sm:$0xff] }
 0x4d2   :  { %2033 = vmatpush1.msra.mxu0 %v6483_v25  ;;  %2104 = vmatpush1.msra.mxu1 %v6486_v32  ;;  %9273 = vst [vmem:[#allocation100_spill] sm:$0xff] %v6495_v22  ;;  %9274 = vst [vmem:[#allocation101_spill] sm:$0xff] %v6498_v30  ;;  %v6501_v25 = vld [vmem:[#allocation6 + $0x48] sm:$0xff]  ;;  %v6504_v32 = vld [vmem:[#allocation6 + $0x58] sm:$0xff] }
 0x4d3   :  { %2034 = vmatprep.subr.mxu0 %v6489_v38  ;;  %2105 = vmatprep.subr.mxu1 %v6492_v62  ;;  %9275 = vst [vmem:[#allocation102_spill] sm:$0xff] %v6501_v25  ;;  %9276 = vst [vmem:[#allocation103_spill] sm:$0xff] %v6504_v32  ;;  %v6507_v38 = vld [vmem:[#allocation6 + $0x40] sm:$0xff]  ;;  %v6510_v62 = vld [vmem:[#allocation6 + $0x50] sm:$0xff] }
 0x4d4   :  { %2035 = vmatpush1.msra.mxu0 %v6495_v22  ;;  %2106 = vmatpush1.msra.mxu1 %v6498_v30  ;;  %9277 = vst [vmem:[#allocation104_spill] sm:$0xff] %v6507_v38  ;;  %9278 = vst [vmem:[#allocation105_spill] sm:$0xff] %v6510_v62  ;;  %v6513_v22 = vld [vmem:[#allocation6 + $0x28] sm:$0xff]  ;;  %v6516_v30 = vld [vmem:[#allocation6 + $0x38] sm:$0xff] }
 0x4d5   :  { %2036 = vmatprep.subr.mxu0 %v6501_v25  ;;  %2107 = vmatprep.subr.mxu1 %v6504_v32  ;;  %9279 = vst [vmem:[#allocation106_spill] sm:$0xff] %v6513_v22  ;;  %9280 = vst [vmem:[#allocation107_spill] sm:$0xff] %v6516_v30  ;;  %v6519_v25 = vld [vmem:[#allocation6 + $0x20] sm:$0xff]  ;;  %v6522_v32 = vld [vmem:[#allocation6 + $0x30] sm:$0xff] }
 0x4d6   :  { %2037 = vmatpush1.msra.mxu0 %v6507_v38  ;;  %2108 = vmatpush1.msra.mxu1 %v6510_v62  ;;  %9281 = vst [vmem:[#allocation108_spill] sm:$0xff] %v6519_v25  ;;  %9282 = vst [vmem:[#allocation109_spill] sm:$0xff] %v6522_v32  ;;  %v6525_v38 = vld [vmem:[#allocation6 + $0x8] sm:$0xff]  ;;  %v6528_v62 = vld [vmem:[#allocation6 + $0x18] sm:$0xff] }
 0x4d7   :  { %2038 = vmatprep.subr.mxu0 %v6513_v22  ;;  %2109 = vmatprep.subr.mxu1 %v6516_v30  ;;  %9283 = vst [vmem:[#allocation110_spill] sm:$0xff] %v6525_v38  ;;  %9284 = vst [vmem:[#allocation111_spill] sm:$0xff] %v6528_v62  ;;  %v6531_v22 = vld [vmem:[#allocation6] sm:$0xff]  ;;  %v6534_v30 = vld [vmem:[#allocation6 + $0x10] sm:$0xff] }
 0x4d8   :  { %2039 = vmatpush1.msra.mxu0 %v6519_v25  ;;  %2110 = vmatpush1.msra.mxu1 %v6522_v32  ;;  %9285 = vst [vmem:[#allocation112_spill] sm:$0xff] %v6531_v22  ;;  %9286 = vst [vmem:[#allocation113_spill] sm:$0xff] %v6534_v30  ;;  %v6537_v25 = vld [vmem:[#allocation6 + $0x3e8] sm:$0xff]  ;;  %v6540_v32 = vld [vmem:[#allocation6 + $0x3f8] sm:$0xff] }
 0x4d9   :  { %2040 = vmatprep.subr.mxu0 %v6525_v38  ;;  %2111 = vmatprep.subr.mxu1 %v6528_v62  ;;  %9287 = vst [vmem:[#allocation114_spill] sm:$0xff] %v6537_v25  ;;  %9288 = vst [vmem:[#allocation115_spill] sm:$0xff] %v6540_v32  ;;  %v6543_v38 = vld [vmem:[#allocation6 + $0x3e0] sm:$0xff]  ;;  %v6546_v62 = vld [vmem:[#allocation6 + $0x3f0] sm:$0xff] }
 0x4da   :  { %2041 = vmatpush1.msra.mxu0 %v6531_v22  ;;  %2112 = vmatpush1.msra.mxu1 %v6534_v30  ;;  %9289 = vst [vmem:[#allocation116_spill] sm:$0xff] %v6543_v38  ;;  %9290 = vst [vmem:[#allocation117_spill] sm:$0xff] %v6546_v62  ;;  %v6549_v22 = vld [vmem:[#allocation6 + $0x3c8] sm:$0xff]  ;;  %v6552_v30 = vld [vmem:[#allocation6 + $0x3d8] sm:$0xff] }
 0x4db   :  { %2042 = vmatprep.subr.mxu0 %v6537_v25  ;;  %2113 = vmatprep.subr.mxu1 %v6540_v32  ;;  %9291 = vst [vmem:[#allocation118_spill] sm:$0xff] %v6549_v22  ;;  %9292 = vst [vmem:[#allocation119_spill] sm:$0xff] %v6552_v30  ;;  %v6555_v25 = vld [vmem:[#allocation6 + $0x3c0] sm:$0xff]  ;;  %v6558_v32 = vld [vmem:[#allocation6 + $0x3d0] sm:$0xff] }
 0x4dc   :  { %2043 = vmatpush2.msra.mxu0 %v6543_v38  ;;  %2114 = vmatpush2.msra.mxu1 %v6546_v62  ;;  %9293 = vst [vmem:[#allocation120_spill] sm:$0xff] %v6555_v25  ;;  %9294 = vst [vmem:[#allocation121_spill] sm:$0xff] %v6558_v32  ;;  %v6561_v38 = vld [vmem:[#allocation6 + $0x3a8] sm:$0xff]  ;;  %v6564_v62 = vld [vmem:[#allocation6 + $0x3b8] sm:$0xff] }
 0x4dd   :  { %2044 = vmatprep.subr.mxu0 %v6549_v22  ;;  %2115 = vmatprep.subr.mxu1 %v6552_v30  ;;  %9295 = vst [vmem:[#allocation122_spill] sm:$0xff] %v6561_v38  ;;  %9296 = vst [vmem:[#allocation123_spill] sm:$0xff] %v6564_v62  ;;  %v6567_v22 = vld [vmem:[#allocation6 + $0x3a0] sm:$0xff]  ;;  %v6570_v30 = vld [vmem:[#allocation6 + $0x3b0] sm:$0xff] }
 0x4de   :  { %2045 = vmatpush2.msra.mxu0 %v6555_v25  ;;  %2116 = vmatpush2.msra.mxu1 %v6558_v32  ;;  %9297 = vst [vmem:[#allocation124_spill] sm:$0xff] %v6567_v22  ;;  %9298 = vst [vmem:[#allocation125_spill] sm:$0xff] %v6570_v30  ;;  %v6573_v25 = vld [vmem:[#allocation6 + $0x388] sm:$0xff]  ;;  %v6576_v32 = vld [vmem:[#allocation6 + $0x398] sm:$0xff] }
 0x4df   :  { %2046 = vmatprep.subr.mxu0 %v6561_v38  ;;  %2117 = vmatprep.subr.mxu1 %v6564_v62  ;;  %9299 = vst [vmem:[#allocation126_spill] sm:$0xff] %v6573_v25  ;;  %9300 = vst [vmem:[#allocation127_spill] sm:$0xff] %v6576_v32  ;;  %v6579_v38 = vld [vmem:[#allocation6 + $0x380] sm:$0xff]  ;;  %v6582_v62 = vld [vmem:[#allocation6 + $0x390] sm:$0xff] }
 0x4e0   :  { %2047 = vmatpush2.msra.mxu0 %v6567_v22  ;;  %2118 = vmatpush2.msra.mxu1 %v6570_v30  ;;  %9301 = vst [vmem:[#allocation128_spill] sm:$0xff] %v6579_v38  ;;  %9302 = vst [vmem:[#allocation129_spill] sm:$0xff] %v6582_v62  ;;  %v6585_v22 = vld [vmem:[#allocation6 + $0x368] sm:$0xff]  ;;  %v6588_v30 = vld [vmem:[#allocation6 + $0x378] sm:$0xff] }
 0x4e1   :  { %2048 = vmatprep.subr.mxu0 %v6573_v25  ;;  %2119 = vmatprep.subr.mxu1 %v6576_v32  ;;  %9303 = vst [vmem:[#allocation130_spill] sm:$0xff] %v6585_v22  ;;  %9304 = vst [vmem:[#allocation131_spill] sm:$0xff] %v6588_v30  ;;  %v6591_v25 = vld [vmem:[#allocation6 + $0x360] sm:$0xff]  ;;  %v6594_v32 = vld [vmem:[#allocation6 + $0x370] sm:$0xff] }
 0x4e2   :  { %2049 = vmatpush2.msra.mxu0 %v6579_v38  ;;  %2120 = vmatpush2.msra.mxu1 %v6582_v62  ;;  %9305 = vst [vmem:[#allocation132_spill] sm:$0xff] %v6591_v25  ;;  %9306 = vst [vmem:[#allocation133_spill] sm:$0xff] %v6594_v32  ;;  %v6597_v38 = vld [vmem:[#allocation6 + $0x348] sm:$0xff]  ;;  %v6600_v62 = vld [vmem:[#allocation6 + $0x358] sm:$0xff] }
 0x4e3   :  { %2050 = vmatprep.subr.mxu0 %v6585_v22  ;;  %2121 = vmatprep.subr.mxu1 %v6588_v30  ;;  %9307 = vst [vmem:[#allocation134_spill] sm:$0xff] %v6597_v38  ;;  %9308 = vst [vmem:[#allocation135_spill] sm:$0xff] %v6600_v62  ;;  %v6603_v22 = vld [vmem:[#allocation6 + $0x340] sm:$0xff]  ;;  %v6606_v30 = vld [vmem:[#allocation6 + $0x350] sm:$0xff] }
 0x4e4   :  { %2051 = vmatpush2.msra.mxu0 %v6591_v25  ;;  %2122 = vmatpush2.msra.mxu1 %v6594_v32  ;;  %9309 = vst [vmem:[#allocation136_spill] sm:$0xff] %v6603_v22  ;;  %9310 = vst [vmem:[#allocation137_spill] sm:$0xff] %v6606_v30  ;;  %v6609_v25 = vld [vmem:[#allocation6 + $0x328] sm:$0xff]  ;;  %v6612_v32 = vld [vmem:[#allocation6 + $0x338] sm:$0xff] }
 0x4e5   :  { %2052 = vmatprep.subr.mxu0 %v6597_v38  ;;  %2123 = vmatprep.subr.mxu1 %v6600_v62  ;;  %9311 = vst [vmem:[#allocation138_spill] sm:$0xff] %v6609_v25  ;;  %9312 = vst [vmem:[#allocation139_spill] sm:$0xff] %v6612_v32  ;;  %v6615_v38 = vld [vmem:[#allocation6 + $0x320] sm:$0xff]  ;;  %v6618_v62 = vld [vmem:[#allocation6 + $0x330] sm:$0xff] }
 0x4e6   :  { %2053 = vmatpush2.msra.mxu0 %v6603_v22  ;;  %2124 = vmatpush2.msra.mxu1 %v6606_v30  ;;  %9313 = vst [vmem:[#allocation140_spill] sm:$0xff] %v6615_v38  ;;  %9314 = vst [vmem:[#allocation141_spill] sm:$0xff] %v6618_v62  ;;  %v6621_v22 = vld [vmem:[#allocation6 + $0x308] sm:$0xff]  ;;  %v6624_v30 = vld [vmem:[#allocation6 + $0x318] sm:$0xff] }
 0x4e7   :  { %2054 = vmatprep.subr.mxu0 %v6609_v25  ;;  %2125 = vmatprep.subr.mxu1 %v6612_v32  ;;  %9315 = vst [vmem:[#allocation142_spill] sm:$0xff] %v6621_v22  ;;  %9316 = vst [vmem:[#allocation143_spill] sm:$0xff] %v6624_v30  ;;  %v6627_v25 = vld [vmem:[#allocation6 + $0x300] sm:$0xff]  ;;  %v6630_v32 = vld [vmem:[#allocation6 + $0x310] sm:$0xff] }
 0x4e8   :  { %2055 = vmatpush2.msra.mxu0 %v6615_v38  ;;  %2126 = vmatpush2.msra.mxu1 %v6618_v62  ;;  %9317 = vst [vmem:[#allocation144_spill] sm:$0xff] %v6627_v25  ;;  %9318 = vst [vmem:[#allocation145_spill] sm:$0xff] %v6630_v32  ;;  %v6633_v38 = vld [vmem:[#allocation6 + $0x2e8] sm:$0xff]  ;;  %v6636_v62 = vld [vmem:[#allocation6 + $0x2f8] sm:$0xff] }
 0x4e9   :  { %2056 = vmatprep.subr.mxu0 %v6621_v22  ;;  %2127 = vmatprep.subr.mxu1 %v6624_v30  ;;  %9319 = vst [vmem:[#allocation146_spill] sm:$0xff] %v6633_v38  ;;  %9320 = vst [vmem:[#allocation147_spill] sm:$0xff] %v6636_v62  ;;  %v6639_v22 = vld [vmem:[#allocation6 + $0x2e0] sm:$0xff]  ;;  %v6642_v30 = vld [vmem:[#allocation6 + $0x2f0] sm:$0xff] }
 0x4ea   :  { %2057 = vmatpush2.msra.mxu0 %v6627_v25  ;;  %2128 = vmatpush2.msra.mxu1 %v6630_v32  ;;  %9321 = vst [vmem:[#allocation148_spill] sm:$0xff] %v6639_v22  ;;  %9322 = vst [vmem:[#allocation149_spill] sm:$0xff] %v6642_v30  ;;  %v6645_v25 = vld [vmem:[#allocation6 + $0x2c8] sm:$0xff]  ;;  %v6648_v32 = vld [vmem:[#allocation6 + $0x2d8] sm:$0xff] }
 0x4eb   :  { %2058 = vmatprep.subr.mxu0 %v6633_v38  ;;  %2129 = vmatprep.subr.mxu1 %v6636_v62  ;;  %9323 = vst [vmem:[#allocation150_spill] sm:$0xff] %v6645_v25  ;;  %9324 = vst [vmem:[#allocation151_spill] sm:$0xff] %v6648_v32  ;;  %v6651_v38 = vld [vmem:[#allocation6 + $0x2c0] sm:$0xff]  ;;  %v6654_v62 = vld [vmem:[#allocation6 + $0x2d0] sm:$0xff] }
 0x4ec   :  { %2059 = vmatpush2.msra.mxu0 %v6639_v22  ;;  %2130 = vmatpush2.msra.mxu1 %v6642_v30  ;;  %9325 = vst [vmem:[#allocation152_spill] sm:$0xff] %v6651_v38  ;;  %9326 = vst [vmem:[#allocation153_spill] sm:$0xff] %v6654_v62  ;;  %v6657_v22 = vld [vmem:[#allocation6 + $0x2a8] sm:$0xff]  ;;  %v6660_v30 = vld [vmem:[#allocation6 + $0x2b8] sm:$0xff] }
 0x4ed   :  { %2060 = vmatprep.subr.mxu0 %v6645_v25  ;;  %2131 = vmatprep.subr.mxu1 %v6648_v32  ;;  %9327 = vst [vmem:[#allocation154_spill] sm:$0xff] %v6657_v22  ;;  %9328 = vst [vmem:[#allocation155_spill] sm:$0xff] %v6660_v30  ;;  %v6663_v25 = vld [vmem:[#allocation6 + $0x2a0] sm:$0xff]  ;;  %v6666_v32 = vld [vmem:[#allocation6 + $0x2b0] sm:$0xff] }
 0x4ee   :  { %2061 = vmatpush2.msra.mxu0 %v6651_v38  ;;  %2132 = vmatpush2.msra.mxu1 %v6654_v62  ;;  %9329 = vst [vmem:[#allocation156_spill] sm:$0xff] %v6663_v25  ;;  %9330 = vst [vmem:[#allocation157_spill] sm:$0xff] %v6666_v32  ;;  %v6669_v38 = vld [vmem:[#allocation6 + $0x288] sm:$0xff]  ;;  %v6672_v62 = vld [vmem:[#allocation6 + $0x298] sm:$0xff] }
 0x4ef   :  { %2062 = vmatprep.subr.mxu0 %v6657_v22  ;;  %2133 = vmatprep.subr.mxu1 %v6660_v30  ;;  %9331 = vst [vmem:[#allocation158_spill] sm:$0xff] %v6669_v38  ;;  %9332 = vst [vmem:[#allocation159_spill] sm:$0xff] %v6672_v62  ;;  %v6675_v22 = vld [vmem:[#allocation6 + $0x280] sm:$0xff]  ;;  %v6678_v30 = vld [vmem:[#allocation6 + $0x290] sm:$0xff] }
 0x4f0   :  { %2063 = vmatpush2.msra.mxu0 %v6663_v25  ;;  %2134 = vmatpush2.msra.mxu1 %v6666_v32  ;;  %9333 = vst [vmem:[#allocation160_spill] sm:$0xff] %v6675_v22  ;;  %9334 = vst [vmem:[#allocation161_spill] sm:$0xff] %v6678_v30  ;;  %v6681_v25 = vld [vmem:[#allocation6 + $0x268] sm:$0xff]  ;;  %v6684_v32 = vld [vmem:[#allocation6 + $0x278] sm:$0xff] }
 0x4f1   :  { %2064 = vmatprep.subr.mxu0 %v6669_v38  ;;  %2135 = vmatprep.subr.mxu1 %v6672_v62  ;;  %9335 = vst [vmem:[#allocation162_spill] sm:$0xff] %v6681_v25  ;;  %9336 = vst [vmem:[#allocation163_spill] sm:$0xff] %v6684_v32  ;;  %v6687_v38 = vld [vmem:[#allocation6 + $0x260] sm:$0xff]  ;;  %v6690_v62 = vld [vmem:[#allocation6 + $0x270] sm:$0xff] }
 0x4f2   :  { %2065 = vmatpush2.msra.mxu0 %v6675_v22  ;;  %2136 = vmatpush2.msra.mxu1 %v6678_v30  ;;  %9337 = vst [vmem:[#allocation164_spill] sm:$0xff] %v6687_v38  ;;  %9338 = vst [vmem:[#allocation165_spill] sm:$0xff] %v6690_v62  ;;  %v6693_v22 = vld [vmem:[#allocation6 + $0x248] sm:$0xff]  ;;  %v6696_v30 = vld [vmem:[#allocation6 + $0x258] sm:$0xff] }
 0x4f3   :  { %2066 = vmatprep.subr.mxu0 %v6681_v25  ;;  %2137 = vmatprep.subr.mxu1 %v6684_v32  ;;  %9339 = vst [vmem:[#allocation167_spill] sm:$0xff] %v6693_v22  ;;  %9340 = vst [vmem:[#allocation170_spill] sm:$0xff] %v6696_v30  ;;  %v6699_v25 = vld [vmem:[#allocation6 + $0x240] sm:$0xff]  ;;  %v6702_v32 = vld [vmem:[#allocation6 + $0x250] sm:$0xff] }
 0x4f4   :  { %2067 = vmatpush2.msra.mxu0 %v6687_v38  ;;  %2138 = vmatpush2.msra.mxu1 %v6690_v62  ;;  %9341 = vst [vmem:[#allocation171_spill] sm:$0xff] %v6699_v25  ;;  %9342 = vst [vmem:[#allocation172_spill] sm:$0xff] %v6702_v32  ;;  %v6705_v38 = vld [vmem:[#allocation6 + $0x228] sm:$0xff]  ;;  %v6708_v62 = vld [vmem:[#allocation6 + $0x238] sm:$0xff] }
 0x4f5   :  { %2068 = vmatprep.subr.mxu0 %v6693_v22  ;;  %2139 = vmatprep.subr.mxu1 %v6696_v30  ;;  %9343 = vst [vmem:[#allocation173_spill] sm:$0xff] %v6705_v38  ;;  %9344 = vst [vmem:[#allocation174_spill] sm:$0xff] %v6708_v62  ;;  %v6711_v22 = vld [vmem:[#allocation6 + $0x220] sm:$0xff]  ;;  %v6714_v30 = vld [vmem:[#allocation6 + $0x230] sm:$0xff] }
 0x4f6   :  { %2069 = vmatpush2.msra.mxu0 %v6699_v25  ;;  %2140 = vmatpush2.msra.mxu1 %v6702_v32  ;;  %9345 = vst [vmem:[#allocation175_spill] sm:$0xff] %v6711_v22  ;;  %9346 = vst [vmem:[#allocation176_spill] sm:$0xff] %v6714_v30  ;;  %v6717_v25 = vld [vmem:[#allocation6 + $0x208] sm:$0xff]  ;;  %v6720_v32 = vld [vmem:[#allocation6 + $0x218] sm:$0xff] }
 0x4f7   :  { %2070 = vmatprep.subr.mxu0 %v6705_v38  ;;  %2141 = vmatprep.subr.mxu1 %v6708_v62  ;;  %9347 = vst [vmem:[#allocation177_spill] sm:$0xff] %v6717_v25  ;;  %9348 = vst [vmem:[#allocation178_spill] sm:$0xff] %v6720_v32  ;;  %v6723_v38 = vld [vmem:[#allocation6 + $0x200] sm:$0xff]  ;;  %v6726_v62 = vld [vmem:[#allocation6 + $0x210] sm:$0xff] }
 0x4f8   :  { %2071 = vmatpush2.msra.mxu0 %v6711_v22  ;;  %2142 = vmatpush2.msra.mxu1 %v6714_v30  ;;  %9349 = vst [vmem:[#allocation179_spill] sm:$0xff] %v6723_v38  ;;  %9350 = vst [vmem:[#allocation180_spill] sm:$0xff] %v6726_v62 }
 0x4f9   :  { %2072 = vmatprep.subr.mxu0 %v6717_v25  ;;  %2143 = vmatprep.subr.mxu1 %v6720_v32 }
 0x4fa   :  { %2073 = vmatpush2.msra.mxu0 %v6723_v38  ;;  %2144 = vmatpush2.msra.mxu1 %v6726_v62 }
 0x4fb   :  { %2195 = vmatprep.subr.mxu0 %v6115_v42  ;;  %2266 = vmatprep.subr.mxu1 %v6118_v61 }
 0x559   :  { %v1709_v30 = vpop.f32.mrf.mxu0  ;;  %v1780_v32 = vpop.f32.mrf.mxu1 }
 0x55a   :  { %v1710_v22 = vadd.f32 %v1709_v30, %v9182_v59  ;;  %v1781_v42 = vadd.f32 %v1780_v32, %v9185_v11 }
 0x55b   :  { %v1711_v25 = vpop.f32.mrf.mxu0  ;;  %v1782_v38 = vpop.f32.mrf.mxu1 }
 0x55c   :  { %v3343_v23 = vmul.f32 -1.442695, %v1710_v22  ;;  %v1712_v26 = vadd.f32 %v1711_v25, %v9183_v54  ;;  %v1783_v60 = vadd.f32 %v1782_v38, %v9184_v6  ;;  %v1822_v22 = vpop.permute.xlu1 %1821 }
 0x55d   :  { %v1825_v32 = vmul.f32 %v1822_v22, %v9188_v21 }
 0x55e   :  { %3506 = vpow2.f32 %v3343_v23  ;;  %v3344_v24 = vmul.f32 -1.442695, %v1712_v26  ;;  %v3345_v27 = vmul.f32 -1.442695, %v1783_v60  ;;  %v1824_v23 = vmul.f32 %v1822_v22, %v9186_v20  ;;  %v1972_v26 = vpop.permute.xlu0 %1971 }
 0x55f   :  { %v1974_v60 = vmul.f32 %v1972_v26, %v9187_v33 }
 0x560   :  { %3508 = vpow2.f32 %v3344_v24 }
 0x561   :  { %3510 = vpow2.f32 %v3345_v27 }
 0x56b   :  { %v3507_v62 = vpop.eup %3506 }
 0x56c   :  { %v1788_v37 = vadd.f32 1.0, %v3507_v62 }
 0x56d   :  { %v3509_v61 = vpop.eup %3508 }
 0x56e   :  { %3512 = vrcp.f32 %v1788_v37  ;;  %v1794_v30 = vadd.f32 1.0, %v3509_v61  ;;  %v3511_v25 = vpop.eup %3510 }
 0x56f   :  { %3514 = vtanh.f32 %v1781_v42  ;;  %v1801_v37 = vadd.f32 1.0, %v3511_v25 }
 0x570   :  { %3516 = vrcp.f32 %v1794_v30  ;;  %v1975_v30 = vmul.f32 %v1972_v26, %v8855_v35 }
 0x571   :  { %3518 = vrcp.f32 %v1801_v37 }
 0x57a   :  { %v1894_v24 = vpop.f32.mrf.mxu0  ;;  %v1965_v38 = vpop.f32.mrf.mxu1 }
 0x57b   :  { %v3513_v54 = vpop.eup %3512  ;;  %v1895_v59 = vadd.f32 %v1894_v24, %v1824_v23  ;;  %v1827_v24 = vmul.f32 %v1822_v22, %v5033_v46 }
 0x57c   :  { %v3515_v62 = vpop.eup %3514  ;;  %v1896_v11 = vpop.f32.mrf.mxu0 }
 0x57d   :  { %v3517_v27 = vpop.eup %3516  ;;  %v1978_v61 = vadd.f32 %v1974_v60, %v1895_v59  ;;  %v1897_v42 = vadd.f32 %v1896_v11, %v1825_v32  ;;  %v1805_v6 = vmul.f32 %v3515_v62, %v3513_v54  ;;  %v1967_v23 = vpop.f32.mrf.mxu1  ;;  %v1977_v54 = vmul.f32 %v1972_v26, %v5039_v3 }
 0x57e   :  { %v1804_v20 = vmul.f32 %v3517_v27, %v6132_v39  ;;  %v1968_v25 = vadd.f32 %v1967_v23, %v1827_v24  ;;  %v1826_v11 = vmul.f32 %v1822_v22, %v5043_v49  ;;  %v1976_v32 = vmul.f32 %v1972_v26, %v5050_v1 }
 0x57f   :  { %v1982_v19 = vadd.f32 %v1978_v61, %v5026_v0  ;;  %v1979_v15 = vadd.f32 %v1975_v30, %v1897_v42 }
 0x580   :  { %v6742_v33 = vadd.f32 %v1805_v6, %v1804_v20  ;;  %v1981_v39 = vadd.f32 %v1977_v54, %v1968_v25  ;;  %v1966_v60 = vadd.f32 %v1965_v38, %v1826_v11 }
 0x581   :  { %v3348_v21 = vmul.f32 -1.442695, %v1982_v19  ;;  %v1983_v14 = vadd.f32 %v1979_v15, %v5036_v44  ;;  %v3519_v19 = vpop.eup %3518 }
 0x582   :  { %3520 = vtanh.f32 %v6742_v33  ;;  %v1985_v6 = vadd.f32 %v1981_v39, %v8856_v9  ;;  %v1980_v20 = vadd.f32 %v1976_v32, %v1966_v60  ;;  %v9380_v60 = vld [vmem:[#allocation45_spill] sm:$0xff]  ;;  %v9381_v32 = vld [vmem:[#allocation46_spill] sm:$0xff] }
 0x583   :  { %3522 = vpow2.f32 %v3348_v21  ;;  %v3349_v59 = vmul.f32 -1.442695, %v1983_v14 }
 0x584   :  { %v3350_v62 = vmul.f32 -1.442695, %v1985_v6  ;;  %v1984_v37 = vadd.f32 %v1980_v20, %v5058_v58  ;;  %v9382_v6 = vld [vmem:[#allocation47_spill] sm:$0xff]  ;;  %v9383_v20 = vld [vmem:[#allocation48_spill] sm:$0xff] }
 0x585   :  { %3524 = vpow2.f32 %v3349_v59 }
 0x586   :  { %3526 = vpow2.f32 %v3350_v62  ;;  %v9385_v62 = vld [vmem:[#allocation49_spill] sm:$0xff] }
 0x58f   :  { %v3521_v15 = vpop.eup %3520 }
 0x590   :  { %v3523_v27 = vpop.eup %3522  ;;  %v1808_v21 = vmul.f32 %v3521_v15, %v3519_v19  ;;  %v9384_v19 = vmov 0.0   ;;  %v9386_v15 = vld [vmem:[#allocation50_spill] sm:$0xff] }
 0x591   :  { %v1989_v14 = vadd.f32 1.0, %v3523_v27  ;;  %v9387_v27 = vld [vmem:[#allocation51_spill] sm:$0xff] }
 0x592   :  { %v3525_v61 = vpop.eup %3524  ;;  %2074 = vmatprep.mubr.f32.mxu0 %v1808_v21  ;;  %2145 = vmatprep.mubr.f32.mxu1 %v1808_v21  ;;  %v1809_v22 = vmul.f32 %v6144_v18, %v1808_v21  ;;  %v9389_v21 = vld [vmem:[#allocation53_spill] sm:$0xff] }
 0x593   :  { %3528 = vrcp.f32 %v1989_v14  ;;  %v1995_v38 = vadd.f32 1.0, %v3525_v61  ;;  %v3527_v26 = vpop.eup %3526  ;;  %v9390_v14 = vld [vmem:[#allocation54_spill] sm:$0xff]  ;;  %v9391_v61 = vld [vmem:[#allocation55_spill] sm:$0xff] }
 0x594   :  { %3530 = vtanh.f32 %v1984_v37  ;;  %1810 = vadd.xlane.f32.xlu1 %v1809_v22  ;;  %v2002_v24 = vadd.f32 1.0, %v3527_v26  ;;  %v9388_v37 = vld [vmem:[#allocation52_spill] sm:$0xff]  ;;  %v9394_v26 = vld [vmem:[#allocation58_spill] sm:$0xff] }
 0x595   :  { %3532 = vrcp.f32 %v1995_v38  ;;  %v9392_v22 = vld [vmem:[#allocation56_spill] sm:$0xff]  ;;  %v9393_v38 = vld [vmem:[#allocation57_spill] sm:$0xff] }
 0x596   :  { %3534 = vrcp.f32 %v2002_v24  ;;  %v9398_v24 = vld [vmem:[#allocation62_spill] sm:$0xff] }
 0x5a0   :  { %v3529_v42 = vpop.eup %3528 }
 0x5a1   :  { %v3531_v30 = vpop.eup %3530 }
 0x5a2   :  { %v3533_v23 = vpop.eup %3532  ;;  %v2006_v25 = vmul.f32 %v3531_v30, %v3529_v42  ;;  %v9395_v42 = vld [vmem:[#allocation59_spill] sm:$0xff]  ;;  %v9396_v30 = vld [vmem:[#allocation60_spill] sm:$0xff] }
 0x5a3   :  { %v2005_v59 = vmul.f32 %v3533_v23, %v6148_v56  ;;  %v3535_v11 = vpop.eup %3534  ;;  %v9351_v56 = vld [vmem:[#allocation16_spill] sm:$0xff]  ;;  %v9397_v23 = vld [vmem:[#allocation61_spill] sm:$0xff] }
 0x5a5   :  { %v6753_v54 = vadd.f32 %v2006_v25, %v2005_v59  ;;  %v9399_v25 = vld [vmem:[#allocation63_spill] sm:$0xff]  ;;  %v9400_v59 = vld [vmem:[#allocation64_spill] sm:$0xff] }
 0x5a7   :  { %3536 = vtanh.f32 %v6753_v54 }
 0x5b4   :  { %v3537_v18 = vpop.eup %3536 }
 0x5b5   :  { %v6756_v39 = vmul.f32 %v3537_v18, %v3535_v11  ;;  %v9401_v11 = vld [vmem:[#allocation65_spill] sm:$0xff]  ;;  %v9402_v18 = vld [vmem:[#allocation66_spill] sm:$0xff] }
 0x5b7   :  { %2075 = vmatmul.mubr.f32.vlgmr.msra.gmra.mxu0 %v6756_v39  ;;  %2146 = vmatmul.mubr.f32.vlgmr.msra.gmra.mxu1 %v6756_v39 }
 0x5b8   :  { %2196 = vmatpush1.msra.mxu0 %v6155_v48  ;;  %2267 = vmatpush1.msra.mxu1 %v6158_v51  ;;  %v9352_v48 = vld [vmem:[#allocation17_spill] sm:$0xff]  ;;  %v9353_v51 = vld [vmem:[#allocation18_spill] sm:$0xff] }
 0x5b9   :  { %2197 = vmatprep.subr.mxu0 %v6161_v16  ;;  %2268 = vmatprep.subr.mxu1 %v6164_v36  ;;  %v9354_v16 = vld [vmem:[#allocation19_spill] sm:$0xff]  ;;  %v9355_v36 = vld [vmem:[#allocation20_spill] sm:$0xff] }
 0x5ba   :  { %2198 = vmatpush1.msra.mxu0 %v6167_v5  ;;  %2269 = vmatpush1.msra.mxu1 %v6170_v28  ;;  %v9356_v5 = vld [vmem:[#allocation21_spill] sm:$0xff]  ;;  %v9357_v28 = vld [vmem:[#allocation22_spill] sm:$0xff] }
 0x5bb   :  { %2199 = vmatprep.subr.mxu0 %v6173_v13  ;;  %2270 = vmatprep.subr.mxu1 %v6176_v47  ;;  %v9358_v13 = vld [vmem:[#allocation23_spill] sm:$0xff]  ;;  %v9359_v47 = vld [vmem:[#allocation24_spill] sm:$0xff] }
 0x5bc   :  { %2200 = vmatpush1.msra.mxu0 %v6179_v17  ;;  %2271 = vmatpush1.msra.mxu1 %v6182_v31  ;;  %v9360_v17 = vld [vmem:[#allocation25_spill] sm:$0xff]  ;;  %v9361_v31 = vld [vmem:[#allocation26_spill] sm:$0xff] }
 0x5bd   :  { %2201 = vmatprep.subr.mxu0 %v6185_v34  ;;  %2272 = vmatprep.subr.mxu1 %v6188_v40  ;;  %v9362_v34 = vld [vmem:[#allocation27_spill] sm:$0xff]  ;;  %v9363_v40 = vld [vmem:[#allocation28_spill] sm:$0xff] }
 0x5be   :  { %2202 = vmatpush1.msra.mxu0 %v6191_v45  ;;  %2273 = vmatpush1.msra.mxu1 %v6194_v41  ;;  %v9364_v45 = vld [vmem:[#allocation29_spill] sm:$0xff]  ;;  %v9365_v41 = vld [vmem:[#allocation30_spill] sm:$0xff] }
 0x5bf   :  { %2203 = vmatprep.subr.mxu0 %v6197_v43  ;;  %2274 = vmatprep.subr.mxu1 %v6200_v55  ;;  %v9366_v43 = vld [vmem:[#allocation31_spill] sm:$0xff]  ;;  %v9367_v55 = vld [vmem:[#allocation32_spill] sm:$0xff] }
 0x5c0   :  { %2204 = vmatpush1.msra.mxu0 %v6203_v29  ;;  %2275 = vmatpush1.msra.mxu1 %v6206_v57  ;;  %v9368_v29 = vld [vmem:[#allocation33_spill] sm:$0xff]  ;;  %v9369_v57 = vld [vmem:[#allocation34_spill] sm:$0xff] }
 0x5c1   :  { %2205 = vmatprep.subr.mxu0 %v6209_v2  ;;  %2276 = vmatprep.subr.mxu1 %v6212_v53  ;;  %v9370_v2 = vld [vmem:[#allocation35_spill] sm:$0xff]  ;;  %v9371_v53 = vld [vmem:[#allocation36_spill] sm:$0xff] }
 0x5c2   :  { %2206 = vmatpush1.msra.mxu0 %v6215_v63  ;;  %2277 = vmatpush1.msra.mxu1 %v6218_v52  ;;  %v9372_v63 = vld [vmem:[#allocation37_spill] sm:$0xff]  ;;  %v9373_v52 = vld [vmem:[#allocation38_spill] sm:$0xff] }
 0x5c3   :  { %2207 = vmatprep.subr.mxu0 %v6221_v4  ;;  %2278 = vmatprep.subr.mxu1 %v6224_v50  ;;  %v9374_v4 = vld [vmem:[#allocation39_spill] sm:$0xff]  ;;  %v9375_v50 = vld [vmem:[#allocation40_spill] sm:$0xff] }
 0x5c4   :  { %2208 = vmatpush1.msra.mxu0 %v6227_v7  ;;  %2279 = vmatpush1.msra.mxu1 %v6230_v8  ;;  %v9376_v7 = vld [vmem:[#allocation41_spill] sm:$0xff]  ;;  %v9377_v8 = vld [vmem:[#allocation42_spill] sm:$0xff] }
 0x5c5   :  { %2209 = vmatprep.subr.mxu0 %v6233_v10  ;;  %2280 = vmatprep.subr.mxu1 %v6236_v12  ;;  %v9378_v10 = vld [vmem:[#allocation43_spill] sm:$0xff]  ;;  %v9379_v12 = vld [vmem:[#allocation44_spill] sm:$0xff] }
 0x5c6   :  { %2210 = vmatpush1.msra.mxu0 %v9351_v56  ;;  %2281 = vmatpush1.msra.mxu1 %v9352_v48  ;;  %v9404_v56 = vld [vmem:[#allocation68_spill] sm:$0xff]  ;;  %v9405_v48 = vld [vmem:[#allocation69_spill] sm:$0xff] }
 0x5c7   :  { %2211 = vmatprep.subr.mxu0 %v9353_v51  ;;  %2282 = vmatprep.subr.mxu1 %v9354_v16  ;;  %v9406_v51 = vld [vmem:[#allocation70_spill] sm:$0xff]  ;;  %v9407_v16 = vld [vmem:[#allocation71_spill] sm:$0xff] }
 0x5c8   :  { %2212 = vmatpush1.msra.mxu0 %v9355_v36  ;;  %2283 = vmatpush1.msra.mxu1 %v9356_v5  ;;  %v9408_v36 = vld [vmem:[#allocation72_spill] sm:$0xff]  ;;  %v9409_v5 = vld [vmem:[#allocation73_spill] sm:$0xff] }
 0x5c9   :  { %2213 = vmatprep.subr.mxu0 %v9357_v28  ;;  %2284 = vmatprep.subr.mxu1 %v9358_v13  ;;  %v9410_v28 = vld [vmem:[#allocation74_spill] sm:$0xff]  ;;  %v9411_v13 = vld [vmem:[#allocation75_spill] sm:$0xff] }
 0x5ca   :  { %2214 = vmatpush1.msra.mxu0 %v9359_v47  ;;  %2285 = vmatpush1.msra.mxu1 %v9360_v17  ;;  %v9412_v47 = vld [vmem:[#allocation76_spill] sm:$0xff]  ;;  %v9413_v17 = vld [vmem:[#allocation77_spill] sm:$0xff] }
 0x5cb   :  { %2215 = vmatprep.subr.mxu0 %v9361_v31  ;;  %2286 = vmatprep.subr.mxu1 %v9362_v34  ;;  %v9414_v31 = vld [vmem:[#allocation78_spill] sm:$0xff]  ;;  %v9415_v34 = vld [vmem:[#allocation79_spill] sm:$0xff] }
 0x5cc   :  { %2216 = vmatpush1.msra.mxu0 %v9363_v40  ;;  %2287 = vmatpush1.msra.mxu1 %v9364_v45  ;;  %v9416_v40 = vld [vmem:[#allocation80_spill] sm:$0xff]  ;;  %v9417_v45 = vld [vmem:[#allocation81_spill] sm:$0xff] }
 0x5cd   :  { %2217 = vmatprep.subr.mxu0 %v9365_v41  ;;  %2288 = vmatprep.subr.mxu1 %v9366_v43  ;;  %v9418_v41 = vld [vmem:[#allocation82_spill] sm:$0xff]  ;;  %v9419_v43 = vld [vmem:[#allocation83_spill] sm:$0xff] }
 0x5ce   :  { %2218 = vmatpush1.msra.mxu0 %v9367_v55  ;;  %2289 = vmatpush1.msra.mxu1 %v9368_v29  ;;  %v9420_v55 = vld [vmem:[#allocation84_spill] sm:$0xff]  ;;  %v9421_v29 = vld [vmem:[#allocation85_spill] sm:$0xff] }
 0x5cf   :  { %2219 = vmatprep.subr.mxu0 %v9369_v57  ;;  %2290 = vmatprep.subr.mxu1 %v9370_v2  ;;  %v9422_v57 = vld [vmem:[#allocation86_spill] sm:$0xff]  ;;  %v9423_v2 = vld [vmem:[#allocation87_spill] sm:$0xff] }
 0x5d0   :  { %2220 = vmatpush1.msra.mxu0 %v9371_v53  ;;  %2291 = vmatpush1.msra.mxu1 %v9372_v63  ;;  %v9424_v53 = vld [vmem:[#allocation88_spill] sm:$0xff]  ;;  %v9425_v63 = vld [vmem:[#allocation89_spill] sm:$0xff] }
 0x5d1   :  { %2221 = vmatprep.subr.mxu0 %v9373_v52  ;;  %2292 = vmatprep.subr.mxu1 %v9374_v4  ;;  %v9426_v52 = vld [vmem:[#allocation90_spill] sm:$0xff]  ;;  %v9427_v4 = vld [vmem:[#allocation91_spill] sm:$0xff] }
 0x5d2   :  { %2222 = vmatpush1.msra.mxu0 %v9375_v50  ;;  %2293 = vmatpush1.msra.mxu1 %v9376_v7  ;;  %v9428_v50 = vld [vmem:[#allocation92_spill] sm:$0xff]  ;;  %v9429_v7 = vld [vmem:[#allocation93_spill] sm:$0xff] }
 0x5d3   :  { %2223 = vmatprep.subr.mxu0 %v9377_v8  ;;  %2294 = vmatprep.subr.mxu1 %v9378_v10  ;;  %v9430_v8 = vld [vmem:[#allocation94_spill] sm:$0xff]  ;;  %v9431_v10 = vld [vmem:[#allocation95_spill] sm:$0xff] }
 0x5d4   :  { %2224 = vmatpush1.msra.mxu0 %v9379_v12  ;;  %2295 = vmatpush1.msra.mxu1 %v9380_v60  ;;  %v9432_v12 = vld [vmem:[#allocation96_spill] sm:$0xff]  ;;  %v9433_v60 = vld [vmem:[#allocation97_spill] sm:$0xff] }
 0x5d5   :  { %2225 = vmatprep.subr.mxu0 %v9381_v32  ;;  %2296 = vmatprep.subr.mxu1 %v9382_v6  ;;  %v9434_v32 = vld [vmem:[#allocation98_spill] sm:$0xff]  ;;  %v9435_v6 = vld [vmem:[#allocation99_spill] sm:$0xff] }
 0x5d6   :  { %2226 = vmatpush1.msra.mxu0 %v9383_v20  ;;  %2259 = vmatprep.mubr.f32.mxu0 %v9384_v19  ;;  %v9436_v20 = vld [vmem:[#allocation100_spill] sm:$0xff] }
 0x5d7   :  { %2297 = vmatpush1.msra.mxu1 %v9385_v62  ;;  %2330 = vmatprep.mubr.f32.mxu1 %v9384_v19  ;;  %v9437_v62 = vld [vmem:[#allocation101_spill] sm:$0xff] }
 0x5d8   :  { %2260 = vmatmul.mubr.f32.vlgmr.msra.gmra.mxu0 %v6756_v39  ;;  %2331 = vmatmul.mubr.f32.vlgmr.msra.gmra.mxu1 %v6756_v39  ;;  %v9403_v39 = vld [vmem:[#allocation67_spill] sm:$0xff] }
 0x5d9   :  { %2377 = vmatprep.subr.mxu0 %v9386_v15  ;;  %2448 = vmatprep.subr.mxu1 %v9387_v27  ;;  %v9438_v15 = vld [vmem:[#allocation102_spill] sm:$0xff]  ;;  %v9439_v27 = vld [vmem:[#allocation103_spill] sm:$0xff] }
 0x5da   :  { %2378 = vmatpush1.msra.mxu0 %v9388_v37  ;;  %2449 = vmatpush1.msra.mxu1 %v9389_v21  ;;  %v9440_v37 = vld [vmem:[#allocation104_spill] sm:$0xff]  ;;  %v9441_v21 = vld [vmem:[#allocation105_spill] sm:$0xff] }
 0x5db   :  { %2379 = vmatprep.subr.mxu0 %v9390_v14  ;;  %2450 = vmatprep.subr.mxu1 %v9391_v61  ;;  %v9442_v14 = vld [vmem:[#allocation106_spill] sm:$0xff]  ;;  %v9443_v61 = vld [vmem:[#allocation107_spill] sm:$0xff] }
 0x5dc   :  { %2380 = vmatpush1.msra.mxu0 %v9392_v22  ;;  %2451 = vmatpush1.msra.mxu1 %v9393_v38  ;;  %v9444_v22 = vld [vmem:[#allocation108_spill] sm:$0xff]  ;;  %v9445_v38 = vld [vmem:[#allocation109_spill] sm:$0xff] }
 0x5dd   :  { %2381 = vmatprep.subr.mxu0 %v9394_v26  ;;  %2452 = vmatprep.subr.mxu1 %v9395_v42  ;;  %v9446_v26 = vld [vmem:[#allocation110_spill] sm:$0xff]  ;;  %v9447_v42 = vld [vmem:[#allocation111_spill] sm:$0xff] }
 0x5de   :  { %2382 = vmatpush1.msra.mxu0 %v9396_v30  ;;  %2453 = vmatpush1.msra.mxu1 %v9397_v23  ;;  %v9448_v30 = vld [vmem:[#allocation112_spill] sm:$0xff]  ;;  %v9449_v23 = vld [vmem:[#allocation113_spill] sm:$0xff] }
 0x5df   :  { %2383 = vmatprep.subr.mxu0 %v9398_v24  ;;  %2454 = vmatprep.subr.mxu1 %v9399_v25  ;;  %v9450_v24 = vld [vmem:[#allocation114_spill] sm:$0xff]  ;;  %v9451_v25 = vld [vmem:[#allocation115_spill] sm:$0xff] }
 0x5e0   :  { %2384 = vmatpush1.msra.mxu0 %v9400_v59  ;;  %2455 = vmatpush1.msra.mxu1 %v9401_v11  ;;  %v9452_v59 = vld [vmem:[#allocation116_spill] sm:$0xff]  ;;  %v9453_v11 = vld [vmem:[#allocation117_spill] sm:$0xff] }
 0x5e1   :  { %2385 = vmatprep.subr.mxu0 %v9402_v18  ;;  %2456 = vmatprep.subr.mxu1 %v9403_v39  ;;  %v9454_v18 = vld [vmem:[#allocation118_spill] sm:$0xff]  ;;  %v9455_v39 = vld [vmem:[#allocation119_spill] sm:$0xff] }
 0x5e2   :  { %2386 = vmatpush1.msra.mxu0 %v9404_v56  ;;  %2457 = vmatpush1.msra.mxu1 %v9405_v48  ;;  %v9456_v56 = vld [vmem:[#allocation120_spill] sm:$0xff]  ;;  %v9457_v48 = vld [vmem:[#allocation121_spill] sm:$0xff] }
 0x5e3   :  { %2387 = vmatprep.subr.mxu0 %v9406_v51  ;;  %2458 = vmatprep.subr.mxu1 %v9407_v16  ;;  %v9458_v51 = vld [vmem:[#allocation122_spill] sm:$0xff]  ;;  %v9459_v16 = vld [vmem:[#allocation123_spill] sm:$0xff] }
 0x5e4   :  { %2388 = vmatpush1.msra.mxu0 %v9408_v36  ;;  %2459 = vmatpush1.msra.mxu1 %v9409_v5  ;;  %v9460_v36 = vld [vmem:[#allocation124_spill] sm:$0xff]  ;;  %v9461_v5 = vld [vmem:[#allocation125_spill] sm:$0xff] }
 0x5e5   :  { %2389 = vmatprep.subr.mxu0 %v9410_v28  ;;  %2460 = vmatprep.subr.mxu1 %v9411_v13  ;;  %v9462_v28 = vld [vmem:[#allocation126_spill] sm:$0xff]  ;;  %v9463_v13 = vld [vmem:[#allocation127_spill] sm:$0xff] }
 0x5e6   :  { %2390 = vmatpush1.msra.mxu0 %v9412_v47  ;;  %2461 = vmatpush1.msra.mxu1 %v9413_v17  ;;  %v9464_v47 = vld [vmem:[#allocation128_spill] sm:$0xff]  ;;  %v9465_v17 = vld [vmem:[#allocation129_spill] sm:$0xff] }
 0x5e7   :  { %2391 = vmatprep.subr.mxu0 %v9414_v31  ;;  %2462 = vmatprep.subr.mxu1 %v9415_v34  ;;  %v9466_v31 = vld [vmem:[#allocation130_spill] sm:$0xff]  ;;  %v9467_v34 = vld [vmem:[#allocation131_spill] sm:$0xff] }
 0x5e8   :  { %2392 = vmatpush1.msra.mxu0 %v9416_v40  ;;  %2463 = vmatpush1.msra.mxu1 %v9417_v45  ;;  %v9468_v40 = vld [vmem:[#allocation132_spill] sm:$0xff]  ;;  %v9469_v45 = vld [vmem:[#allocation133_spill] sm:$0xff] }
 0x5e9   :  { %2393 = vmatprep.subr.mxu0 %v9418_v41  ;;  %2464 = vmatprep.subr.mxu1 %v9419_v43  ;;  %v9470_v41 = vld [vmem:[#allocation134_spill] sm:$0xff]  ;;  %v9471_v43 = vld [vmem:[#allocation135_spill] sm:$0xff] }
 0x5ea   :  { %2394 = vmatpush1.msra.mxu0 %v9420_v55  ;;  %2465 = vmatpush1.msra.mxu1 %v9421_v29  ;;  %v9472_v55 = vld [vmem:[#allocation136_spill] sm:$0xff]  ;;  %v9473_v29 = vld [vmem:[#allocation137_spill] sm:$0xff] }
 0x5eb   :  { %2395 = vmatprep.subr.mxu0 %v9422_v57  ;;  %2466 = vmatprep.subr.mxu1 %v9423_v2  ;;  %v9474_v57 = vld [vmem:[#allocation138_spill] sm:$0xff]  ;;  %v9475_v2 = vld [vmem:[#allocation139_spill] sm:$0xff] }
 0x5ec   :  { %2396 = vmatpush1.msra.mxu0 %v9424_v53  ;;  %2467 = vmatpush1.msra.mxu1 %v9425_v63  ;;  %v9476_v53 = vld [vmem:[#allocation140_spill] sm:$0xff]  ;;  %v9477_v63 = vld [vmem:[#allocation141_spill] sm:$0xff] }
 0x5ed   :  { %2397 = vmatprep.subr.mxu0 %v9426_v52  ;;  %2468 = vmatprep.subr.mxu1 %v9427_v4  ;;  %v9478_v52 = vld [vmem:[#allocation142_spill] sm:$0xff]  ;;  %v9479_v4 = vld [vmem:[#allocation143_spill] sm:$0xff] }
 0x5ee   :  { %2398 = vmatpush1.msra.mxu0 %v9428_v50  ;;  %2469 = vmatpush1.msra.mxu1 %v9429_v7  ;;  %v9480_v50 = vld [vmem:[#allocation144_spill] sm:$0xff]  ;;  %v9481_v7 = vld [vmem:[#allocation145_spill] sm:$0xff] }
 0x5ef   :  { %2399 = vmatprep.subr.mxu0 %v9430_v8  ;;  %2470 = vmatprep.subr.mxu1 %v9431_v10  ;;  %v9482_v8 = vld [vmem:[#allocation146_spill] sm:$0xff]  ;;  %v9483_v10 = vld [vmem:[#allocation147_spill] sm:$0xff] }
 0x5f0   :  { %2400 = vmatpush1.msra.mxu0 %v9432_v12  ;;  %2471 = vmatpush1.msra.mxu1 %v9433_v60  ;;  %v9484_v12 = vld [vmem:[#allocation148_spill] sm:$0xff]  ;;  %v9485_v60 = vld [vmem:[#allocation149_spill] sm:$0xff] }
 0x5f1   :  { %2401 = vmatprep.subr.mxu0 %v9434_v32  ;;  %2472 = vmatprep.subr.mxu1 %v9435_v6  ;;  %v9486_v32 = vld [vmem:[#allocation150_spill] sm:$0xff]  ;;  %v9487_v6 = vld [vmem:[#allocation151_spill] sm:$0xff] }
 0x5f2   :  { %2402 = vmatpush1.msra.mxu0 %v9436_v20  ;;  %2473 = vmatpush1.msra.mxu1 %v9437_v62  ;;  %v9488_v20 = vld [vmem:[#allocation152_spill] sm:$0xff]  ;;  %v9489_v62 = vld [vmem:[#allocation153_spill] sm:$0xff] }
 0x5f3   :  { %2403 = vmatprep.subr.mxu0 %v9438_v15  ;;  %2474 = vmatprep.subr.mxu1 %v9439_v27  ;;  %v9490_v15 = vld [vmem:[#allocation154_spill] sm:$0xff]  ;;  %v9491_v27 = vld [vmem:[#allocation155_spill] sm:$0xff] }
 0x5f4   :  { %2404 = vmatpush1.msra.mxu0 %v9440_v37  ;;  %2475 = vmatpush1.msra.mxu1 %v9441_v21  ;;  %v9492_v37 = vld [vmem:[#allocation156_spill] sm:$0xff]  ;;  %v9493_v21 = vld [vmem:[#allocation157_spill] sm:$0xff] }
 0x5f5   :  { %2405 = vmatprep.subr.mxu0 %v9442_v14  ;;  %2476 = vmatprep.subr.mxu1 %v9443_v61  ;;  %v9494_v14 = vld [vmem:[#allocation158_spill] sm:$0xff]  ;;  %v9495_v61 = vld [vmem:[#allocation159_spill] sm:$0xff] }
 0x5f6   :  { %2406 = vmatpush1.msra.mxu0 %v9444_v22  ;;  %2477 = vmatpush1.msra.mxu1 %v9445_v38  ;;  %v9496_v22 = vld [vmem:[#allocation160_spill] sm:$0xff]  ;;  %v9497_v38 = vld [vmem:[#allocation161_spill] sm:$0xff] }
 0x5f7   :  { %2407 = vmatprep.subr.mxu0 %v9446_v26  ;;  %2478 = vmatprep.subr.mxu1 %v9447_v42  ;;  %v9498_v26 = vld [vmem:[#allocation162_spill] sm:$0xff]  ;;  %v9499_v42 = vld [vmem:[#allocation163_spill] sm:$0xff] }
 0x5f8   :  { %2408 = vmatpush1.msra.mxu0 %v9448_v30  ;;  %2479 = vmatpush1.msra.mxu1 %v9449_v23  ;;  %v9500_v30 = vld [vmem:[#allocation164_spill] sm:$0xff]  ;;  %v9501_v23 = vld [vmem:[#allocation165_spill] sm:$0xff] }
 0x5f9   :  { %2409 = vmatprep.subr.mxu0 %v9450_v24  ;;  %2480 = vmatprep.subr.mxu1 %v9451_v25  ;;  %v9502_v24 = vld [vmem:[#allocation167_spill] sm:$0xff]  ;;  %v9503_v25 = vld [vmem:[#allocation170_spill] sm:$0xff] }
 0x5fa   :  { %2410 = vmatpush2.msra.mxu0 %v9452_v59  ;;  %2481 = vmatpush2.msra.mxu1 %v9453_v11  ;;  %v9504_v59 = vld [vmem:[#allocation171_spill] sm:$0xff]  ;;  %v9505_v11 = vld [vmem:[#allocation172_spill] sm:$0xff] }
 0x5fb   :  { %2411 = vmatprep.subr.mxu0 %v9454_v18  ;;  %2482 = vmatprep.subr.mxu1 %v9455_v39  ;;  %v9506_v18 = vld [vmem:[#allocation173_spill] sm:$0xff]  ;;  %v9507_v39 = vld [vmem:[#allocation174_spill] sm:$0xff] }
 0x5fc   :  { %2412 = vmatpush2.msra.mxu0 %v9456_v56  ;;  %2483 = vmatpush2.msra.mxu1 %v9457_v48  ;;  %v9508_v56 = vld [vmem:[#allocation175_spill] sm:$0xff]  ;;  %v9509_v48 = vld [vmem:[#allocation176_spill] sm:$0xff] }
 0x5fd   :  { %2413 = vmatprep.subr.mxu0 %v9458_v51  ;;  %2484 = vmatprep.subr.mxu1 %v9459_v16  ;;  %v9510_v51 = vld [vmem:[#allocation177_spill] sm:$0xff]  ;;  %v9511_v16 = vld [vmem:[#allocation178_spill] sm:$0xff] }
 0x5fe   :  { %2414 = vmatpush2.msra.mxu0 %v9460_v36  ;;  %2485 = vmatpush2.msra.mxu1 %v9461_v5  ;;  %v9512_v36 = vld [vmem:[#allocation179_spill] sm:$0xff]  ;;  %v9513_v5 = vld [vmem:[#allocation180_spill] sm:$0xff] }
 0x5ff   :  { %2415 = vmatprep.subr.mxu0 %v9462_v28  ;;  %2486 = vmatprep.subr.mxu1 %v9463_v13  ;;  %v6954_v28 = vld [vmem:[#allocation3 + $0x1e8] sm:$0xff]  ;;  %v6957_v13 = vld [vmem:[#allocation3 + $0x1f8] sm:$0xff] }
 0x600   :  { %2416 = vmatpush2.msra.mxu0 %v9464_v47  ;;  %2487 = vmatpush2.msra.mxu1 %v9465_v17  ;;  %v9514_v17 = vld [vmem:[#allocation12_spill] sm:$0xff] }
 0x601   :  { %2417 = vmatprep.subr.mxu0 %v9466_v31  ;;  %2488 = vmatprep.subr.mxu1 %v9467_v34 }
 0x602   :  { %2418 = vmatpush2.msra.mxu0 %v9468_v40  ;;  %2489 = vmatpush2.msra.mxu1 %v9469_v45  ;;  %v9515_v45 = vld [vmem:[#allocation13_spill] sm:$0xff] }
 0x603   :  { %2419 = vmatprep.subr.mxu0 %v9470_v41  ;;  %2490 = vmatprep.subr.mxu1 %v9471_v43 }
 0x604   :  { %2420 = vmatpush2.msra.mxu0 %v9472_v55  ;;  %2491 = vmatpush2.msra.mxu1 %v9473_v29 }
 0x605   :  { %2421 = vmatprep.subr.mxu0 %v9474_v57  ;;  %2492 = vmatprep.subr.mxu1 %v9475_v2  ;;  %v9516_v57 = vld [vmem:[#allocation14_spill] sm:$0xff] }
 0x606   :  { %2422 = vmatpush2.msra.mxu0 %v9476_v53  ;;  %2493 = vmatpush2.msra.mxu1 %v9477_v63 }
 0x607   :  { %2423 = vmatprep.subr.mxu0 %v9478_v52  ;;  %2494 = vmatprep.subr.mxu1 %v9479_v4  ;;  %v9517_v52 = vld [vmem:[#allocation15_spill] sm:$0xff] }
 0x608   :  { %2424 = vmatpush2.msra.mxu0 %v9480_v50  ;;  %2495 = vmatpush2.msra.mxu1 %v9481_v7 }
 0x609   :  { %2425 = vmatprep.subr.mxu0 %v9482_v8  ;;  %2496 = vmatprep.subr.mxu1 %v9483_v10  ;;  %v2189_v10 = vpop.permute.xlu1 %2188 }
 0x60a   :  { %2426 = vmatpush2.msra.mxu0 %v9484_v12  ;;  %2497 = vmatpush2.msra.mxu1 %v9485_v60  ;;  %v9518_v12 = vld [vmem:[#allocation166_spill] sm:$0xff] }
 0x60b   :  { %2427 = vmatprep.subr.mxu0 %v9486_v32  ;;  %2498 = vmatprep.subr.mxu1 %v9487_v6  ;;  %v2191_v60 = vmul.f32 %v2189_v10, %v9518_v12  ;;  %v2339_v6 = vpop.permute.xlu0 %2338 }
 0x60c   :  { %2428 = vmatpush2.msra.mxu0 %v9488_v20  ;;  %2499 = vmatpush2.msra.mxu1 %v9489_v62 }
 0x60d   :  { %2429 = vmatprep.subr.mxu0 %v9490_v15  ;;  %2500 = vmatprep.subr.mxu1 %v9491_v27  ;;  %v9519_v27 = vld [vmem:[#allocation168_spill] sm:$0xff] }
 0x60e   :  { %2430 = vmatpush2.msra.mxu0 %v9492_v37  ;;  %2501 = vmatpush2.msra.mxu1 %v9493_v21  ;;  %v2341_v37 = vmul.f32 %v2339_v6, %v9519_v27 }
 0x60f   :  { %2431 = vmatprep.subr.mxu0 %v9494_v14  ;;  %2502 = vmatprep.subr.mxu1 %v9495_v61  ;;  %v9520_v14 = vld [vmem:[#allocation169_spill] sm:$0xff] }
 0x610   :  { %2432 = vmatpush2.msra.mxu0 %v9496_v22  ;;  %2503 = vmatpush2.msra.mxu1 %v9497_v38  ;;  %v2192_v61 = vmul.f32 %v2189_v10, %v9520_v14 }
 0x611   :  { %2433 = vmatprep.subr.mxu0 %v9498_v26  ;;  %2504 = vmatprep.subr.mxu1 %v9499_v42 }
 0x612   :  { %2434 = vmatpush2.msra.mxu0 %v9500_v30  ;;  %2505 = vmatpush2.msra.mxu1 %v9501_v23 }
 0x613   :  { %2435 = vmatprep.subr.mxu0 %v9502_v24  ;;  %2506 = vmatprep.subr.mxu1 %v9503_v25  ;;  %v2342_v24 = vmul.f32 %v2339_v6, %v8855_v35 }
 0x614   :  { %2436 = vmatpush2.msra.mxu0 %v9504_v59  ;;  %2507 = vmatpush2.msra.mxu1 %v9505_v11 }
 0x615   :  { %2437 = vmatprep.subr.mxu0 %v9506_v18  ;;  %2508 = vmatprep.subr.mxu1 %v9507_v39 }
 0x616   :  { %2438 = vmatpush2.msra.mxu0 %v9508_v56  ;;  %2509 = vmatpush2.msra.mxu1 %v9509_v48  ;;  %v2194_v56 = vmul.f32 %v2189_v10, %v5033_v46 }
 0x617   :  { %2439 = vmatprep.subr.mxu0 %v9510_v51  ;;  %2510 = vmatprep.subr.mxu1 %v9511_v16 }
 0x618   :  { %2440 = vmatpush2.msra.mxu0 %v9512_v36  ;;  %2511 = vmatpush2.msra.mxu1 %v9513_v5 }
 0x619   :  { %2562 = vmatprep.subr.mxu0 %v6954_v28  ;;  %2633 = vmatprep.subr.mxu1 %v6957_v13 }
 0x677   :  { %v2076_v47 = vpop.f32.mrf.mxu0  ;;  %v2147_v43 = vpop.f32.mrf.mxu1 }
 0x678   :  { %v2077_v31 = vadd.f32 %v2076_v47, %v9514_v17  ;;  %v2148_v4 = vadd.f32 %v2147_v43, %v9517_v52  ;;  %v2344_v47 = vmul.f32 %v2339_v6, %v5039_v3 }
 0x679   :  { %v2078_v34 = vpop.f32.mrf.mxu0  ;;  %v2149_v29 = vpop.f32.mrf.mxu1 }
 0x67a   :  { %v3351_v40 = vmul.f32 -1.442695, %v2077_v31  ;;  %v2079_v41 = vadd.f32 %v2078_v34, %v9515_v45  ;;  %v2150_v2 = vadd.f32 %v2149_v29, %v9516_v57 }
 0x67c   :  { %3538 = vpow2.f32 %v3351_v40  ;;  %v3352_v55 = vmul.f32 -1.442695, %v2079_v41  ;;  %v3353_v53 = vmul.f32 -1.442695, %v2150_v2  ;;  %v2343_v40 = vmul.f32 %v2339_v6, %v5050_v1 }
 0x67e   :  { %3540 = vpow2.f32 %v3352_v55 }
 0x67f   :  { %3542 = vpow2.f32 %v3353_v53 }
 0x689   :  { %v3539_v63 = vpop.eup %3538 }
 0x68a   :  { %v2155_v50 = vadd.f32 1.0, %v3539_v63 }
 0x68b   :  { %v3541_v7 = vpop.eup %3540 }
 0x68c   :  { %3544 = vrcp.f32 %v2155_v50  ;;  %v2161_v8 = vadd.f32 1.0, %v3541_v7  ;;  %v3543_v32 = vpop.eup %3542 }
 0x68d   :  { %3546 = vtanh.f32 %v2148_v4  ;;  %v2168_v42 = vadd.f32 1.0, %v3543_v32 }
 0x68e   :  { %3548 = vrcp.f32 %v2161_v8  ;;  %v6983_v8 = vld [vmem:[%s7840_s6] ss:$0 sm:$0xff] }
 0x68f   :  { %3550 = vrcp.f32 %v2168_v42  ;;  %v6994_v42 = vld [vmem:[#allocation3 + $0x1e0] sm:$0xff] }
 0x698   :  { %v2261_v20 = vpop.f32.mrf.mxu0  ;;  %v2332_v21 = vpop.f32.mrf.mxu1 }
 0x699   :  { %v3545_v62 = vpop.eup %3544  ;;  %v2262_v15 = vadd.f32 %v2261_v20, %v2191_v60 }
 0x69a   :  { %v3547_v22 = vpop.eup %3546  ;;  %v2263_v38 = vpop.f32.mrf.mxu0 }
 0x69b   :  { %v3549_v26 = vpop.eup %3548  ;;  %v2345_v30 = vadd.f32 %v2341_v37, %v2262_v15  ;;  %v2264_v23 = vadd.f32 %v2263_v38, %v2192_v61  ;;  %v2172_v25 = vmul.f32 %v3547_v22, %v3545_v62  ;;  %v2334_v39 = vpop.f32.mrf.mxu1 }
 0x69c   :  { %v2171_v59 = vmul.f32 %v3549_v26, %v6742_v33  ;;  %v2335_v36 = vadd.f32 %v2334_v39, %v2194_v56  ;;  %v2193_v33 = vmul.f32 %v2189_v10, %v5043_v49  ;;  %v3551_v55 = vpop.eup %3550  ;;  %v7021_v39 = vld [vmem:[#allocation3 + $0x1b0] sm:$0xff]  ;;  %v7024_v56 = vld [vmem:[#allocation3 + $0x188] sm:$0xff] }
 0x69d   :  { %v2349_v11 = vadd.f32 %v2345_v30, %v5026_v0  ;;  %v2346_v18 = vadd.f32 %v2342_v24, %v2264_v23  ;;  %v6997_v30 = vld [vmem:[#allocation3 + $0x1f0] sm:$0xff]  ;;  %v7003_v23 = vld [vmem:[#allocation3 + $0x1d8] sm:$0xff]  ;;  %v7006_v24 = vld [vmem:[#allocation3 + $0x1c0] sm:$0xff] }
 0x69e   :  { %v6971_v48 = vadd.f32 %v2172_v25, %v2171_v59  ;;  %v2348_v31 = vadd.f32 %v2344_v47, %v2335_v36  ;;  %v2333_v34 = vadd.f32 %v2332_v21, %v2193_v33  ;;  %v7009_v25 = vld [vmem:[#allocation3 + $0x1d0] sm:$0xff]  ;;  %v7012_v59 = vld [vmem:[#allocation3 + $0x1a8] sm:$0xff]  ;;  %v7039_v47 = vld [vmem:[#allocation3 + $0x178] sm:$0xff] }
 0x69f   :  { %v3356_v51 = vmul.f32 -1.442695, %v2349_v11  ;;  %v2350_v16 = vadd.f32 %v2346_v18, %v5036_v44  ;;  %v7015_v11 = vld [vmem:[#allocation3 + $0x1b8] sm:$0xff]  ;;  %v7018_v18 = vld [vmem:[#allocation3 + $0x1a0] sm:$0xff]  ;;  %v7033_v36 = vld [vmem:[#allocation3 + $0x190] sm:$0xff] }
 0x6a0   :  { %3552 = vtanh.f32 %v6971_v48  ;;  %v2352_v41 = vadd.f32 %v2348_v31, %v8856_v9  ;;  %v2347_v43 = vadd.f32 %v2343_v40, %v2333_v34  ;;  %v7042_v33 = vld [vmem:[#allocation3 + $0x160] sm:$0xff]  ;;  %v7045_v31 = vld [vmem:[#allocation3 + $0x170] sm:$0xff]  ;;  %v7048_v34 = vld [vmem:[#allocation3 + $0x148] sm:$0xff] }
 0x6a1   :  { %3554 = vpow2.f32 %v3356_v51  ;;  %v3357_v5 = vmul.f32 -1.442695, %v2350_v16  ;;  %v7027_v51 = vld [vmem:[#allocation3 + $0x198] sm:$0xff]  ;;  %v7030_v16 = vld [vmem:[#allocation3 + $0x180] sm:$0xff] }
 0x6a2   :  { %v3358_v29 = vmul.f32 -1.442695, %v2352_v41  ;;  %v2351_v63 = vadd.f32 %v2347_v43, %v5058_v58  ;;  %v7051_v40 = vld [vmem:[#allocation3 + $0x158] sm:$0xff]  ;;  %v7054_v41 = vld [vmem:[#allocation3 + $0x140] sm:$0xff]  ;;  %v7057_v43 = vld [vmem:[#allocation3 + $0x150] sm:$0xff] }
 0x6a3   :  { %3556 = vpow2.f32 %v3357_v5  ;;  %v7036_v5 = vld [vmem:[#allocation3 + $0x168] sm:$0xff] }
 0x6a4   :  { %3558 = vpow2.f32 %v3358_v29  ;;  %v7063_v29 = vld [vmem:[#allocation3 + $0x138] sm:$0xff] }
 0x6ad   :  { %v3553_v2 = vpop.eup %3552 }
 0x6ae   :  { %v3555_v53 = vpop.eup %3554  ;;  %v2175_v4 = vmul.f32 %v3553_v2, %v3551_v55  ;;  %v7060_v55 = vld [vmem:[#allocation3 + $0x128] sm:$0xff]  ;;  %v7066_v2 = vld [vmem:[#allocation3 + $0x120] sm:$0xff] }
 0x6af   :  { %v2356_v50 = vadd.f32 1.0, %v3555_v53  ;;  %v7069_v53 = vld [vmem:[#allocation3 + $0x130] sm:$0xff] }
 0x6b0   :  { %v3557_v7 = vpop.eup %3556  ;;  %2441 = vmatprep.mubr.f32.mxu0 %v2175_v4  ;;  %2512 = vmatprep.mubr.f32.mxu1 %v2175_v4  ;;  %v2176_v10 = vmul.f32 %v6983_v8, %v2175_v4  ;;  %v7075_v4 = vld [vmem:[#allocation3 + $0x118] sm:$0xff] }
 0x6b1   :  { %3560 = vrcp.f32 %v2356_v50  ;;  %v2362_v60 = vadd.f32 1.0, %v3557_v7  ;;  %v3559_v32 = vpop.eup %3558  ;;  %v7078_v50 = vld [vmem:[#allocation3 + $0x100] sm:$0xff]  ;;  %v7081_v7 = vld [vmem:[#allocation3 + $0x110] sm:$0xff] }
 0x6b2   :  { %3562 = vtanh.f32 %v2351_v63  ;;  %2177 = vadd.xlane.f32.xlu0 %v2176_v10  ;;  %v2369_v15 = vadd.f32 1.0, %v3559_v32  ;;  %v7072_v63 = vld [vmem:[#allocation3 + $0x108] sm:$0xff]  ;;  %9521 = vst [vmem:[#allocation16_spill] sm:$0xff] %v7078_v50  ;;  %9522 = vst [vmem:[#allocation17_spill] sm:$0xff] %v7081_v7  ;;  %v7090_v32 = vld [vmem:[#allocation3 + $0xe0] sm:$0xff] }
 0x6b3   :  { %3564 = vrcp.f32 %v2362_v60  ;;  %v7084_v10 = vld [vmem:[#allocation3 + $0xe8] sm:$0xff]  ;;  %v7087_v60 = vld [vmem:[#allocation3 + $0xf8] sm:$0xff]  ;;  %9525 = vst [vmem:[#allocation20_spill] sm:$0xff] %v7090_v32 }
 0x6b4   :  { %3566 = vrcp.f32 %v2369_v15  ;;  %9523 = vst [vmem:[#allocation18_spill] sm:$0xff] %v7084_v10  ;;  %9524 = vst [vmem:[#allocation19_spill] sm:$0xff] %v7087_v60  ;;  %v7102_v15 = vld [vmem:[#allocation3 + $0xc0] sm:$0xff] }
 0x6b5   :  { %9529 = vst [vmem:[#allocation24_spill] sm:$0xff] %v7102_v15 }
 0x6be   :  { %v3561_v6 = vpop.eup %3560 }
 0x6bf   :  { %v3563_v20 = vpop.eup %3562 }
 0x6c0   :  { %v3565_v62 = vpop.eup %3564  ;;  %v2373_v37 = vmul.f32 %v3563_v20, %v3561_v6  ;;  %v7093_v6 = vld [vmem:[#allocation3 + $0xf0] sm:$0xff]  ;;  %v7096_v20 = vld [vmem:[#allocation3 + $0xc8] sm:$0xff] }
 0x6c1   :  { %v2372_v21 = vmul.f32 %v3565_v62, %v6753_v54  ;;  %v3567_v22 = vpop.eup %3566  ;;  %v7000_v54 = vld [vmem:[#allocation3 + $0x1c8] sm:$0xff]  ;;  %9526 = vst [vmem:[#allocation21_spill] sm:$0xff] %v7093_v6  ;;  %9527 = vst [vmem:[#allocation22_spill] sm:$0xff] %v7096_v20  ;;  %v7099_v62 = vld [vmem:[#allocation3 + $0xd8] sm:$0xff] }
 0x6c2   :  { %9528 = vst [vmem:[#allocation23_spill] sm:$0xff] %v7099_v62 }
 0x6c3   :  { %v6987_v61 = vadd.f32 %v2373_v37, %v2372_v21  ;;  %v7105_v37 = vld [vmem:[#allocation3 + $0xd0] sm:$0xff]  ;;  %v7108_v21 = vld [vmem:[#allocation3 + $0xa8] sm:$0xff] }
 0x6c4   :  { %9530 = vst [vmem:[#allocation25_spill] sm:$0xff] %v7105_v37  ;;  %9531 = vst [vmem:[#allocation26_spill] sm:$0xff] %v7108_v21 }
 0x6c5   :  { %3568 = vtanh.f32 %v6987_v61 }
 0x6d2   :  { %v3569_v38 = vpop.eup %3568 }
 0x6d3   :  { %v6990_v26 = vmul.f32 %v3569_v38, %v3567_v22  ;;  %v7111_v22 = vld [vmem:[#allocation3 + $0xb8] sm:$0xff]  ;;  %v7114_v38 = vld [vmem:[#allocation3 + $0xa0] sm:$0xff] }
 0x6d4   :  { %9532 = vst [vmem:[#allocation27_spill] sm:$0xff] %v7111_v22  ;;  %9533 = vst [vmem:[#allocation28_spill] sm:$0xff] %v7114_v38 }
 0x6d5   :  { %2442 = vmatmul.mubr.f32.vlgmr.msra.gmra.mxu0 %v6990_v26  ;;  %2513 = vmatmul.mubr.f32.vlgmr.msra.gmra.mxu1 %v6990_v26 }
 0x6d6   :  { %2563 = vmatpush1.msra.mxu0 %v6994_v42  ;;  %2634 = vmatpush1.msra.mxu1 %v6997_v30 }
 0x6d7   :  { %2564 = vmatprep.subr.mxu0 %v7000_v54  ;;  %2635 = vmatprep.subr.mxu1 %v7003_v23 }
 0x6d8   :  { %2565 = vmatpush1.msra.mxu0 %v7006_v24  ;;  %2636 = vmatpush1.msra.mxu1 %v7009_v25 }
 0x6d9   :  { %2566 = vmatprep.subr.mxu0 %v7012_v59  ;;  %2637 = vmatprep.subr.mxu1 %v7015_v11 }
 0x6da   :  { %2567 = vmatpush1.msra.mxu0 %v7018_v18  ;;  %2638 = vmatpush1.msra.mxu1 %v7021_v39 }
 0x6db   :  { %2568 = vmatprep.subr.mxu0 %v7024_v56  ;;  %2639 = vmatprep.subr.mxu1 %v7027_v51 }
 0x6dc   :  { %2569 = vmatpush1.msra.mxu0 %v7030_v16  ;;  %2640 = vmatpush1.msra.mxu1 %v7033_v36 }
 0x6dd   :  { %2570 = vmatprep.subr.mxu0 %v7036_v5  ;;  %2641 = vmatprep.subr.mxu1 %v7039_v47 }
 0x6de   :  { %2571 = vmatpush1.msra.mxu0 %v7042_v33  ;;  %2642 = vmatpush1.msra.mxu1 %v7045_v31 }
 0x6df   :  { %2572 = vmatprep.subr.mxu0 %v7048_v34  ;;  %2643 = vmatprep.subr.mxu1 %v7051_v40 }
 0x6e0   :  { %2573 = vmatpush1.msra.mxu0 %v7054_v41  ;;  %2644 = vmatpush1.msra.mxu1 %v7057_v43 }
 0x6e1   :  { %2574 = vmatprep.subr.mxu0 %v7060_v55  ;;  %2645 = vmatprep.subr.mxu1 %v7063_v29 }
 0x6e2   :  { %2575 = vmatpush1.msra.mxu0 %v7066_v2  ;;  %2646 = vmatpush1.msra.mxu1 %v7069_v53 }
 0x6e3   :  { %2576 = vmatprep.subr.mxu0 %v7072_v63  ;;  %2647 = vmatprep.subr.mxu1 %v7075_v4 }
 0x6e4   :  { %2577 = vmatpush1.msra.mxu0 %v7078_v50  ;;  %2648 = vmatpush1.msra.mxu1 %v7081_v7 }
 0x6e5   :  { %2578 = vmatprep.subr.mxu0 %v7084_v10  ;;  %2649 = vmatprep.subr.mxu1 %v7087_v60 }
 0x6e6   :  { %2579 = vmatpush1.msra.mxu0 %v7090_v32  ;;  %2650 = vmatpush1.msra.mxu1 %v7093_v6 }
 0x6e7   :  { %2580 = vmatprep.subr.mxu0 %v7096_v20  ;;  %2651 = vmatprep.subr.mxu1 %v7099_v62  ;;  %v7117_v62 = vld [vmem:[#allocation3 + $0xb0] sm:$0xff] }
 0x6e8   :  { %2581 = vmatpush1.msra.mxu0 %v7102_v15  ;;  %2652 = vmatpush1.msra.mxu1 %v7105_v37  ;;  %9534 = vst [vmem:[#allocation29_spill] sm:$0xff] %v7117_v62  ;;  %v7120_v15 = vld [vmem:[#allocation3 + $0x88] sm:$0xff]  ;;  %v7123_v37 = vld [vmem:[#allocation3 + $0x98] sm:$0xff] }
 0x6e9   :  { %2582 = vmatprep.subr.mxu0 %v7108_v21  ;;  %2653 = vmatprep.subr.mxu1 %v7111_v22  ;;  %9535 = vst [vmem:[#allocation30_spill] sm:$0xff] %v7120_v15  ;;  %9536 = vst [vmem:[#allocation31_spill] sm:$0xff] %v7123_v37  ;;  %v7126_v21 = vld [vmem:[#allocation3 + $0x80] sm:$0xff]  ;;  %v7129_v22 = vld [vmem:[#allocation3 + $0x90] sm:$0xff] }
 0x6ea   :  { %2583 = vmatpush1.msra.mxu0 %v7114_v38  ;;  %2654 = vmatpush1.msra.mxu1 %v7117_v62  ;;  %9537 = vst [vmem:[#allocation32_spill] sm:$0xff] %v7126_v21  ;;  %9538 = vst [vmem:[#allocation33_spill] sm:$0xff] %v7129_v22  ;;  %v7132_v38 = vld [vmem:[#allocation3 + $0x68] sm:$0xff]  ;;  %v7135_v62 = vld [vmem:[#allocation3 + $0x78] sm:$0xff] }
 0x6eb   :  { %2584 = vmatprep.subr.mxu0 %v7120_v15  ;;  %2655 = vmatprep.subr.mxu1 %v7123_v37  ;;  %9539 = vst [vmem:[#allocation34_spill] sm:$0xff] %v7132_v38  ;;  %9540 = vst [vmem:[#allocation35_spill] sm:$0xff] %v7135_v62  ;;  %v7138_v15 = vld [vmem:[#allocation3 + $0x60] sm:$0xff]  ;;  %v7141_v37 = vld [vmem:[#allocation3 + $0x70] sm:$0xff] }
 0x6ec   :  { %2585 = vmatpush1.msra.mxu0 %v7126_v21  ;;  %2656 = vmatpush1.msra.mxu1 %v7129_v22  ;;  %9541 = vst [vmem:[#allocation36_spill] sm:$0xff] %v7138_v15  ;;  %9542 = vst [vmem:[#allocation37_spill] sm:$0xff] %v7141_v37  ;;  %v7144_v21 = vld [vmem:[#allocation3 + $0x48] sm:$0xff]  ;;  %v7147_v22 = vld [vmem:[#allocation3 + $0x58] sm:$0xff] }
 0x6ed   :  { %2586 = vmatprep.subr.mxu0 %v7132_v38  ;;  %2657 = vmatprep.subr.mxu1 %v7135_v62  ;;  %9543 = vst [vmem:[#allocation38_spill] sm:$0xff] %v7144_v21  ;;  %9544 = vst [vmem:[#allocation39_spill] sm:$0xff] %v7147_v22  ;;  %v7150_v38 = vld [vmem:[#allocation3 + $0x40] sm:$0xff]  ;;  %v7153_v62 = vld [vmem:[#allocation3 + $0x50] sm:$0xff] }
 0x6ee   :  { %2587 = vmatpush1.msra.mxu0 %v7138_v15  ;;  %2658 = vmatpush1.msra.mxu1 %v7141_v37  ;;  %9545 = vst [vmem:[#allocation40_spill] sm:$0xff] %v7150_v38  ;;  %9546 = vst [vmem:[#allocation41_spill] sm:$0xff] %v7153_v62  ;;  %v7156_v15 = vld [vmem:[#allocation3 + $0x28] sm:$0xff]  ;;  %v7159_v37 = vld [vmem:[#allocation3 + $0x38] sm:$0xff] }
 0x6ef   :  { %2588 = vmatprep.subr.mxu0 %v7144_v21  ;;  %2659 = vmatprep.subr.mxu1 %v7147_v22  ;;  %9547 = vst [vmem:[#allocation42_spill] sm:$0xff] %v7156_v15  ;;  %9548 = vst [vmem:[#allocation43_spill] sm:$0xff] %v7159_v37  ;;  %v7162_v21 = vld [vmem:[#allocation3 + $0x20] sm:$0xff]  ;;  %v7165_v22 = vld [vmem:[#allocation3 + $0x30] sm:$0xff] }
 0x6f0   :  { %2589 = vmatpush1.msra.mxu0 %v7150_v38  ;;  %2660 = vmatpush1.msra.mxu1 %v7153_v62  ;;  %9549 = vst [vmem:[#allocation44_spill] sm:$0xff] %v7162_v21  ;;  %9550 = vst [vmem:[#allocation45_spill] sm:$0xff] %v7165_v22  ;;  %v7168_v38 = vld [vmem:[#allocation3 + $0x8] sm:$0xff]  ;;  %v7171_v62 = vld [vmem:[#allocation3 + $0x18] sm:$0xff] }
 0x6f1   :  { %2590 = vmatprep.subr.mxu0 %v7156_v15  ;;  %2661 = vmatprep.subr.mxu1 %v7159_v37  ;;  %9551 = vst [vmem:[#allocation46_spill] sm:$0xff] %v7168_v38  ;;  %9552 = vst [vmem:[#allocation47_spill] sm:$0xff] %v7171_v62  ;;  %v7174_v15 = vld [vmem:[#allocation3] sm:$0xff]  ;;  %v7178_v37 = vld [vmem:[#allocation3 + $0x10] sm:$0xff] }
 0x6f2   :  { %2591 = vmatpush1.msra.mxu0 %v7162_v21  ;;  %2662 = vmatpush1.msra.mxu1 %v7165_v22  ;;  %9553 = vst [vmem:[#allocation48_spill] sm:$0xff] %v7174_v15  ;;  %9554 = vst [vmem:[#allocation49_spill] sm:$0xff] %v7178_v37  ;;  %v7193_v22 = vld [vmem:[#allocation6 + $0x1f0] sm:$0xff] }
 0x6f3   :  { %2592 = vmatprep.subr.mxu0 %v7168_v38  ;;  %2663 = vmatprep.subr.mxu1 %v7171_v62  ;;  %v7184_v38 = vld [vmem:[#allocation6 + $0x1e8] sm:$0xff]  ;;  %v7187_v62 = vld [vmem:[#allocation6 + $0x1f8] sm:$0xff]  ;;  %9558 = vst [vmem:[#allocation53_spill] sm:$0xff] %v7193_v22 }
 0x6f4   :  { %2593 = vmatpush1.msra.mxu0 %v7174_v15  ;;  %2626 = vmatprep.mubr.f32.mxu0 %v9384_v19  ;;  %9555 = vst [vmem:[#allocation50_spill] sm:$0xff] %v7184_v38  ;;  %9556 = vst [vmem:[#allocation51_spill] sm:$0xff] %v7187_v62  ;;  %v7190_v15 = vld [vmem:[#allocation6 + $0x1e0] sm:$0xff] }
 0x6f5   :  { %2664 = vmatpush1.msra.mxu1 %v7178_v37  ;;  %2697 = vmatprep.mubr.f32.mxu1 %v9384_v19  ;;  %9557 = vst [vmem:[#allocation52_spill] sm:$0xff] %v7190_v15  ;;  %v7196_v37 = vld [vmem:[#allocation6 + $0x1c8] sm:$0xff] }
 0x6f6   :  { %2627 = vmatmul.mubr.f32.vlgmr.msra.gmra.mxu0 %v6990_v26  ;;  %2698 = vmatmul.mubr.f32.vlgmr.msra.gmra.mxu1 %v6990_v26  ;;  %9559 = vst [vmem:[#allocation54_spill] sm:$0xff] %v7196_v37  ;;  %v7199_v26 = vld [vmem:[#allocation6 + $0x1d8] sm:$0xff] }
 0x6f7   :  { %2744 = vmatprep.subr.mxu0 %v7184_v38  ;;  %2815 = vmatprep.subr.mxu1 %v7187_v62  ;;  %9560 = vst [vmem:[#allocation55_spill] sm:$0xff] %v7199_v26  ;;  %v7202_v38 = vld [vmem:[#allocation6 + $0x1c0] sm:$0xff]  ;;  %v7205_v62 = vld [vmem:[#allocation6 + $0x1d0] sm:$0xff] }
 0x6f8   :  { %2745 = vmatpush1.msra.mxu0 %v7190_v15  ;;  %2816 = vmatpush1.msra.mxu1 %v7193_v22  ;;  %9561 = vst [vmem:[#allocation56_spill] sm:$0xff] %v7202_v38  ;;  %9562 = vst [vmem:[#allocation57_spill] sm:$0xff] %v7205_v62  ;;  %v7208_v15 = vld [vmem:[#allocation6 + $0x1a8] sm:$0xff]  ;;  %v7211_v22 = vld [vmem:[#allocation6 + $0x1b8] sm:$0xff] }
 0x6f9   :  { %2746 = vmatprep.subr.mxu0 %v7196_v37  ;;  %2817 = vmatprep.subr.mxu1 %v7199_v26  ;;  %9563 = vst [vmem:[#allocation58_spill] sm:$0xff] %v7208_v15  ;;  %9564 = vst [vmem:[#allocation59_spill] sm:$0xff] %v7211_v22  ;;  %v7214_v37 = vld [vmem:[#allocation6 + $0x1a0] sm:$0xff]  ;;  %v7217_v26 = vld [vmem:[#allocation6 + $0x1b0] sm:$0xff] }
 0x6fa   :  { %2747 = vmatpush1.msra.mxu0 %v7202_v38  ;;  %2818 = vmatpush1.msra.mxu1 %v7205_v62  ;;  %9565 = vst [vmem:[#allocation60_spill] sm:$0xff] %v7214_v37  ;;  %9566 = vst [vmem:[#allocation61_spill] sm:$0xff] %v7217_v26  ;;  %v7220_v38 = vld [vmem:[#allocation6 + $0x188] sm:$0xff]  ;;  %v7223_v62 = vld [vmem:[#allocation6 + $0x198] sm:$0xff] }
 0x6fb   :  { %2748 = vmatprep.subr.mxu0 %v7208_v15  ;;  %2819 = vmatprep.subr.mxu1 %v7211_v22  ;;  %9567 = vst [vmem:[#allocation62_spill] sm:$0xff] %v7220_v38  ;;  %9568 = vst [vmem:[#allocation63_spill] sm:$0xff] %v7223_v62  ;;  %v7226_v15 = vld [vmem:[#allocation6 + $0x180] sm:$0xff]  ;;  %v7229_v22 = vld [vmem:[#allocation6 + $0x190] sm:$0xff] }
 0x6fc   :  { %2749 = vmatpush1.msra.mxu0 %v7214_v37  ;;  %2820 = vmatpush1.msra.mxu1 %v7217_v26  ;;  %9569 = vst [vmem:[#allocation64_spill] sm:$0xff] %v7226_v15  ;;  %9570 = vst [vmem:[#allocation65_spill] sm:$0xff] %v7229_v22  ;;  %v7232_v37 = vld [vmem:[#allocation6 + $0x168] sm:$0xff]  ;;  %v7235_v26 = vld [vmem:[#allocation6 + $0x178] sm:$0xff] }
 0x6fd   :  { %2750 = vmatprep.subr.mxu0 %v7220_v38  ;;  %2821 = vmatprep.subr.mxu1 %v7223_v62  ;;  %9571 = vst [vmem:[#allocation66_spill] sm:$0xff] %v7232_v37  ;;  %9572 = vst [vmem:[#allocation67_spill] sm:$0xff] %v7235_v26  ;;  %v7238_v38 = vld [vmem:[#allocation6 + $0x160] sm:$0xff]  ;;  %v7241_v62 = vld [vmem:[#allocation6 + $0x170] sm:$0xff] }
 0x6fe   :  { %2751 = vmatpush1.msra.mxu0 %v7226_v15  ;;  %2822 = vmatpush1.msra.mxu1 %v7229_v22  ;;  %9573 = vst [vmem:[#allocation68_spill] sm:$0xff] %v7238_v38  ;;  %9574 = vst [vmem:[#allocation69_spill] sm:$0xff] %v7241_v62  ;;  %v7244_v15 = vld [vmem:[#allocation6 + $0x148] sm:$0xff]  ;;  %v7247_v22 = vld [vmem:[#allocation6 + $0x158] sm:$0xff] }
 0x6ff   :  { %2752 = vmatprep.subr.mxu0 %v7232_v37  ;;  %2823 = vmatprep.subr.mxu1 %v7235_v26  ;;  %9575 = vst [vmem:[#allocation70_spill] sm:$0xff] %v7244_v15  ;;  %9576 = vst [vmem:[#allocation71_spill] sm:$0xff] %v7247_v22  ;;  %v7250_v37 = vld [vmem:[#allocation6 + $0x140] sm:$0xff]  ;;  %v7253_v26 = vld [vmem:[#allocation6 + $0x150] sm:$0xff] }
 0x700   :  { %2753 = vmatpush1.msra.mxu0 %v7238_v38  ;;  %2824 = vmatpush1.msra.mxu1 %v7241_v62  ;;  %9577 = vst [vmem:[#allocation72_spill] sm:$0xff] %v7250_v37  ;;  %9578 = vst [vmem:[#allocation73_spill] sm:$0xff] %v7253_v26  ;;  %v7256_v38 = vld [vmem:[#allocation6 + $0x128] sm:$0xff]  ;;  %v7259_v62 = vld [vmem:[#allocation6 + $0x138] sm:$0xff] }
 0x701   :  { %2754 = vmatprep.subr.mxu0 %v7244_v15  ;;  %2825 = vmatprep.subr.mxu1 %v7247_v22  ;;  %9579 = vst [vmem:[#allocation74_spill] sm:$0xff] %v7256_v38  ;;  %9580 = vst [vmem:[#allocation75_spill] sm:$0xff] %v7259_v62  ;;  %v7262_v15 = vld [vmem:[#allocation6 + $0x120] sm:$0xff]  ;;  %v7265_v22 = vld [vmem:[#allocation6 + $0x130] sm:$0xff] }
 0x702   :  { %2755 = vmatpush1.msra.mxu0 %v7250_v37  ;;  %2826 = vmatpush1.msra.mxu1 %v7253_v26  ;;  %9581 = vst [vmem:[#allocation76_spill] sm:$0xff] %v7262_v15  ;;  %9582 = vst [vmem:[#allocation77_spill] sm:$0xff] %v7265_v22  ;;  %v7268_v37 = vld [vmem:[#allocation6 + $0x108] sm:$0xff]  ;;  %v7271_v26 = vld [vmem:[#allocation6 + $0x118] sm:$0xff] }
 0x703   :  { %2756 = vmatprep.subr.mxu0 %v7256_v38  ;;  %2827 = vmatprep.subr.mxu1 %v7259_v62  ;;  %9583 = vst [vmem:[#allocation78_spill] sm:$0xff] %v7268_v37  ;;  %9584 = vst [vmem:[#allocation79_spill] sm:$0xff] %v7271_v26  ;;  %v7274_v38 = vld [vmem:[#allocation6 + $0x100] sm:$0xff]  ;;  %v7277_v62 = vld [vmem:[#allocation6 + $0x110] sm:$0xff] }
 0x704   :  { %2757 = vmatpush1.msra.mxu0 %v7262_v15  ;;  %2828 = vmatpush1.msra.mxu1 %v7265_v22  ;;  %9585 = vst [vmem:[#allocation80_spill] sm:$0xff] %v7274_v38  ;;  %9586 = vst [vmem:[#allocation81_spill] sm:$0xff] %v7277_v62  ;;  %v7280_v15 = vld [vmem:[#allocation6 + $0xe8] sm:$0xff]  ;;  %v7283_v22 = vld [vmem:[#allocation6 + $0xf8] sm:$0xff] }
 0x705   :  { %2758 = vmatprep.subr.mxu0 %v7268_v37  ;;  %2829 = vmatprep.subr.mxu1 %v7271_v26  ;;  %9587 = vst [vmem:[#allocation82_spill] sm:$0xff] %v7280_v15  ;;  %9588 = vst [vmem:[#allocation83_spill] sm:$0xff] %v7283_v22  ;;  %v7286_v37 = vld [vmem:[#allocation6 + $0xe0] sm:$0xff]  ;;  %v7289_v26 = vld [vmem:[#allocation6 + $0xf0] sm:$0xff] }
 0x706   :  { %2759 = vmatpush1.msra.mxu0 %v7274_v38  ;;  %2830 = vmatpush1.msra.mxu1 %v7277_v62  ;;  %9589 = vst [vmem:[#allocation84_spill] sm:$0xff] %v7286_v37  ;;  %9590 = vst [vmem:[#allocation85_spill] sm:$0xff] %v7289_v26  ;;  %v7292_v38 = vld [vmem:[#allocation6 + $0xc8] sm:$0xff]  ;;  %v7295_v62 = vld [vmem:[#allocation6 + $0xd8] sm:$0xff] }
 0x707   :  { %2760 = vmatprep.subr.mxu0 %v7280_v15  ;;  %2831 = vmatprep.subr.mxu1 %v7283_v22  ;;  %9591 = vst [vmem:[#allocation86_spill] sm:$0xff] %v7292_v38  ;;  %9592 = vst [vmem:[#allocation87_spill] sm:$0xff] %v7295_v62  ;;  %v7298_v15 = vld [vmem:[#allocation6 + $0xc0] sm:$0xff]  ;;  %v7301_v22 = vld [vmem:[#allocation6 + $0xd0] sm:$0xff] }
 0x708   :  { %2761 = vmatpush1.msra.mxu0 %v7286_v37  ;;  %2832 = vmatpush1.msra.mxu1 %v7289_v26  ;;  %9593 = vst [vmem:[#allocation88_spill] sm:$0xff] %v7298_v15  ;;  %9594 = vst [vmem:[#allocation89_spill] sm:$0xff] %v7301_v22  ;;  %v7304_v37 = vld [vmem:[#allocation6 + $0xa8] sm:$0xff]  ;;  %v7307_v26 = vld [vmem:[#allocation6 + $0xb8] sm:$0xff] }
 0x709   :  { %2762 = vmatprep.subr.mxu0 %v7292_v38  ;;  %2833 = vmatprep.subr.mxu1 %v7295_v62  ;;  %9595 = vst [vmem:[#allocation90_spill] sm:$0xff] %v7304_v37  ;;  %9596 = vst [vmem:[#allocation91_spill] sm:$0xff] %v7307_v26  ;;  %v7310_v38 = vld [vmem:[#allocation6 + $0xa0] sm:$0xff]  ;;  %v7313_v62 = vld [vmem:[#allocation6 + $0xb0] sm:$0xff] }
 0x70a   :  { %2763 = vmatpush1.msra.mxu0 %v7298_v15  ;;  %2834 = vmatpush1.msra.mxu1 %v7301_v22  ;;  %9597 = vst [vmem:[#allocation92_spill] sm:$0xff] %v7310_v38  ;;  %9598 = vst [vmem:[#allocation93_spill] sm:$0xff] %v7313_v62  ;;  %v7316_v15 = vld [vmem:[#allocation6 + $0x88] sm:$0xff]  ;;  %v7319_v22 = vld [vmem:[#allocation6 + $0x98] sm:$0xff] }
 0x70b   :  { %2764 = vmatprep.subr.mxu0 %v7304_v37  ;;  %2835 = vmatprep.subr.mxu1 %v7307_v26  ;;  %9599 = vst [vmem:[#allocation94_spill] sm:$0xff] %v7316_v15  ;;  %9600 = vst [vmem:[#allocation95_spill] sm:$0xff] %v7319_v22  ;;  %v7322_v37 = vld [vmem:[#allocation6 + $0x80] sm:$0xff]  ;;  %v7325_v26 = vld [vmem:[#allocation6 + $0x90] sm:$0xff] }
 0x70c   :  { %2765 = vmatpush1.msra.mxu0 %v7310_v38  ;;  %2836 = vmatpush1.msra.mxu1 %v7313_v62  ;;  %9601 = vst [vmem:[#allocation96_spill] sm:$0xff] %v7322_v37  ;;  %9602 = vst [vmem:[#allocation97_spill] sm:$0xff] %v7325_v26  ;;  %v7328_v38 = vld [vmem:[#allocation6 + $0x68] sm:$0xff]  ;;  %v7331_v62 = vld [vmem:[#allocation6 + $0x78] sm:$0xff] }
 0x70d   :  { %2766 = vmatprep.subr.mxu0 %v7316_v15  ;;  %2837 = vmatprep.subr.mxu1 %v7319_v22  ;;  %9603 = vst [vmem:[#allocation98_spill] sm:$0xff] %v7328_v38  ;;  %9604 = vst [vmem:[#allocation99_spill] sm:$0xff] %v7331_v62  ;;  %v7334_v15 = vld [vmem:[#allocation6 + $0x60] sm:$0xff]  ;;  %v7337_v22 = vld [vmem:[#allocation6 + $0x70] sm:$0xff] }
 0x70e   :  { %2767 = vmatpush1.msra.mxu0 %v7322_v37  ;;  %2838 = vmatpush1.msra.mxu1 %v7325_v26  ;;  %9605 = vst [vmem:[#allocation100_spill] sm:$0xff] %v7334_v15  ;;  %9606 = vst [vmem:[#allocation101_spill] sm:$0xff] %v7337_v22  ;;  %v7340_v37 = vld [vmem:[#allocation6 + $0x48] sm:$0xff]  ;;  %v7343_v26 = vld [vmem:[#allocation6 + $0x58] sm:$0xff] }
 0x70f   :  { %2768 = vmatprep.subr.mxu0 %v7328_v38  ;;  %2839 = vmatprep.subr.mxu1 %v7331_v62  ;;  %9607 = vst [vmem:[#allocation102_spill] sm:$0xff] %v7340_v37  ;;  %9608 = vst [vmem:[#allocation103_spill] sm:$0xff] %v7343_v26  ;;  %v7346_v38 = vld [vmem:[#allocation6 + $0x40] sm:$0xff]  ;;  %v7349_v62 = vld [vmem:[#allocation6 + $0x50] sm:$0xff] }
 0x710   :  { %2769 = vmatpush1.msra.mxu0 %v7334_v15  ;;  %2840 = vmatpush1.msra.mxu1 %v7337_v22  ;;  %9609 = vst [vmem:[#allocation104_spill] sm:$0xff] %v7346_v38  ;;  %9610 = vst [vmem:[#allocation105_spill] sm:$0xff] %v7349_v62  ;;  %v7352_v15 = vld [vmem:[#allocation6 + $0x28] sm:$0xff]  ;;  %v7355_v22 = vld [vmem:[#allocation6 + $0x38] sm:$0xff] }
 0x711   :  { %2770 = vmatprep.subr.mxu0 %v7340_v37  ;;  %2841 = vmatprep.subr.mxu1 %v7343_v26  ;;  %9611 = vst [vmem:[#allocation106_spill] sm:$0xff] %v7352_v15  ;;  %9612 = vst [vmem:[#allocation107_spill] sm:$0xff] %v7355_v22  ;;  %v7358_v37 = vld [vmem:[#allocation6 + $0x20] sm:$0xff]  ;;  %v7361_v26 = vld [vmem:[#allocation6 + $0x30] sm:$0xff] }
 0x712   :  { %2771 = vmatpush1.msra.mxu0 %v7346_v38  ;;  %2842 = vmatpush1.msra.mxu1 %v7349_v62  ;;  %9613 = vst [vmem:[#allocation108_spill] sm:$0xff] %v7358_v37  ;;  %9614 = vst [vmem:[#allocation109_spill] sm:$0xff] %v7361_v26  ;;  %v7364_v38 = vld [vmem:[#allocation6 + $0x8] sm:$0xff]  ;;  %v7367_v62 = vld [vmem:[#allocation6 + $0x18] sm:$0xff] }
 0x713   :  { %2772 = vmatprep.subr.mxu0 %v7352_v15  ;;  %2843 = vmatprep.subr.mxu1 %v7355_v22  ;;  %9615 = vst [vmem:[#allocation110_spill] sm:$0xff] %v7364_v38  ;;  %9616 = vst [vmem:[#allocation111_spill] sm:$0xff] %v7367_v62  ;;  %v7370_v15 = vld [vmem:[#allocation6] sm:$0xff]  ;;  %v7373_v22 = vld [vmem:[#allocation6 + $0x10] sm:$0xff] }
 0x714   :  { %2773 = vmatpush1.msra.mxu0 %v7358_v37  ;;  %2844 = vmatpush1.msra.mxu1 %v7361_v26  ;;  %9617 = vst [vmem:[#allocation112_spill] sm:$0xff] %v7370_v15  ;;  %9618 = vst [vmem:[#allocation113_spill] sm:$0xff] %v7373_v22  ;;  %v7376_v37 = vld [vmem:[#allocation6 + $0x3e8] sm:$0xff]  ;;  %v7379_v26 = vld [vmem:[#allocation6 + $0x3f8] sm:$0xff] }
 0x715   :  { %2774 = vmatprep.subr.mxu0 %v7364_v38  ;;  %2845 = vmatprep.subr.mxu1 %v7367_v62  ;;  %9619 = vst [vmem:[#allocation114_spill] sm:$0xff] %v7376_v37  ;;  %9620 = vst [vmem:[#allocation115_spill] sm:$0xff] %v7379_v26  ;;  %v7382_v38 = vld [vmem:[#allocation6 + $0x3e0] sm:$0xff]  ;;  %v7385_v62 = vld [vmem:[#allocation6 + $0x3f0] sm:$0xff] }
 0x716   :  { %2775 = vmatpush1.msra.mxu0 %v7370_v15  ;;  %2846 = vmatpush1.msra.mxu1 %v7373_v22  ;;  %9621 = vst [vmem:[#allocation116_spill] sm:$0xff] %v7382_v38  ;;  %9622 = vst [vmem:[#allocation117_spill] sm:$0xff] %v7385_v62  ;;  %v7388_v15 = vld [vmem:[#allocation6 + $0x3c8] sm:$0xff]  ;;  %v7391_v22 = vld [vmem:[#allocation6 + $0x3d8] sm:$0xff] }
 0x717   :  { %2776 = vmatprep.subr.mxu0 %v7376_v37  ;;  %2847 = vmatprep.subr.mxu1 %v7379_v26  ;;  %9623 = vst [vmem:[#allocation118_spill] sm:$0xff] %v7388_v15  ;;  %9624 = vst [vmem:[#allocation119_spill] sm:$0xff] %v7391_v22  ;;  %v7394_v37 = vld [vmem:[#allocation6 + $0x3c0] sm:$0xff]  ;;  %v7397_v26 = vld [vmem:[#allocation6 + $0x3d0] sm:$0xff] }
 0x718   :  { %2777 = vmatpush2.msra.mxu0 %v7382_v38  ;;  %2848 = vmatpush2.msra.mxu1 %v7385_v62  ;;  %9625 = vst [vmem:[#allocation120_spill] sm:$0xff] %v7394_v37  ;;  %9626 = vst [vmem:[#allocation121_spill] sm:$0xff] %v7397_v26  ;;  %v7400_v38 = vld [vmem:[#allocation6 + $0x3a8] sm:$0xff]  ;;  %v7403_v62 = vld [vmem:[#allocation6 + $0x3b8] sm:$0xff] }
 0x719   :  { %2778 = vmatprep.subr.mxu0 %v7388_v15  ;;  %2849 = vmatprep.subr.mxu1 %v7391_v22  ;;  %9627 = vst [vmem:[#allocation122_spill] sm:$0xff] %v7400_v38  ;;  %9628 = vst [vmem:[#allocation123_spill] sm:$0xff] %v7403_v62  ;;  %v7406_v15 = vld [vmem:[#allocation6 + $0x3a0] sm:$0xff]  ;;  %v7409_v22 = vld [vmem:[#allocation6 + $0x3b0] sm:$0xff] }
 0x71a   :  { %2779 = vmatpush2.msra.mxu0 %v7394_v37  ;;  %2850 = vmatpush2.msra.mxu1 %v7397_v26  ;;  %9629 = vst [vmem:[#allocation124_spill] sm:$0xff] %v7406_v15  ;;  %9630 = vst [vmem:[#allocation125_spill] sm:$0xff] %v7409_v22  ;;  %v7412_v37 = vld [vmem:[#allocation6 + $0x388] sm:$0xff]  ;;  %v7415_v26 = vld [vmem:[#allocation6 + $0x398] sm:$0xff] }
 0x71b   :  { %2780 = vmatprep.subr.mxu0 %v7400_v38  ;;  %2851 = vmatprep.subr.mxu1 %v7403_v62  ;;  %9631 = vst [vmem:[#allocation126_spill] sm:$0xff] %v7412_v37  ;;  %9632 = vst [vmem:[#allocation127_spill] sm:$0xff] %v7415_v26  ;;  %v7418_v38 = vld [vmem:[#allocation6 + $0x380] sm:$0xff]  ;;  %v7421_v62 = vld [vmem:[#allocation6 + $0x390] sm:$0xff] }
 0x71c   :  { %2781 = vmatpush2.msra.mxu0 %v7406_v15  ;;  %2852 = vmatpush2.msra.mxu1 %v7409_v22  ;;  %9633 = vst [vmem:[#allocation128_spill] sm:$0xff] %v7418_v38  ;;  %9634 = vst [vmem:[#allocation129_spill] sm:$0xff] %v7421_v62  ;;  %v7424_v15 = vld [vmem:[#allocation6 + $0x368] sm:$0xff]  ;;  %v7427_v22 = vld [vmem:[#allocation6 + $0x378] sm:$0xff] }
 0x71d   :  { %2782 = vmatprep.subr.mxu0 %v7412_v37  ;;  %2853 = vmatprep.subr.mxu1 %v7415_v26  ;;  %9635 = vst [vmem:[#allocation130_spill] sm:$0xff] %v7424_v15  ;;  %9636 = vst [vmem:[#allocation131_spill] sm:$0xff] %v7427_v22  ;;  %v7430_v37 = vld [vmem:[#allocation6 + $0x360] sm:$0xff]  ;;  %v7433_v26 = vld [vmem:[#allocation6 + $0x370] sm:$0xff] }
 0x71e   :  { %2783 = vmatpush2.msra.mxu0 %v7418_v38  ;;  %2854 = vmatpush2.msra.mxu1 %v7421_v62  ;;  %9637 = vst [vmem:[#allocation132_spill] sm:$0xff] %v7430_v37  ;;  %9638 = vst [vmem:[#allocation133_spill] sm:$0xff] %v7433_v26  ;;  %v7436_v38 = vld [vmem:[#allocation6 + $0x348] sm:$0xff]  ;;  %v7439_v62 = vld [vmem:[#allocation6 + $0x358] sm:$0xff] }
 0x71f   :  { %2784 = vmatprep.subr.mxu0 %v7424_v15  ;;  %2855 = vmatprep.subr.mxu1 %v7427_v22  ;;  %9639 = vst [vmem:[#allocation134_spill] sm:$0xff] %v7436_v38  ;;  %9640 = vst [vmem:[#allocation135_spill] sm:$0xff] %v7439_v62  ;;  %v7442_v15 = vld [vmem:[#allocation6 + $0x340] sm:$0xff]  ;;  %v7445_v22 = vld [vmem:[#allocation6 + $0x350] sm:$0xff] }
 0x720   :  { %2785 = vmatpush2.msra.mxu0 %v7430_v37  ;;  %2856 = vmatpush2.msra.mxu1 %v7433_v26  ;;  %9641 = vst [vmem:[#allocation136_spill] sm:$0xff] %v7442_v15  ;;  %9642 = vst [vmem:[#allocation137_spill] sm:$0xff] %v7445_v22  ;;  %v7448_v37 = vld [vmem:[#allocation6 + $0x328] sm:$0xff]  ;;  %v7451_v26 = vld [vmem:[#allocation6 + $0x338] sm:$0xff] }
 0x721   :  { %2786 = vmatprep.subr.mxu0 %v7436_v38  ;;  %2857 = vmatprep.subr.mxu1 %v7439_v62  ;;  %9643 = vst [vmem:[#allocation138_spill] sm:$0xff] %v7448_v37  ;;  %9644 = vst [vmem:[#allocation139_spill] sm:$0xff] %v7451_v26  ;;  %v7454_v38 = vld [vmem:[#allocation6 + $0x320] sm:$0xff]  ;;  %v7457_v62 = vld [vmem:[#allocation6 + $0x330] sm:$0xff] }
 0x722   :  { %2787 = vmatpush2.msra.mxu0 %v7442_v15  ;;  %2858 = vmatpush2.msra.mxu1 %v7445_v22  ;;  %9645 = vst [vmem:[#allocation140_spill] sm:$0xff] %v7454_v38  ;;  %9646 = vst [vmem:[#allocation141_spill] sm:$0xff] %v7457_v62  ;;  %v7460_v15 = vld [vmem:[#allocation6 + $0x308] sm:$0xff]  ;;  %v7463_v22 = vld [vmem:[#allocation6 + $0x318] sm:$0xff] }
 0x723   :  { %2788 = vmatprep.subr.mxu0 %v7448_v37  ;;  %2859 = vmatprep.subr.mxu1 %v7451_v26  ;;  %9647 = vst [vmem:[#allocation142_spill] sm:$0xff] %v7460_v15  ;;  %9648 = vst [vmem:[#allocation143_spill] sm:$0xff] %v7463_v22  ;;  %v7466_v37 = vld [vmem:[#allocation6 + $0x300] sm:$0xff]  ;;  %v7469_v26 = vld [vmem:[#allocation6 + $0x310] sm:$0xff] }
 0x724   :  { %2789 = vmatpush2.msra.mxu0 %v7454_v38  ;;  %2860 = vmatpush2.msra.mxu1 %v7457_v62  ;;  %9649 = vst [vmem:[#allocation144_spill] sm:$0xff] %v7466_v37  ;;  %9650 = vst [vmem:[#allocation145_spill] sm:$0xff] %v7469_v26  ;;  %v7472_v38 = vld [vmem:[#allocation6 + $0x2e8] sm:$0xff]  ;;  %v7475_v62 = vld [vmem:[#allocation6 + $0x2f8] sm:$0xff] }
 0x725   :  { %2790 = vmatprep.subr.mxu0 %v7460_v15  ;;  %2861 = vmatprep.subr.mxu1 %v7463_v22  ;;  %9651 = vst [vmem:[#allocation146_spill] sm:$0xff] %v7472_v38  ;;  %9652 = vst [vmem:[#allocation147_spill] sm:$0xff] %v7475_v62  ;;  %v7478_v15 = vld [vmem:[#allocation6 + $0x2e0] sm:$0xff]  ;;  %v7481_v22 = vld [vmem:[#allocation6 + $0x2f0] sm:$0xff] }
 0x726   :  { %2791 = vmatpush2.msra.mxu0 %v7466_v37  ;;  %2862 = vmatpush2.msra.mxu1 %v7469_v26  ;;  %9653 = vst [vmem:[#allocation148_spill] sm:$0xff] %v7478_v15  ;;  %9654 = vst [vmem:[#allocation149_spill] sm:$0xff] %v7481_v22  ;;  %v7484_v37 = vld [vmem:[#allocation6 + $0x2c8] sm:$0xff]  ;;  %v7487_v26 = vld [vmem:[#allocation6 + $0x2d8] sm:$0xff] }
 0x727   :  { %2792 = vmatprep.subr.mxu0 %v7472_v38  ;;  %2863 = vmatprep.subr.mxu1 %v7475_v62  ;;  %9655 = vst [vmem:[#allocation150_spill] sm:$0xff] %v7484_v37  ;;  %9656 = vst [vmem:[#allocation151_spill] sm:$0xff] %v7487_v26  ;;  %v7490_v38 = vld [vmem:[#allocation6 + $0x2c0] sm:$0xff]  ;;  %v7493_v62 = vld [vmem:[#allocation6 + $0x2d0] sm:$0xff] }
 0x728   :  { %2793 = vmatpush2.msra.mxu0 %v7478_v15  ;;  %2864 = vmatpush2.msra.mxu1 %v7481_v22  ;;  %9657 = vst [vmem:[#allocation152_spill] sm:$0xff] %v7490_v38  ;;  %9658 = vst [vmem:[#allocation153_spill] sm:$0xff] %v7493_v62  ;;  %v7496_v15 = vld [vmem:[#allocation6 + $0x2a8] sm:$0xff]  ;;  %v7499_v22 = vld [vmem:[#allocation6 + $0x2b8] sm:$0xff] }
 0x729   :  { %2794 = vmatprep.subr.mxu0 %v7484_v37  ;;  %2865 = vmatprep.subr.mxu1 %v7487_v26  ;;  %9659 = vst [vmem:[#allocation154_spill] sm:$0xff] %v7496_v15  ;;  %9660 = vst [vmem:[#allocation155_spill] sm:$0xff] %v7499_v22  ;;  %v7502_v37 = vld [vmem:[#allocation6 + $0x2a0] sm:$0xff]  ;;  %v7505_v26 = vld [vmem:[#allocation6 + $0x2b0] sm:$0xff] }
 0x72a   :  { %2795 = vmatpush2.msra.mxu0 %v7490_v38  ;;  %2866 = vmatpush2.msra.mxu1 %v7493_v62  ;;  %9661 = vst [vmem:[#allocation156_spill] sm:$0xff] %v7502_v37  ;;  %9662 = vst [vmem:[#allocation157_spill] sm:$0xff] %v7505_v26  ;;  %v7508_v38 = vld [vmem:[#allocation6 + $0x288] sm:$0xff]  ;;  %v7511_v62 = vld [vmem:[#allocation6 + $0x298] sm:$0xff] }
 0x72b   :  { %2796 = vmatprep.subr.mxu0 %v7496_v15  ;;  %2867 = vmatprep.subr.mxu1 %v7499_v22  ;;  %9663 = vst [vmem:[#allocation158_spill] sm:$0xff] %v7508_v38  ;;  %9664 = vst [vmem:[#allocation159_spill] sm:$0xff] %v7511_v62  ;;  %v7514_v15 = vld [vmem:[#allocation6 + $0x280] sm:$0xff]  ;;  %v7517_v22 = vld [vmem:[#allocation6 + $0x290] sm:$0xff] }
 0x72c   :  { %2797 = vmatpush2.msra.mxu0 %v7502_v37  ;;  %2868 = vmatpush2.msra.mxu1 %v7505_v26  ;;  %9665 = vst [vmem:[#allocation160_spill] sm:$0xff] %v7514_v15  ;;  %9666 = vst [vmem:[#allocation161_spill] sm:$0xff] %v7517_v22  ;;  %v7520_v37 = vld [vmem:[#allocation6 + $0x268] sm:$0xff]  ;;  %v7523_v26 = vld [vmem:[#allocation6 + $0x278] sm:$0xff] }
 0x72d   :  { %2798 = vmatprep.subr.mxu0 %v7508_v38  ;;  %2869 = vmatprep.subr.mxu1 %v7511_v62  ;;  %9667 = vst [vmem:[#allocation162_spill] sm:$0xff] %v7520_v37  ;;  %9668 = vst [vmem:[#allocation163_spill] sm:$0xff] %v7523_v26  ;;  %v7526_v38 = vld [vmem:[#allocation6 + $0x260] sm:$0xff]  ;;  %v7529_v62 = vld [vmem:[#allocation6 + $0x270] sm:$0xff] }
 0x72e   :  { %2799 = vmatpush2.msra.mxu0 %v7514_v15  ;;  %2870 = vmatpush2.msra.mxu1 %v7517_v22  ;;  %9669 = vst [vmem:[#allocation164_spill] sm:$0xff] %v7526_v38  ;;  %9670 = vst [vmem:[#allocation165_spill] sm:$0xff] %v7529_v62  ;;  %v7532_v15 = vld [vmem:[#allocation6 + $0x248] sm:$0xff]  ;;  %v7535_v22 = vld [vmem:[#allocation6 + $0x258] sm:$0xff] }
 0x72f   :  { %2800 = vmatprep.subr.mxu0 %v7520_v37  ;;  %2871 = vmatprep.subr.mxu1 %v7523_v26  ;;  %9671 = vst [vmem:[#allocation167_spill] sm:$0xff] %v7532_v15  ;;  %9672 = vst [vmem:[#allocation170_spill] sm:$0xff] %v7535_v22  ;;  %v7538_v37 = vld [vmem:[#allocation6 + $0x240] sm:$0xff]  ;;  %v7541_v26 = vld [vmem:[#allocation6 + $0x250] sm:$0xff] }
 0x730   :  { %2801 = vmatpush2.msra.mxu0 %v7526_v38  ;;  %2872 = vmatpush2.msra.mxu1 %v7529_v62  ;;  %9673 = vst [vmem:[#allocation171_spill] sm:$0xff] %v7538_v37  ;;  %9674 = vst [vmem:[#allocation172_spill] sm:$0xff] %v7541_v26  ;;  %v7544_v38 = vld [vmem:[#allocation6 + $0x228] sm:$0xff]  ;;  %v7547_v62 = vld [vmem:[#allocation6 + $0x238] sm:$0xff] }
 0x731   :  { %2802 = vmatprep.subr.mxu0 %v7532_v15  ;;  %2873 = vmatprep.subr.mxu1 %v7535_v22  ;;  %9675 = vst [vmem:[#allocation173_spill] sm:$0xff] %v7544_v38  ;;  %9676 = vst [vmem:[#allocation174_spill] sm:$0xff] %v7547_v62  ;;  %v7550_v15 = vld [vmem:[#allocation6 + $0x220] sm:$0xff]  ;;  %v7553_v22 = vld [vmem:[#allocation6 + $0x230] sm:$0xff] }
 0x732   :  { %2803 = vmatpush2.msra.mxu0 %v7538_v37  ;;  %2874 = vmatpush2.msra.mxu1 %v7541_v26  ;;  %9677 = vst [vmem:[#allocation175_spill] sm:$0xff] %v7550_v15  ;;  %9678 = vst [vmem:[#allocation176_spill] sm:$0xff] %v7553_v22  ;;  %v7556_v37 = vld [vmem:[#allocation6 + $0x208] sm:$0xff]  ;;  %v7559_v26 = vld [vmem:[#allocation6 + $0x218] sm:$0xff] }
 0x733   :  { %2804 = vmatprep.subr.mxu0 %v7544_v38  ;;  %2875 = vmatprep.subr.mxu1 %v7547_v62  ;;  %9679 = vst [vmem:[#allocation177_spill] sm:$0xff] %v7556_v37  ;;  %9680 = vst [vmem:[#allocation178_spill] sm:$0xff] %v7559_v26  ;;  %v7562_v38 = vld [vmem:[#allocation6 + $0x200] sm:$0xff]  ;;  %v7565_v62 = vld [vmem:[#allocation6 + $0x210] sm:$0xff] }
 0x734   :  { %2805 = vmatpush2.msra.mxu0 %v7550_v15  ;;  %2876 = vmatpush2.msra.mxu1 %v7553_v22  ;;  %9681 = vst [vmem:[#allocation179_spill] sm:$0xff] %v7562_v38  ;;  %9682 = vst [vmem:[#allocation180_spill] sm:$0xff] %v7565_v62 }
 0x735   :  { %2806 = vmatprep.subr.mxu0 %v7556_v37  ;;  %2877 = vmatprep.subr.mxu1 %v7559_v26 }
 0x736   :  { %2807 = vmatpush2.msra.mxu0 %v7562_v38  ;;  %2878 = vmatpush2.msra.mxu1 %v7565_v62 }
 0x737   :  { %2929 = vmatprep.subr.mxu0 %v6954_v28  ;;  %3000 = vmatprep.subr.mxu1 %v6957_v13 }
 0x795   :  { %v2443_v22 = vpop.f32.mrf.mxu0  ;;  %v2514_v26 = vpop.f32.mrf.mxu1 }
 0x796   :  { %v2444_v15 = vadd.f32 %v2443_v22, %v9514_v17  ;;  %v2515_v28 = vadd.f32 %v2514_v26, %v9517_v52 }
 0x797   :  { %v2445_v37 = vpop.f32.mrf.mxu0  ;;  %v2516_v38 = vpop.f32.mrf.mxu1 }
 0x798   :  { %v3359_v19 = vmul.f32 -1.442695, %v2444_v15  ;;  %v2446_v21 = vadd.f32 %v2445_v37, %v9515_v45  ;;  %v2517_v6 = vadd.f32 %v2516_v38, %v9516_v57  ;;  %v2556_v15 = vpop.permute.xlu1 %2555 }
 0x799   :  { %v2559_v26 = vmul.f32 %v2556_v15, %v9520_v14 }
 0x79a   :  { %3570 = vpow2.f32 %v3359_v19  ;;  %v3360_v20 = vmul.f32 -1.442695, %v2446_v21  ;;  %v3361_v32 = vmul.f32 -1.442695, %v2517_v6  ;;  %v2558_v19 = vmul.f32 %v2556_v15, %v9518_v12  ;;  %v2706_v21 = vpop.permute.xlu0 %2705 }
 0x79b   :  { %v2708_v6 = vmul.f32 %v2706_v21, %v9519_v27 }
 0x79c   :  { %3572 = vpow2.f32 %v3360_v20 }
 0x79d   :  { %3574 = vpow2.f32 %v3361_v32 }
 0x7a7   :  { %v3571_v62 = vpop.eup %3570 }
 0x7a8   :  { %v2522_v60 = vadd.f32 1.0, %v3571_v62 }
 0x7a9   :  { %v3573_v13 = vpop.eup %3572 }
 0x7aa   :  { %3576 = vrcp.f32 %v2522_v60  ;;  %v2528_v22 = vadd.f32 1.0, %v3573_v13  ;;  %v3575_v37 = vpop.eup %3574 }
 0x7ab   :  { %3578 = vtanh.f32 %v2515_v28  ;;  %v2535_v60 = vadd.f32 1.0, %v3575_v37 }
 0x7ac   :  { %3580 = vrcp.f32 %v2528_v22  ;;  %v2709_v22 = vmul.f32 %v2706_v21, %v8855_v35 }
 0x7ad   :  { %3582 = vrcp.f32 %v2535_v60 }
 0x7b6   :  { %v2628_v20 = vpop.f32.mrf.mxu0  ;;  %v2699_v38 = vpop.f32.mrf.mxu1 }
 0x7b7   :  { %v3577_v45 = vpop.eup %3576  ;;  %v2629_v17 = vadd.f32 %v2628_v20, %v2558_v19  ;;  %v2561_v20 = vmul.f32 %v2556_v15, %v5033_v46 }
 0x7b8   :  { %v3579_v62 = vpop.eup %3578  ;;  %v2630_v52 = vpop.f32.mrf.mxu0 }
 0x7b9   :  { %v3581_v32 = vpop.eup %3580  ;;  %v2712_v13 = vadd.f32 %v2708_v6, %v2629_v17  ;;  %v2631_v28 = vadd.f32 %v2630_v52, %v2559_v26  ;;  %v2539_v57 = vmul.f32 %v3579_v62, %v3577_v45  ;;  %v2701_v19 = vpop.f32.mrf.mxu1  ;;  %v2711_v45 = vmul.f32 %v2706_v21, %v5039_v3 }
 0x7ba   :  { %v2538_v12 = vmul.f32 %v3581_v32, %v6971_v48  ;;  %v2702_v37 = vadd.f32 %v2701_v19, %v2561_v20  ;;  %v2560_v52 = vmul.f32 %v2556_v15, %v5043_v49  ;;  %v2710_v26 = vmul.f32 %v2706_v21, %v5050_v1 }
 0x7bb   :  { %v2716_v10 = vadd.f32 %v2712_v13, %v5026_v0  ;;  %v2713_v7 = vadd.f32 %v2709_v22, %v2631_v28 }
 0x7bc   :  { %v7581_v27 = vadd.f32 %v2539_v57, %v2538_v12  ;;  %v2715_v48 = vadd.f32 %v2711_v45, %v2702_v37  ;;  %v2700_v6 = vadd.f32 %v2699_v38, %v2560_v52 }
 0x7bd   :  { %v3364_v14 = vmul.f32 -1.442695, %v2716_v10  ;;  %v2717_v50 = vadd.f32 %v2713_v7, %v5036_v44  ;;  %v3583_v10 = vpop.eup %3582 }
 0x7be   :  { %3584 = vtanh.f32 %v7581_v27  ;;  %v2719_v57 = vadd.f32 %v2715_v48, %v8856_v9  ;;  %v2714_v12 = vadd.f32 %v2710_v26, %v2700_v6  ;;  %v9712_v6 = vld [vmem:[#allocation45_spill] sm:$0xff]  ;;  %v9713_v26 = vld [vmem:[#allocation46_spill] sm:$0xff] }
 0x7bf   :  { %3586 = vpow2.f32 %v3364_v14  ;;  %v3365_v17 = vmul.f32 -1.442695, %v2717_v50 }
 0x7c0   :  { %v3366_v62 = vmul.f32 -1.442695, %v2719_v57  ;;  %v2718_v60 = vadd.f32 %v2714_v12, %v5058_v58  ;;  %v9714_v57 = vld [vmem:[#allocation47_spill] sm:$0xff]  ;;  %v9715_v12 = vld [vmem:[#allocation48_spill] sm:$0xff] }
 0x7c1   :  { %3588 = vpow2.f32 %v3365_v17 }
 0x7c2   :  { %3590 = vpow2.f32 %v3366_v62  ;;  %v9717_v62 = vld [vmem:[#allocation49_spill] sm:$0xff] }
 0x7cb   :  { %v3585_v7 = vpop.eup %3584 }
 0x7cc   :  { %v3587_v32 = vpop.eup %3586  ;;  %v2542_v14 = vmul.f32 %v3585_v7, %v3583_v10  ;;  %v9716_v10 = vmov 0.0   ;;  %v9718_v7 = vld [vmem:[#allocation50_spill] sm:$0xff] }
 0x7cd   :  { %v2723_v50 = vadd.f32 1.0, %v3587_v32  ;;  %v9719_v32 = vld [vmem:[#allocation51_spill] sm:$0xff] }
 0x7ce   :  { %v3589_v13 = vpop.eup %3588  ;;  %2808 = vmatprep.mubr.f32.mxu0 %v2542_v14  ;;  %2879 = vmatprep.mubr.f32.mxu1 %v2542_v14  ;;  %v2543_v15 = vmul.f32 %v6983_v8, %v2542_v14  ;;  %v9721_v14 = vld [vmem:[#allocation53_spill] sm:$0xff] }
 0x7cf   :  { %3592 = vrcp.f32 %v2723_v50  ;;  %v2729_v38 = vadd.f32 1.0, %v3589_v13  ;;  %v3591_v21 = vpop.eup %3590  ;;  %v9722_v50 = vld [vmem:[#allocation54_spill] sm:$0xff]  ;;  %v9723_v13 = vld [vmem:[#allocation55_spill] sm:$0xff] }
 0x7d0   :  { %3594 = vtanh.f32 %v2718_v60  ;;  %2544 = vadd.xlane.f32.xlu1 %v2543_v15  ;;  %v2736_v20 = vadd.f32 1.0, %v3591_v21  ;;  %v9720_v60 = vld [vmem:[#allocation52_spill] sm:$0xff]  ;;  %v9726_v21 = vld [vmem:[#allocation58_spill] sm:$0xff] }
 0x7d1   :  { %3596 = vrcp.f32 %v2729_v38  ;;  %v9724_v15 = vld [vmem:[#allocation56_spill] sm:$0xff]  ;;  %v9725_v38 = vld [vmem:[#allocation57_spill] sm:$0xff] }
 0x7d2   :  { %3598 = vrcp.f32 %v2736_v20  ;;  %v9730_v20 = vld [vmem:[#allocation62_spill] sm:$0xff] }
 0x7dc   :  { %v3593_v28 = vpop.eup %3592 }
 0x7dd   :  { %v3595_v22 = vpop.eup %3594 }
 0x7de   :  { %v3597_v19 = vpop.eup %3596  ;;  %v2740_v37 = vmul.f32 %v3595_v22, %v3593_v28  ;;  %v9727_v28 = vld [vmem:[#allocation59_spill] sm:$0xff]  ;;  %v9728_v22 = vld [vmem:[#allocation60_spill] sm:$0xff] }
 0x7df   :  { %v2739_v17 = vmul.f32 %v3597_v19, %v6987_v61  ;;  %v3599_v52 = vpop.eup %3598  ;;  %v9683_v61 = vld [vmem:[#allocation16_spill] sm:$0xff]  ;;  %v9729_v19 = vld [vmem:[#allocation61_spill] sm:$0xff] }
 0x7e1   :  { %v7592_v45 = vadd.f32 %v2740_v37, %v2739_v17  ;;  %v9731_v37 = vld [vmem:[#allocation63_spill] sm:$0xff]  ;;  %v9732_v17 = vld [vmem:[#allocation64_spill] sm:$0xff] }
 0x7e3   :  { %3600 = vtanh.f32 %v7592_v45 }
 0x7f0   :  { %v3601_v8 = vpop.eup %3600 }
 0x7f1   :  { %v7595_v48 = vmul.f32 %v3601_v8, %v3599_v52  ;;  %v9733_v52 = vld [vmem:[#allocation65_spill] sm:$0xff]  ;;  %v9734_v8 = vld [vmem:[#allocation66_spill] sm:$0xff] }
 0x7f3   :  { %2809 = vmatmul.mubr.f32.vlgmr.msra.gmra.mxu0 %v7595_v48  ;;  %2880 = vmatmul.mubr.f32.vlgmr.msra.gmra.mxu1 %v7595_v48 }
 0x7f4   :  { %2930 = vmatpush1.msra.mxu0 %v6994_v42  ;;  %3001 = vmatpush1.msra.mxu1 %v6997_v30  ;;  %v9684_v42 = vld [vmem:[#allocation17_spill] sm:$0xff]  ;;  %v9685_v30 = vld [vmem:[#allocation18_spill] sm:$0xff] }
 0x7f5   :  { %2931 = vmatprep.subr.mxu0 %v7000_v54  ;;  %3002 = vmatprep.subr.mxu1 %v7003_v23  ;;  %v9686_v54 = vld [vmem:[#allocation19_spill] sm:$0xff]  ;;  %v9687_v23 = vld [vmem:[#allocation20_spill] sm:$0xff] }
 0x7f6   :  { %2932 = vmatpush1.msra.mxu0 %v7006_v24  ;;  %3003 = vmatpush1.msra.mxu1 %v7009_v25  ;;  %v9688_v24 = vld [vmem:[#allocation21_spill] sm:$0xff]  ;;  %v9689_v25 = vld [vmem:[#allocation22_spill] sm:$0xff] }
 0x7f7   :  { %2933 = vmatprep.subr.mxu0 %v7012_v59  ;;  %3004 = vmatprep.subr.mxu1 %v7015_v11  ;;  %v9690_v59 = vld [vmem:[#allocation23_spill] sm:$0xff]  ;;  %v9691_v11 = vld [vmem:[#allocation24_spill] sm:$0xff] }
 0x7f8   :  { %2934 = vmatpush1.msra.mxu0 %v7018_v18  ;;  %3005 = vmatpush1.msra.mxu1 %v7021_v39  ;;  %v9692_v18 = vld [vmem:[#allocation25_spill] sm:$0xff]  ;;  %v9693_v39 = vld [vmem:[#allocation26_spill] sm:$0xff] }
 0x7f9   :  { %2935 = vmatprep.subr.mxu0 %v7024_v56  ;;  %3006 = vmatprep.subr.mxu1 %v7027_v51  ;;  %v9694_v56 = vld [vmem:[#allocation27_spill] sm:$0xff]  ;;  %v9695_v51 = vld [vmem:[#allocation28_spill] sm:$0xff] }
 0x7fa   :  { %2936 = vmatpush1.msra.mxu0 %v7030_v16  ;;  %3007 = vmatpush1.msra.mxu1 %v7033_v36  ;;  %v9696_v16 = vld [vmem:[#allocation29_spill] sm:$0xff]  ;;  %v9697_v36 = vld [vmem:[#allocation30_spill] sm:$0xff] }
 0x7fb   :  { %2937 = vmatprep.subr.mxu0 %v7036_v5  ;;  %3008 = vmatprep.subr.mxu1 %v7039_v47  ;;  %v9698_v5 = vld [vmem:[#allocation31_spill] sm:$0xff]  ;;  %v9699_v47 = vld [vmem:[#allocation32_spill] sm:$0xff] }
 0x7fc   :  { %2938 = vmatpush1.msra.mxu0 %v7042_v33  ;;  %3009 = vmatpush1.msra.mxu1 %v7045_v31  ;;  %v9700_v33 = vld [vmem:[#allocation33_spill] sm:$0xff]  ;;  %v9701_v31 = vld [vmem:[#allocation34_spill] sm:$0xff] }
 0x7fd   :  { %2939 = vmatprep.subr.mxu0 %v7048_v34  ;;  %3010 = vmatprep.subr.mxu1 %v7051_v40  ;;  %v9702_v34 = vld [vmem:[#allocation35_spill] sm:$0xff]  ;;  %v9703_v40 = vld [vmem:[#allocation36_spill] sm:$0xff] }
 0x7fe   :  { %2940 = vmatpush1.msra.mxu0 %v7054_v41  ;;  %3011 = vmatpush1.msra.mxu1 %v7057_v43  ;;  %v9704_v41 = vld [vmem:[#allocation37_spill] sm:$0xff]  ;;  %v9705_v43 = vld [vmem:[#allocation38_spill] sm:$0xff] }
 0x7ff   :  { %2941 = vmatprep.subr.mxu0 %v7060_v55  ;;  %3012 = vmatprep.subr.mxu1 %v7063_v29  ;;  %v9706_v55 = vld [vmem:[#allocation39_spill] sm:$0xff]  ;;  %v9707_v29 = vld [vmem:[#allocation40_spill] sm:$0xff] }
 0x800   :  { %2942 = vmatpush1.msra.mxu0 %v7066_v2  ;;  %3013 = vmatpush1.msra.mxu1 %v7069_v53  ;;  %v9708_v2 = vld [vmem:[#allocation41_spill] sm:$0xff]  ;;  %v9709_v53 = vld [vmem:[#allocation42_spill] sm:$0xff] }
 0x801   :  { %2943 = vmatprep.subr.mxu0 %v7072_v63  ;;  %3014 = vmatprep.subr.mxu1 %v7075_v4  ;;  %v9710_v63 = vld [vmem:[#allocation43_spill] sm:$0xff]  ;;  %v9711_v4 = vld [vmem:[#allocation44_spill] sm:$0xff] }
 0x802   :  { %2944 = vmatpush1.msra.mxu0 %v9683_v61  ;;  %3015 = vmatpush1.msra.mxu1 %v9684_v42  ;;  %v9736_v61 = vld [vmem:[#allocation68_spill] sm:$0xff]  ;;  %v9737_v42 = vld [vmem:[#allocation69_spill] sm:$0xff] }
 0x803   :  { %2945 = vmatprep.subr.mxu0 %v9685_v30  ;;  %3016 = vmatprep.subr.mxu1 %v9686_v54  ;;  %v9738_v30 = vld [vmem:[#allocation70_spill] sm:$0xff]  ;;  %v9739_v54 = vld [vmem:[#allocation71_spill] sm:$0xff] }
 0x804   :  { %2946 = vmatpush1.msra.mxu0 %v9687_v23  ;;  %3017 = vmatpush1.msra.mxu1 %v9688_v24  ;;  %v9740_v23 = vld [vmem:[#allocation72_spill] sm:$0xff]  ;;  %v9741_v24 = vld [vmem:[#allocation73_spill] sm:$0xff] }
 0x805   :  { %2947 = vmatprep.subr.mxu0 %v9689_v25  ;;  %3018 = vmatprep.subr.mxu1 %v9690_v59  ;;  %v9742_v25 = vld [vmem:[#allocation74_spill] sm:$0xff]  ;;  %v9743_v59 = vld [vmem:[#allocation75_spill] sm:$0xff] }
 0x806   :  { %2948 = vmatpush1.msra.mxu0 %v9691_v11  ;;  %3019 = vmatpush1.msra.mxu1 %v9692_v18  ;;  %v9744_v11 = vld [vmem:[#allocation76_spill] sm:$0xff]  ;;  %v9745_v18 = vld [vmem:[#allocation77_spill] sm:$0xff] }
 0x807   :  { %2949 = vmatprep.subr.mxu0 %v9693_v39  ;;  %3020 = vmatprep.subr.mxu1 %v9694_v56  ;;  %v9746_v39 = vld [vmem:[#allocation78_spill] sm:$0xff]  ;;  %v9747_v56 = vld [vmem:[#allocation79_spill] sm:$0xff] }
 0x808   :  { %2950 = vmatpush1.msra.mxu0 %v9695_v51  ;;  %3021 = vmatpush1.msra.mxu1 %v9696_v16  ;;  %v9748_v51 = vld [vmem:[#allocation80_spill] sm:$0xff]  ;;  %v9749_v16 = vld [vmem:[#allocation81_spill] sm:$0xff] }
 0x809   :  { %2951 = vmatprep.subr.mxu0 %v9697_v36  ;;  %3022 = vmatprep.subr.mxu1 %v9698_v5  ;;  %v9750_v36 = vld [vmem:[#allocation82_spill] sm:$0xff]  ;;  %v9751_v5 = vld [vmem:[#allocation83_spill] sm:$0xff] }
 0x80a   :  { %2952 = vmatpush1.msra.mxu0 %v9699_v47  ;;  %3023 = vmatpush1.msra.mxu1 %v9700_v33  ;;  %v9752_v47 = vld [vmem:[#allocation84_spill] sm:$0xff]  ;;  %v9753_v33 = vld [vmem:[#allocation85_spill] sm:$0xff] }
 0x80b   :  { %2953 = vmatprep.subr.mxu0 %v9701_v31  ;;  %3024 = vmatprep.subr.mxu1 %v9702_v34  ;;  %v9754_v31 = vld [vmem:[#allocation86_spill] sm:$0xff]  ;;  %v9755_v34 = vld [vmem:[#allocation87_spill] sm:$0xff] }
 0x80c   :  { %2954 = vmatpush1.msra.mxu0 %v9703_v40  ;;  %3025 = vmatpush1.msra.mxu1 %v9704_v41  ;;  %v9756_v40 = vld [vmem:[#allocation88_spill] sm:$0xff]  ;;  %v9757_v41 = vld [vmem:[#allocation89_spill] sm:$0xff] }
 0x80d   :  { %2955 = vmatprep.subr.mxu0 %v9705_v43  ;;  %3026 = vmatprep.subr.mxu1 %v9706_v55  ;;  %v9758_v43 = vld [vmem:[#allocation90_spill] sm:$0xff]  ;;  %v9759_v55 = vld [vmem:[#allocation91_spill] sm:$0xff] }
 0x80e   :  { %2956 = vmatpush1.msra.mxu0 %v9707_v29  ;;  %3027 = vmatpush1.msra.mxu1 %v9708_v2  ;;  %v9760_v29 = vld [vmem:[#allocation92_spill] sm:$0xff]  ;;  %v9761_v2 = vld [vmem:[#allocation93_spill] sm:$0xff] }
 0x80f   :  { %2957 = vmatprep.subr.mxu0 %v9709_v53  ;;  %3028 = vmatprep.subr.mxu1 %v9710_v63  ;;  %v9762_v53 = vld [vmem:[#allocation94_spill] sm:$0xff]  ;;  %v9763_v63 = vld [vmem:[#allocation95_spill] sm:$0xff] }
 0x810   :  { %2958 = vmatpush1.msra.mxu0 %v9711_v4  ;;  %3029 = vmatpush1.msra.mxu1 %v9712_v6  ;;  %v9764_v4 = vld [vmem:[#allocation96_spill] sm:$0xff]  ;;  %v9765_v6 = vld [vmem:[#allocation97_spill] sm:$0xff] }
 0x811   :  { %2959 = vmatprep.subr.mxu0 %v9713_v26  ;;  %3030 = vmatprep.subr.mxu1 %v9714_v57  ;;  %v9766_v26 = vld [vmem:[#allocation98_spill] sm:$0xff]  ;;  %v9767_v57 = vld [vmem:[#allocation99_spill] sm:$0xff] }
 0x812   :  { %2960 = vmatpush1.msra.mxu0 %v9715_v12  ;;  %2993 = vmatprep.mubr.f32.mxu0 %v9716_v10  ;;  %v9768_v12 = vld [vmem:[#allocation100_spill] sm:$0xff] }
 0x813   :  { %3031 = vmatpush1.msra.mxu1 %v9717_v62  ;;  %3064 = vmatprep.mubr.f32.mxu1 %v9716_v10  ;;  %v9769_v62 = vld [vmem:[#allocation101_spill] sm:$0xff] }
 0x814   :  { %2994 = vmatmul.mubr.f32.vlgmr.msra.gmra.mxu0 %v7595_v48  ;;  %3065 = vmatmul.mubr.f32.vlgmr.msra.gmra.mxu1 %v7595_v48  ;;  %v9735_v48 = vld [vmem:[#allocation67_spill] sm:$0xff] }
 0x815   :  { %3111 = vmatprep.subr.mxu0 %v9718_v7  ;;  %3182 = vmatprep.subr.mxu1 %v9719_v32  ;;  %v9770_v7 = vld [vmem:[#allocation102_spill] sm:$0xff]  ;;  %v9771_v32 = vld [vmem:[#allocation103_spill] sm:$0xff] }
 0x816   :  { %3112 = vmatpush1.msra.mxu0 %v9720_v60  ;;  %3183 = vmatpush1.msra.mxu1 %v9721_v14  ;;  %v9772_v60 = vld [vmem:[#allocation104_spill] sm:$0xff]  ;;  %v9773_v14 = vld [vmem:[#allocation105_spill] sm:$0xff] }
 0x817   :  { %3113 = vmatprep.subr.mxu0 %v9722_v50  ;;  %3184 = vmatprep.subr.mxu1 %v9723_v13  ;;  %v9774_v50 = vld [vmem:[#allocation106_spill] sm:$0xff]  ;;  %v9775_v13 = vld [vmem:[#allocation107_spill] sm:$0xff] }
 0x818   :  { %3114 = vmatpush1.msra.mxu0 %v9724_v15  ;;  %3185 = vmatpush1.msra.mxu1 %v9725_v38  ;;  %v9776_v15 = vld [vmem:[#allocation108_spill] sm:$0xff]  ;;  %v9777_v38 = vld [vmem:[#allocation109_spill] sm:$0xff] }
 0x819   :  { %3115 = vmatprep.subr.mxu0 %v9726_v21  ;;  %3186 = vmatprep.subr.mxu1 %v9727_v28  ;;  %v9778_v21 = vld [vmem:[#allocation110_spill] sm:$0xff]  ;;  %v9779_v28 = vld [vmem:[#allocation111_spill] sm:$0xff] }
 0x81a   :  { %3116 = vmatpush1.msra.mxu0 %v9728_v22  ;;  %3187 = vmatpush1.msra.mxu1 %v9729_v19  ;;  %v9780_v22 = vld [vmem:[#allocation112_spill] sm:$0xff]  ;;  %v9781_v19 = vld [vmem:[#allocation113_spill] sm:$0xff] }
 0x81b   :  { %3117 = vmatprep.subr.mxu0 %v9730_v20  ;;  %3188 = vmatprep.subr.mxu1 %v9731_v37  ;;  %v9782_v20 = vld [vmem:[#allocation114_spill] sm:$0xff]  ;;  %v9783_v37 = vld [vmem:[#allocation115_spill] sm:$0xff] }
 0x81c   :  { %3118 = vmatpush1.msra.mxu0 %v9732_v17  ;;  %3189 = vmatpush1.msra.mxu1 %v9733_v52  ;;  %v9784_v17 = vld [vmem:[#allocation116_spill] sm:$0xff]  ;;  %v9785_v52 = vld [vmem:[#allocation117_spill] sm:$0xff] }
 0x81d   :  { %3119 = vmatprep.subr.mxu0 %v9734_v8  ;;  %3190 = vmatprep.subr.mxu1 %v9735_v48  ;;  %v9786_v8 = vld [vmem:[#allocation118_spill] sm:$0xff]  ;;  %v9787_v48 = vld [vmem:[#allocation119_spill] sm:$0xff] }
 0x81e   :  { %3120 = vmatpush1.msra.mxu0 %v9736_v61  ;;  %3191 = vmatpush1.msra.mxu1 %v9737_v42  ;;  %v9788_v61 = vld [vmem:[#allocation120_spill] sm:$0xff]  ;;  %v9789_v42 = vld [vmem:[#allocation121_spill] sm:$0xff] }
 0x81f   :  { %3121 = vmatprep.subr.mxu0 %v9738_v30  ;;  %3192 = vmatprep.subr.mxu1 %v9739_v54  ;;  %v9790_v30 = vld [vmem:[#allocation122_spill] sm:$0xff]  ;;  %v9791_v54 = vld [vmem:[#allocation123_spill] sm:$0xff] }
 0x820   :  { %3122 = vmatpush1.msra.mxu0 %v9740_v23  ;;  %3193 = vmatpush1.msra.mxu1 %v9741_v24  ;;  %v9792_v23 = vld [vmem:[#allocation124_spill] sm:$0xff]  ;;  %v9793_v24 = vld [vmem:[#allocation125_spill] sm:$0xff] }
 0x821   :  { %3123 = vmatprep.subr.mxu0 %v9742_v25  ;;  %3194 = vmatprep.subr.mxu1 %v9743_v59  ;;  %v9794_v25 = vld [vmem:[#allocation126_spill] sm:$0xff]  ;;  %v9795_v59 = vld [vmem:[#allocation127_spill] sm:$0xff] }
 0x822   :  { %3124 = vmatpush1.msra.mxu0 %v9744_v11  ;;  %3195 = vmatpush1.msra.mxu1 %v9745_v18  ;;  %v9796_v11 = vld [vmem:[#allocation128_spill] sm:$0xff]  ;;  %v9797_v18 = vld [vmem:[#allocation129_spill] sm:$0xff] }
 0x823   :  { %3125 = vmatprep.subr.mxu0 %v9746_v39  ;;  %3196 = vmatprep.subr.mxu1 %v9747_v56  ;;  %v9798_v39 = vld [vmem:[#allocation130_spill] sm:$0xff]  ;;  %v9799_v56 = vld [vmem:[#allocation131_spill] sm:$0xff] }
 0x824   :  { %3126 = vmatpush1.msra.mxu0 %v9748_v51  ;;  %3197 = vmatpush1.msra.mxu1 %v9749_v16  ;;  %v9800_v51 = vld [vmem:[#allocation132_spill] sm:$0xff]  ;;  %v9801_v16 = vld [vmem:[#allocation133_spill] sm:$0xff] }
 0x825   :  { %3127 = vmatprep.subr.mxu0 %v9750_v36  ;;  %3198 = vmatprep.subr.mxu1 %v9751_v5  ;;  %v9802_v36 = vld [vmem:[#allocation134_spill] sm:$0xff]  ;;  %v9803_v5 = vld [vmem:[#allocation135_spill] sm:$0xff] }
 0x826   :  { %3128 = vmatpush1.msra.mxu0 %v9752_v47  ;;  %3199 = vmatpush1.msra.mxu1 %v9753_v33  ;;  %v9804_v47 = vld [vmem:[#allocation136_spill] sm:$0xff]  ;;  %v9805_v33 = vld [vmem:[#allocation137_spill] sm:$0xff] }
 0x827   :  { %3129 = vmatprep.subr.mxu0 %v9754_v31  ;;  %3200 = vmatprep.subr.mxu1 %v9755_v34  ;;  %v9806_v31 = vld [vmem:[#allocation138_spill] sm:$0xff]  ;;  %v9807_v34 = vld [vmem:[#allocation139_spill] sm:$0xff] }
 0x828   :  { %3130 = vmatpush1.msra.mxu0 %v9756_v40  ;;  %3201 = vmatpush1.msra.mxu1 %v9757_v41  ;;  %v9808_v40 = vld [vmem:[#allocation140_spill] sm:$0xff]  ;;  %v9809_v41 = vld [vmem:[#allocation141_spill] sm:$0xff] }
 0x829   :  { %3131 = vmatprep.subr.mxu0 %v9758_v43  ;;  %3202 = vmatprep.subr.mxu1 %v9759_v55  ;;  %v9810_v43 = vld [vmem:[#allocation142_spill] sm:$0xff]  ;;  %v9811_v55 = vld [vmem:[#allocation143_spill] sm:$0xff] }
 0x82a   :  { %3132 = vmatpush1.msra.mxu0 %v9760_v29  ;;  %3203 = vmatpush1.msra.mxu1 %v9761_v2  ;;  %v9812_v29 = vld [vmem:[#allocation144_spill] sm:$0xff]  ;;  %v9813_v2 = vld [vmem:[#allocation145_spill] sm:$0xff] }
 0x82b   :  { %3133 = vmatprep.subr.mxu0 %v9762_v53  ;;  %3204 = vmatprep.subr.mxu1 %v9763_v63  ;;  %v9814_v53 = vld [vmem:[#allocation146_spill] sm:$0xff]  ;;  %v9815_v63 = vld [vmem:[#allocation147_spill] sm:$0xff] }
 0x82c   :  { %3134 = vmatpush1.msra.mxu0 %v9764_v4  ;;  %3205 = vmatpush1.msra.mxu1 %v9765_v6  ;;  %v9816_v4 = vld [vmem:[#allocation148_spill] sm:$0xff]  ;;  %v9817_v6 = vld [vmem:[#allocation149_spill] sm:$0xff] }
 0x82d   :  { %3135 = vmatprep.subr.mxu0 %v9766_v26  ;;  %3206 = vmatprep.subr.mxu1 %v9767_v57  ;;  %v9818_v26 = vld [vmem:[#allocation150_spill] sm:$0xff]  ;;  %v9819_v57 = vld [vmem:[#allocation151_spill] sm:$0xff] }
 0x82e   :  { %3136 = vmatpush1.msra.mxu0 %v9768_v12  ;;  %3207 = vmatpush1.msra.mxu1 %v9769_v62  ;;  %v9820_v12 = vld [vmem:[#allocation152_spill] sm:$0xff]  ;;  %v9821_v62 = vld [vmem:[#allocation153_spill] sm:$0xff] }
 0x82f   :  { %3137 = vmatprep.subr.mxu0 %v9770_v7  ;;  %3208 = vmatprep.subr.mxu1 %v9771_v32  ;;  %v9822_v7 = vld [vmem:[#allocation154_spill] sm:$0xff]  ;;  %v9823_v32 = vld [vmem:[#allocation155_spill] sm:$0xff] }
 0x830   :  { %3138 = vmatpush1.msra.mxu0 %v9772_v60  ;;  %3209 = vmatpush1.msra.mxu1 %v9773_v14  ;;  %v9824_v60 = vld [vmem:[#allocation156_spill] sm:$0xff]  ;;  %v9825_v14 = vld [vmem:[#allocation157_spill] sm:$0xff] }
 0x831   :  { %3139 = vmatprep.subr.mxu0 %v9774_v50  ;;  %3210 = vmatprep.subr.mxu1 %v9775_v13  ;;  %v9826_v50 = vld [vmem:[#allocation158_spill] sm:$0xff]  ;;  %v9827_v13 = vld [vmem:[#allocation159_spill] sm:$0xff] }
 0x832   :  { %3140 = vmatpush1.msra.mxu0 %v9776_v15  ;;  %3211 = vmatpush1.msra.mxu1 %v9777_v38  ;;  %v9828_v15 = vld [vmem:[#allocation160_spill] sm:$0xff]  ;;  %v9829_v38 = vld [vmem:[#allocation161_spill] sm:$0xff] }
 0x833   :  { %3141 = vmatprep.subr.mxu0 %v9778_v21  ;;  %3212 = vmatprep.subr.mxu1 %v9779_v28  ;;  %v9830_v21 = vld [vmem:[#allocation162_spill] sm:$0xff]  ;;  %v9831_v28 = vld [vmem:[#allocation163_spill] sm:$0xff] }
 0x834   :  { %3142 = vmatpush1.msra.mxu0 %v9780_v22  ;;  %3213 = vmatpush1.msra.mxu1 %v9781_v19  ;;  %v9832_v22 = vld [vmem:[#allocation164_spill] sm:$0xff]  ;;  %v9833_v19 = vld [vmem:[#allocation165_spill] sm:$0xff] }
 0x835   :  { %3143 = vmatprep.subr.mxu0 %v9782_v20  ;;  %3214 = vmatprep.subr.mxu1 %v9783_v37  ;;  %v9834_v20 = vld [vmem:[#allocation167_spill] sm:$0xff]  ;;  %v9835_v37 = vld [vmem:[#allocation170_spill] sm:$0xff] }
 0x836   :  { %3144 = vmatpush2.msra.mxu0 %v9784_v17  ;;  %3215 = vmatpush2.msra.mxu1 %v9785_v52  ;;  %v9836_v17 = vld [vmem:[#allocation171_spill] sm:$0xff]  ;;  %v9837_v52 = vld [vmem:[#allocation172_spill] sm:$0xff] }
 0x837   :  { %3145 = vmatprep.subr.mxu0 %v9786_v8  ;;  %3216 = vmatprep.subr.mxu1 %v9787_v48  ;;  %v9838_v8 = vld [vmem:[#allocation173_spill] sm:$0xff]  ;;  %v9839_v48 = vld [vmem:[#allocation174_spill] sm:$0xff] }
 0x838   :  { %3146 = vmatpush2.msra.mxu0 %v9788_v61  ;;  %3217 = vmatpush2.msra.mxu1 %v9789_v42  ;;  %v9840_v61 = vld [vmem:[#allocation175_spill] sm:$0xff]  ;;  %v9841_v42 = vld [vmem:[#allocation176_spill] sm:$0xff] }
 0x839   :  { %3147 = vmatprep.subr.mxu0 %v9790_v30  ;;  %3218 = vmatprep.subr.mxu1 %v9791_v54  ;;  %v9842_v30 = vld [vmem:[#allocation177_spill] sm:$0xff]  ;;  %v9843_v54 = vld [vmem:[#allocation178_spill] sm:$0xff] }
 0x83a   :  { %3148 = vmatpush2.msra.mxu0 %v9792_v23  ;;  %3219 = vmatpush2.msra.mxu1 %v9793_v24  ;;  %v9844_v23 = vld [vmem:[#allocation179_spill] sm:$0xff]  ;;  %v9845_v24 = vld [vmem:[#allocation180_spill] sm:$0xff] }
 0x83b   :  { %3149 = vmatprep.subr.mxu0 %v9794_v25  ;;  %3220 = vmatprep.subr.mxu1 %v9795_v59  ;;  %v9846_v59 = vld [vmem:[#allocation12_spill] sm:$0xff] }
 0x83c   :  { %3150 = vmatpush2.msra.mxu0 %v9796_v11  ;;  %3221 = vmatpush2.msra.mxu1 %v9797_v18 }
 0x83d   :  { %3151 = vmatprep.subr.mxu0 %v9798_v39  ;;  %3222 = vmatprep.subr.mxu1 %v9799_v56  ;;  %v9847_v56 = vld [vmem:[#allocation13_spill] sm:$0xff] }
 0x83e   :  { %3152 = vmatpush2.msra.mxu0 %v9800_v51  ;;  %3223 = vmatpush2.msra.mxu1 %v9801_v16 }
 0x83f   :  { %3153 = vmatprep.subr.mxu0 %v9802_v36  ;;  %3224 = vmatprep.subr.mxu1 %v9803_v5 }
 0x840   :  { %3154 = vmatpush2.msra.mxu0 %v9804_v47  ;;  %3225 = vmatpush2.msra.mxu1 %v9805_v33  ;;  %v9848_v47 = vld [vmem:[#allocation14_spill] sm:$0xff] }
 0x841   :  { %3155 = vmatprep.subr.mxu0 %v9806_v31  ;;  %3226 = vmatprep.subr.mxu1 %v9807_v34 }
 0x842   :  { %3156 = vmatpush2.msra.mxu0 %v9808_v40  ;;  %3227 = vmatpush2.msra.mxu1 %v9809_v41  ;;  %v9849_v40 = vld [vmem:[#allocation15_spill] sm:$0xff] }
 0x843   :  { %3157 = vmatprep.subr.mxu0 %v9810_v43  ;;  %3228 = vmatprep.subr.mxu1 %v9811_v55 }
 0x844   :  { %3158 = vmatpush2.msra.mxu0 %v9812_v29  ;;  %3229 = vmatpush2.msra.mxu1 %v9813_v2  ;;  %v3073_v2 = vpop.permute.xlu0 %3072 }
 0x845   :  { %3159 = vmatprep.subr.mxu0 %v9814_v53  ;;  %3230 = vmatprep.subr.mxu1 %v9815_v63  ;;  %v2923_v53 = vpop.permute.xlu1 %2922  ;;  %v9850_v63 = vld [vmem:[#allocation166_spill] sm:$0xff] }
 0x846   :  { %3160 = vmatpush2.msra.mxu0 %v9816_v4  ;;  %3231 = vmatpush2.msra.mxu1 %v9817_v6  ;;  %v2925_v4 = vmul.f32 %v2923_v53, %v9850_v63  ;;  %v3379_v63 = vld [vmem:[#allocation2] ss:$0 sm:$0xff] }
 0x847   :  { %3161 = vmatprep.subr.mxu0 %v9818_v26  ;;  %3232 = vmatprep.subr.mxu1 %v9819_v57 }
 0x848   :  { %3162 = vmatpush2.msra.mxu0 %v9820_v12  ;;  %3233 = vmatpush2.msra.mxu1 %v9821_v62  ;;  %v9851_v62 = vld [vmem:[#allocation168_spill] sm:$0xff] }
 0x849   :  { %3163 = vmatprep.subr.mxu0 %v9822_v7  ;;  %3234 = vmatprep.subr.mxu1 %v9823_v32  ;;  %v3075_v7 = vmul.f32 %v3073_v2, %v9851_v62 }
 0x84a   :  { %3164 = vmatpush2.msra.mxu0 %v9824_v60  ;;  %3235 = vmatpush2.msra.mxu1 %v9825_v14  ;;  %v9852_v60 = vld [vmem:[#allocation169_spill] sm:$0xff] }
 0x84b   :  { %3165 = vmatprep.subr.mxu0 %v9826_v50  ;;  %3236 = vmatprep.subr.mxu1 %v9827_v13  ;;  %v2926_v14 = vmul.f32 %v2923_v53, %v9852_v60 }
 0x84c   :  { %3166 = vmatpush2.msra.mxu0 %v9828_v15  ;;  %3237 = vmatpush2.msra.mxu1 %v9829_v38 }
 0x84d   :  { %3167 = vmatprep.subr.mxu0 %v9830_v21  ;;  %3238 = vmatprep.subr.mxu1 %v9831_v28 }
 0x84e   :  { %3168 = vmatpush2.msra.mxu0 %v9832_v22  ;;  %3239 = vmatpush2.msra.mxu1 %v9833_v19  ;;  %v3076_v22 = vmul.f32 %v3073_v2, %v8855_v35 }
 0x84f   :  { %3169 = vmatprep.subr.mxu0 %v9834_v20  ;;  %3240 = vmatprep.subr.mxu1 %v9835_v37 }
 0x850   :  { %3170 = vmatpush2.msra.mxu0 %v9836_v17  ;;  %3241 = vmatpush2.msra.mxu1 %v9837_v52 }
 0x851   :  { %3171 = vmatprep.subr.mxu0 %v9838_v8  ;;  %3242 = vmatprep.subr.mxu1 %v9839_v48  ;;  %v2928_v8 = vmul.f32 %v2923_v53, %v5033_v46  ;;  %v3077_v46 = vmul.f32 %v3073_v2, %v5050_v1 }
 0x852   :  { %3172 = vmatpush2.msra.mxu0 %v9840_v61  ;;  %3243 = vmatpush2.msra.mxu1 %v9841_v42 }
 0x853   :  { %3173 = vmatprep.subr.mxu0 %v9842_v30  ;;  %3244 = vmatprep.subr.mxu1 %v9843_v54  ;;  %v3078_v54 = vmul.f32 %v3073_v2, %v5039_v3 }
 0x854   :  { %3174 = vmatpush2.msra.mxu0 %v9844_v23  ;;  %3245 = vmatpush2.msra.mxu1 %v9845_v24 }
 0x8b3   :  { %v2810_v25 = vpop.f32.mrf.mxu0  ;;  %v2881_v16 = vpop.f32.mrf.mxu1 }
 0x8b4   :  { %v2811_v11 = vadd.f32 %v2810_v25, %v9846_v59  ;;  %v2882_v41 = vadd.f32 %v2881_v16, %v9849_v40 }
 0x8b5   :  { %v2812_v18 = vpop.f32.mrf.mxu0  ;;  %v2883_v5 = vpop.f32.mrf.mxu1 }
 0x8b6   :  { %v3367_v39 = vmul.f32 -1.442695, %v2811_v11  ;;  %v2813_v51 = vadd.f32 %v2812_v18, %v9847_v56  ;;  %v2884_v33 = vadd.f32 %v2883_v5, %v9848_v47 }
 0x8b8   :  { %3602 = vpow2.f32 %v3367_v39  ;;  %v3368_v36 = vmul.f32 -1.442695, %v2813_v51  ;;  %v3369_v31 = vmul.f32 -1.442695, %v2884_v33 }
 0x8ba   :  { %3604 = vpow2.f32 %v3368_v36 }
 0x8bb   :  { %3606 = vpow2.f32 %v3369_v31 }
 0x8c5   :  { %v3603_v34 = vpop.eup %3602 }
 0x8c6   :  { %v2889_v43 = vadd.f32 1.0, %v3603_v34 }
 0x8c7   :  { %v3605_v55 = vpop.eup %3604 }
 0x8c8   :  { %3608 = vrcp.f32 %v2889_v43  ;;  %v2895_v29 = vadd.f32 1.0, %v3605_v55  ;;  %v3607_v6 = vpop.eup %3606 }
 0x8c9   :  { %3610 = vtanh.f32 %v2882_v41  ;;  %v2902_v38 = vadd.f32 1.0, %v3607_v6 }
 0x8ca   :  { %3612 = vrcp.f32 %v2895_v29 }
 0x8cb   :  { %3614 = vrcp.f32 %v2902_v38 }
 0x8d4   :  { %v2995_v26 = vpop.f32.mrf.mxu0  ;;  %v3066_v32 = vpop.f32.mrf.mxu1 }
 0x8d5   :  { %v3609_v57 = vpop.eup %3608  ;;  %v2996_v12 = vadd.f32 %v2995_v26, %v2925_v4 }
 0x8d6   :  { %v3611_v50 = vpop.eup %3610  ;;  %v2997_v13 = vpop.f32.mrf.mxu0 }
 0x8d7   :  { %v3613_v15 = vpop.eup %3612  ;;  %v3079_v21 = vadd.f32 %v3075_v7, %v2996_v12  ;;  %v2998_v28 = vadd.f32 %v2997_v13, %v2926_v14  ;;  %v2906_v19 = vmul.f32 %v3611_v50, %v3609_v57  ;;  %v3068_v52 = vpop.f32.mrf.mxu1 }
 0x8d8   :  { %v2905_v20 = vmul.f32 %v3613_v15, %v7581_v27  ;;  %v3069_v30 = vadd.f32 %v3068_v52, %v2928_v8  ;;  %v3615_v11 = vpop.eup %3614  ;;  %v9853_v8 = vlaneseq }
 0x8d9   :  { %v3083_v37 = vadd.f32 %v3079_v21, %v5026_v0  ;;  %v3080_v17 = vadd.f32 %v3076_v22, %v2998_v28  ;;  %v2927_v0 = vmul.f32 %v2923_v53, %v5043_v49  ;;  %v4228_v49 = vld [vmem:[%s7840_s6] ss:$0 sm:$0xff]  ;;  %s4302_s6 = smov [#allocation8]  }
 0x8da   :  { %v7804_v48 = vadd.f32 %v2906_v19, %v2905_v20  ;;  %v3082_v27 = vadd.f32 %v3078_v54, %v3069_v30  ;;  %v710_v30 = vpop.xlane.xlu1 %709  ;;  %s3304_s19 = sshll.u32 %s4302_s6, 4  ;;  %s3305_s19 = int_to_ptr.vmem [resolvable:$true] %s3304_s19 }
 0x8db   :  { %v3372_v61 = vmul.f32 -1.442695, %v3083_v37  ;;  %v3084_v42 = vadd.f32 %v3080_v17, %v5036_v44  ;;  %v3067_v23 = vadd.f32 %v3066_v32, %v2927_v0  ;;  %s4269_s20 = scalar_lea.vmem %s3305_s19, 128  ;;  %p4274_p11 = scmp.lt.s32.totalorder %s3305_s19, %s3305_s19 }
 0x8dc   :  { %3616 = vtanh.f32 %v7804_v48  ;;  %v3086_v24 = vadd.f32 %v3082_v27, %v8856_v9  ;;  %p4270_p10 = scmp.ne.s32.totalorder %s3305_s19, %s4269_s20  ;;  %p4275_p12 = scmp.lt.s32.totalorder %s4269_s20, %s4269_s20 }
 0x8dd   :  { %3618 = vpow2.f32 %v3372_v61  ;;  %v3373_v35 = vmul.f32 -1.442695, %v3084_v42  ;;  %v3081_v25 = vadd.f32 %v3077_v46, %v3067_v23  ;;  %v307_v61 = vand.u32 127, %v9853_v8  ;;  %v1077_v42 = vpop.xlane.xlu0 %1076 }
 0x8de   :  { %v3374_v18 = vmul.f32 -1.442695, %v3086_v24  ;;  %v1811_v46 = vpop.xlane.xlu1 %1810  ;;  %p4276_p13 = por %p4275_p12, %p4274_p11 }
 0x8df   :  { %3620 = vpow2.f32 %v3373_v35  ;;  %v3085_v51 = vadd.f32 %v3081_v25, %v5058_v58  ;;  %vm1078_vm0 = vcmp.eq.s32.totalorder %v307_v61, 1  ;;  %vm711_vm1 = vcmp.eq.s32.totalorder %v307_v61, 0 }
 0x8e0   :  { %3622 = vpow2.f32 %v3374_v18  ;;  %vm1445_vm2 = vcmp.eq.s32.totalorder %v307_v61, 2  ;;  %v3330_v35 = vsel %vm1078_vm0, 1.0, %v9716_v10  ;;  %vm1812_vm3 = vcmp.eq.s32.totalorder %v307_v61, 3  ;;  %p4277_p0 = pnand %p4276_p13, %p4270_p10 }
 0x8e1   :  { %v3338_v54 = vsel %vm1445_vm2, 1.0, %v9716_v10  ;;  %v1444_v0 = vpop.xlane.xlu0 %1443  ;;  %v1081_v27 = vmul.f32 %v3330_v35, %v1077_v42  ;;  %vm2179_vm4 = vcmp.eq.s32.totalorder %v307_v61, 4  ;;  %v3346_v23 = vsel %vm1812_vm3, 1.0, %v9716_v10 }
 0x8e2   :  { %v1448_v25 = vmul.f32 %v3338_v54, %v1444_v0  ;;  %vm2546_vm5 = vcmp.eq.s32.totalorder %v307_v61, 5  ;;  %vm2913_vm6 = vcmp.eq.s32.totalorder %v307_v61, 6  ;;  %vm3280_vm7 = vcmp.eq.s32.totalorder %v307_v61, 7 }
 0x8e5   :  { %v2178_v18 = vpop.xlane.xlu0 %2177 }
 0x8e9   :  { %v3617_v44 = vpop.eup %3616 }
 0x8ea   :  { %v3619_v39 = vpop.eup %3618  ;;  %v2909_v16 = vmul.f32 %v3617_v44, %v3615_v11  ;;  %v3354_v11 = vsel %vm2179_vm4, 1.0, %v9716_v10 }
 0x8eb   :  { %v3090_v36 = vadd.f32 1.0, %v3619_v39  ;;  %v1815_v39 = vmul.f32 %v3346_v23, %v1811_v46 }
 0x8ec   :  { %v3621_v5 = vpop.eup %3620  ;;  %3175 = vmatprep.mubr.f32.mxu0 %v2909_v16  ;;  %3246 = vmatprep.mubr.f32.mxu1 %v2909_v16  ;;  %v2910_v3 = vmul.f32 %v4228_v49, %v2909_v16  ;;  %v2545_v16 = vpop.xlane.xlu1 %2544 }
 0x8ed   :  { %3624 = vrcp.f32 %v3090_v36  ;;  %v3096_v1 = vadd.f32 1.0, %v3621_v5  ;;  %v3623_v9 = vpop.eup %3622  ;;  %v2182_v5 = vmul.f32 %v3354_v11, %v2178_v18 }
 0x8ee   :  { %3626 = vtanh.f32 %v3085_v51  ;;  %2911 = vadd.xlane.f32.xlu0 %v2910_v3  ;;  %v3103_v34 = vadd.f32 1.0, %v3623_v9  ;;  %v3362_v51 = vsel %vm2546_vm5, 1.0, %v9716_v10 }
 0x8ef   :  { %3628 = vrcp.f32 %v3096_v1  ;;  %v2549_v9 = vmul.f32 %v3362_v51, %v2545_v16 }
 0x8f0   :  { %3630 = vrcp.f32 %v3103_v34 }
 0x8fa   :  { %v3625_v33 = vpop.eup %3624 }
 0x8fb   :  { %v3627_v31 = vpop.eup %3626 }
 0x8fc   :  { %v3629_v58 = vpop.eup %3628  ;;  %v3107_v41 = vmul.f32 %v3627_v31, %v3625_v33 }
 0x8fd   :  { %v3106_v43 = vmul.f32 %v3629_v58, %v7592_v45  ;;  %v3631_v29 = vpop.eup %3630  ;;  %v3378_v58 = vsel %vm3280_vm7, 1.0, %v9716_v10 }
 0x8ff   :  { %v3108_v55 = vadd.f32 %v3107_v41, %v3106_v43 }
 0x901   :  { %3632 = vtanh.f32 %v3108_v55 }
 0x904   :  { %3292 = vperm.xlu0 %3393, %v3379_v63  }
 0x90e   :  { %v3633_v2 = vpop.eup %3632 }
 0x90f   :  { %v3110_v53 = vmul.f32 %v3633_v2, %v3631_v29 }
 0x911   :  { %3176 = vmatmul.mubr.f32.vlgmr.msra.gmra.mxu0 %v3110_v53  ;;  %3247 = vmatmul.mubr.f32.vlgmr.msra.gmra.mxu1 %v3110_v53 }
 0x977   :  { %v2912_v3 = vpop.xlane.xlu0 %2911 }
 0x97f   :  { %v3293_v29 = vpop.permute.xlu0 %3292 }
 0x9d1   :  { %v3177_v4 = vpop.f32.mrf.mxu0  ;;  %v3248_v62 = vpop.f32.mrf.mxu1 }
 0x9d2   :  { %v3178_v6 = vadd.f32 %v3177_v4, %v9846_v59  ;;  %v3249_v50 = vadd.f32 %v3248_v62, %v9849_v40 }
 0x9d3   :  { %v3179_v26 = vpop.f32.mrf.mxu0  ;;  %v3250_v7 = vpop.f32.mrf.mxu1 }
 0x9d4   :  { %v3375_v57 = vmul.f32 -1.442695, %v3178_v6  ;;  %v3180_v12 = vadd.f32 %v3179_v26, %v9847_v56  ;;  %v3251_v32 = vadd.f32 %v3250_v7, %v9848_v47 }
 0x9d6   :  { %3634 = vpow2.f32 %v3375_v57  ;;  %v3376_v45 = vmul.f32 -1.442695, %v3180_v12  ;;  %v3377_v60 = vmul.f32 -1.442695, %v3251_v32 }
 0x9d8   :  { %3636 = vpow2.f32 %v3376_v45 }
 0x9d9   :  { %3638 = vpow2.f32 %v3377_v60 }
 0x9e3   :  { %v3635_v14 = vpop.eup %3634 }
 0x9e4   :  { %v3256_v13 = vadd.f32 1.0, %v3635_v14 }
 0x9e5   :  { %v3637_v15 = vpop.eup %3636 }
 0x9e6   :  { %3640 = vrcp.f32 %v3256_v13  ;;  %v3262_v59 = vadd.f32 1.0, %v3637_v15  ;;  %v3639_v38 = vpop.eup %3638 }
 0x9e7   :  { %3642 = vtanh.f32 %v3249_v50  ;;  %v3269_v22 = vadd.f32 1.0, %v3639_v38 }
 0x9e8   :  { %3644 = vrcp.f32 %v3262_v59 }
 0x9e9   :  { %3646 = vrcp.f32 %v3269_v22 }
 0x9f3   :  { %v3641_v56 = vpop.eup %3640 }
 0x9f4   :  { %v3643_v21 = vpop.eup %3642 }
 0x9f5   :  { %v3645_v28 = vpop.eup %3644  ;;  %v3273_v19 = vmul.f32 %v3643_v21, %v3641_v56 }
 0x9f6   :  { %v3272_v20 = vmul.f32 %v3645_v28, %v7804_v48  ;;  %v3647_v37 = vpop.eup %3646  ;;  %v3322_v48 = vsel %vm711_vm1, 1.0, %v9716_v10 }
 0x9f7   :  { %v714_v24 = vmul.f32 %v3322_v48, %v710_v30 }
 0x9f8   :  { %v3274_v47 = vadd.f32 %v3273_v19, %v3272_v20 }
 0x9f9   :  { %v1082_v44 = vadd.f32 %v1081_v27, %v714_v24 }
 0x9fa   :  { %3648 = vtanh.f32 %v3274_v47 }
 0x9fb   :  { %v1449_v36 = vadd.f32 %v1448_v25, %v1082_v44 }
 0x9fd   :  { %v1816_v1 = vadd.f32 %v1815_v39, %v1449_v36 }
 0x9ff   :  { %v2183_v33 = vadd.f32 %v2182_v5, %v1816_v1 }
 0xa01   :  { %v2550_v34 = vadd.f32 %v2549_v9, %v2183_v33 }
 0xa07   :  { %v3649_v40 = vpop.eup %3648 }
 0xa08   :  { %v3276_v17 = vmul.f32 %v3649_v40, %v3647_v37 }
 0xa0a   :  { %v3277_v52 = vmul.f32 %v4228_v49, %v3276_v17  ;;  %v3370_v49 = vsel %vm2913_vm6, 1.0, %v9716_v10 }
 0xa0b   :  { %v2916_v31 = vmul.f32 %v3370_v49, %v2912_v3 }
 0xa0c   :  { %3278 = vadd.xlane.f32.xlu1 %v3277_v52 }
 0xa0d   :  { %v2917_v43 = vadd.f32 %v2916_v31, %v2550_v34 }
 0xa95   :  { %v3279_v41 = vpop.xlane.xlu1 %3278 }
 0xa96   :  { %v3283_v55 = vmul.f32 %v3378_v58, %v3279_v41 }
 0xa98   :  { %v3284_v2 = vadd.f32 %v3283_v55, %v2917_v43 }
 0xa9a   :  { %v3295_v53 = vadd.f32 %v3293_v29, %v3284_v2 }
 0xa9c   :  { %3297 = vst.msk [vmem:[#allocation8] sm:$0xff] %vm3296_vm8, %v3295_v53 }
 0xa9d   :  { %4280 = shalt.err (!%p4277_p0)
}
 0xa9e   :  { %3307 = dma.vmem_to_hbm [thread:$0]  %s3305_s19, 128, %s7842_s8, [#allocation5]  }
 0xa9f   :  { %4293 = dma.done.wait [#allocation5], 128  }
 0xaa0   :  { %4294 = vsyncadd [#allocation5], 4294967168 }
 0xaa1   :  { %3311 = vsyncpa [#allocation4], 1 }
 0xaa2   :  { %3312 = vsyncpa [#allocation7], 1 }
 0xaa3   :  { %3313 = vsyncpa [#allocation5], 1 }

</bundles_post_ra>
